<compile_context>
chip_gen: v5e
topology: v5e:2x2
jax: 0.10.0
libtpu: 0.0.40
codegen_flags: <defaults>
</compile_context>

<pallas_src>
import functools

import jax
import jax.numpy as jnp
import numpy as np
from jax import lax
from jax.experimental import pallas as pl
from jax.experimental.pallas import tpu as pltpu

_LANES = 128
_SUBLANES = 8


def _round_up(x, m):
    return ((x + m - 1) // m) * m


# ----------------------------------------------------------------------------
# Fused MRF kernel: all (selected) resblocks + residuals + scaled sum on one
# resident tile.  Everything between the input DMA and the output store stays
# in VMEM.
# ----------------------------------------------------------------------------
def _mrf_fused_kernel(*refs, blocks, n_convs, T_tile, Hp, T_orig, scale,
                      compute_dtype):
    """refs = [x_center, x_left_halo, x_right_halo, w_0..w_{n-1}, b_0..b_{n-1}, out].

    x_center : (1, T_tile, C)   current time tile
    x_*_halo : (1, Hp, C)       Hp rows left/right of the tile (clamped blocks)
    w_i      : (K_i, C, C)      conv weight (tap, C_in, C_out), compute_dtype
    b_i      : (1, C)           bias, f32
    out      : (1, T_tile, C)   scale * sum over the resblocks in `blocks`
    """
    xc_ref, xl_ref, xr_ref = refs[0], refs[1], refs[2]
    w_refs = refs[3:3 + n_convs]
    b_refs = refs[3 + n_convs:3 + 2 * n_convs]
    o_ref = refs[3 + 2 * n_convs]

    t = pl.program_id(1)
    C = xc_ref.shape[-1]
    Tw = T_tile + 2 * Hp

    # Haloed working buffer; it and everything derived from it stays in VMEM.
    xw = jnp.concatenate(
        [xl_ref[0].astype(jnp.float32),
         xc_ref[0].astype(jnp.float32),
         xr_ref[0].astype(jnp.float32)], axis=0)                 # (Tw, C) f32

    # Rows outside the original signal [0, T_orig) must be zero before EVERY
    # conv -- this reproduces Conv1d(padding='same') zero padding (relying on
    # leaky_relu(0) == 0) and also neutralises the clamped halo blocks at the
    # global boundaries and the wrapper's tail padding.
    row = lax.broadcasted_iota(jnp.int32, (Tw, 1), 0) + (t * T_tile - Hp)
    valid = jnp.logical_and(row >= 0, row < T_orig)               # (Tw, 1)
    xw = jnp.where(valid, xw, 0.0)

    acc = jnp.zeros((T_tile, C), jnp.float32)
    li = 0
    for blk in blocks:                        # resblocks
        x = xw                                # (Tw, C) f32, buffer rows [0, Tw)
        off = 0                               # current window = [off, Tw-off)
        for group in blk:                     # residual wraps each dilation group
            res = x
            res_off = off
            for (K, d) in group:
                h = d * (K - 1) // 2
                # leaky_relu(0.1) on the VPU, cast to compute_dtype BEFORE the
                # taps are staged so all shifted copies are half-width.
                a = jnp.maximum(x, 0.1 * x).astype(compute_dtype)
                new_off = off + h
                new_len = Tw - 2 * new_off
                w_ref = w_refs[li]            # (K, C, C) compute_dtype
                b = b_refs[li][...]           # (1, C)    f32
                li += 1
                # K accumulating matmuls over direct slices (sublane shifts go
                # to the XLU); contraction dim stays C (>=128), f32 accumulate.
                y = jnp.zeros((new_len, C), jnp.float32)
                for k in range(K):
                    tap = a[k * d:k * d + new_len, :]
                    y = y + jnp.dot(tap, w_ref[k],
                                    preferred_element_type=jnp.float32)
                y = y + b
                # Re-apply boundary zeros so the next conv sees 'same' padding.
                x = jnp.where(valid[new_off:new_off + new_len], y, 0.0)
                off = new_off
            # Residual add (static re-alignment of the wider `res` window).
            delta = off - res_off
            x = x + res[delta:delta + (Tw - 2 * off), :]
        # Fold the mean: accumulate this resblock's interior rows.
        start = Hp - off
        acc = acc + x[start:start + T_tile, :]
    o_ref[0] = (acc * scale).astype(o_ref.dtype)


# ----------------------------------------------------------------------------
# One fused pallas_call over a (possibly partial) list of resblocks.
# ----------------------------------------------------------------------------
def _call_fused(xp, blocks, w_in, b_in, *, T_tile, Hp, T_orig, scale,
                compute_dtype, out_dtype):
    N, T_pad, C_pad = xp.shape
    nT = T_pad // T_tile
    r = T_tile // Hp
    n_hp = T_pad // Hp
    n_convs = len(w_in)

    kernel = functools.partial(
        _mrf_fused_kernel, blocks=blocks, n_convs=n_convs, T_tile=T_tile,
        Hp=Hp, T_orig=T_orig, scale=scale, compute_dtype=compute_dtype)

    def build_specs(single_buffer_params):
        in_specs = [
            # centre tile
            pl.BlockSpec((1, T_tile, C_pad), lambda n, t: (n, t, 0)),
            # left halo: Hp rows just before the tile (clamped at the start)
            pl.BlockSpec((1, Hp, C_pad),
                         lambda n, t: (n, jnp.maximum(t * r - 1, 0), 0)),
            # right halo: Hp rows just after the tile (clamped at the end)
            pl.BlockSpec((1, Hp, C_pad),
                         lambda n, t: (n, jnp.minimum((t + 1) * r, n_hp - 1), 0)),
        ]

        def const_spec(shape):
            rank = len(shape)
            idx = lambda n, t, _r=rank: (0,) * _r
            if single_buffer_params and hasattr(pl, "Buffered"):
                # Constant-index blocks: single-buffer to halve resident VMEM.
                return pl.BlockSpec(shape, idx, pipeline_mode=pl.Buffered(1))
            return pl.BlockSpec(shape, idx)

        in_specs += [const_spec(tuple(w.shape)) for w in w_in]
        in_specs += [const_spec(tuple(b.shape)) for b in b_in]
        return in_specs

    def vmem_limit(single_buffer_params):
        itemsize_c = jnp.dtype(compute_dtype).itemsize
        Tw = T_tile + 2 * Hp
        wb = sum(int(np.prod(w.shape)) * itemsize_c for w in w_in)
        bb = sum(int(np.prod(b.shape)) * 4 for b in b_in)
        nbuf = 1 if single_buffer_params else 2
        est = (nbuf * (wb + bb)
               + 2 * T_tile * C_pad * xp.dtype.itemsize      # in tile, 2-deep
               + 2 * 2 * Hp * C_pad * xp.dtype.itemsize      # halo tiles
               + 2 * T_tile * C_pad * jnp.dtype(out_dtype).itemsize  # out tile
               + 6 * Tw * C_pad * 4                          # f32 temporaries
               + 2 * Tw * C_pad * itemsize_c)                # bf16 act + tap
        if est <= 8 * 1024 * 1024:        # v5e default scoped limit is 16 MiB
            return None
        try:
            cap = int(pltpu.get_tpu_info().vmem_capacity_bytes)
        except Exception:
            cap = 64 * 1024 * 1024
        return min(int(est) * 5 // 4 + (2 << 20), cap * 9 // 10)

    def run(single_buffer_params):
        return pl.pallas_call(
            kernel,
            out_shape=jax.ShapeDtypeStruct((N, T_pad, C_pad), out_dtype),
            grid=(N, nT),
            in_specs=build_specs(single_buffer_params),
            out_specs=pl.BlockSpec((1, T_tile, C_pad), lambda n, t: (n, t, 0)),
            compiler_params=pltpu.CompilerParams(
                dimension_semantics=("parallel", "parallel"),
                vmem_limit_bytes=vmem_limit(single_buffer_params)),
        )(xp, xp, xp, *w_in, *b_in)

    try:
        return run(True)       # single-buffered weights/biases
    except Exception:
        return run(False)      # fallback: default double buffering


# ----------------------------------------------------------------------------
# Parameter packing (weight_norm at inference == plain conv weights).
# ----------------------------------------------------------------------------
def _pack_params(params, C, C_pad, compute_dtype):
    w_in, b_in = [], []
    for (weights, biases) in params:
        for w, b in zip(weights, biases):
            K = int(w.shape[0])
            wp = jnp.zeros((K, C_pad, C_pad), jnp.float32)
            wp = wp.at[:, :C, :C].set(jnp.asarray(w, jnp.float32))
            w_in.append(wp.astype(compute_dtype))                 # (K, Cp, Cp)
            b_in.append(jnp.pad(jnp.asarray(b, jnp.float32),
                                (0, C_pad - C)).reshape(1, C_pad))
    return w_in, b_in


# ----------------------------------------------------------------------------
# Wrappers.
# ----------------------------------------------------------------------------
def mrf_forward_ntc(x_ntc, params, D_r, K_r, *, compute_dtype=jnp.bfloat16,
                    target_tile_t=1024, split_per_resblock=None):
    """MRF.forward on a time-major tensor (N, T, C) -> (N, T, C).

    Preferred entry point: no layout transposes.  params: list over resblocks
    of (weights, biases); weights[i]: (K, C_in, C_out), biases[i]: (C,).
    """
    N, T, C = x_ntc.shape

    # Static per-conv config and per-resblock halo requirement.
    blocks, H = [], 0
    for d_r, k_r in zip(D_r, K_r):
        blk, h_r = [], 0
        for group in d_r:
            g = []
            for d in group:
                K = int(k_r)
                assert K % 2 == 1, "even kernel size: asymmetric 'same' pad unsupported"
                g.append((K, int(d)))
                h_r += int(d) * (K - 1) // 2
            blk.append(g)
        blocks.append(blk)
        H = max(H, h_r)
    R = len(blocks)

    # Time tiling: halo rounded to a sublane multiple; T_tile a multiple of Hp
    # so the neighbour halos are plain Hp-sized blocks of the same input.
    # Aim for >= 2 T-tiles so a v7x megacore can shard even at N == 1.
    Hp = _round_up(max(H, _SUBLANES), _SUBLANES)
    want = max(Hp, min(int(target_tile_t), (T + 1) // 2))
    T_tile = Hp * max(1, want // Hp)
    T_pad = _round_up(max(T, T_tile), T_tile)

    # Lane-dense channel layout (C padded to a multiple of 128).
    C_pad = _round_up(C, _LANES)
    # TODO(synk): for C <= 64 MRF stages, pack the contraction densely (K*C
    # lanes, no per-tap padding) instead of padding every tap to 128 lanes.

    pad_t, pad_c = T_pad - T, C_pad - C
    xp = x_ntc if (pad_t == 0 and pad_c == 0) else jnp.pad(
        x_ntc, ((0, 0), (0, pad_t), (0, pad_c)))

    w_in, b_in = _pack_params(params, C, C_pad, compute_dtype)
    assert len(w_in) == sum(sum(len(g) for g in blk) for blk in blocks)

    # Fused-vs-per-resblock decision: if single-buffered weights alone exceed
    # ~40% of this chip's VMEM, split per resblock (v7x 64 MiB, C=512 case)
    # and fold the mean in the wrapper.
    if split_per_resblock is None:
        itemsize_c = jnp.dtype(compute_dtype).itemsize
        wbytes = sum(int(np.prod(w.shape)) * itemsize_c for w in w_in)
        try:
            cap = int(pltpu.get_tpu_info().vmem_capacity_bytes)
        except Exception:
            cap = 64 * 1024 * 1024
        split_per_resblock = wbytes > (cap * 2) // 5

    common = dict(T_tile=T_tile, Hp=Hp, T_orig=T, compute_dtype=compute_dtype,
                  out_dtype=x_ntc.dtype)
    if not split_per_resblock:
        out = _call_fused(xp, blocks, w_in, b_in, scale=1.0 / R, **common)
    else:
        out, ci = None, 0
        for blk in blocks:
            nblk = sum(len(g) for g in blk)
            o = _call_fused(xp, [blk], w_in[ci:ci + nblk], b_in[ci:ci + nblk],
                            scale=1.0 / R, **common)
            ci += nblk
            out = o if out is None else out + o

    return out[:, :T, :C]


def mrf_forward(x_nct, params, D_r, K_r, **kwargs):
    """PyTorch-layout MRF.forward: (N, C, T) -> (N, C, T).

    NOTE: the two transposes below are wrapper-level HBM passes; keep the
    surrounding generator time-major and call mrf_forward_ntc to avoid them.
    """
    out = mrf_forward_ntc(jnp.transpose(x_nct, (0, 2, 1)), params, D_r, K_r,
                          **kwargs)
    return jnp.transpose(out, (0, 2, 1))


# ----------------------------------------------------------------------------
# Parameter construction (deterministic).
# ----------------------------------------------------------------------------
def make_mrf_params(key, channels, D_r, K_r):
    params = []
    for d_r, k_r in zip(D_r, K_r):
        n_convs = sum(len(m) for m in d_r)
        weights, biases = [], []
        for _ in range(n_convs):
            key, kw, kb = jax.random.split(key, 3)
            w = jax.random.normal(kw, (k_r, channels, channels), jnp.float32) * 0.1
            b = jax.random.normal(kb, (channels,), jnp.float32) * 0.1
            weights.append(w)
            biases.append(b)
        params.append((weights, biases))
    return params


# ----------------------------------------------------------------------------
# Pure-JAX reference (correctness check).
# ----------------------------------------------------------------------------
def _ref_conv(x_nct, w_kio, b, dilation):
    w_oik = jnp.transpose(w_kio, (2, 1, 0))            # torch layout (O, I, K)
    pad = dilation * (w_oik.shape[2] - 1) // 2
    y = lax.conv_general_dilated(
        x_nct, w_oik, window_strides=(1,), padding=[(pad, pad)],
        rhs_dilation=(dilation,), dimension_numbers=("NCH", "OIH", "NCH"),
        precision=lax.Precision.HIGHEST)
    return y + b[None, :, None]


def _ref_mrf(x_nct, params, D_r):
    outs = []
    for (weights, biases), d_r in zip(params, D_r):
        x = x_nct
        i = 0
        for m in range(len(d_r)):
            res = x
            for _l in range(len(d_r[m])):
                x = jnp.where(x >= 0, x, 0.1 * x)
                x = _ref_conv(x, weights[i], biases[i], d_r[m][_l])
                i += 1
            x = x + res
        outs.append(x)
    return jnp.mean(jnp.stack(outs), axis=0)


# ----------------------------------------------------------------------------
if __name__ == "__main__":
    # Small MRF config (HiFi-GAN style, shrunk): 2 resblocks, T not a multiple
    # of the tile so halo exchange, clamped halos and tail masking all run.
    channels, N, T = 8, 2, 40
    D_r = [[[1, 1], [3, 1]], [[1, 1], [2, 1]]]
    K_r = [3, 5]

    key = jax.random.PRNGKey(0)
    key, kx = jax.random.split(key)
    x = jax.random.normal(kx, (N, channels, T), jnp.float32)   # NCT like PyTorch
    params = make_mrf_params(key, channels, D_r, K_r)

    ref = jax.block_until_ready(_ref_mrf(x, params, D_r))

    # Exact (f32 MXU) path: matches the dilated-conv reference tightly.
    out_f32 = jax.block_until_ready(
        mrf_forward(x, params, D_r, K_r, compute_dtype=jnp.float32))
    np.testing.assert_allclose(np.asarray(out_f32), np.asarray(ref),
                               rtol=5e-4, atol=5e-4)

    # bf16 MXU operands (f32 elementwise / accumulation), per perf review.
    out_bf16 = jax.block_until_ready(
        mrf_forward(x, params, D_r, K_r, compute_dtype=jnp.bfloat16))
    np.testing.assert_allclose(np.asarray(out_bf16), np.asarray(ref),
                               rtol=5e-2, atol=5e-2)

    # Per-resblock split path (v7x large-C fallback), validated at f32.
    out_split = jax.block_until_ready(
        mrf_forward(x, params, D_r, K_r, compute_dtype=jnp.float32,
                    split_per_resblock=True))
    np.testing.assert_allclose(np.asarray(out_split), np.asarray(ref),
                               rtol=5e-4, atol=5e-4)

    print("KERNEL_OK")
</pallas_src>

<mosaic_0001>
module attributes {stable_mosaic.version = 11 : i64} {
  func.func @_mrf_fused_kernel(%arg0: i32, %arg1: i32, %arg2: memref<1x16x128xf32, #tpu.memory_space<vmem>>, %arg3: memref<1x16x128xf32, #tpu.memory_space<vmem>>, %arg4: memref<1x16x128xf32, #tpu.memory_space<vmem>>, %arg5: memref<3x128x128xf32, #tpu.memory_space<vmem>>, %arg6: memref<3x128x128xf32, #tpu.memory_space<vmem>>, %arg7: memref<3x128x128xf32, #tpu.memory_space<vmem>>, %arg8: memref<3x128x128xf32, #tpu.memory_space<vmem>>, %arg9: memref<5x128x128xf32, #tpu.memory_space<vmem>>, %arg10: memref<5x128x128xf32, #tpu.memory_space<vmem>>, %arg11: memref<5x128x128xf32, #tpu.memory_space<vmem>>, %arg12: memref<5x128x128xf32, #tpu.memory_space<vmem>>, %arg13: memref<1x128xf32, #tpu.memory_space<vmem>>, %arg14: memref<1x128xf32, #tpu.memory_space<vmem>>, %arg15: memref<1x128xf32, #tpu.memory_space<vmem>>, %arg16: memref<1x128xf32, #tpu.memory_space<vmem>>, %arg17: memref<1x128xf32, #tpu.memory_space<vmem>>, %arg18: memref<1x128xf32, #tpu.memory_space<vmem>>, %arg19: memref<1x128xf32, #tpu.memory_space<vmem>>, %arg20: memref<1x128xf32, #tpu.memory_space<vmem>>, %arg21: memref<1x16x128xf32, #tpu.memory_space<vmem>>) attributes {dimension_semantics = [#tpu.dimension_semantics<parallel>, #tpu.dimension_semantics<parallel>], iteration_bounds = array<i64: 2, 3>, scalar_prefetch = 0 : i64, scratch_operands = 0 : i64, tpu.core_type = #tpu.core_type<tc>, window_params = [{transform_indices = @transform_0, window_bounds = array<i64: 1, 16, 128>}, {transform_indices = @transform_1, window_bounds = array<i64: 1, 16, 128>}, {transform_indices = @transform_2, window_bounds = array<i64: 1, 16, 128>}, {pipeline_mode = #tpu.pipeline_mode<synchronous>, transform_indices = @transform_3, window_bounds = array<i64: 3, 128, 128>}, {pipeline_mode = #tpu.pipeline_mode<synchronous>, transform_indices = @transform_4, window_bounds = array<i64: 3, 128, 128>}, {pipeline_mode = #tpu.pipeline_mode<synchronous>, transform_indices = @transform_5, window_bounds = array<i64: 3, 128, 128>}, {pipeline_mode = #tpu.pipeline_mode<synchronous>, transform_indices = @transform_6, window_bounds = array<i64: 3, 128, 128>}, {pipeline_mode = #tpu.pipeline_mode<synchronous>, transform_indices = @transform_7, window_bounds = array<i64: 5, 128, 128>}, {pipeline_mode = #tpu.pipeline_mode<synchronous>, transform_indices = @transform_8, window_bounds = array<i64: 5, 128, 128>}, {pipeline_mode = #tpu.pipeline_mode<synchronous>, transform_indices = @transform_9, window_bounds = array<i64: 5, 128, 128>}, {pipeline_mode = #tpu.pipeline_mode<synchronous>, transform_indices = @transform_10, window_bounds = array<i64: 5, 128, 128>}, {pipeline_mode = #tpu.pipeline_mode<synchronous>, transform_indices = @transform_11, window_bounds = array<i64: 1, 128>}, {pipeline_mode = #tpu.pipeline_mode<synchronous>, transform_indices = @transform_12, window_bounds = array<i64: 1, 128>}, {pipeline_mode = #tpu.pipeline_mode<synchronous>, transform_indices = @transform_13, window_bounds = array<i64: 1, 128>}, {pipeline_mode = #tpu.pipeline_mode<synchronous>, transform_indices = @transform_14, window_bounds = array<i64: 1, 128>}, {pipeline_mode = #tpu.pipeline_mode<synchronous>, transform_indices = @transform_15, window_bounds = array<i64: 1, 128>}, {pipeline_mode = #tpu.pipeline_mode<synchronous>, transform_indices = @transform_16, window_bounds = array<i64: 1, 128>}, {pipeline_mode = #tpu.pipeline_mode<synchronous>, transform_indices = @transform_17, window_bounds = array<i64: 1, 128>}, {pipeline_mode = #tpu.pipeline_mode<synchronous>, transform_indices = @transform_18, window_bounds = array<i64: 1, 128>}, {transform_indices = @transform_19, window_bounds = array<i64: 1, 16, 128>}]} {
    %c0 = arith.constant 0 : index
    %c0_0 = arith.constant 0 : index
    %c0_1 = arith.constant 0 : index
    %0 = vector.load %arg3[%c0, %c0_0, %c0_1] : memref<1x16x128xf32, #tpu.memory_space<vmem>>, vector<1x16x128xf32>
    %1 = vector.shape_cast %0 : vector<1x16x128xf32> to vector<16x128xf32>
    %c0_2 = arith.constant 0 : index
    %c0_3 = arith.constant 0 : index
    %c0_4 = arith.constant 0 : index
    %2 = vector.load %arg2[%c0_2, %c0_3, %c0_4] : memref<1x16x128xf32, #tpu.memory_space<vmem>>, vector<1x16x128xf32>
    %3 = vector.shape_cast %2 : vector<1x16x128xf32> to vector<16x128xf32>
    %c0_5 = arith.constant 0 : index
    %c0_6 = arith.constant 0 : index
    %c0_7 = arith.constant 0 : index
    %4 = vector.load %arg4[%c0_5, %c0_6, %c0_7] : memref<1x16x128xf32, #tpu.memory_space<vmem>>, vector<1x16x128xf32>
    %5 = vector.shape_cast %4 : vector<1x16x128xf32> to vector<16x128xf32>
    %6 = tpu.concatenate %1, %3, %5 in 0 : vector<16x128xf32>, vector<16x128xf32>, vector<16x128xf32> -> vector<48x128xf32>
    %7 = tpu.iota {dimensions = array<i32: 0>} : vector<48x1xi32>
    %c16_i32 = arith.constant 16 : i32
    %8 = arith.muli %arg1, %c16_i32 : i32
    %c16_i32_8 = arith.constant 16 : i32
    %9 = arith.subi %8, %c16_i32_8 : i32
    %10 = vector.broadcast %9 : i32 to vector<48x1xi32>
    %11 = arith.addi %7, %10 : vector<48x1xi32>
    %c0_i32 = arith.constant 0 : i32
    %12 = vector.broadcast %c0_i32 : i32 to vector<48x1xi32>
    %13 = arith.cmpi sge, %11, %12 : vector<48x1xi32>
    %c40_i32 = arith.constant 40 : i32
    %14 = vector.broadcast %c40_i32 : i32 to vector<48x1xi32>
    %15 = arith.cmpi slt, %11, %14 : vector<48x1xi32>
    %16 = arith.andi %13, %15 : vector<48x1xi1>
    %cst = arith.constant 0.000000e+00 : f32
    %17 = vector.shape_cast %16 : vector<48x1xi1> to vector<48x1xi1>
    %18 = vector.broadcast %17 : vector<48x1xi1> to vector<48x128xi1>
    %19 = vector.broadcast %cst : f32 to vector<48x128xf32>
    %20 = arith.select %18, %6, %19 : vector<48x128xi1>, vector<48x128xf32>
    %cst_9 = arith.constant 0.000000e+00 : f32
    %21 = vector.broadcast %cst_9 : f32 to vector<16x128xf32>
    %cst_10 = arith.constant 1.000000e-01 : f32
    %22 = vector.broadcast %cst_10 : f32 to vector<48x128xf32>
    %23 = arith.mulf %22, %20 : vector<48x128xf32>
    %24 = arith.maximumf %20, %23 : vector<48x128xf32>
    %c0_11 = arith.constant 0 : index
    %c0_12 = arith.constant 0 : index
    %25 = vector.load %arg13[%c0_11, %c0_12] : memref<1x128xf32, #tpu.memory_space<vmem>>, vector<1x128xf32>
    %cst_13 = arith.constant 0.000000e+00 : f32
    %26 = vector.broadcast %cst_13 : f32 to vector<46x128xf32>
    %27 = vector.extract_strided_slice %24 {offsets = [0, 0], sizes = [46, 128], strides = [1, 1]} : vector<48x128xf32> to vector<46x128xf32>
    %c0_14 = arith.constant 0 : index
    %c0_15 = arith.constant 0 : index
    %c0_16 = arith.constant 0 : index
    %28 = vector.load %arg5[%c0_14, %c0_15, %c0_16] : memref<3x128x128xf32, #tpu.memory_space<vmem>>, vector<1x128x128xf32>
    %29 = vector.shape_cast %28 : vector<1x128x128xf32> to vector<128x128xf32>
    %cst_17 = arith.constant dense<0.000000e+00> : vector<46x128xf32>
    %30 = tpu.matmul %27, %29, %cst_17 {dimension_numbers = #tpu.dot_dimension_numbers<[1], [0], [0], [1], [0, 0, 1, 1], [], []>} : vector<46x128xf32>, vector<128x128xf32>, vector<46x128xf32> -> vector<46x128xf32>
    %31 = arith.addf %26, %30 : vector<46x128xf32>
    %32 = vector.extract_strided_slice %24 {offsets = [1, 0], sizes = [46, 128], strides = [1, 1]} : vector<48x128xf32> to vector<46x128xf32>
    %c1 = arith.constant 1 : index
    %c0_18 = arith.constant 0 : index
    %c0_19 = arith.constant 0 : index
    %33 = vector.load %arg5[%c1, %c0_18, %c0_19] : memref<3x128x128xf32, #tpu.memory_space<vmem>>, vector<1x128x128xf32>
    %34 = vector.shape_cast %33 : vector<1x128x128xf32> to vector<128x128xf32>
    %cst_20 = arith.constant dense<0.000000e+00> : vector<46x128xf32>
    %35 = tpu.matmul %32, %34, %cst_20 {dimension_numbers = #tpu.dot_dimension_numbers<[1], [0], [0], [1], [0, 0, 1, 1], [], []>} : vector<46x128xf32>, vector<128x128xf32>, vector<46x128xf32> -> vector<46x128xf32>
    %36 = arith.addf %31, %35 : vector<46x128xf32>
    %37 = vector.extract_strided_slice %24 {offsets = [2, 0], sizes = [46, 128], strides = [1, 1]} : vector<48x128xf32> to vector<46x128xf32>
    %c2 = arith.constant 2 : index
    %c0_21 = arith.constant 0 : index
    %c0_22 = arith.constant 0 : index
    %38 = vector.load %arg5[%c2, %c0_21, %c0_22] : memref<3x128x128xf32, #tpu.memory_space<vmem>>, vector<1x128x128xf32>
    %39 = vector.shape_cast %38 : vector<1x128x128xf32> to vector<128x128xf32>
    %cst_23 = arith.constant dense<0.000000e+00> : vector<46x128xf32>
    %40 = tpu.matmul %37, %39, %cst_23 {dimension_numbers = #tpu.dot_dimension_numbers<[1], [0], [0], [1], [0, 0, 1, 1], [], []>} : vector<46x128xf32>, vector<128x128xf32>, vector<46x128xf32> -> vector<46x128xf32>
    %41 = arith.addf %36, %40 : vector<46x128xf32>
    %42 = vector.broadcast %25 : vector<1x128xf32> to vector<46x128xf32>
    %43 = arith.addf %41, %42 : vector<46x128xf32>
    %44 = vector.extract_strided_slice %16 {offsets = [1, 0], sizes = [46, 1], strides = [1, 1]} : vector<48x1xi1> to vector<46x1xi1>
    %cst_24 = arith.constant 0.000000e+00 : f32
    %45 = vector.shape_cast %44 : vector<46x1xi1> to vector<46x1xi1>
    %46 = vector.broadcast %45 : vector<46x1xi1> to vector<46x128xi1>
    %47 = vector.broadcast %cst_24 : f32 to vector<46x128xf32>
    %48 = arith.select %46, %43, %47 : vector<46x128xi1>, vector<46x128xf32>
    %cst_25 = arith.constant 1.000000e-01 : f32
    %49 = vector.broadcast %cst_25 : f32 to vector<46x128xf32>
    %50 = arith.mulf %49, %48 : vector<46x128xf32>
    %51 = arith.maximumf %48, %50 : vector<46x128xf32>
    %c0_26 = arith.constant 0 : index
    %c0_27 = arith.constant 0 : index
    %52 = vector.load %arg14[%c0_26, %c0_27] : memref<1x128xf32, #tpu.memory_space<vmem>>, vector<1x128xf32>
    %cst_28 = arith.constant 0.000000e+00 : f32
    %53 = vector.broadcast %cst_28 : f32 to vector<44x128xf32>
    %54 = vector.extract_strided_slice %51 {offsets = [0, 0], sizes = [44, 128], strides = [1, 1]} : vector<46x128xf32> to vector<44x128xf32>
    %c0_29 = arith.constant 0 : index
    %c0_30 = arith.constant 0 : index
    %c0_31 = arith.constant 0 : index
    %55 = vector.load %arg6[%c0_29, %c0_30, %c0_31] : memref<3x128x128xf32, #tpu.memory_space<vmem>>, vector<1x128x128xf32>
    %56 = vector.shape_cast %55 : vector<1x128x128xf32> to vector<128x128xf32>
    %cst_32 = arith.constant dense<0.000000e+00> : vector<44x128xf32>
    %57 = tpu.matmul %54, %56, %cst_32 {dimension_numbers = #tpu.dot_dimension_numbers<[1], [0], [0], [1], [0, 0, 1, 1], [], []>} : vector<44x128xf32>, vector<128x128xf32>, vector<44x128xf32> -> vector<44x128xf32>
    %58 = arith.addf %53, %57 : vector<44x128xf32>
    %59 = vector.extract_strided_slice %51 {offsets = [1, 0], sizes = [44, 128], strides = [1, 1]} : vector<46x128xf32> to vector<44x128xf32>
    %c1_33 = arith.constant 1 : index
    %c0_34 = arith.constant 0 : index
    %c0_35 = arith.constant 0 : index
    %60 = vector.load %arg6[%c1_33, %c0_34, %c0_35] : memref<3x128x128xf32, #tpu.memory_space<vmem>>, vector<1x128x128xf32>
    %61 = vector.shape_cast %60 : vector<1x128x128xf32> to vector<128x128xf32>
    %cst_36 = arith.constant dense<0.000000e+00> : vector<44x128xf32>
    %62 = tpu.matmul %59, %61, %cst_36 {dimension_numbers = #tpu.dot_dimension_numbers<[1], [0], [0], [1], [0, 0, 1, 1], [], []>} : vector<44x128xf32>, vector<128x128xf32>, vector<44x128xf32> -> vector<44x128xf32>
    %63 = arith.addf %58, %62 : vector<44x128xf32>
    %64 = vector.extract_strided_slice %51 {offsets = [2, 0], sizes = [44, 128], strides = [1, 1]} : vector<46x128xf32> to vector<44x128xf32>
    %c2_37 = arith.constant 2 : index
    %c0_38 = arith.constant 0 : index
    %c0_39 = arith.constant 0 : index
    %65 = vector.load %arg6[%c2_37, %c0_38, %c0_39] : memref<3x128x128xf32, #tpu.memory_space<vmem>>, vector<1x128x128xf32>
    %66 = vector.shape_cast %65 : vector<1x128x128xf32> to vector<128x128xf32>
    %cst_40 = arith.constant dense<0.000000e+00> : vector<44x128xf32>
    %67 = tpu.matmul %64, %66, %cst_40 {dimension_numbers = #tpu.dot_dimension_numbers<[1], [0], [0], [1], [0, 0, 1, 1], [], []>} : vector<44x128xf32>, vector<128x128xf32>, vector<44x128xf32> -> vector<44x128xf32>
    %68 = arith.addf %63, %67 : vector<44x128xf32>
    %69 = vector.broadcast %52 : vector<1x128xf32> to vector<44x128xf32>
    %70 = arith.addf %68, %69 : vector<44x128xf32>
    %71 = vector.extract_strided_slice %16 {offsets = [2, 0], sizes = [44, 1], strides = [1, 1]} : vector<48x1xi1> to vector<44x1xi1>
    %cst_41 = arith.constant 0.000000e+00 : f32
    %72 = vector.shape_cast %71 : vector<44x1xi1> to vector<44x1xi1>
    %73 = vector.broadcast %72 : vector<44x1xi1> to vector<44x128xi1>
    %74 = vector.broadcast %cst_41 : f32 to vector<44x128xf32>
    %75 = arith.select %73, %70, %74 : vector<44x128xi1>, vector<44x128xf32>
    %76 = vector.extract_strided_slice %20 {offsets = [2, 0], sizes = [44, 128], strides = [1, 1]} : vector<48x128xf32> to vector<44x128xf32>
    %77 = arith.addf %75, %76 : vector<44x128xf32>
    %cst_42 = arith.constant 1.000000e-01 : f32
    %78 = vector.broadcast %cst_42 : f32 to vector<44x128xf32>
    %79 = arith.mulf %78, %77 : vector<44x128xf32>
    %80 = arith.maximumf %77, %79 : vector<44x128xf32>
    %c0_43 = arith.constant 0 : index
    %c0_44 = arith.constant 0 : index
    %81 = vector.load %arg15[%c0_43, %c0_44] : memref<1x128xf32, #tpu.memory_space<vmem>>, vector<1x128xf32>
    %cst_45 = arith.constant 0.000000e+00 : f32
    %82 = vector.broadcast %cst_45 : f32 to vector<38x128xf32>
    %83 = vector.extract_strided_slice %80 {offsets = [0, 0], sizes = [38, 128], strides = [1, 1]} : vector<44x128xf32> to vector<38x128xf32>
    %c0_46 = arith.constant 0 : index
    %c0_47 = arith.constant 0 : index
    %c0_48 = arith.constant 0 : index
    %84 = vector.load %arg7[%c0_46, %c0_47, %c0_48] : memref<3x128x128xf32, #tpu.memory_space<vmem>>, vector<1x128x128xf32>
    %85 = vector.shape_cast %84 : vector<1x128x128xf32> to vector<128x128xf32>
    %cst_49 = arith.constant dense<0.000000e+00> : vector<38x128xf32>
    %86 = tpu.matmul %83, %85, %cst_49 {dimension_numbers = #tpu.dot_dimension_numbers<[1], [0], [0], [1], [0, 0, 1, 1], [], []>} : vector<38x128xf32>, vector<128x128xf32>, vector<38x128xf32> -> vector<38x128xf32>
    %87 = arith.addf %82, %86 : vector<38x128xf32>
    %88 = vector.extract_strided_slice %80 {offsets = [3, 0], sizes = [38, 128], strides = [1, 1]} : vector<44x128xf32> to vector<38x128xf32>
    %c1_50 = arith.constant 1 : index
    %c0_51 = arith.constant 0 : index
    %c0_52 = arith.constant 0 : index
    %89 = vector.load %arg7[%c1_50, %c0_51, %c0_52] : memref<3x128x128xf32, #tpu.memory_space<vmem>>, vector<1x128x128xf32>
    %90 = vector.shape_cast %89 : vector<1x128x128xf32> to vector<128x128xf32>
    %cst_53 = arith.constant dense<0.000000e+00> : vector<38x128xf32>
    %91 = tpu.matmul %88, %90, %cst_53 {dimension_numbers = #tpu.dot_dimension_numbers<[1], [0], [0], [1], [0, 0, 1, 1], [], []>} : vector<38x128xf32>, vector<128x128xf32>, vector<38x128xf32> -> vector<38x128xf32>
    %92 = arith.addf %87, %91 : vector<38x128xf32>
    %93 = vector.extract_strided_slice %80 {offsets = [6, 0], sizes = [38, 128], strides = [1, 1]} : vector<44x128xf32> to vector<38x128xf32>
    %c2_54 = arith.constant 2 : index
    %c0_55 = arith.constant 0 : index
    %c0_56 = arith.constant 0 : index
    %94 = vector.load %arg7[%c2_54, %c0_55, %c0_56] : memref<3x128x128xf32, #tpu.memory_space<vmem>>, vector<1x128x128xf32>
    %95 = vector.shape_cast %94 : vector<1x128x128xf32> to vector<128x128xf32>
    %cst_57 = arith.constant dense<0.000000e+00> : vector<38x128xf32>
    %96 = tpu.matmul %93, %95, %cst_57 {dimension_numbers = #tpu.dot_dimension_numbers<[1], [0], [0], [1], [0, 0, 1, 1], [], []>} : vector<38x128xf32>, vector<128x128xf32>, vector<38x128xf32> -> vector<38x128xf32>
    %97 = arith.addf %92, %96 : vector<38x128xf32>
    %98 = vector.broadcast %81 : vector<1x128xf32> to vector<38x128xf32>
    %99 = arith.addf %97, %98 : vector<38x128xf32>
    %100 = vector.extract_strided_slice %16 {offsets = [5, 0], sizes = [38, 1], strides = [1, 1]} : vector<48x1xi1> to vector<38x1xi1>
    %cst_58 = arith.constant 0.000000e+00 : f32
    %101 = vector.shape_cast %100 : vector<38x1xi1> to vector<38x1xi1>
    %102 = vector.broadcast %101 : vector<38x1xi1> to vector<38x128xi1>
    %103 = vector.broadcast %cst_58 : f32 to vector<38x128xf32>
    %104 = arith.select %102, %99, %103 : vector<38x128xi1>, vector<38x128xf32>
    %cst_59 = arith.constant 1.000000e-01 : f32
    %105 = vector.broadcast %cst_59 : f32 to vector<38x128xf32>
    %106 = arith.mulf %105, %104 : vector<38x128xf32>
    %107 = arith.maximumf %104, %106 : vector<38x128xf32>
    %c0_60 = arith.constant 0 : index
    %c0_61 = arith.constant 0 : index
    %108 = vector.load %arg16[%c0_60, %c0_61] : memref<1x128xf32, #tpu.memory_space<vmem>>, vector<1x128xf32>
    %cst_62 = arith.constant 0.000000e+00 : f32
    %109 = vector.broadcast %cst_62 : f32 to vector<36x128xf32>
    %110 = vector.extract_strided_slice %107 {offsets = [0, 0], sizes = [36, 128], strides = [1, 1]} : vector<38x128xf32> to vector<36x128xf32>
    %c0_63 = arith.constant 0 : index
    %c0_64 = arith.constant 0 : index
    %c0_65 = arith.constant 0 : index
    %111 = vector.load %arg8[%c0_63, %c0_64, %c0_65] : memref<3x128x128xf32, #tpu.memory_space<vmem>>, vector<1x128x128xf32>
    %112 = vector.shape_cast %111 : vector<1x128x128xf32> to vector<128x128xf32>
    %cst_66 = arith.constant dense<0.000000e+00> : vector<36x128xf32>
    %113 = tpu.matmul %110, %112, %cst_66 {dimension_numbers = #tpu.dot_dimension_numbers<[1], [0], [0], [1], [0, 0, 1, 1], [], []>} : vector<36x128xf32>, vector<128x128xf32>, vector<36x128xf32> -> vector<36x128xf32>
    %114 = arith.addf %109, %113 : vector<36x128xf32>
    %115 = vector.extract_strided_slice %107 {offsets = [1, 0], sizes = [36, 128], strides = [1, 1]} : vector<38x128xf32> to vector<36x128xf32>
    %c1_67 = arith.constant 1 : index
    %c0_68 = arith.constant 0 : index
    %c0_69 = arith.constant 0 : index
    %116 = vector.load %arg8[%c1_67, %c0_68, %c0_69] : memref<3x128x128xf32, #tpu.memory_space<vmem>>, vector<1x128x128xf32>
    %117 = vector.shape_cast %116 : vector<1x128x128xf32> to vector<128x128xf32>
    %cst_70 = arith.constant dense<0.000000e+00> : vector<36x128xf32>
    %118 = tpu.matmul %115, %117, %cst_70 {dimension_numbers = #tpu.dot_dimension_numbers<[1], [0], [0], [1], [0, 0, 1, 1], [], []>} : vector<36x128xf32>, vector<128x128xf32>, vector<36x128xf32> -> vector<36x128xf32>
    %119 = arith.addf %114, %118 : vector<36x128xf32>
    %120 = vector.extract_strided_slice %107 {offsets = [2, 0], sizes = [36, 128], strides = [1, 1]} : vector<38x128xf32> to vector<36x128xf32>
    %c2_71 = arith.constant 2 : index
    %c0_72 = arith.constant 0 : index
    %c0_73 = arith.constant 0 : index
    %121 = vector.load %arg8[%c2_71, %c0_72, %c0_73] : memref<3x128x128xf32, #tpu.memory_space<vmem>>, vector<1x128x128xf32>
    %122 = vector.shape_cast %121 : vector<1x128x128xf32> to vector<128x128xf32>
    %cst_74 = arith.constant dense<0.000000e+00> : vector<36x128xf32>
    %123 = tpu.matmul %120, %122, %cst_74 {dimension_numbers = #tpu.dot_dimension_numbers<[1], [0], [0], [1], [0, 0, 1, 1], [], []>} : vector<36x128xf32>, vector<128x128xf32>, vector<36x128xf32> -> vector<36x128xf32>
    %124 = arith.addf %119, %123 : vector<36x128xf32>
    %125 = vector.broadcast %108 : vector<1x128xf32> to vector<36x128xf32>
    %126 = arith.addf %124, %125 : vector<36x128xf32>
    %127 = vector.extract_strided_slice %16 {offsets = [6, 0], sizes = [36, 1], strides = [1, 1]} : vector<48x1xi1> to vector<36x1xi1>
    %cst_75 = arith.constant 0.000000e+00 : f32
    %128 = vector.shape_cast %127 : vector<36x1xi1> to vector<36x1xi1>
    %129 = vector.broadcast %128 : vector<36x1xi1> to vector<36x128xi1>
    %130 = vector.broadcast %cst_75 : f32 to vector<36x128xf32>
    %131 = arith.select %129, %126, %130 : vector<36x128xi1>, vector<36x128xf32>
    %132 = vector.extract_strided_slice %77 {offsets = [4, 0], sizes = [36, 128], strides = [1, 1]} : vector<44x128xf32> to vector<36x128xf32>
    %133 = arith.addf %131, %132 : vector<36x128xf32>
    %134 = vector.extract_strided_slice %133 {offsets = [10, 0], sizes = [16, 128], strides = [1, 1]} : vector<36x128xf32> to vector<16x128xf32>
    %135 = arith.addf %21, %134 : vector<16x128xf32>
    %cst_76 = arith.constant 1.000000e-01 : f32
    %136 = vector.broadcast %cst_76 : f32 to vector<48x128xf32>
    %137 = arith.mulf %136, %20 : vector<48x128xf32>
    %138 = arith.maximumf %20, %137 : vector<48x128xf32>
    %c0_77 = arith.constant 0 : index
    %c0_78 = arith.constant 0 : index
    %139 = vector.load %arg17[%c0_77, %c0_78] : memref<1x128xf32, #tpu.memory_space<vmem>>, vector<1x128xf32>
    %cst_79 = arith.constant 0.000000e+00 : f32
    %140 = vector.broadcast %cst_79 : f32 to vector<44x128xf32>
    %141 = vector.extract_strided_slice %138 {offsets = [0, 0], sizes = [44, 128], strides = [1, 1]} : vector<48x128xf32> to vector<44x128xf32>
    %c0_80 = arith.constant 0 : index
    %c0_81 = arith.constant 0 : index
    %c0_82 = arith.constant 0 : index
    %142 = vector.load %arg9[%c0_80, %c0_81, %c0_82] : memref<5x128x128xf32, #tpu.memory_space<vmem>>, vector<1x128x128xf32>
    %143 = vector.shape_cast %142 : vector<1x128x128xf32> to vector<128x128xf32>
    %cst_83 = arith.constant dense<0.000000e+00> : vector<44x128xf32>
    %144 = tpu.matmul %141, %143, %cst_83 {dimension_numbers = #tpu.dot_dimension_numbers<[1], [0], [0], [1], [0, 0, 1, 1], [], []>} : vector<44x128xf32>, vector<128x128xf32>, vector<44x128xf32> -> vector<44x128xf32>
    %145 = arith.addf %140, %144 : vector<44x128xf32>
    %146 = vector.extract_strided_slice %138 {offsets = [1, 0], sizes = [44, 128], strides = [1, 1]} : vector<48x128xf32> to vector<44x128xf32>
    %c1_84 = arith.constant 1 : index
    %c0_85 = arith.constant 0 : index
    %c0_86 = arith.constant 0 : index
    %147 = vector.load %arg9[%c1_84, %c0_85, %c0_86] : memref<5x128x128xf32, #tpu.memory_space<vmem>>, vector<1x128x128xf32>
    %148 = vector.shape_cast %147 : vector<1x128x128xf32> to vector<128x128xf32>
    %cst_87 = arith.constant dense<0.000000e+00> : vector<44x128xf32>
    %149 = tpu.matmul %146, %148, %cst_87 {dimension_numbers = #tpu.dot_dimension_numbers<[1], [0], [0], [1], [0, 0, 1, 1], [], []>} : vector<44x128xf32>, vector<128x128xf32>, vector<44x128xf32> -> vector<44x128xf32>
    %150 = arith.addf %145, %149 : vector<44x128xf32>
    %151 = vector.extract_strided_slice %138 {offsets = [2, 0], sizes = [44, 128], strides = [1, 1]} : vector<48x128xf32> to vector<44x128xf32>
    %c2_88 = arith.constant 2 : index
    %c0_89 = arith.constant 0 : index
    %c0_90 = arith.constant 0 : index
    %152 = vector.load %arg9[%c2_88, %c0_89, %c0_90] : memref<5x128x128xf32, #tpu.memory_space<vmem>>, vector<1x128x128xf32>
    %153 = vector.shape_cast %152 : vector<1x128x128xf32> to vector<128x128xf32>
    %cst_91 = arith.constant dense<0.000000e+00> : vector<44x128xf32>
    %154 = tpu.matmul %151, %153, %cst_91 {dimension_numbers = #tpu.dot_dimension_numbers<[1], [0], [0], [1], [0, 0, 1, 1], [], []>} : vector<44x128xf32>, vector<128x128xf32>, vector<44x128xf32> -> vector<44x128xf32>
    %155 = arith.addf %150, %154 : vector<44x128xf32>
    %156 = vector.extract_strided_slice %138 {offsets = [3, 0], sizes = [44, 128], strides = [1, 1]} : vector<48x128xf32> to vector<44x128xf32>
    %c3 = arith.constant 3 : index
    %c0_92 = arith.constant 0 : index
    %c0_93 = arith.constant 0 : index
    %157 = vector.load %arg9[%c3, %c0_92, %c0_93] : memref<5x128x128xf32, #tpu.memory_space<vmem>>, vector<1x128x128xf32>
    %158 = vector.shape_cast %157 : vector<1x128x128xf32> to vector<128x128xf32>
    %cst_94 = arith.constant dense<0.000000e+00> : vector<44x128xf32>
    %159 = tpu.matmul %156, %158, %cst_94 {dimension_numbers = #tpu.dot_dimension_numbers<[1], [0], [0], [1], [0, 0, 1, 1], [], []>} : vector<44x128xf32>, vector<128x128xf32>, vector<44x128xf32> -> vector<44x128xf32>
    %160 = arith.addf %155, %159 : vector<44x128xf32>
    %161 = vector.extract_strided_slice %138 {offsets = [4, 0], sizes = [44, 128], strides = [1, 1]} : vector<48x128xf32> to vector<44x128xf32>
    %c4 = arith.constant 4 : index
    %c0_95 = arith.constant 0 : index
    %c0_96 = arith.constant 0 : index
    %162 = vector.load %arg9[%c4, %c0_95, %c0_96] : memref<5x128x128xf32, #tpu.memory_space<vmem>>, vector<1x128x128xf32>
    %163 = vector.shape_cast %162 : vector<1x128x128xf32> to vector<128x128xf32>
    %cst_97 = arith.constant dense<0.000000e+00> : vector<44x128xf32>
    %164 = tpu.matmul %161, %163, %cst_97 {dimension_numbers = #tpu.dot_dimension_numbers<[1], [0], [0], [1], [0, 0, 1, 1], [], []>} : vector<44x128xf32>, vector<128x128xf32>, vector<44x128xf32> -> vector<44x128xf32>
    %165 = arith.addf %160, %164 : vector<44x128xf32>
    %166 = vector.broadcast %139 : vector<1x128xf32> to vector<44x128xf32>
    %167 = arith.addf %165, %166 : vector<44x128xf32>
    %168 = vector.extract_strided_slice %16 {offsets = [2, 0], sizes = [44, 1], strides = [1, 1]} : vector<48x1xi1> to vector<44x1xi1>
    %cst_98 = arith.constant 0.000000e+00 : f32
    %169 = vector.shape_cast %168 : vector<44x1xi1> to vector<44x1xi1>
    %170 = vector.broadcast %169 : vector<44x1xi1> to vector<44x128xi1>
    %171 = vector.broadcast %cst_98 : f32 to vector<44x128xf32>
    %172 = arith.select %170, %167, %171 : vector<44x128xi1>, vector<44x128xf32>
    %cst_99 = arith.constant 1.000000e-01 : f32
    %173 = vector.broadcast %cst_99 : f32 to vector<44x128xf32>
    %174 = arith.mulf %173, %172 : vector<44x128xf32>
    %175 = arith.maximumf %172, %174 : vector<44x128xf32>
    %c0_100 = arith.constant 0 : index
    %c0_101 = arith.constant 0 : index
    %176 = vector.load %arg18[%c0_100, %c0_101] : memref<1x128xf32, #tpu.memory_space<vmem>>, vector<1x128xf32>
    %cst_102 = arith.constant 0.000000e+00 : f32
    %177 = vector.broadcast %cst_102 : f32 to vector<40x128xf32>
    %178 = vector.extract_strided_slice %175 {offsets = [0, 0], sizes = [40, 128], strides = [1, 1]} : vector<44x128xf32> to vector<40x128xf32>
    %c0_103 = arith.constant 0 : index
    %c0_104 = arith.constant 0 : index
    %c0_105 = arith.constant 0 : index
    %179 = vector.load %arg10[%c0_103, %c0_104, %c0_105] : memref<5x128x128xf32, #tpu.memory_space<vmem>>, vector<1x128x128xf32>
    %180 = vector.shape_cast %179 : vector<1x128x128xf32> to vector<128x128xf32>
    %cst_106 = arith.constant dense<0.000000e+00> : vector<40x128xf32>
    %181 = tpu.matmul %178, %180, %cst_106 {dimension_numbers = #tpu.dot_dimension_numbers<[1], [0], [0], [1], [0, 0, 1, 1], [], []>} : vector<40x128xf32>, vector<128x128xf32>, vector<40x128xf32> -> vector<40x128xf32>
    %182 = arith.addf %177, %181 : vector<40x128xf32>
    %183 = vector.extract_strided_slice %175 {offsets = [1, 0], sizes = [40, 128], strides = [1, 1]} : vector<44x128xf32> to vector<40x128xf32>
    %c1_107 = arith.constant 1 : index
    %c0_108 = arith.constant 0 : index
    %c0_109 = arith.constant 0 : index
    %184 = vector.load %arg10[%c1_107, %c0_108, %c0_109] : memref<5x128x128xf32, #tpu.memory_space<vmem>>, vector<1x128x128xf32>
    %185 = vector.shape_cast %184 : vector<1x128x128xf32> to vector<128x128xf32>
    %cst_110 = arith.constant dense<0.000000e+00> : vector<40x128xf32>
    %186 = tpu.matmul %183, %185, %cst_110 {dimension_numbers = #tpu.dot_dimension_numbers<[1], [0], [0], [1], [0, 0, 1, 1], [], []>} : vector<40x128xf32>, vector<128x128xf32>, vector<40x128xf32> -> vector<40x128xf32>
    %187 = arith.addf %182, %186 : vector<40x128xf32>
    %188 = vector.extract_strided_slice %175 {offsets = [2, 0], sizes = [40, 128], strides = [1, 1]} : vector<44x128xf32> to vector<40x128xf32>
    %c2_111 = arith.constant 2 : index
    %c0_112 = arith.constant 0 : index
    %c0_113 = arith.constant 0 : index
    %189 = vector.load %arg10[%c2_111, %c0_112, %c0_113] : memref<5x128x128xf32, #tpu.memory_space<vmem>>, vector<1x128x128xf32>
    %190 = vector.shape_cast %189 : vector<1x128x128xf32> to vector<128x128xf32>
    %cst_114 = arith.constant dense<0.000000e+00> : vector<40x128xf32>
    %191 = tpu.matmul %188, %190, %cst_114 {dimension_numbers = #tpu.dot_dimension_numbers<[1], [0], [0], [1], [0, 0, 1, 1], [], []>} : vector<40x128xf32>, vector<128x128xf32>, vector<40x128xf32> -> vector<40x128xf32>
    %192 = arith.addf %187, %191 : vector<40x128xf32>
    %193 = vector.extract_strided_slice %175 {offsets = [3, 0], sizes = [40, 128], strides = [1, 1]} : vector<44x128xf32> to vector<40x128xf32>
    %c3_115 = arith.constant 3 : index
    %c0_116 = arith.constant 0 : index
    %c0_117 = arith.constant 0 : index
    %194 = vector.load %arg10[%c3_115, %c0_116, %c0_117] : memref<5x128x128xf32, #tpu.memory_space<vmem>>, vector<1x128x128xf32>
    %195 = vector.shape_cast %194 : vector<1x128x128xf32> to vector<128x128xf32>
    %cst_118 = arith.constant dense<0.000000e+00> : vector<40x128xf32>
    %196 = tpu.matmul %193, %195, %cst_118 {dimension_numbers = #tpu.dot_dimension_numbers<[1], [0], [0], [1], [0, 0, 1, 1], [], []>} : vector<40x128xf32>, vector<128x128xf32>, vector<40x128xf32> -> vector<40x128xf32>
    %197 = arith.addf %192, %196 : vector<40x128xf32>
    %198 = vector.extract_strided_slice %175 {offsets = [4, 0], sizes = [40, 128], strides = [1, 1]} : vector<44x128xf32> to vector<40x128xf32>
    %c4_119 = arith.constant 4 : index
    %c0_120 = arith.constant 0 : index
    %c0_121 = arith.constant 0 : index
    %199 = vector.load %arg10[%c4_119, %c0_120, %c0_121] : memref<5x128x128xf32, #tpu.memory_space<vmem>>, vector<1x128x128xf32>
    %200 = vector.shape_cast %199 : vector<1x128x128xf32> to vector<128x128xf32>
    %cst_122 = arith.constant dense<0.000000e+00> : vector<40x128xf32>
    %201 = tpu.matmul %198, %200, %cst_122 {dimension_numbers = #tpu.dot_dimension_numbers<[1], [0], [0], [1], [0, 0, 1, 1], [], []>} : vector<40x128xf32>, vector<128x128xf32>, vector<40x128xf32> -> vector<40x128xf32>
    %202 = arith.addf %197, %201 : vector<40x128xf32>
    %203 = vector.broadcast %176 : vector<1x128xf32> to vector<40x128xf32>
    %204 = arith.addf %202, %203 : vector<40x128xf32>
    %205 = vector.extract_strided_slice %16 {offsets = [4, 0], sizes = [40, 1], strides = [1, 1]} : vector<48x1xi1> to vector<40x1xi1>
    %cst_123 = arith.constant 0.000000e+00 : f32
    %206 = vector.shape_cast %205 : vector<40x1xi1> to vector<40x1xi1>
    %207 = vector.broadcast %206 : vector<40x1xi1> to vector<40x128xi1>
    %208 = vector.broadcast %cst_123 : f32 to vector<40x128xf32>
    %209 = arith.select %207, %204, %208 : vector<40x128xi1>, vector<40x128xf32>
    %210 = vector.extract_strided_slice %20 {offsets = [4, 0], sizes = [40, 128], strides = [1, 1]} : vector<48x128xf32> to vector<40x128xf32>
    %211 = arith.addf %209, %210 : vector<40x128xf32>
    %cst_124 = arith.constant 1.000000e-01 : f32
    %212 = vector.broadcast %cst_124 : f32 to vector<40x128xf32>
    %213 = arith.mulf %212, %211 : vector<40x128xf32>
    %214 = arith.maximumf %211, %213 : vector<40x128xf32>
    %c0_125 = arith.constant 0 : index
    %c0_126 = arith.constant 0 : index
    %215 = vector.load %arg19[%c0_125, %c0_126] : memref<1x128xf32, #tpu.memory_space<vmem>>, vector<1x128xf32>
    %cst_127 = arith.constant 0.000000e+00 : f32
    %216 = vector.broadcast %cst_127 : f32 to vector<32x128xf32>
    %217 = vector.extract_strided_slice %214 {offsets = [0, 0], sizes = [32, 128], strides = [1, 1]} : vector<40x128xf32> to vector<32x128xf32>
    %c0_128 = arith.constant 0 : index
    %c0_129 = arith.constant 0 : index
    %c0_130 = arith.constant 0 : index
    %218 = vector.load %arg11[%c0_128, %c0_129, %c0_130] : memref<5x128x128xf32, #tpu.memory_space<vmem>>, vector<1x128x128xf32>
    %219 = vector.shape_cast %218 : vector<1x128x128xf32> to vector<128x128xf32>
    %cst_131 = arith.constant dense<0.000000e+00> : vector<32x128xf32>
    %220 = tpu.matmul %217, %219, %cst_131 {dimension_numbers = #tpu.dot_dimension_numbers<[1], [0], [0], [1], [0, 0, 1, 1], [], []>} : vector<32x128xf32>, vector<128x128xf32>, vector<32x128xf32> -> vector<32x128xf32>
    %221 = arith.addf %216, %220 : vector<32x128xf32>
    %222 = vector.extract_strided_slice %214 {offsets = [2, 0], sizes = [32, 128], strides = [1, 1]} : vector<40x128xf32> to vector<32x128xf32>
    %c1_132 = arith.constant 1 : index
    %c0_133 = arith.constant 0 : index
    %c0_134 = arith.constant 0 : index
    %223 = vector.load %arg11[%c1_132, %c0_133, %c0_134] : memref<5x128x128xf32, #tpu.memory_space<vmem>>, vector<1x128x128xf32>
    %224 = vector.shape_cast %223 : vector<1x128x128xf32> to vector<128x128xf32>
    %cst_135 = arith.constant dense<0.000000e+00> : vector<32x128xf32>
    %225 = tpu.matmul %222, %224, %cst_135 {dimension_numbers = #tpu.dot_dimension_numbers<[1], [0], [0], [1], [0, 0, 1, 1], [], []>} : vector<32x128xf32>, vector<128x128xf32>, vector<32x128xf32> -> vector<32x128xf32>
    %226 = arith.addf %221, %225 : vector<32x128xf32>
    %227 = vector.extract_strided_slice %214 {offsets = [4, 0], sizes = [32, 128], strides = [1, 1]} : vector<40x128xf32> to vector<32x128xf32>
    %c2_136 = arith.constant 2 : index
    %c0_137 = arith.constant 0 : index
    %c0_138 = arith.constant 0 : index
    %228 = vector.load %arg11[%c2_136, %c0_137, %c0_138] : memref<5x128x128xf32, #tpu.memory_space<vmem>>, vector<1x128x128xf32>
    %229 = vector.shape_cast %228 : vector<1x128x128xf32> to vector<128x128xf32>
    %cst_139 = arith.constant dense<0.000000e+00> : vector<32x128xf32>
    %230 = tpu.matmul %227, %229, %cst_139 {dimension_numbers = #tpu.dot_dimension_numbers<[1], [0], [0], [1], [0, 0, 1, 1], [], []>} : vector<32x128xf32>, vector<128x128xf32>, vector<32x128xf32> -> vector<32x128xf32>
    %231 = arith.addf %226, %230 : vector<32x128xf32>
    %232 = vector.extract_strided_slice %214 {offsets = [6, 0], sizes = [32, 128], strides = [1, 1]} : vector<40x128xf32> to vector<32x128xf32>
    %c3_140 = arith.constant 3 : index
    %c0_141 = arith.constant 0 : index
    %c0_142 = arith.constant 0 : index
    %233 = vector.load %arg11[%c3_140, %c0_141, %c0_142] : memref<5x128x128xf32, #tpu.memory_space<vmem>>, vector<1x128x128xf32>
    %234 = vector.shape_cast %233 : vector<1x128x128xf32> to vector<128x128xf32>
    %cst_143 = arith.constant dense<0.000000e+00> : vector<32x128xf32>
    %235 = tpu.matmul %232, %234, %cst_143 {dimension_numbers = #tpu.dot_dimension_numbers<[1], [0], [0], [1], [0, 0, 1, 1], [], []>} : vector<32x128xf32>, vector<128x128xf32>, vector<32x128xf32> -> vector<32x128xf32>
    %236 = arith.addf %231, %235 : vector<32x128xf32>
    %237 = vector.extract_strided_slice %214 {offsets = [8, 0], sizes = [32, 128], strides = [1, 1]} : vector<40x128xf32> to vector<32x128xf32>
    %c4_144 = arith.constant 4 : index
    %c0_145 = arith.constant 0 : index
    %c0_146 = arith.constant 0 : index
    %238 = vector.load %arg11[%c4_144, %c0_145, %c0_146] : memref<5x128x128xf32, #tpu.memory_space<vmem>>, vector<1x128x128xf32>
    %239 = vector.shape_cast %238 : vector<1x128x128xf32> to vector<128x128xf32>
    %cst_147 = arith.constant dense<0.000000e+00> : vector<32x128xf32>
    %240 = tpu.matmul %237, %239, %cst_147 {dimension_numbers = #tpu.dot_dimension_numbers<[1], [0], [0], [1], [0, 0, 1, 1], [], []>} : vector<32x128xf32>, vector<128x128xf32>, vector<32x128xf32> -> vector<32x128xf32>
    %241 = arith.addf %236, %240 : vector<32x128xf32>
    %242 = vector.broadcast %215 : vector<1x128xf32> to vector<32x128xf32>
    %243 = arith.addf %241, %242 : vector<32x128xf32>
    %244 = vector.extract_strided_slice %16 {offsets = [8, 0], sizes = [32, 1], strides = [1, 1]} : vector<48x1xi1> to vector<32x1xi1>
    %cst_148 = arith.constant 0.000000e+00 : f32
    %245 = vector.shape_cast %244 : vector<32x1xi1> to vector<32x1xi1>
    %246 = vector.broadcast %245 : vector<32x1xi1> to vector<32x128xi1>
    %247 = vector.broadcast %cst_148 : f32 to vector<32x128xf32>
    %248 = arith.select %246, %243, %247 : vector<32x128xi1>, vector<32x128xf32>
    %cst_149 = arith.constant 1.000000e-01 : f32
    %249 = vector.broadcast %cst_149 : f32 to vector<32x128xf32>
    %250 = arith.mulf %249, %248 : vector<32x128xf32>
    %251 = arith.maximumf %248, %250 : vector<32x128xf32>
    %c0_150 = arith.constant 0 : index
    %c0_151 = arith.constant 0 : index
    %252 = vector.load %arg20[%c0_150, %c0_151] : memref<1x128xf32, #tpu.memory_space<vmem>>, vector<1x128xf32>
    %cst_152 = arith.constant 0.000000e+00 : f32
    %253 = vector.broadcast %cst_152 : f32 to vector<28x128xf32>
    %254 = vector.extract_strided_slice %251 {offsets = [0, 0], sizes = [28, 128], strides = [1, 1]} : vector<32x128xf32> to vector<28x128xf32>
    %c0_153 = arith.constant 0 : index
    %c0_154 = arith.constant 0 : index
    %c0_155 = arith.constant 0 : index
    %255 = vector.load %arg12[%c0_153, %c0_154, %c0_155] : memref<5x128x128xf32, #tpu.memory_space<vmem>>, vector<1x128x128xf32>
    %256 = vector.shape_cast %255 : vector<1x128x128xf32> to vector<128x128xf32>
    %cst_156 = arith.constant dense<0.000000e+00> : vector<28x128xf32>
    %257 = tpu.matmul %254, %256, %cst_156 {dimension_numbers = #tpu.dot_dimension_numbers<[1], [0], [0], [1], [0, 0, 1, 1], [], []>} : vector<28x128xf32>, vector<128x128xf32>, vector<28x128xf32> -> vector<28x128xf32>
    %258 = arith.addf %253, %257 : vector<28x128xf32>
    %259 = vector.extract_strided_slice %251 {offsets = [1, 0], sizes = [28, 128], strides = [1, 1]} : vector<32x128xf32> to vector<28x128xf32>
    %c1_157 = arith.constant 1 : index
    %c0_158 = arith.constant 0 : index
    %c0_159 = arith.constant 0 : index
    %260 = vector.load %arg12[%c1_157, %c0_158, %c0_159] : memref<5x128x128xf32, #tpu.memory_space<vmem>>, vector<1x128x128xf32>
    %261 = vector.shape_cast %260 : vector<1x128x128xf32> to vector<128x128xf32>
    %cst_160 = arith.constant dense<0.000000e+00> : vector<28x128xf32>
    %262 = tpu.matmul %259, %261, %cst_160 {dimension_numbers = #tpu.dot_dimension_numbers<[1], [0], [0], [1], [0, 0, 1, 1], [], []>} : vector<28x128xf32>, vector<128x128xf32>, vector<28x128xf32> -> vector<28x128xf32>
    %263 = arith.addf %258, %262 : vector<28x128xf32>
    %264 = vector.extract_strided_slice %251 {offsets = [2, 0], sizes = [28, 128], strides = [1, 1]} : vector<32x128xf32> to vector<28x128xf32>
    %c2_161 = arith.constant 2 : index
    %c0_162 = arith.constant 0 : index
    %c0_163 = arith.constant 0 : index
    %265 = vector.load %arg12[%c2_161, %c0_162, %c0_163] : memref<5x128x128xf32, #tpu.memory_space<vmem>>, vector<1x128x128xf32>
    %266 = vector.shape_cast %265 : vector<1x128x128xf32> to vector<128x128xf32>
    %cst_164 = arith.constant dense<0.000000e+00> : vector<28x128xf32>
    %267 = tpu.matmul %264, %266, %cst_164 {dimension_numbers = #tpu.dot_dimension_numbers<[1], [0], [0], [1], [0, 0, 1, 1], [], []>} : vector<28x128xf32>, vector<128x128xf32>, vector<28x128xf32> -> vector<28x128xf32>
    %268 = arith.addf %263, %267 : vector<28x128xf32>
    %269 = vector.extract_strided_slice %251 {offsets = [3, 0], sizes = [28, 128], strides = [1, 1]} : vector<32x128xf32> to vector<28x128xf32>
    %c3_165 = arith.constant 3 : index
    %c0_166 = arith.constant 0 : index
    %c0_167 = arith.constant 0 : index
    %270 = vector.load %arg12[%c3_165, %c0_166, %c0_167] : memref<5x128x128xf32, #tpu.memory_space<vmem>>, vector<1x128x128xf32>
    %271 = vector.shape_cast %270 : vector<1x128x128xf32> to vector<128x128xf32>
    %cst_168 = arith.constant dense<0.000000e+00> : vector<28x128xf32>
    %272 = tpu.matmul %269, %271, %cst_168 {dimension_numbers = #tpu.dot_dimension_numbers<[1], [0], [0], [1], [0, 0, 1, 1], [], []>} : vector<28x128xf32>, vector<128x128xf32>, vector<28x128xf32> -> vector<28x128xf32>
    %273 = arith.addf %268, %272 : vector<28x128xf32>
    %274 = vector.extract_strided_slice %251 {offsets = [4, 0], sizes = [28, 128], strides = [1, 1]} : vector<32x128xf32> to vector<28x128xf32>
    %c4_169 = arith.constant 4 : index
    %c0_170 = arith.constant 0 : index
    %c0_171 = arith.constant 0 : index
    %275 = vector.load %arg12[%c4_169, %c0_170, %c0_171] : memref<5x128x128xf32, #tpu.memory_space<vmem>>, vector<1x128x128xf32>
    %276 = vector.shape_cast %275 : vector<1x128x128xf32> to vector<128x128xf32>
    %cst_172 = arith.constant dense<0.000000e+00> : vector<28x128xf32>
    %277 = tpu.matmul %274, %276, %cst_172 {dimension_numbers = #tpu.dot_dimension_numbers<[1], [0], [0], [1], [0, 0, 1, 1], [], []>} : vector<28x128xf32>, vector<128x128xf32>, vector<28x128xf32> -> vector<28x128xf32>
    %278 = arith.addf %273, %277 : vector<28x128xf32>
    %279 = vector.broadcast %252 : vector<1x128xf32> to vector<28x128xf32>
    %280 = arith.addf %278, %279 : vector<28x128xf32>
    %281 = vector.extract_strided_slice %16 {offsets = [10, 0], sizes = [28, 1], strides = [1, 1]} : vector<48x1xi1> to vector<28x1xi1>
    %cst_173 = arith.constant 0.000000e+00 : f32
    %282 = vector.shape_cast %281 : vector<28x1xi1> to vector<28x1xi1>
    %283 = vector.broadcast %282 : vector<28x1xi1> to vector<28x128xi1>
    %284 = vector.broadcast %cst_173 : f32 to vector<28x128xf32>
    %285 = arith.select %283, %280, %284 : vector<28x128xi1>, vector<28x128xf32>
    %286 = vector.extract_strided_slice %211 {offsets = [6, 0], sizes = [28, 128], strides = [1, 1]} : vector<40x128xf32> to vector<28x128xf32>
    %287 = arith.addf %285, %286 : vector<28x128xf32>
    %288 = vector.extract_strided_slice %287 {offsets = [6, 0], sizes = [16, 128], strides = [1, 1]} : vector<28x128xf32> to vector<16x128xf32>
    %289 = arith.addf %135, %288 : vector<16x128xf32>
    %cst_174 = arith.constant 5.000000e-01 : f32
    %290 = vector.broadcast %cst_174 : f32 to vector<16x128xf32>
    %291 = arith.mulf %289, %290 : vector<16x128xf32>
    %c0_175 = arith.constant 0 : index
    %c0_176 = arith.constant 0 : index
    %c0_177 = arith.constant 0 : index
    %292 = vector.load %arg21[%c0_175, %c0_176, %c0_177] : memref<1x16x128xf32, #tpu.memory_space<vmem>>, vector<1x16x128xf32>
    %293 = vector.shape_cast %292 : vector<1x16x128xf32> to vector<16x128xf32>
    %294 = vector.shape_cast %291 : vector<16x128xf32> to vector<1x16x128xf32>
    tpu.vector_store %arg21[%c0_175, %c0_176, %c0_177], %294 {strides = array<i32>} : memref<1x16x128xf32, #tpu.memory_space<vmem>>, vector<1x16x128xf32>,
    return
  }
  func.func @transform_0(%arg0: i32, %arg1: i32) -> (i32, i32, i32) {
    %c0_i32 = arith.constant 0 : i32
    %c0_i32_0 = arith.constant 0 : i32
    return %arg0, %arg1, %c0_i32 : i32, i32, i32
  }
  func.func @transform_1(%arg0: i32, %arg1: i32) -> (i32, i32, i32) {
    %c1_i32 = arith.constant 1 : i32
    %0 = arith.muli %arg1, %c1_i32 : i32
    %c1_i32_0 = arith.constant 1 : i32
    %1 = arith.subi %0, %c1_i32_0 : i32
    %c0_i32 = arith.constant 0 : i32
    %2 = arith.maxsi %1, %c0_i32 : i32
    %c0_i32_1 = arith.constant 0 : i32
    %c0_i32_2 = arith.constant 0 : i32
    return %arg0, %2, %c0_i32_1 : i32, i32, i32
  }
  func.func @transform_2(%arg0: i32, %arg1: i32) -> (i32, i32, i32) {
    %c1_i32 = arith.constant 1 : i32
    %0 = arith.addi %arg1, %c1_i32 : i32
    %c1_i32_0 = arith.constant 1 : i32
    %1 = arith.muli %0, %c1_i32_0 : i32
    %c2_i32 = arith.constant 2 : i32
    %2 = arith.minsi %1, %c2_i32 : i32
    %c0_i32 = arith.constant 0 : i32
    %c0_i32_1 = arith.constant 0 : i32
    return %arg0, %2, %c0_i32 : i32, i32, i32
  }
  func.func @transform_3(%arg0: i32, %arg1: i32) -> (i32, i32, i32) {
    %c0_i32 = arith.constant 0 : i32
    %c0_i32_0 = arith.constant 0 : i32
    %c0_i32_1 = arith.constant 0 : i32
    %c0_i32_2 = arith.constant 0 : i32
    return %c0_i32, %c0_i32_0, %c0_i32_1 : i32, i32, i32
  }
  func.func @transform_4(%arg0: i32, %arg1: i32) -> (i32, i32, i32) {
    %c0_i32 = arith.constant 0 : i32
    %c0_i32_0 = arith.constant 0 : i32
    %c0_i32_1 = arith.constant 0 : i32
    %c0_i32_2 = arith.constant 0 : i32
    return %c0_i32, %c0_i32_0, %c0_i32_1 : i32, i32, i32
  }
  func.func @transform_5(%arg0: i32, %arg1: i32) -> (i32, i32, i32) {
    %c0_i32 = arith.constant 0 : i32
    %c0_i32_0 = arith.constant 0 : i32
    %c0_i32_1 = arith.constant 0 : i32
    %c0_i32_2 = arith.constant 0 : i32
    return %c0_i32, %c0_i32_0, %c0_i32_1 : i32, i32, i32
  }
  func.func @transform_6(%arg0: i32, %arg1: i32) -> (i32, i32, i32) {
    %c0_i32 = arith.constant 0 : i32
    %c0_i32_0 = arith.constant 0 : i32
    %c0_i32_1 = arith.constant 0 : i32
    %c0_i32_2 = arith.constant 0 : i32
    return %c0_i32, %c0_i32_0, %c0_i32_1 : i32, i32, i32
  }
  func.func @transform_7(%arg0: i32, %arg1: i32) -> (i32, i32, i32) {
    %c0_i32 = arith.constant 0 : i32
    %c0_i32_0 = arith.constant 0 : i32
    %c0_i32_1 = arith.constant 0 : i32
    %c0_i32_2 = arith.constant 0 : i32
    return %c0_i32, %c0_i32_0, %c0_i32_1 : i32, i32, i32
  }
  func.func @transform_8(%arg0: i32, %arg1: i32) -> (i32, i32, i32) {
    %c0_i32 = arith.constant 0 : i32
    %c0_i32_0 = arith.constant 0 : i32
    %c0_i32_1 = arith.constant 0 : i32
    %c0_i32_2 = arith.constant 0 : i32
    return %c0_i32, %c0_i32_0, %c0_i32_1 : i32, i32, i32
  }
  func.func @transform_9(%arg0: i32, %arg1: i32) -> (i32, i32, i32) {
    %c0_i32 = arith.constant 0 : i32
    %c0_i32_0 = arith.constant 0 : i32
    %c0_i32_1 = arith.constant 0 : i32
    %c0_i32_2 = arith.constant 0 : i32
    return %c0_i32, %c0_i32_0, %c0_i32_1 : i32, i32, i32
  }
  func.func @transform_10(%arg0: i32, %arg1: i32) -> (i32, i32, i32) {
    %c0_i32 = arith.constant 0 : i32
    %c0_i32_0 = arith.constant 0 : i32
    %c0_i32_1 = arith.constant 0 : i32
    %c0_i32_2 = arith.constant 0 : i32
    return %c0_i32, %c0_i32_0, %c0_i32_1 : i32, i32, i32
  }
  func.func @transform_11(%arg0: i32, %arg1: i32) -> (i32, i32) {
    %c0_i32 = arith.constant 0 : i32
    %c0_i32_0 = arith.constant 0 : i32
    %c0_i32_1 = arith.constant 0 : i32
    return %c0_i32, %c0_i32_0 : i32, i32
  }
  func.func @transform_12(%arg0: i32, %arg1: i32) -> (i32, i32) {
    %c0_i32 = arith.constant 0 : i32
    %c0_i32_0 = arith.constant 0 : i32
    %c0_i32_1 = arith.constant 0 : i32
    return %c0_i32, %c0_i32_0 : i32, i32
  }
  func.func @transform_13(%arg0: i32, %arg1: i32) -> (i32, i32) {
    %c0_i32 = arith.constant 0 : i32
    %c0_i32_0 = arith.constant 0 : i32
    %c0_i32_1 = arith.constant 0 : i32
    return %c0_i32, %c0_i32_0 : i32, i32
  }
  func.func @transform_14(%arg0: i32, %arg1: i32) -> (i32, i32) {
    %c0_i32 = arith.constant 0 : i32
    %c0_i32_0 = arith.constant 0 : i32
    %c0_i32_1 = arith.constant 0 : i32
    return %c0_i32, %c0_i32_0 : i32, i32
  }
  func.func @transform_15(%arg0: i32, %arg1: i32) -> (i32, i32) {
    %c0_i32 = arith.constant 0 : i32
    %c0_i32_0 = arith.constant 0 : i32
    %c0_i32_1 = arith.constant 0 : i32
    return %c0_i32, %c0_i32_0 : i32, i32
  }
  func.func @transform_16(%arg0: i32, %arg1: i32) -> (i32, i32) {
    %c0_i32 = arith.constant 0 : i32
    %c0_i32_0 = arith.constant 0 : i32
    %c0_i32_1 = arith.constant 0 : i32
    return %c0_i32, %c0_i32_0 : i32, i32
  }
  func.func @transform_17(%arg0: i32, %arg1: i32) -> (i32, i32) {
    %c0_i32 = arith.constant 0 : i32
    %c0_i32_0 = arith.constant 0 : i32
    %c0_i32_1 = arith.constant 0 : i32
    return %c0_i32, %c0_i32_0 : i32, i32
  }
  func.func @transform_18(%arg0: i32, %arg1: i32) -> (i32, i32) {
    %c0_i32 = arith.constant 0 : i32
    %c0_i32_0 = arith.constant 0 : i32
    %c0_i32_1 = arith.constant 0 : i32
    return %c0_i32, %c0_i32_0 : i32, i32
  }
  func.func @transform_19(%arg0: i32, %arg1: i32) -> (i32, i32, i32) {
    %c0_i32 = arith.constant 0 : i32
    %c0_i32_0 = arith.constant 0 : i32
    return %arg0, %arg1, %c0_i32 : i32, i32, i32
  }
}

module attributes {stable_mosaic.version = 11 : i64} {
  func.func @_mrf_fused_kernel(%arg0: i32, %arg1: i32, %arg2: memref<1x16x128xf32, #tpu.memory_space<vmem>>, %arg3: memref<1x16x128xf32, #tpu.memory_space<vmem>>, %arg4: memref<1x16x128xf32, #tpu.memory_space<vmem>>, %arg5: memref<3x128x128xf32, #tpu.memory_space<vmem>>, %arg6: memref<3x128x128xf32, #tpu.memory_space<vmem>>, %arg7: memref<3x128x128xf32, #tpu.memory_space<vmem>>, %arg8: memref<3x128x128xf32, #tpu.memory_space<vmem>>, %arg9: memref<5x128x128xf32, #tpu.memory_space<vmem>>, %arg10: memref<5x128x128xf32, #tpu.memory_space<vmem>>, %arg11: memref<5x128x128xf32, #tpu.memory_space<vmem>>, %arg12: memref<5x128x128xf32, #tpu.memory_space<vmem>>, %arg13: memref<1x128xf32, #tpu.memory_space<vmem>>, %arg14: memref<1x128xf32, #tpu.memory_space<vmem>>, %arg15: memref<1x128xf32, #tpu.memory_space<vmem>>, %arg16: memref<1x128xf32, #tpu.memory_space<vmem>>, %arg17: memref<1x128xf32, #tpu.memory_space<vmem>>, %arg18: memref<1x128xf32, #tpu.memory_space<vmem>>, %arg19: memref<1x128xf32, #tpu.memory_space<vmem>>, %arg20: memref<1x128xf32, #tpu.memory_space<vmem>>, %arg21: memref<1x16x128xf32, #tpu.memory_space<vmem>>) attributes {dimension_semantics = [#tpu.dimension_semantics<parallel>, #tpu.dimension_semantics<parallel>], iteration_bounds = array<i64: 2, 3>, scalar_prefetch = 0 : i64, scratch_operands = 0 : i64, tpu.core_type = #tpu.core_type<tc>, window_params = [{transform_indices = @transform_0, window_bounds = array<i64: 1, 16, 128>}, {transform_indices = @transform_1, window_bounds = array<i64: 1, 16, 128>}, {transform_indices = @transform_2, window_bounds = array<i64: 1, 16, 128>}, {pipeline_mode = #tpu.pipeline_mode<synchronous>, transform_indices = @transform_3, window_bounds = array<i64: 3, 128, 128>}, {pipeline_mode = #tpu.pipeline_mode<synchronous>, transform_indices = @transform_4, window_bounds = array<i64: 3, 128, 128>}, {pipeline_mode = #tpu.pipeline_mode<synchronous>, transform_indices = @transform_5, window_bounds = array<i64: 3, 128, 128>}, {pipeline_mode = #tpu.pipeline_mode<synchronous>, transform_indices = @transform_6, window_bounds = array<i64: 3, 128, 128>}, {pipeline_mode = #tpu.pipeline_mode<synchronous>, transform_indices = @transform_7, window_bounds = array<i64: 5, 128, 128>}, {pipeline_mode = #tpu.pipeline_mode<synchronous>, transform_indices = @transform_8, window_bounds = array<i64: 5, 128, 128>}, {pipeline_mode = #tpu.pipeline_mode<synchronous>, transform_indices = @transform_9, window_bounds = array<i64: 5, 128, 128>}, {pipeline_mode = #tpu.pipeline_mode<synchronous>, transform_indices = @transform_10, window_bounds = array<i64: 5, 128, 128>}, {pipeline_mode = #tpu.pipeline_mode<synchronous>, transform_indices = @transform_11, window_bounds = array<i64: 1, 128>}, {pipeline_mode = #tpu.pipeline_mode<synchronous>, transform_indices = @transform_12, window_bounds = array<i64: 1, 128>}, {pipeline_mode = #tpu.pipeline_mode<synchronous>, transform_indices = @transform_13, window_bounds = array<i64: 1, 128>}, {pipeline_mode = #tpu.pipeline_mode<synchronous>, transform_indices = @transform_14, window_bounds = array<i64: 1, 128>}, {pipeline_mode = #tpu.pipeline_mode<synchronous>, transform_indices = @transform_15, window_bounds = array<i64: 1, 128>}, {pipeline_mode = #tpu.pipeline_mode<synchronous>, transform_indices = @transform_16, window_bounds = array<i64: 1, 128>}, {pipeline_mode = #tpu.pipeline_mode<synchronous>, transform_indices = @transform_17, window_bounds = array<i64: 1, 128>}, {pipeline_mode = #tpu.pipeline_mode<synchronous>, transform_indices = @transform_18, window_bounds = array<i64: 1, 128>}, {transform_indices = @transform_19, window_bounds = array<i64: 1, 16, 128>}]} {
    %c0 = arith.constant 0 : index
    %c0_0 = arith.constant 0 : index
    %c0_1 = arith.constant 0 : index
    %0 = vector.load %arg3[%c0, %c0_0, %c0_1] : memref<1x16x128xf32, #tpu.memory_space<vmem>>, vector<1x16x128xf32>
    %1 = vector.shape_cast %0 : vector<1x16x128xf32> to vector<16x128xf32>
    %c0_2 = arith.constant 0 : index
    %c0_3 = arith.constant 0 : index
    %c0_4 = arith.constant 0 : index
    %2 = vector.load %arg2[%c0_2, %c0_3, %c0_4] : memref<1x16x128xf32, #tpu.memory_space<vmem>>, vector<1x16x128xf32>
    %3 = vector.shape_cast %2 : vector<1x16x128xf32> to vector<16x128xf32>
    %c0_5 = arith.constant 0 : index
    %c0_6 = arith.constant 0 : index
    %c0_7 = arith.constant 0 : index
    %4 = vector.load %arg4[%c0_5, %c0_6, %c0_7] : memref<1x16x128xf32, #tpu.memory_space<vmem>>, vector<1x16x128xf32>
    %5 = vector.shape_cast %4 : vector<1x16x128xf32> to vector<16x128xf32>
    %6 = tpu.concatenate %1, %3, %5 in 0 : vector<16x128xf32>, vector<16x128xf32>, vector<16x128xf32> -> vector<48x128xf32>
    %7 = tpu.iota {dimensions = array<i32: 0>} : vector<48x1xi32>
    %c16_i32 = arith.constant 16 : i32
    %8 = arith.muli %arg1, %c16_i32 : i32
    %c16_i32_8 = arith.constant 16 : i32
    %9 = arith.subi %8, %c16_i32_8 : i32
    %10 = vector.broadcast %9 : i32 to vector<48x1xi32>
    %11 = arith.addi %7, %10 : vector<48x1xi32>
    %c0_i32 = arith.constant 0 : i32
    %12 = vector.broadcast %c0_i32 : i32 to vector<48x1xi32>
    %13 = arith.cmpi sge, %11, %12 : vector<48x1xi32>
    %c40_i32 = arith.constant 40 : i32
    %14 = vector.broadcast %c40_i32 : i32 to vector<48x1xi32>
    %15 = arith.cmpi slt, %11, %14 : vector<48x1xi32>
    %16 = arith.andi %13, %15 : vector<48x1xi1>
    %cst = arith.constant 0.000000e+00 : f32
    %17 = vector.shape_cast %16 : vector<48x1xi1> to vector<48x1xi1>
    %18 = vector.broadcast %17 : vector<48x1xi1> to vector<48x128xi1>
    %19 = vector.broadcast %cst : f32 to vector<48x128xf32>
    %20 = arith.select %18, %6, %19 : vector<48x128xi1>, vector<48x128xf32>
    %cst_9 = arith.constant 0.000000e+00 : f32
    %21 = vector.broadcast %cst_9 : f32 to vector<16x128xf32>
    %cst_10 = arith.constant 1.000000e-01 : f32
    %22 = vector.broadcast %cst_10 : f32 to vector<48x128xf32>
    %23 = arith.mulf %22, %20 : vector<48x128xf32>
    %24 = arith.maximumf %20, %23 : vector<48x128xf32>
    %c0_11 = arith.constant 0 : index
    %c0_12 = arith.constant 0 : index
    %25 = vector.load %arg13[%c0_11, %c0_12] : memref<1x128xf32, #tpu.memory_space<vmem>>, vector<1x128xf32>
    %cst_13 = arith.constant 0.000000e+00 : f32
    %26 = vector.broadcast %cst_13 : f32 to vector<46x128xf32>
    %27 = vector.extract_strided_slice %24 {offsets = [0, 0], sizes = [46, 128], strides = [1, 1]} : vector<48x128xf32> to vector<46x128xf32>
    %c0_14 = arith.constant 0 : index
    %c0_15 = arith.constant 0 : index
    %c0_16 = arith.constant 0 : index
    %28 = vector.load %arg5[%c0_14, %c0_15, %c0_16] : memref<3x128x128xf32, #tpu.memory_space<vmem>>, vector<1x128x128xf32>
    %29 = vector.shape_cast %28 : vector<1x128x128xf32> to vector<128x128xf32>
    %cst_17 = arith.constant dense<0.000000e+00> : vector<46x128xf32>
    %30 = tpu.matmul %27, %29, %cst_17 {dimension_numbers = #tpu.dot_dimension_numbers<[1], [0], [0], [1], [0, 0, 1, 1], [], []>} : vector<46x128xf32>, vector<128x128xf32>, vector<46x128xf32> -> vector<46x128xf32>
    %31 = arith.addf %26, %30 : vector<46x128xf32>
    %32 = vector.extract_strided_slice %24 {offsets = [1, 0], sizes = [46, 128], strides = [1, 1]} : vector<48x128xf32> to vector<46x128xf32>
    %c1 = arith.constant 1 : index
    %c0_18 = arith.constant 0 : index
    %c0_19 = arith.constant 0 : index
    %33 = vector.load %arg5[%c1, %c0_18, %c0_19] : memref<3x128x128xf32, #tpu.memory_space<vmem>>, vector<1x128x128xf32>
    %34 = vector.shape_cast %33 : vector<1x128x128xf32> to vector<128x128xf32>
    %cst_20 = arith.constant dense<0.000000e+00> : vector<46x128xf32>
    %35 = tpu.matmul %32, %34, %cst_20 {dimension_numbers = #tpu.dot_dimension_numbers<[1], [0], [0], [1], [0, 0, 1, 1], [], []>} : vector<46x128xf32>, vector<128x128xf32>, vector<46x128xf32> -> vector<46x128xf32>
    %36 = arith.addf %31, %35 : vector<46x128xf32>
    %37 = vector.extract_strided_slice %24 {offsets = [2, 0], sizes = [46, 128], strides = [1, 1]} : vector<48x128xf32> to vector<46x128xf32>
    %c2 = arith.constant 2 : index
    %c0_21 = arith.constant 0 : index
    %c0_22 = arith.constant 0 : index
    %38 = vector.load %arg5[%c2, %c0_21, %c0_22] : memref<3x128x128xf32, #tpu.memory_space<vmem>>, vector<1x128x128xf32>
    %39 = vector.shape_cast %38 : vector<1x128x128xf32> to vector<128x128xf32>
    %cst_23 = arith.constant dense<0.000000e+00> : vector<46x128xf32>
    %40 = tpu.matmul %37, %39, %cst_23 {dimension_numbers = #tpu.dot_dimension_numbers<[1], [0], [0], [1], [0, 0, 1, 1], [], []>} : vector<46x128xf32>, vector<128x128xf32>, vector<46x128xf32> -> vector<46x128xf32>
    %41 = arith.addf %36, %40 : vector<46x128xf32>
    %42 = vector.broadcast %25 : vector<1x128xf32> to vector<46x128xf32>
    %43 = arith.addf %41, %42 : vector<46x128xf32>
    %44 = vector.extract_strided_slice %16 {offsets = [1, 0], sizes = [46, 1], strides = [1, 1]} : vector<48x1xi1> to vector<46x1xi1>
    %cst_24 = arith.constant 0.000000e+00 : f32
    %45 = vector.shape_cast %44 : vector<46x1xi1> to vector<46x1xi1>
    %46 = vector.broadcast %45 : vector<46x1xi1> to vector<46x128xi1>
    %47 = vector.broadcast %cst_24 : f32 to vector<46x128xf32>
    %48 = arith.select %46, %43, %47 : vector<46x128xi1>, vector<46x128xf32>
    %cst_25 = arith.constant 1.000000e-01 : f32
    %49 = vector.broadcast %cst_25 : f32 to vector<46x128xf32>
    %50 = arith.mulf %49, %48 : vector<46x128xf32>
    %51 = arith.maximumf %48, %50 : vector<46x128xf32>
    %c0_26 = arith.constant 0 : index
    %c0_27 = arith.constant 0 : index
    %52 = vector.load %arg14[%c0_26, %c0_27] : memref<1x128xf32, #tpu.memory_space<vmem>>, vector<1x128xf32>
    %cst_28 = arith.constant 0.000000e+00 : f32
    %53 = vector.broadcast %cst_28 : f32 to vector<44x128xf32>
    %54 = vector.extract_strided_slice %51 {offsets = [0, 0], sizes = [44, 128], strides = [1, 1]} : vector<46x128xf32> to vector<44x128xf32>
    %c0_29 = arith.constant 0 : index
    %c0_30 = arith.constant 0 : index
    %c0_31 = arith.constant 0 : index
    %55 = vector.load %arg6[%c0_29, %c0_30, %c0_31] : memref<3x128x128xf32, #tpu.memory_space<vmem>>, vector<1x128x128xf32>
    %56 = vector.shape_cast %55 : vector<1x128x128xf32> to vector<128x128xf32>
    %cst_32 = arith.constant dense<0.000000e+00> : vector<44x128xf32>
    %57 = tpu.matmul %54, %56, %cst_32 {dimension_numbers = #tpu.dot_dimension_numbers<[1], [0], [0], [1], [0, 0, 1, 1], [], []>} : vector<44x128xf32>, vector<128x128xf32>, vector<44x128xf32> -> vector<44x128xf32>
    %58 = arith.addf %53, %57 : vector<44x128xf32>
    %59 = vector.extract_strided_slice %51 {offsets = [1, 0], sizes = [44, 128], strides = [1, 1]} : vector<46x128xf32> to vector<44x128xf32>
    %c1_33 = arith.constant 1 : index
    %c0_34 = arith.constant 0 : index
    %c0_35 = arith.constant 0 : index
    %60 = vector.load %arg6[%c1_33, %c0_34, %c0_35] : memref<3x128x128xf32, #tpu.memory_space<vmem>>, vector<1x128x128xf32>
    %61 = vector.shape_cast %60 : vector<1x128x128xf32> to vector<128x128xf32>
    %cst_36 = arith.constant dense<0.000000e+00> : vector<44x128xf32>
    %62 = tpu.matmul %59, %61, %cst_36 {dimension_numbers = #tpu.dot_dimension_numbers<[1], [0], [0], [1], [0, 0, 1, 1], [], []>} : vector<44x128xf32>, vector<128x128xf32>, vector<44x128xf32> -> vector<44x128xf32>
    %63 = arith.addf %58, %62 : vector<44x128xf32>
    %64 = vector.extract_strided_slice %51 {offsets = [2, 0], sizes = [44, 128], strides = [1, 1]} : vector<46x128xf32> to vector<44x128xf32>
    %c2_37 = arith.constant 2 : index
    %c0_38 = arith.constant 0 : index
    %c0_39 = arith.constant 0 : index
    %65 = vector.load %arg6[%c2_37, %c0_38, %c0_39] : memref<3x128x128xf32, #tpu.memory_space<vmem>>, vector<1x128x128xf32>
    %66 = vector.shape_cast %65 : vector<1x128x128xf32> to vector<128x128xf32>
    %cst_40 = arith.constant dense<0.000000e+00> : vector<44x128xf32>
    %67 = tpu.matmul %64, %66, %cst_40 {dimension_numbers = #tpu.dot_dimension_numbers<[1], [0], [0], [1], [0, 0, 1, 1], [], []>} : vector<44x128xf32>, vector<128x128xf32>, vector<44x128xf32> -> vector<44x128xf32>
    %68 = arith.addf %63, %67 : vector<44x128xf32>
    %69 = vector.broadcast %52 : vector<1x128xf32> to vector<44x128xf32>
    %70 = arith.addf %68, %69 : vector<44x128xf32>
    %71 = vector.extract_strided_slice %16 {offsets = [2, 0], sizes = [44, 1], strides = [1, 1]} : vector<48x1xi1> to vector<44x1xi1>
    %cst_41 = arith.constant 0.000000e+00 : f32
    %72 = vector.shape_cast %71 : vector<44x1xi1> to vector<44x1xi1>
    %73 = vector.broadcast %72 : vector<44x1xi1> to vector<44x128xi1>
    %74 = vector.broadcast %cst_41 : f32 to vector<44x128xf32>
    %75 = arith.select %73, %70, %74 : vector<44x128xi1>, vector<44x128xf32>
    %76 = vector.extract_strided_slice %20 {offsets = [2, 0], sizes = [44, 128], strides = [1, 1]} : vector<48x128xf32> to vector<44x128xf32>
    %77 = arith.addf %75, %76 : vector<44x128xf32>
    %cst_42 = arith.constant 1.000000e-01 : f32
    %78 = vector.broadcast %cst_42 : f32 to vector<44x128xf32>
    %79 = arith.mulf %78, %77 : vector<44x128xf32>
    %80 = arith.maximumf %77, %79 : vector<44x128xf32>
    %c0_43 = arith.constant 0 : index
    %c0_44 = arith.constant 0 : index
    %81 = vector.load %arg15[%c0_43, %c0_44] : memref<1x128xf32, #tpu.memory_space<vmem>>, vector<1x128xf32>
    %cst_45 = arith.constant 0.000000e+00 : f32
    %82 = vector.broadcast %cst_45 : f32 to vector<38x128xf32>
    %83 = vector.extract_strided_slice %80 {offsets = [0, 0], sizes = [38, 128], strides = [1, 1]} : vector<44x128xf32> to vector<38x128xf32>
    %c0_46 = arith.constant 0 : index
    %c0_47 = arith.constant 0 : index
    %c0_48 = arith.constant 0 : index
    %84 = vector.load %arg7[%c0_46, %c0_47, %c0_48] : memref<3x128x128xf32, #tpu.memory_space<vmem>>, vector<1x128x128xf32>
    %85 = vector.shape_cast %84 : vector<1x128x128xf32> to vector<128x128xf32>
    %cst_49 = arith.constant dense<0.000000e+00> : vector<38x128xf32>
    %86 = tpu.matmul %83, %85, %cst_49 {dimension_numbers = #tpu.dot_dimension_numbers<[1], [0], [0], [1], [0, 0, 1, 1], [], []>} : vector<38x128xf32>, vector<128x128xf32>, vector<38x128xf32> -> vector<38x128xf32>
    %87 = arith.addf %82, %86 : vector<38x128xf32>
    %88 = vector.extract_strided_slice %80 {offsets = [3, 0], sizes = [38, 128], strides = [1, 1]} : vector<44x128xf32> to vector<38x128xf32>
    %c1_50 = arith.constant 1 : index
    %c0_51 = arith.constant 0 : index
    %c0_52 = arith.constant 0 : index
    %89 = vector.load %arg7[%c1_50, %c0_51, %c0_52] : memref<3x128x128xf32, #tpu.memory_space<vmem>>, vector<1x128x128xf32>
    %90 = vector.shape_cast %89 : vector<1x128x128xf32> to vector<128x128xf32>
    %cst_53 = arith.constant dense<0.000000e+00> : vector<38x128xf32>
    %91 = tpu.matmul %88, %90, %cst_53 {dimension_numbers = #tpu.dot_dimension_numbers<[1], [0], [0], [1], [0, 0, 1, 1], [], []>} : vector<38x128xf32>, vector<128x128xf32>, vector<38x128xf32> -> vector<38x128xf32>
    %92 = arith.addf %87, %91 : vector<38x128xf32>
    %93 = vector.extract_strided_slice %80 {offsets = [6, 0], sizes = [38, 128], strides = [1, 1]} : vector<44x128xf32> to vector<38x128xf32>
    %c2_54 = arith.constant 2 : index
    %c0_55 = arith.constant 0 : index
    %c0_56 = arith.constant 0 : index
    %94 = vector.load %arg7[%c2_54, %c0_55, %c0_56] : memref<3x128x128xf32, #tpu.memory_space<vmem>>, vector<1x128x128xf32>
    %95 = vector.shape_cast %94 : vector<1x128x128xf32> to vector<128x128xf32>
    %cst_57 = arith.constant dense<0.000000e+00> : vector<38x128xf32>
    %96 = tpu.matmul %93, %95, %cst_57 {dimension_numbers = #tpu.dot_dimension_numbers<[1], [0], [0], [1], [0, 0, 1, 1], [], []>} : vector<38x128xf32>, vector<128x128xf32>, vector<38x128xf32> -> vector<38x128xf32>
    %97 = arith.addf %92, %96 : vector<38x128xf32>
    %98 = vector.broadcast %81 : vector<1x128xf32> to vector<38x128xf32>
    %99 = arith.addf %97, %98 : vector<38x128xf32>
    %100 = vector.extract_strided_slice %16 {offsets = [5, 0], sizes = [38, 1], strides = [1, 1]} : vector<48x1xi1> to vector<38x1xi1>
    %cst_58 = arith.constant 0.000000e+00 : f32
    %101 = vector.shape_cast %100 : vector<38x1xi1> to vector<38x1xi1>
    %102 = vector.broadcast %101 : vector<38x1xi1> to vector<38x128xi1>
    %103 = vector.broadcast %cst_58 : f32 to vector<38x128xf32>
    %104 = arith.select %102, %99, %103 : vector<38x128xi1>, vector<38x128xf32>
    %cst_59 = arith.constant 1.000000e-01 : f32
    %105 = vector.broadcast %cst_59 : f32 to vector<38x128xf32>
    %106 = arith.mulf %105, %104 : vector<38x128xf32>
    %107 = arith.maximumf %104, %106 : vector<38x128xf32>
    %c0_60 = arith.constant 0 : index
    %c0_61 = arith.constant 0 : index
    %108 = vector.load %arg16[%c0_60, %c0_61] : memref<1x128xf32, #tpu.memory_space<vmem>>, vector<1x128xf32>
    %cst_62 = arith.constant 0.000000e+00 : f32
    %109 = vector.broadcast %cst_62 : f32 to vector<36x128xf32>
    %110 = vector.extract_strided_slice %107 {offsets = [0, 0], sizes = [36, 128], strides = [1, 1]} : vector<38x128xf32> to vector<36x128xf32>
    %c0_63 = arith.constant 0 : index
    %c0_64 = arith.constant 0 : index
    %c0_65 = arith.constant 0 : index
    %111 = vector.load %arg8[%c0_63, %c0_64, %c0_65] : memref<3x128x128xf32, #tpu.memory_space<vmem>>, vector<1x128x128xf32>
    %112 = vector.shape_cast %111 : vector<1x128x128xf32> to vector<128x128xf32>
    %cst_66 = arith.constant dense<0.000000e+00> : vector<36x128xf32>
    %113 = tpu.matmul %110, %112, %cst_66 {dimension_numbers = #tpu.dot_dimension_numbers<[1], [0], [0], [1], [0, 0, 1, 1], [], []>} : vector<36x128xf32>, vector<128x128xf32>, vector<36x128xf32> -> vector<36x128xf32>
    %114 = arith.addf %109, %113 : vector<36x128xf32>
    %115 = vector.extract_strided_slice %107 {offsets = [1, 0], sizes = [36, 128], strides = [1, 1]} : vector<38x128xf32> to vector<36x128xf32>
    %c1_67 = arith.constant 1 : index
    %c0_68 = arith.constant 0 : index
    %c0_69 = arith.constant 0 : index
    %116 = vector.load %arg8[%c1_67, %c0_68, %c0_69] : memref<3x128x128xf32, #tpu.memory_space<vmem>>, vector<1x128x128xf32>
    %117 = vector.shape_cast %116 : vector<1x128x128xf32> to vector<128x128xf32>
    %cst_70 = arith.constant dense<0.000000e+00> : vector<36x128xf32>
    %118 = tpu.matmul %115, %117, %cst_70 {dimension_numbers = #tpu.dot_dimension_numbers<[1], [0], [0], [1], [0, 0, 1, 1], [], []>} : vector<36x128xf32>, vector<128x128xf32>, vector<36x128xf32> -> vector<36x128xf32>
    %119 = arith.addf %114, %118 : vector<36x128xf32>
    %120 = vector.extract_strided_slice %107 {offsets = [2, 0], sizes = [36, 128], strides = [1, 1]} : vector<38x128xf32> to vector<36x128xf32>
    %c2_71 = arith.constant 2 : index
    %c0_72 = arith.constant 0 : index
    %c0_73 = arith.constant 0 : index
    %121 = vector.load %arg8[%c2_71, %c0_72, %c0_73] : memref<3x128x128xf32, #tpu.memory_space<vmem>>, vector<1x128x128xf32>
    %122 = vector.shape_cast %121 : vector<1x128x128xf32> to vector<128x128xf32>
    %cst_74 = arith.constant dense<0.000000e+00> : vector<36x128xf32>
    %123 = tpu.matmul %120, %122, %cst_74 {dimension_numbers = #tpu.dot_dimension_numbers<[1], [0], [0], [1], [0, 0, 1, 1], [], []>} : vector<36x128xf32>, vector<128x128xf32>, vector<36x128xf32> -> vector<36x128xf32>
    %124 = arith.addf %119, %123 : vector<36x128xf32>
    %125 = vector.broadcast %108 : vector<1x128xf32> to vector<36x128xf32>
    %126 = arith.addf %124, %125 : vector<36x128xf32>
    %127 = vector.extract_strided_slice %16 {offsets = [6, 0], sizes = [36, 1], strides = [1, 1]} : vector<48x1xi1> to vector<36x1xi1>
    %cst_75 = arith.constant 0.000000e+00 : f32
    %128 = vector.shape_cast %127 : vector<36x1xi1> to vector<36x1xi1>
    %129 = vector.broadcast %128 : vector<36x1xi1> to vector<36x128xi1>
    %130 = vector.broadcast %cst_75 : f32 to vector<36x128xf32>
    %131 = arith.select %129, %126, %130 : vector<36x128xi1>, vector<36x128xf32>
    %132 = vector.extract_strided_slice %77 {offsets = [4, 0], sizes = [36, 128], strides = [1, 1]} : vector<44x128xf32> to vector<36x128xf32>
    %133 = arith.addf %131, %132 : vector<36x128xf32>
    %134 = vector.extract_strided_slice %133 {offsets = [10, 0], sizes = [16, 128], strides = [1, 1]} : vector<36x128xf32> to vector<16x128xf32>
    %135 = arith.addf %21, %134 : vector<16x128xf32>
    %cst_76 = arith.constant 1.000000e-01 : f32
    %136 = vector.broadcast %cst_76 : f32 to vector<48x128xf32>
    %137 = arith.mulf %136, %20 : vector<48x128xf32>
    %138 = arith.maximumf %20, %137 : vector<48x128xf32>
    %c0_77 = arith.constant 0 : index
    %c0_78 = arith.constant 0 : index
    %139 = vector.load %arg17[%c0_77, %c0_78] : memref<1x128xf32, #tpu.memory_space<vmem>>, vector<1x128xf32>
    %cst_79 = arith.constant 0.000000e+00 : f32
    %140 = vector.broadcast %cst_79 : f32 to vector<44x128xf32>
    %141 = vector.extract_strided_slice %138 {offsets = [0, 0], sizes = [44, 128], strides = [1, 1]} : vector<48x128xf32> to vector<44x128xf32>
    %c0_80 = arith.constant 0 : index
    %c0_81 = arith.constant 0 : index
    %c0_82 = arith.constant 0 : index
    %142 = vector.load %arg9[%c0_80, %c0_81, %c0_82] : memref<5x128x128xf32, #tpu.memory_space<vmem>>, vector<1x128x128xf32>
    %143 = vector.shape_cast %142 : vector<1x128x128xf32> to vector<128x128xf32>
    %cst_83 = arith.constant dense<0.000000e+00> : vector<44x128xf32>
    %144 = tpu.matmul %141, %143, %cst_83 {dimension_numbers = #tpu.dot_dimension_numbers<[1], [0], [0], [1], [0, 0, 1, 1], [], []>} : vector<44x128xf32>, vector<128x128xf32>, vector<44x128xf32> -> vector<44x128xf32>
    %145 = arith.addf %140, %144 : vector<44x128xf32>
    %146 = vector.extract_strided_slice %138 {offsets = [1, 0], sizes = [44, 128], strides = [1, 1]} : vector<48x128xf32> to vector<44x128xf32>
    %c1_84 = arith.constant 1 : index
    %c0_85 = arith.constant 0 : index
    %c0_86 = arith.constant 0 : index
    %147 = vector.load %arg9[%c1_84, %c0_85, %c0_86] : memref<5x128x128xf32, #tpu.memory_space<vmem>>, vector<1x128x128xf32>
    %148 = vector.shape_cast %147 : vector<1x128x128xf32> to vector<128x128xf32>
    %cst_87 = arith.constant dense<0.000000e+00> : vector<44x128xf32>
    %149 = tpu.matmul %146, %148, %cst_87 {dimension_numbers = #tpu.dot_dimension_numbers<[1], [0], [0], [1], [0, 0, 1, 1], [], []>} : vector<44x128xf32>, vector<128x128xf32>, vector<44x128xf32> -> vector<44x128xf32>
    %150 = arith.addf %145, %149 : vector<44x128xf32>
    %151 = vector.extract_strided_slice %138 {offsets = [2, 0], sizes = [44, 128], strides = [1, 1]} : vector<48x128xf32> to vector<44x128xf32>
    %c2_88 = arith.constant 2 : index
    %c0_89 = arith.constant 0 : index
    %c0_90 = arith.constant 0 : index
    %152 = vector.load %arg9[%c2_88, %c0_89, %c0_90] : memref<5x128x128xf32, #tpu.memory_space<vmem>>, vector<1x128x128xf32>
    %153 = vector.shape_cast %152 : vector<1x128x128xf32> to vector<128x128xf32>
    %cst_91 = arith.constant dense<0.000000e+00> : vector<44x128xf32>
    %154 = tpu.matmul %151, %153, %cst_91 {dimension_numbers = #tpu.dot_dimension_numbers<[1], [0], [0], [1], [0, 0, 1, 1], [], []>} : vector<44x128xf32>, vector<128x128xf32>, vector<44x128xf32> -> vector<44x128xf32>
    %155 = arith.addf %150, %154 : vector<44x128xf32>
    %156 = vector.extract_strided_slice %138 {offsets = [3, 0], sizes = [44, 128], strides = [1, 1]} : vector<48x128xf32> to vector<44x128xf32>
    %c3 = arith.constant 3 : index
    %c0_92 = arith.constant 0 : index
    %c0_93 = arith.constant 0 : index
    %157 = vector.load %arg9[%c3, %c0_92, %c0_93] : memref<5x128x128xf32, #tpu.memory_space<vmem>>, vector<1x128x128xf32>
    %158 = vector.shape_cast %157 : vector<1x128x128xf32> to vector<128x128xf32>
    %cst_94 = arith.constant dense<0.000000e+00> : vector<44x128xf32>
    %159 = tpu.matmul %156, %158, %cst_94 {dimension_numbers = #tpu.dot_dimension_numbers<[1], [0], [0], [1], [0, 0, 1, 1], [], []>} : vector<44x128xf32>, vector<128x128xf32>, vector<44x128xf32> -> vector<44x128xf32>
    %160 = arith.addf %155, %159 : vector<44x128xf32>
    %161 = vector.extract_strided_slice %138 {offsets = [4, 0], sizes = [44, 128], strides = [1, 1]} : vector<48x128xf32> to vector<44x128xf32>
    %c4 = arith.constant 4 : index
    %c0_95 = arith.constant 0 : index
    %c0_96 = arith.constant 0 : index
    %162 = vector.load %arg9[%c4, %c0_95, %c0_96] : memref<5x128x128xf32, #tpu.memory_space<vmem>>, vector<1x128x128xf32>
    %163 = vector.shape_cast %162 : vector<1x128x128xf32> to vector<128x128xf32>
    %cst_97 = arith.constant dense<0.000000e+00> : vector<44x128xf32>
    %164 = tpu.matmul %161, %163, %cst_97 {dimension_numbers = #tpu.dot_dimension_numbers<[1], [0], [0], [1], [0, 0, 1, 1], [], []>} : vector<44x128xf32>, vector<128x128xf32>, vector<44x128xf32> -> vector<44x128xf32>
    %165 = arith.addf %160, %164 : vector<44x128xf32>
    %166 = vector.broadcast %139 : vector<1x128xf32> to vector<44x128xf32>
    %167 = arith.addf %165, %166 : vector<44x128xf32>
    %168 = vector.extract_strided_slice %16 {offsets = [2, 0], sizes = [44, 1], strides = [1, 1]} : vector<48x1xi1> to vector<44x1xi1>
    %cst_98 = arith.constant 0.000000e+00 : f32
    %169 = vector.shape_cast %168 : vector<44x1xi1> to vector<44x1xi1>
    %170 = vector.broadcast %169 : vector<44x1xi1> to vector<44x128xi1>
    %171 = vector.broadcast %cst_98 : f32 to vector<44x128xf32>
    %172 = arith.select %170, %167, %171 : vector<44x128xi1>, vector<44x128xf32>
    %cst_99 = arith.constant 1.000000e-01 : f32
    %173 = vector.broadcast %cst_99 : f32 to vector<44x128xf32>
    %174 = arith.mulf %173, %172 : vector<44x128xf32>
    %175 = arith.maximumf %172, %174 : vector<44x128xf32>
    %c0_100 = arith.constant 0 : index
    %c0_101 = arith.constant 0 : index
    %176 = vector.load %arg18[%c0_100, %c0_101] : memref<1x128xf32, #tpu.memory_space<vmem>>, vector<1x128xf32>
    %cst_102 = arith.constant 0.000000e+00 : f32
    %177 = vector.broadcast %cst_102 : f32 to vector<40x128xf32>
    %178 = vector.extract_strided_slice %175 {offsets = [0, 0], sizes = [40, 128], strides = [1, 1]} : vector<44x128xf32> to vector<40x128xf32>
    %c0_103 = arith.constant 0 : index
    %c0_104 = arith.constant 0 : index
    %c0_105 = arith.constant 0 : index
    %179 = vector.load %arg10[%c0_103, %c0_104, %c0_105] : memref<5x128x128xf32, #tpu.memory_space<vmem>>, vector<1x128x128xf32>
    %180 = vector.shape_cast %179 : vector<1x128x128xf32> to vector<128x128xf32>
    %cst_106 = arith.constant dense<0.000000e+00> : vector<40x128xf32>
    %181 = tpu.matmul %178, %180, %cst_106 {dimension_numbers = #tpu.dot_dimension_numbers<[1], [0], [0], [1], [0, 0, 1, 1], [], []>} : vector<40x128xf32>, vector<128x128xf32>, vector<40x128xf32> -> vector<40x128xf32>
    %182 = arith.addf %177, %181 : vector<40x128xf32>
    %183 = vector.extract_strided_slice %175 {offsets = [1, 0], sizes = [40, 128], strides = [1, 1]} : vector<44x128xf32> to vector<40x128xf32>
    %c1_107 = arith.constant 1 : index
    %c0_108 = arith.constant 0 : index
    %c0_109 = arith.constant 0 : index
    %184 = vector.load %arg10[%c1_107, %c0_108, %c0_109] : memref<5x128x128xf32, #tpu.memory_space<vmem>>, vector<1x128x128xf32>
    %185 = vector.shape_cast %184 : vector<1x128x128xf32> to vector<128x128xf32>
    %cst_110 = arith.constant dense<0.000000e+00> : vector<40x128xf32>
    %186 = tpu.matmul %183, %185, %cst_110 {dimension_numbers = #tpu.dot_dimension_numbers<[1], [0], [0], [1], [0, 0, 1, 1], [], []>} : vector<40x128xf32>, vector<128x128xf32>, vector<40x128xf32> -> vector<40x128xf32>
    %187 = arith.addf %182, %186 : vector<40x128xf32>
    %188 = vector.extract_strided_slice %175 {offsets = [2, 0], sizes = [40, 128], strides = [1, 1]} : vector<44x128xf32> to vector<40x128xf32>
    %c2_111 = arith.constant 2 : index
    %c0_112 = arith.constant 0 : index
    %c0_113 = arith.constant 0 : index
    %189 = vector.load %arg10[%c2_111, %c0_112, %c0_113] : memref<5x128x128xf32, #tpu.memory_space<vmem>>, vector<1x128x128xf32>
    %190 = vector.shape_cast %189 : vector<1x128x128xf32> to vector<128x128xf32>
    %cst_114 = arith.constant dense<0.000000e+00> : vector<40x128xf32>
    %191 = tpu.matmul %188, %190, %cst_114 {dimension_numbers = #tpu.dot_dimension_numbers<[1], [0], [0], [1], [0, 0, 1, 1], [], []>} : vector<40x128xf32>, vector<128x128xf32>, vector<40x128xf32> -> vector<40x128xf32>
    %192 = arith.addf %187, %191 : vector<40x128xf32>
    %193 = vector.extract_strided_slice %175 {offsets = [3, 0], sizes = [40, 128], strides = [1, 1]} : vector<44x128xf32> to vector<40x128xf32>
    %c3_115 = arith.constant 3 : index
    %c0_116 = arith.constant 0 : index
    %c0_117 = arith.constant 0 : index
    %194 = vector.load %arg10[%c3_115, %c0_116, %c0_117] : memref<5x128x128xf32, #tpu.memory_space<vmem>>, vector<1x128x128xf32>
    %195 = vector.shape_cast %194 : vector<1x128x128xf32> to vector<128x128xf32>
    %cst_118 = arith.constant dense<0.000000e+00> : vector<40x128xf32>
    %196 = tpu.matmul %193, %195, %cst_118 {dimension_numbers = #tpu.dot_dimension_numbers<[1], [0], [0], [1], [0, 0, 1, 1], [], []>} : vector<40x128xf32>, vector<128x128xf32>, vector<40x128xf32> -> vector<40x128xf32>
    %197 = arith.addf %192, %196 : vector<40x128xf32>
    %198 = vector.extract_strided_slice %175 {offsets = [4, 0], sizes = [40, 128], strides = [1, 1]} : vector<44x128xf32> to vector<40x128xf32>
    %c4_119 = arith.constant 4 : index
    %c0_120 = arith.constant 0 : index
    %c0_121 = arith.constant 0 : index
    %199 = vector.load %arg10[%c4_119, %c0_120, %c0_121] : memref<5x128x128xf32, #tpu.memory_space<vmem>>, vector<1x128x128xf32>
    %200 = vector.shape_cast %199 : vector<1x128x128xf32> to vector<128x128xf32>
    %cst_122 = arith.constant dense<0.000000e+00> : vector<40x128xf32>
    %201 = tpu.matmul %198, %200, %cst_122 {dimension_numbers = #tpu.dot_dimension_numbers<[1], [0], [0], [1], [0, 0, 1, 1], [], []>} : vector<40x128xf32>, vector<128x128xf32>, vector<40x128xf32> -> vector<40x128xf32>
    %202 = arith.addf %197, %201 : vector<40x128xf32>
    %203 = vector.broadcast %176 : vector<1x128xf32> to vector<40x128xf32>
    %204 = arith.addf %202, %203 : vector<40x128xf32>
    %205 = vector.extract_strided_slice %16 {offsets = [4, 0], sizes = [40, 1], strides = [1, 1]} : vector<48x1xi1> to vector<40x1xi1>
    %cst_123 = arith.constant 0.000000e+00 : f32
    %206 = vector.shape_cast %205 : vector<40x1xi1> to vector<40x1xi1>
    %207 = vector.broadcast %206 : vector<40x1xi1> to vector<40x128xi1>
    %208 = vector.broadcast %cst_123 : f32 to vector<40x128xf32>
    %209 = arith.select %207, %204, %208 : vector<40x128xi1>, vector<40x128xf32>
    %210 = vector.extract_strided_slice %20 {offsets = [4, 0], sizes = [40, 128], strides = [1, 1]} : vector<48x128xf32> to vector<40x128xf32>
    %211 = arith.addf %209, %210 : vector<40x128xf32>
    %cst_124 = arith.constant 1.000000e-01 : f32
    %212 = vector.broadcast %cst_124 : f32 to vector<40x128xf32>
    %213 = arith.mulf %212, %211 : vector<40x128xf32>
    %214 = arith.maximumf %211, %213 : vector<40x128xf32>
    %c0_125 = arith.constant 0 : index
    %c0_126 = arith.constant 0 : index
    %215 = vector.load %arg19[%c0_125, %c0_126] : memref<1x128xf32, #tpu.memory_space<vmem>>, vector<1x128xf32>
    %cst_127 = arith.constant 0.000000e+00 : f32
    %216 = vector.broadcast %cst_127 : f32 to vector<32x128xf32>
    %217 = vector.extract_strided_slice %214 {offsets = [0, 0], sizes = [32, 128], strides = [1, 1]} : vector<40x128xf32> to vector<32x128xf32>
    %c0_128 = arith.constant 0 : index
    %c0_129 = arith.constant 0 : index
    %c0_130 = arith.constant 0 : index
    %218 = vector.load %arg11[%c0_128, %c0_129, %c0_130] : memref<5x128x128xf32, #tpu.memory_space<vmem>>, vector<1x128x128xf32>
    %219 = vector.shape_cast %218 : vector<1x128x128xf32> to vector<128x128xf32>
    %cst_131 = arith.constant dense<0.000000e+00> : vector<32x128xf32>
    %220 = tpu.matmul %217, %219, %cst_131 {dimension_numbers = #tpu.dot_dimension_numbers<[1], [0], [0], [1], [0, 0, 1, 1], [], []>} : vector<32x128xf32>, vector<128x128xf32>, vector<32x128xf32> -> vector<32x128xf32>
    %221 = arith.addf %216, %220 : vector<32x128xf32>
    %222 = vector.extract_strided_slice %214 {offsets = [2, 0], sizes = [32, 128], strides = [1, 1]} : vector<40x128xf32> to vector<32x128xf32>
    %c1_132 = arith.constant 1 : index
    %c0_133 = arith.constant 0 : index
    %c0_134 = arith.constant 0 : index
    %223 = vector.load %arg11[%c1_132, %c0_133, %c0_134] : memref<5x128x128xf32, #tpu.memory_space<vmem>>, vector<1x128x128xf32>
    %224 = vector.shape_cast %223 : vector<1x128x128xf32> to vector<128x128xf32>
    %cst_135 = arith.constant dense<0.000000e+00> : vector<32x128xf32>
    %225 = tpu.matmul %222, %224, %cst_135 {dimension_numbers = #tpu.dot_dimension_numbers<[1], [0], [0], [1], [0, 0, 1, 1], [], []>} : vector<32x128xf32>, vector<128x128xf32>, vector<32x128xf32> -> vector<32x128xf32>
    %226 = arith.addf %221, %225 : vector<32x128xf32>
    %227 = vector.extract_strided_slice %214 {offsets = [4, 0], sizes = [32, 128], strides = [1, 1]} : vector<40x128xf32> to vector<32x128xf32>
    %c2_136 = arith.constant 2 : index
    %c0_137 = arith.constant 0 : index
    %c0_138 = arith.constant 0 : index
    %228 = vector.load %arg11[%c2_136, %c0_137, %c0_138] : memref<5x128x128xf32, #tpu.memory_space<vmem>>, vector<1x128x128xf32>
    %229 = vector.shape_cast %228 : vector<1x128x128xf32> to vector<128x128xf32>
    %cst_139 = arith.constant dense<0.000000e+00> : vector<32x128xf32>
    %230 = tpu.matmul %227, %229, %cst_139 {dimension_numbers = #tpu.dot_dimension_numbers<[1], [0], [0], [1], [0, 0, 1, 1], [], []>} : vector<32x128xf32>, vector<128x128xf32>, vector<32x128xf32> -> vector<32x128xf32>
    %231 = arith.addf %226, %230 : vector<32x128xf32>
    %232 = vector.extract_strided_slice %214 {offsets = [6, 0], sizes = [32, 128], strides = [1, 1]} : vector<40x128xf32> to vector<32x128xf32>
    %c3_140 = arith.constant 3 : index
    %c0_141 = arith.constant 0 : index
    %c0_142 = arith.constant 0 : index
    %233 = vector.load %arg11[%c3_140, %c0_141, %c0_142] : memref<5x128x128xf32, #tpu.memory_space<vmem>>, vector<1x128x128xf32>
    %234 = vector.shape_cast %233 : vector<1x128x128xf32> to vector<128x128xf32>
    %cst_143 = arith.constant dense<0.000000e+00> : vector<32x128xf32>
    %235 = tpu.matmul %232, %234, %cst_143 {dimension_numbers = #tpu.dot_dimension_numbers<[1], [0], [0], [1], [0, 0, 1, 1], [], []>} : vector<32x128xf32>, vector<128x128xf32>, vector<32x128xf32> -> vector<32x128xf32>
    %236 = arith.addf %231, %235 : vector<32x128xf32>
    %237 = vector.extract_strided_slice %214 {offsets = [8, 0], sizes = [32, 128], strides = [1, 1]} : vector<40x128xf32> to vector<32x128xf32>
    %c4_144 = arith.constant 4 : index
    %c0_145 = arith.constant 0 : index
    %c0_146 = arith.constant 0 : index
    %238 = vector.load %arg11[%c4_144, %c0_145, %c0_146] : memref<5x128x128xf32, #tpu.memory_space<vmem>>, vector<1x128x128xf32>
    %239 = vector.shape_cast %238 : vector<1x128x128xf32> to vector<128x128xf32>
    %cst_147 = arith.constant dense<0.000000e+00> : vector<32x128xf32>
    %240 = tpu.matmul %237, %239, %cst_147 {dimension_numbers = #tpu.dot_dimension_numbers<[1], [0], [0], [1], [0, 0, 1, 1], [], []>} : vector<32x128xf32>, vector<128x128xf32>, vector<32x128xf32> -> vector<32x128xf32>
    %241 = arith.addf %236, %240 : vector<32x128xf32>
    %242 = vector.broadcast %215 : vector<1x128xf32> to vector<32x128xf32>
    %243 = arith.addf %241, %242 : vector<32x128xf32>
    %244 = vector.extract_strided_slice %16 {offsets = [8, 0], sizes = [32, 1], strides = [1, 1]} : vector<48x1xi1> to vector<32x1xi1>
    %cst_148 = arith.constant 0.000000e+00 : f32
    %245 = vector.shape_cast %244 : vector<32x1xi1> to vector<32x1xi1>
    %246 = vector.broadcast %245 : vector<32x1xi1> to vector<32x128xi1>
    %247 = vector.broadcast %cst_148 : f32 to vector<32x128xf32>
    %248 = arith.select %246, %243, %247 : vector<32x128xi1>, vector<32x128xf32>
    %cst_149 = arith.constant 1.000000e-01 : f32
    %249 = vector.broadcast %cst_149 : f32 to vector<32x128xf32>
    %250 = arith.mulf %249, %248 : vector<32x128xf32>
    %251 = arith.maximumf %248, %250 : vector<32x128xf32>
    %c0_150 = arith.constant 0 : index
    %c0_151 = arith.constant 0 : index
    %252 = vector.load %arg20[%c0_150, %c0_151] : memref<1x128xf32, #tpu.memory_space<vmem>>, vector<1x128xf32>
    %cst_152 = arith.constant 0.000000e+00 : f32
    %253 = vector.broadcast %cst_152 : f32 to vector<28x128xf32>
    %254 = vector.extract_strided_slice %251 {offsets = [0, 0], sizes = [28, 128], strides = [1, 1]} : vector<32x128xf32> to vector<28x128xf32>
    %c0_153 = arith.constant 0 : index
    %c0_154 = arith.constant 0 : index
    %c0_155 = arith.constant 0 : index
    %255 = vector.load %arg12[%c0_153, %c0_154, %c0_155] : memref<5x128x128xf32, #tpu.memory_space<vmem>>, vector<1x128x128xf32>
    %256 = vector.shape_cast %255 : vector<1x128x128xf32> to vector<128x128xf32>
    %cst_156 = arith.constant dense<0.000000e+00> : vector<28x128xf32>
    %257 = tpu.matmul %254, %256, %cst_156 {dimension_numbers = #tpu.dot_dimension_numbers<[1], [0], [0], [1], [0, 0, 1, 1], [], []>} : vector<28x128xf32>, vector<128x128xf32>, vector<28x128xf32> -> vector<28x128xf32>
    %258 = arith.addf %253, %257 : vector<28x128xf32>
    %259 = vector.extract_strided_slice %251 {offsets = [1, 0], sizes = [28, 128], strides = [1, 1]} : vector<32x128xf32> to vector<28x128xf32>
    %c1_157 = arith.constant 1 : index
    %c0_158 = arith.constant 0 : index
    %c0_159 = arith.constant 0 : index
    %260 = vector.load %arg12[%c1_157, %c0_158, %c0_159] : memref<5x128x128xf32, #tpu.memory_space<vmem>>, vector<1x128x128xf32>
    %261 = vector.shape_cast %260 : vector<1x128x128xf32> to vector<128x128xf32>
    %cst_160 = arith.constant dense<0.000000e+00> : vector<28x128xf32>
    %262 = tpu.matmul %259, %261, %cst_160 {dimension_numbers = #tpu.dot_dimension_numbers<[1], [0], [0], [1], [0, 0, 1, 1], [], []>} : vector<28x128xf32>, vector<128x128xf32>, vector<28x128xf32> -> vector<28x128xf32>
    %263 = arith.addf %258, %262 : vector<28x128xf32>
    %264 = vector.extract_strided_slice %251 {offsets = [2, 0], sizes = [28, 128], strides = [1, 1]} : vector<32x128xf32> to vector<28x128xf32>
    %c2_161 = arith.constant 2 : index
    %c0_162 = arith.constant 0 : index
    %c0_163 = arith.constant 0 : index
    %265 = vector.load %arg12[%c2_161, %c0_162, %c0_163] : memref<5x128x128xf32, #tpu.memory_space<vmem>>, vector<1x128x128xf32>
    %266 = vector.shape_cast %265 : vector<1x128x128xf32> to vector<128x128xf32>
    %cst_164 = arith.constant dense<0.000000e+00> : vector<28x128xf32>
    %267 = tpu.matmul %264, %266, %cst_164 {dimension_numbers = #tpu.dot_dimension_numbers<[1], [0], [0], [1], [0, 0, 1, 1], [], []>} : vector<28x128xf32>, vector<128x128xf32>, vector<28x128xf32> -> vector<28x128xf32>
    %268 = arith.addf %263, %267 : vector<28x128xf32>
    %269 = vector.extract_strided_slice %251 {offsets = [3, 0], sizes = [28, 128], strides = [1, 1]} : vector<32x128xf32> to vector<28x128xf32>
    %c3_165 = arith.constant 3 : index
    %c0_166 = arith.constant 0 : index
    %c0_167 = arith.constant 0 : index
    %270 = vector.load %arg12[%c3_165, %c0_166, %c0_167] : memref<5x128x128xf32, #tpu.memory_space<vmem>>, vector<1x128x128xf32>
    %271 = vector.shape_cast %270 : vector<1x128x128xf32> to vector<128x128xf32>
    %cst_168 = arith.constant dense<0.000000e+00> : vector<28x128xf32>
    %272 = tpu.matmul %269, %271, %cst_168 {dimension_numbers = #tpu.dot_dimension_numbers<[1], [0], [0], [1], [0, 0, 1, 1], [], []>} : vector<28x128xf32>, vector<128x128xf32>, vector<28x128xf32> -> vector<28x128xf32>
    %273 = arith.addf %268, %272 : vector<28x128xf32>
    %274 = vector.extract_strided_slice %251 {offsets = [4, 0], sizes = [28, 128], strides = [1, 1]} : vector<32x128xf32> to vector<28x128xf32>
    %c4_169 = arith.constant 4 : index
    %c0_170 = arith.constant 0 : index
    %c0_171 = arith.constant 0 : index
    %275 = vector.load %arg12[%c4_169, %c0_170, %c0_171] : memref<5x128x128xf32, #tpu.memory_space<vmem>>, vector<1x128x128xf32>
    %276 = vector.shape_cast %275 : vector<1x128x128xf32> to vector<128x128xf32>
    %cst_172 = arith.constant dense<0.000000e+00> : vector<28x128xf32>
    %277 = tpu.matmul %274, %276, %cst_172 {dimension_numbers = #tpu.dot_dimension_numbers<[1], [0], [0], [1], [0, 0, 1, 1], [], []>} : vector<28x128xf32>, vector<128x128xf32>, vector<28x128xf32> -> vector<28x128xf32>
    %278 = arith.addf %273, %277 : vector<28x128xf32>
    %279 = vector.broadcast %252 : vector<1x128xf32> to vector<28x128xf32>
    %280 = arith.addf %278, %279 : vector<28x128xf32>
    %281 = vector.extract_strided_slice %16 {offsets = [10, 0], sizes = [28, 1], strides = [1, 1]} : vector<48x1xi1> to vector<28x1xi1>
    %cst_173 = arith.constant 0.000000e+00 : f32
    %282 = vector.shape_cast %281 : vector<28x1xi1> to vector<28x1xi1>
    %283 = vector.broadcast %282 : vector<28x1xi1> to vector<28x128xi1>
    %284 = vector.broadcast %cst_173 : f32 to vector<28x128xf32>
    %285 = arith.select %283, %280, %284 : vector<28x128xi1>, vector<28x128xf32>
    %286 = vector.extract_strided_slice %211 {offsets = [6, 0], sizes = [28, 128], strides = [1, 1]} : vector<40x128xf32> to vector<28x128xf32>
    %287 = arith.addf %285, %286 : vector<28x128xf32>
    %288 = vector.extract_strided_slice %287 {offsets = [6, 0], sizes = [16, 128], strides = [1, 1]} : vector<28x128xf32> to vector<16x128xf32>
    %289 = arith.addf %135, %288 : vector<16x128xf32>
    %cst_174 = arith.constant 5.000000e-01 : f32
    %290 = vector.broadcast %cst_174 : f32 to vector<16x128xf32>
    %291 = arith.mulf %289, %290 : vector<16x128xf32>
    %c0_175 = arith.constant 0 : index
    %c0_176 = arith.constant 0 : index
    %c0_177 = arith.constant 0 : index
    %292 = vector.load %arg21[%c0_175, %c0_176, %c0_177] : memref<1x16x128xf32, #tpu.memory_space<vmem>>, vector<1x16x128xf32>
    %293 = vector.shape_cast %292 : vector<1x16x128xf32> to vector<16x128xf32>
    %294 = vector.shape_cast %291 : vector<16x128xf32> to vector<1x16x128xf32>
    tpu.vector_store %arg21[%c0_175, %c0_176, %c0_177], %294 {strides = array<i32>} : memref<1x16x128xf32, #tpu.memory_space<vmem>>, vector<1x16x128xf32>,
    return
  }
  func.func @transform_0(%arg0: i32, %arg1: i32) -> (i32, i32, i32) {
    %c0_i32 = arith.constant 0 : i32
    %c0_i32_0 = arith.constant 0 : i32
    return %arg0, %arg1, %c0_i32 : i32, i32, i32
  }
  func.func @transform_1(%arg0: i32, %arg1: i32) -> (i32, i32, i32) {
    %c1_i32 = arith.constant 1 : i32
    %0 = arith.muli %arg1, %c1_i32 : i32
    %c1_i32_0 = arith.constant 1 : i32
    %1 = arith.subi %0, %c1_i32_0 : i32
    %c0_i32 = arith.constant 0 : i32
    %2 = arith.maxsi %1, %c0_i32 : i32
    %c0_i32_1 = arith.constant 0 : i32
    %c0_i32_2 = arith.constant 0 : i32
    return %arg0, %2, %c0_i32_1 : i32, i32, i32
  }
  func.func @transform_2(%arg0: i32, %arg1: i32) -> (i32, i32, i32) {
    %c1_i32 = arith.constant 1 : i32
    %0 = arith.addi %arg1, %c1_i32 : i32
    %c1_i32_0 = arith.constant 1 : i32
    %1 = arith.muli %0, %c1_i32_0 : i32
    %c2_i32 = arith.constant 2 : i32
    %2 = arith.minsi %1, %c2_i32 : i32
    %c0_i32 = arith.constant 0 : i32
    %c0_i32_1 = arith.constant 0 : i32
    return %arg0, %2, %c0_i32 : i32, i32, i32
  }
  func.func @transform_3(%arg0: i32, %arg1: i32) -> (i32, i32, i32) {
    %c0_i32 = arith.constant 0 : i32
    %c0_i32_0 = arith.constant 0 : i32
    %c0_i32_1 = arith.constant 0 : i32
    %c0_i32_2 = arith.constant 0 : i32
    return %c0_i32, %c0_i32_0, %c0_i32_1 : i32, i32, i32
  }
  func.func @transform_4(%arg0: i32, %arg1: i32) -> (i32, i32, i32) {
    %c0_i32 = arith.constant 0 : i32
    %c0_i32_0 = arith.constant 0 : i32
    %c0_i32_1 = arith.constant 0 : i32
    %c0_i32_2 = arith.constant 0 : i32
    return %c0_i32, %c0_i32_0, %c0_i32_1 : i32, i32, i32
  }
  func.func @transform_5(%arg0: i32, %arg1: i32) -> (i32, i32, i32) {
    %c0_i32 = arith.constant 0 : i32
    %c0_i32_0 = arith.constant 0 : i32
    %c0_i32_1 = arith.constant 0 : i32
    %c0_i32_2 = arith.constant 0 : i32
    return %c0_i32, %c0_i32_0, %c0_i32_1 : i32, i32, i32
  }
  func.func @transform_6(%arg0: i32, %arg1: i32) -> (i32, i32, i32) {
    %c0_i32 = arith.constant 0 : i32
    %c0_i32_0 = arith.constant 0 : i32
    %c0_i32_1 = arith.constant 0 : i32
    %c0_i32_2 = arith.constant 0 : i32
    return %c0_i32, %c0_i32_0, %c0_i32_1 : i32, i32, i32
  }
  func.func @transform_7(%arg0: i32, %arg1: i32) -> (i32, i32, i32) {
    %c0_i32 = arith.constant 0 : i32
    %c0_i32_0 = arith.constant 0 : i32
    %c0_i32_1 = arith.constant 0 : i32
    %c0_i32_2 = arith.constant 0 : i32
    return %c0_i32, %c0_i32_0, %c0_i32_1 : i32, i32, i32
  }
  func.func @transform_8(%arg0: i32, %arg1: i32) -> (i32, i32, i32) {
    %c0_i32 = arith.constant 0 : i32
    %c0_i32_0 = arith.constant 0 : i32
    %c0_i32_1 = arith.constant 0 : i32
    %c0_i32_2 = arith.constant 0 : i32
    return %c0_i32, %c0_i32_0, %c0_i32_1 : i32, i32, i32
  }
  func.func @transform_9(%arg0: i32, %arg1: i32) -> (i32, i32, i32) {
    %c0_i32 = arith.constant 0 : i32
    %c0_i32_0 = arith.constant 0 : i32
    %c0_i32_1 = arith.constant 0 : i32
    %c0_i32_2 = arith.constant 0 : i32
    return %c0_i32, %c0_i32_0, %c0_i32_1 : i32, i32, i32
  }
  func.func @transform_10(%arg0: i32, %arg1: i32) -> (i32, i32, i32) {
    %c0_i32 = arith.constant 0 : i32
    %c0_i32_0 = arith.constant 0 : i32
    %c0_i32_1 = arith.constant 0 : i32
    %c0_i32_2 = arith.constant 0 : i32
    return %c0_i32, %c0_i32_0, %c0_i32_1 : i32, i32, i32
  }
  func.func @transform_11(%arg0: i32, %arg1: i32) -> (i32, i32) {
    %c0_i32 = arith.constant 0 : i32
    %c0_i32_0 = arith.constant 0 : i32
    %c0_i32_1 = arith.constant 0 : i32
    return %c0_i32, %c0_i32_0 : i32, i32
  }
  func.func @transform_12(%arg0: i32, %arg1: i32) -> (i32, i32) {
    %c0_i32 = arith.constant 0 : i32
    %c0_i32_0 = arith.constant 0 : i32
    %c0_i32_1 = arith.constant 0 : i32
    return %c0_i32, %c0_i32_0 : i32, i32
  }
  func.func @transform_13(%arg0: i32, %arg1: i32) -> (i32, i32) {
    %c0_i32 = arith.constant 0 : i32
    %c0_i32_0 = arith.constant 0 : i32
    %c0_i32_1 = arith.constant 0 : i32
    return %c0_i32, %c0_i32_0 : i32, i32
  }
  func.func @transform_14(%arg0: i32, %arg1: i32) -> (i32, i32) {
    %c0_i32 = arith.constant 0 : i32
    %c0_i32_0 = arith.constant 0 : i32
    %c0_i32_1 = arith.constant 0 : i32
    return %c0_i32, %c0_i32_0 : i32, i32
  }
  func.func @transform_15(%arg0: i32, %arg1: i32) -> (i32, i32) {
    %c0_i32 = arith.constant 0 : i32
    %c0_i32_0 = arith.constant 0 : i32
    %c0_i32_1 = arith.constant 0 : i32
    return %c0_i32, %c0_i32_0 : i32, i32
  }
  func.func @transform_16(%arg0: i32, %arg1: i32) -> (i32, i32) {
    %c0_i32 = arith.constant 0 : i32
    %c0_i32_0 = arith.constant 0 : i32
    %c0_i32_1 = arith.constant 0 : i32
    return %c0_i32, %c0_i32_0 : i32, i32
  }
  func.func @transform_17(%arg0: i32, %arg1: i32) -> (i32, i32) {
    %c0_i32 = arith.constant 0 : i32
    %c0_i32_0 = arith.constant 0 : i32
    %c0_i32_1 = arith.constant 0 : i32
    return %c0_i32, %c0_i32_0 : i32, i32
  }
  func.func @transform_18(%arg0: i32, %arg1: i32) -> (i32, i32) {
    %c0_i32 = arith.constant 0 : i32
    %c0_i32_0 = arith.constant 0 : i32
    %c0_i32_1 = arith.constant 0 : i32
    return %c0_i32, %c0_i32_0 : i32, i32
  }
  func.func @transform_19(%arg0: i32, %arg1: i32) -> (i32, i32, i32) {
    %c0_i32 = arith.constant 0 : i32
    %c0_i32_0 = arith.constant 0 : i32
    return %arg0, %arg1, %c0_i32 : i32, i32, i32
  }
}

</mosaic_0001>

<bundles_post_ra>
// kernel: tpu_custom_call.1
= control target key start
LH: loop header
LB: loop body
LE: loop exit
PB: predicated region body
PF: predicated region fallthrough
CT: control target
= control target key end

     0   :  { %s5555_s0 = inlined_call_operand.hbm [shape: f32[2,48,128], index: 0, kind: input, shape index: {}]   ;;  %s5556_s1 = inlined_call_operand.hbm [shape: f32[2,48,128], index: 1, kind: input, shape index: {}]   ;;  %s5557_s2 = inlined_call_operand.hbm [shape: f32[2,48,128], index: 2, kind: input, shape index: {}]   ;;  %s5558_s3 = inlined_call_operand.hbm [shape: f32[3,128,128], index: 3, kind: input, shape index: {}]   ;;  %s5559_s4 = inlined_call_operand.hbm [shape: f32[3,128,128], index: 4, kind: input, shape index: {}]   ;;  %s5560_s5 = inlined_call_operand.hbm [shape: f32[3,128,128], index: 5, kind: input, shape index: {}]   ;;  %s5561_s6 = inlined_call_operand.hbm [shape: f32[3,128,128], index: 6, kind: input, shape index: {}]   ;;  %s5562_s7 = inlined_call_operand.hbm [shape: f32[5,128,128], index: 7, kind: input, shape index: {}]   ;;  %s5563_s8 = inlined_call_operand.hbm [shape: f32[5,128,128], index: 8, kind: input, shape index: {}]   ;;  %s5564_s9 = inlined_call_operand.hbm [shape: f32[5,128,128], index: 9, kind: input, shape index: {}]   ;;  %s5565_s10 = inlined_call_operand.hbm [shape: f32[5,128,128], index: 10, kind: input, shape index: {}]   ;;  %s5566_s11 = inlined_call_operand.vmem [shape: f32[1,128], index: 11, kind: input, shape index: {}]   ;;  %s5567_s12 = inlined_call_operand.vmem [shape: f32[1,128], index: 12, kind: input, shape index: {}]   ;;  %s5568_s13 = inlined_call_operand.vmem [shape: f32[1,128], index: 13, kind: input, shape index: {}]   ;;  %s5569_s14 = inlined_call_operand.vmem [shape: f32[1,128], index: 14, kind: input, shape index: {}]   ;;  %s5570_s15 = inlined_call_operand.vmem [shape: f32[1,128], index: 15, kind: input, shape index: {}]   ;;  %s5571_s16 = inlined_call_operand.vmem [shape: f32[1,128], index: 16, kind: input, shape index: {}]   ;;  %s5572_s17 = inlined_call_operand.vmem [shape: f32[1,128], index: 17, kind: input, shape index: {}]   ;;  %s5573_s18 = inlined_call_operand.vmem [shape: f32[1,128], index: 18, kind: input, shape index: {}]   ;;  %s5574_s19 = inlined_call_operand.hbm [shape: f32[2,48,128], index: 19, kind: output, shape index: {}]  }
   0x1   :  { %5598 = sst [smem:[#allocation47_spill]] %s5555_s0 }
   0x2   :  { %5599 = sst [smem:[#allocation48_spill]] %s5556_s1 }
   0x3   :  { %5600 = sst [smem:[#allocation49_spill]] %s5557_s2 }
   0x4   :  { %5601 = sst [smem:[#allocation50_spill]] %s5558_s3 }
   0x5   :  { %5602 = sst [smem:[#allocation51_spill]] %s5559_s4 }
   0x6   :  { %5603 = sst [smem:[#allocation52_spill]] %s5560_s5 }
   0x7   :  { %5604 = sst [smem:[#allocation53_spill]] %s5561_s6 }
   0x8   :  { %5605 = sst [smem:[#allocation54_spill]] %s5562_s7 }
   0x9   :  { %5606 = sst [smem:[#allocation55_spill]] %s5563_s8 }
   0xa   :  { %5607 = sst [smem:[#allocation56_spill]] %s5564_s9 }
   0xb   :  { %5608 = sst [smem:[#allocation57_spill]] %s5565_s10 }
   0xc   :  { %5609 = sst [smem:[#allocation58_spill]] %s5566_s11 }
   0xd   :  { %5610 = sst [smem:[#allocation59_spill]] %s5567_s12 }
   0xe   :  { %5611 = sst [smem:[#allocation60_spill]] %s5568_s13 }
   0xf   :  { %5612 = sst [smem:[#allocation61_spill]] %s5569_s14 }
  0x10   :  { %5613 = sst [smem:[#allocation62_spill]] %s5570_s15 }
  0x11   :  { %5614 = sst [smem:[#allocation63_spill]] %s5571_s16 }
  0x12   :  { %5615 = sst [smem:[#allocation64_spill]] %s5572_s17 }
  0x13   :  { %5616 = sst [smem:[#allocation65_spill]] %s5573_s18 }
  0x14   :  { %5617 = sst [smem:[#allocation66_spill]] %s5574_s19 }
  0x15   :  { %24 = vsyncpa [#allocation3], 0 }
  0x16   :  { %26 = vsyncpa [#allocation3 + $0x1], 0 }
  0x17   :  { %27 = vsyncpa [#allocation6], 0 }
  0x18   :  { %29 = vsyncpa [#allocation6 + $0x1], 0 }
  0x19   :  { %30 = vsyncpa [#allocation9], 0 }
  0x1a   :  { %31 = vsyncpa [#allocation12], 0 }
  0x1b   :  { %32 = vsyncpa [#allocation15], 0 }
  0x1c   :  { %33 = vsyncpa [#allocation18], 0 }
  0x1d   :  { %34 = vsyncpa [#allocation4], 0 }
  0x1e   :  { %36 = vsyncpa [#allocation4 + $0x1], 0  ;;  %s4449_s0 = smov 0   ;;  %s4451_s30 = smov 0  }
  0x1f   :  { %s4453_s20 = smov 0   ;;  %s4455_s21 = smov 0  }
  0x20   :  { %s4457_s1 = smov 0   ;;  %s4459_s22 = smov 0  }
  0x21   :  { %s4461_s2 = smov 0   ;;  %s4463_s23 = smov 0  }
  0x22   :  { %s4465_s24 = smov 0   ;;  %s4467_s25 = smov 0  }
  0x23   :  { %s4469_s3 = smov 0   ;;  %s4471_s26 = smov 0  }
  0x24   :  { %s4473_s27 = smov 0   ;;  %s4475_s28 = smov 0  }
  0x25 LB: > { %5618 = sst [smem:[#allocation29_spill]] %s4283_s0  ;;  %s4520_s29 = sadd.s32 4294967295, %s4335_s28   ;;  %s4335_s28 = sphi %s4475_s28, %s42_s28   ;;  %s4331_s27 = sphi %s4473_s27, %s5708_s27   ;;  %s4327_s26 = sphi %s4471_s26, %s5707_s26   ;;  %s4323_s3 = sphi %s4469_s3, %s5706_s3   ;;  %s4319_s25 = sphi %s4467_s25, %s5705_s25   ;;  %s4315_s24 = sphi %s4465_s24, %s5704_s24   ;;  %s4311_s23 = sphi %s4463_s23, %s5713_s23   ;;  %s4307_s2 = sphi %s4461_s2, %s5712_s2   ;;  %s4303_s22 = sphi %s4459_s22, %s5711_s22   ;;  %s4299_s1 = sphi %s4457_s1, %s5710_s1   ;;  %s4295_s21 = sphi %s4455_s21, %s5701_s21   ;;  %s4291_s20 = sphi %s4453_s20, %s5709_s20   ;;  %s4287_s30 = sphi %s4451_s30, %s5700_s30   ;;  %s4283_s0 = sphi %s4449_s0, %s5699_s0  }
  0x26   : > { %5619 = sst [smem:[#allocation30_spill]] %s4287_s30  ;;  %p3562_p0 = scmp.ge.s32.totalorder %s4335_s28, 1 }
  0x27   : > { %5620 = sst [smem:[#allocation31_spill]] %s4291_s20  ;;  %p77_p1 = scmp.eq.s32.totalorder %s4520_s29, 0 }
  0x28   : > { %5621 = sst [smem:[#allocation32_spill]] %s4299_s1  ;;  %p519_p2 = scmp.lt.s32.totalorder %s4335_s28, 7 }
  0x29   : > { %5622 = sst [smem:[#allocation33_spill]] %s4307_s2  ;;  %s4337_s16 = smov [#allocation8]  }
  0x2a   : > { %5623 = sst [smem:[#allocation34_spill]] %s4315_s24  ;;  %p4528_p3 = pnand %p3562_p0, %p519_p2 }
  0x2b   : > { %5624 = sst [smem:[#allocation35_spill]] %s4319_s25  ;;  %s532_s15 = sshll.u32 %s4337_s16, 4  ;;  %s533_s15 = int_to_ptr.vmem [resolvable:$true] %s532_s15 }
  0x2c   : > { %5625 = sst [smem:[#allocation36_spill]] %s4323_s3  ;;  %p3646_p4 = pneg %p4528_p3 }
  0x2d   : > { %5626 = sst [smem:[#allocation37_spill]] %s4327_s26  ;;  %s5578_s18 = smov 128  }
  0x2e   : > { %5627 = sst [smem:[#allocation38_spill]] %s4331_s27  ;;  %p4536_p5 = pnand %p3646_p4, %p77_p1 }
  0x2f   : > { %5628 = sst [smem:[#allocation39_spill]] %s4520_s29  ;;  %s5580_s19 = smov 8  }
  0x30   : > { %s5629_s14 = sld [smem:[#allocation50_spill]]  ;;  %s4340_s16 = smov [#allocation11]  }
  0x31   : > { %s5630_s17 = scalar_select %p4528_p3, 1, 0 }
  0x32   : > { %s5633_s5 = sld [smem:[#allocation52_spill]]  ;;  %s560_s25 = sshll.u32 %s4340_s16, 4  ;;  %s561_s25 = int_to_ptr.vmem [resolvable:$true] %s560_s25 }
  0x33   : > { %5631 = sst [smem:[#allocation40_spill]] %s5630_s17  ;;  %s4341_s16 = smov [#allocation14]  }
  0x34   : > { %s5634_s7 = sld [smem:[#allocation54_spill]]  ;;  %s4342_s17 = smov [#allocation17]  }
  0x35   : > { %s5635_s9 = sld [smem:[#allocation56_spill]]  ;;  %s616_s0 = sshll.u32 %s4342_s17, 4  ;;  %s617_s0 = int_to_ptr.vmem [resolvable:$true] %s616_s0 }
  0x36   : > { %s530_s3 = sshll.u32 %s5629_s14, 4  ;;  %p71_p7 = scmp.eq.s32.totalorder %s4335_s28, 0  ;;  %s531_s3 = int_to_ptr.hbm [resolvable:$true] %s530_s3 }
  0x37   : > { %3649 = dma.hbm_to_vmem [thread:$0]  (!%p4536_p5), %s531_s3, 6144, %s533_s15, [#allocation9], %s5578_s18, %s5578_s18, %s5580_s19  }
  0x38   : > { %s558_s14 = sshll.u32 %s5633_s5, 4  ;;  %s588_s5 = sshll.u32 %s4341_s16, 4  ;;  %s559_s14 = int_to_ptr.hbm [resolvable:$true] %s558_s14  ;;  %s589_s5 = int_to_ptr.vmem [resolvable:$true] %s588_s5 }
  0x39   : > { %3655 = dma.hbm_to_vmem [thread:$0]  (!%p4536_p5), %s559_s14, 6144, %s561_s25, [#allocation12], %s5578_s18, %s5578_s18, %s5580_s19  }
  0x3a   : > { %s586_s11 = sshll.u32 %s5634_s7, 4  ;;  %s4570_s25 = sadd.s32 1, %s4327_s26  ;;  %s587_s11 = int_to_ptr.hbm [resolvable:$true] %s586_s11 }
  0x3b   : > { %s614_s3 = sshll.u32 %s5635_s9, 4  ;;  %5636 = sst [smem:[#allocation41_spill]] %s4570_s25  ;;  %s615_s3 = int_to_ptr.hbm [resolvable:$true] %s614_s3 }
  0x3c   : > { %3661 = dma.hbm_to_vmem [thread:$0]  (!%p4536_p5), %s587_s11, 10240, %s589_s5, [#allocation15], %s5578_s18, %s5578_s18, %s5580_s19  }
  0x3d   : > { %3667 = dma.hbm_to_vmem [thread:$0]  (!%p4536_p5), %s615_s3, 10240, %s617_s0, [#allocation18], %s5578_s18, %s5578_s18, %s5580_s19  }
  0x3e   : > { %s54_s14 = sadd.s32 1, %s4331_s27  ;;  %p52_p6 = scmp.ge.s32.totalorder %s4570_s25, 3 }
  0x3f   : > { %s3560_s5 = sadd.s32 4294967295, %s4327_s26  ;;  %s97_s11 = sadd.s32 1, %s4303_s22 }
  0x40   : > { %s4578_s12 = scalar_select %p52_p6, 0, %s4570_s25  }
  0x41   : > { %s5715_s14 = smov (!%p52_p6, %s54_s14), %s4331_s27  ;;  %p87_p8 = scmp.gt.s32.totalorder %s3560_s5, 0 }
  0x42   : > { %5637 = sst [smem:[#allocation42_spill]] %s4578_s12  ;;  %s59_s15 = ssub.s32 %s4327_s26, %s4578_s12 }
  0x43   : > { %p56_p9 = scmp.ge.s32.totalorder %s5715_s14, 2  ;;  %s3561_s3 = sadd.s32 4294967295, %s4578_s12 }
  0x44   : > { %s5717_s5 = smov (!%p87_p8, %s3560_s5), 0  ;;  %p90_p10 = scmp.gt.s32.totalorder %s3561_s3, 0 }
  0x45   : > { %s5719_s14 = smov (%p56_p9, %s5715_s14), 0  ;;  %p104_p11 = scmp.ne.s32.totalorder %s4303_s22, %s4299_s1 }
  0x46   : > { %5638 = sst [smem:[#allocation43_spill]] %s5719_s14  ;;  %s4590_s16 = ssub.s32 %s4331_s27, %s5719_s14 }
  0x47   : > { %p110_p12 = scmp.ne.s32.totalorder %s4299_s1, %s4295_s21  ;;  %s4595_s17 = sor.u32 %s59_s15, %s4590_s16 }
  0x48   : > { %p4599_p13 = por %p104_p11, %p71_p7  ;;  %p61_p0 = scmp.eq.s32.totalorder %s4595_s17, 0 }
  0x49   : > { %p4606_p2 = por %p110_p12, %p77_p1  ;;  %s5721_s3 = smov (!%p90_p10, %s3561_s3), 0 }
  0x4a   : > { %p5597_p4 = scmp.lt.s32.totalorder %s4335_s28, 6  ;;  %s4612_s19 = smul.u32 6, %s4331_s27 }
  0x4b   : > { %s5640_s18 = scalar_select %p4606_p2, 1, 0 }
  0x4c   : > { %s93_s21 = ssub.s32 %s5717_s5, %s5721_s3  ;;  %s692_s15 = sand.u32 1, %s4335_s28  }
  0x4d   : > { %5641 = sst [smem:[#allocation44_spill]] %s5640_s18  ;;  %s94_s7 = sor.u32 %s93_s21, %s4590_s16 }
  0x4e   : > { %p95_p6 = scmp.eq.s32.totalorder %s94_s7, 0  ;;  %s694_s9 = sand.u32 1, %s4303_s22  }
  0x4f   : > { %s3575_s14 = sshll.u32 %s694_s9, 4  ;;  %s3577_s1 = sshll.u32 %s5717_s5, 1 }
  0x50   : > { %s4618_s30 = scalar_select %p95_p6, %s4303_s22, %s97_s11  }
  0x51   : > { %s704_s20 = sadd.s32 %s4612_s19, %s3577_s1  ;;  %s696_s25 = scalar_lea.vmem [#allocation5], %s3575_s14 }
  0x52   : > { %5642 = sst [smem:[#allocation45_spill]] %s4618_s30  ;;  %s3578_s12 = sshll.u32 %s704_s20, 3 }
  0x53   : > { %s709_s18 = sshll.u32 %s696_s25, 4  ;;  %s5643_s29 = sld [smem:[#allocation48_spill]]  ;;  %s710_s18 = int_to_ptr.vmem [resolvable:$true] %s709_s18 }
  0x54   : > { %p3675_p8 = pnand %p5597_p4, %p4599_p13  ;;  %s5644_s4 = sld [smem:[#allocation51_spill]] }
  0x55   : > { %s4631_s20 = scalar_lea.sflag [#allocation6], %s692_s15  ;;  %s5645_s1 = smov 8  }
  0x56   : > { %s5646_s25 = smov 128   ;;  %s5647_s6 = sld [smem:[#allocation53_spill]] }
  0x57   : > { %s4344_s11 = smov [#allocation13]   ;;  %s5648_s8 = sld [smem:[#allocation55_spill]] }
  0x58   : > { %s5649_s0 = sld [smem:[#allocation33_spill]]  ;;  %s4345_s26 = smov [#allocation16]  }
  0x59   : > { %s706_s10 = scalar_lea.hbm %s5643_s29, %s3578_s12  ;;  %s4343_s29 = smov [#allocation10]  }
  0x5a   : > { %s707_s2 = sshll.u32 %s706_s10, 4  ;;  %s544_s5 = sshll.u32 %s5644_s4, 4  ;;  %s708_s2 = int_to_ptr.hbm [resolvable:$true] %s707_s2  ;;  %s545_s5 = int_to_ptr.hbm [resolvable:$true] %s544_s5 }
  0x5b   : > { %3677 = dma.hbm_to_vmem [thread:$0]  (!%p3675_p8), %s708_s2, 256, %s710_s18, %s4631_s20, %s5646_s25, %s5646_s25, %s5645_s1  }
  0x5c   : > { %s572_s10 = sshll.u32 %s5647_s6, 4  ;;  %s546_s14 = sshll.u32 %s4343_s29, 4  ;;  %s573_s10 = int_to_ptr.hbm [resolvable:$true] %s572_s10  ;;  %s547_s14 = int_to_ptr.vmem [resolvable:$true] %s546_s14 }
  0x5d   : > { %3652 = dma.hbm_to_vmem [thread:$0]  (!%p4536_p5), %s545_s5, 6144, %s547_s14, [#allocation9], %s5646_s25, %s5646_s25, %s5645_s1  }
  0x5e   : > { %s574_s12 = sshll.u32 %s4344_s11, 4  ;;  %s600_s18 = sshll.u32 %s5648_s8, 4  ;;  %s575_s12 = int_to_ptr.vmem [resolvable:$true] %s574_s12  ;;  %s601_s18 = int_to_ptr.hbm [resolvable:$true] %s600_s18 }
  0x5f   : > { %3658 = dma.hbm_to_vmem [thread:$0]  (!%p4536_p5), %s573_s10, 6144, %s575_s12, [#allocation12], %s5646_s25, %s5646_s25, %s5645_s1  }
  0x60   : > { %s5650_s7 = sld [smem:[#allocation57_spill]]  ;;  %s602_s27 = sshll.u32 %s4345_s26, 4  ;;  %s603_s27 = int_to_ptr.vmem [resolvable:$true] %s602_s27 }
  0x61   : > { %s5651_s9 = sld [smem:[#allocation39_spill]]  ;;  %s4346_s29 = smov [#allocation19]  }
  0x62   : > { %3664 = dma.hbm_to_vmem [thread:$0]  (!%p4536_p5), %s601_s18, 10240, %s603_s27, [#allocation15], %s5646_s25, %s5646_s25, %s5645_s1  }
  0x63   : > { %s5652_s14 = sld [smem:[#allocation37_spill]]  ;;  %s630_s10 = sshll.u32 %s4346_s29, 4  ;;  %s631_s10 = int_to_ptr.vmem [resolvable:$true] %s630_s10 }
  0x64   : > { %s3559_s11 = sadd.s32 4294967294, %s4335_s28   ;;  %s63_s12 = sadd.s32 1, %s4315_s24 }
  0x65   : > { %s4671_s3 = scalar_select %p61_p0, %s4315_s24, %s63_s12  }
  0x66   : > { %s628_s5 = sshll.u32 %s5650_s7, 4  ;;  %p70_p9 = scmp.ne.s32.totalorder %s4315_s24, %s4311_s23  ;;  %s629_s5 = int_to_ptr.hbm [resolvable:$true] %s628_s5 }
  0x67   : > { %3670 = dma.hbm_to_vmem [thread:$0]  (!%p4536_p5), %s629_s5, 10240, %s631_s10, [#allocation18], %s5646_s25, %s5646_s25, %s5645_s1  }
  0x68   : > { %5653 = sst [smem:[#allocation46_spill]] %s4671_s3  ;;  %p76_p10 = scmp.ne.s32.totalorder %s4311_s23, %s5649_s0 }
  0x69   : > { %p506_p11 = scmp.eq.s32.totalorder %s5651_s9, 5  ;;  %p512_p12 = scmp.eq.s32.totalorder %s3559_s11, 5 }
  0x6a   : > { %p4680_p13 = por %p71_p7, %p70_p9  ;;  %p4686_p6 = por %p77_p1, %p76_p10 }
  0x6b   : > { %p4690_p5 = por %p506_p11, %p70_p9  ;;  %s5657_s18 = sld [smem:[#allocation41_spill]] }
  0x6c   : > { %p4694_p0 = por %p512_p12, %p76_p10  ;;  %s5659_s21 = sld [smem:[#allocation42_spill]] }
  0x6d   : > { %s668_s15 = sand.u32 1, %s4315_s24   ;;  %s3573_s7 = sshll.u32 %s5652_s14, 1 }
  0x6e   : > { %s5660_s5 = sld [smem:[#allocation31_spill]]  ;;  %s3572_s26 = sshll.u32 %s668_s15, 4 }
  0x6f   : > { %s677_s27 = sadd.s32 %s4612_s19, %s3573_s7  ;;  %s5661_s10 = sld [smem:[#allocation30_spill]] }
  0x70   : > { %s3574_s29 = sshll.u32 %s677_s27, 3  ;;  %s672_s11 = scalar_lea.vmem [#allocation2], %s3572_s26 }
  0x71   : > { %s5662_s12 = sld [smem:[#allocation29_spill]]  ;;  %s682_s4 = sshll.u32 %s672_s11, 4  ;;  %s683_s4 = int_to_ptr.vmem [resolvable:$true] %s682_s4 }
  0x72   : > { %s5663_s3 = sld [smem:[#allocation47_spill]]  ;;  %p3672_p8 = pnand %p5597_p4, %p4680_p13 }
  0x73   : > { %s669_s14 = scalar_lea.sflag [#allocation3], %s668_s15  ;;  %p121_p9 = scmp.lt.s32.totalorder %s5657_s18, 2 }
  0x74   : > { %s123_s7 = sadd.s32 1, %s5659_s21  ;;  %s131_s6 = sadd.s32 1, %s5660_s5 }
  0x75   : > { %p124_p10 = scmp.lt.s32.totalorder %s123_s7, 2  ;;  %s5723_s18 = smov (!%p121_p9, %s5657_s18), 2 }
  0x76   : > { %p138_p11 = scmp.ne.s32.totalorder %s5660_s5, %s5661_s10  ;;  %s3580_s21 = sshll.u32 %s5723_s18, 1 }
  0x77   : > { %s5725_s7 = smov (!%p124_p10, %s123_s7), 2  ;;  %p144_p12 = scmp.ne.s32.totalorder %s5661_s10, %s5662_s12 }
  0x78   : > { %s679_s30 = scalar_lea.hbm %s5663_s3, %s3574_s29  ;;  %s127_s8 = ssub.s32 %s5723_s18, %s5725_s7 }
  0x79   : > { %s680_s24 = sshll.u32 %s679_s30, 4  ;;  %s721_s30 = sand.u32 1, %s5660_s5   ;;  %s681_s24 = int_to_ptr.hbm [resolvable:$true] %s680_s24 }
  0x7a   : > { %3674 = dma.hbm_to_vmem [thread:$0]  (!%p3672_p8), %s681_s24, 256, %s683_s4, %s669_s14, %s5646_s25, %s5646_s25, %s5645_s1  }
  0x7b   : > { %s128_s3 = sor.u32 %s127_s8, %s4590_s16  ;;  %p4723_p13 = por %p138_p11, %p71_p7 }
  0x7c   : > { %p129_p8 = scmp.eq.s32.totalorder %s128_s3, 0  ;;  %p4729_p4 = por %p144_p12, %p77_p1 }
  0x7d   : > { %s3579_s24 = sshll.u32 %s721_s30, 4  ;;  %s731_s15 = sadd.s32 %s4612_s19, %s3580_s21 }
  0x7e   : > { %s5727_s5 = smov (!%p129_p8, %s5660_s5), %s131_s6  ;;  %s3581_s26 = sshll.u32 %s731_s15, 3 }
  0x7f   : > { %s723_s16 = scalar_lea.vmem [#allocation7], %s3579_s24  ;;  %s5666_s11 = sld [smem:[#allocation49_spill]] }
  0x80   : > { %s736_s27 = sshll.u32 %s723_s16, 4  ;;  %p5667_p7 = scmp.lt.s32.totalorder %s4335_s28, 6  ;;  %s737_s27 = int_to_ptr.vmem [resolvable:$true] %s736_s27 }
  0x81   : > { %s4751_s19 = sand.u32 (!%p4528_p3), 1, %s4311_s23  }
  0x82   : > { %p3678_p9 = pnand %p5667_p7, %p4723_p13  ;;  %s3583_s18 = sshll.u32 (!%p4528_p3), %s4751_s19, 4 }
  0x83   : > { %748 = sbr.rel (%p4528_p3) target bundleno = 1485 (0x5cd), region = 96  ;;  %s751_s7 = scalar_lea.sflag (!%p4528_p3), [#allocation3], %s4751_s19 }
  0x84   : > { %s4757_s6 = scalar_lea.vmem (!%p4528_p3), [#allocation2], %s3583_s18 }
  0x85   : > { %s733_s12 = scalar_lea.hbm %s5666_s11, %s3581_s26 }
  0x86   : > { %s734_s14 = sshll.u32 %s733_s12, 4  ;;  %s735_s14 = int_to_ptr.hbm [resolvable:$true] %s734_s14 }
  0x87   : > { %3680 = dma.hbm_to_vmem [thread:$0]  (!%p3678_p9), %s735_s14, 256, %s737_s27, %s4631_s20, %s5646_s25, %s5646_s25, %s5645_s1  }
  0x88   : > { %4250 = dma.done.wait (%p4686_p6), %s751_s7, 256  }
  0x89   : > { %4252 = vsyncadd (%p4686_p6), %s751_s7, 4294967040  ;;  %s5669_s20 = sld [smem:[#allocation39_spill]] }
  0x8a   : > { %s5670_s1 = sld [smem:[#allocation32_spill]] }
  0x8f   : > { %s760_s8 = sand.u32 1, %s5669_s20  }
  0x90   : > { %s762_s30 = sand.u32 1, %s5670_s1   ;;  %s761_s2 = scalar_lea.sflag [#allocation6], %s760_s8 }
  0x91   : > { %s4765_s3 = sshll.u32 %s762_s30, 4 }
  0x92   : > { %s764_s24 = scalar_lea.vmem [#allocation5], %s4765_s3 }
  0x93   : > { %4254 = dma.done.wait (%p4606_p2), %s761_s2, 256  }
  0x94   : > { %4256 = vsyncadd (%p4606_p2), %s761_s2, 4294967040  ;;  %s5672_s21 = sld [smem:[#allocation30_spill]] }
  0x9a   : > { %s772_s15 = sand.u32 1, %s5672_s21  }
  0x9b   : > { %s4773_s13 = sshll.u32 %s772_s15, 4 }
  0x9c   : > { %s774_s26 = scalar_lea.vmem [#allocation7], %s4773_s13 }
  0x9d   : > { %4258 = dma.done.wait (%p4729_p4), %s761_s2, 256  }
  0x9e   : > { %4260 = vsyncadd (%p4729_p4), %s761_s2, 4294967040 }
  0x9f   : > { %4262 = dma.done.wait (%p77_p1), [#allocation9], 12288  }
  0xa0   : > { %4264 = vsyncadd (%p77_p1), [#allocation9], 4294955008 }
  0xa1   : > { %4266 = dma.done.wait (%p77_p1), [#allocation12], 12288  }
  0xa2   : > { %4268 = vsyncadd (%p77_p1), [#allocation12], 4294955008 }
  0xa3   : > { %4270 = dma.done.wait (%p77_p1), [#allocation15], 20480  }
  0xa4   : > { %4272 = vsyncadd (%p77_p1), [#allocation15], 4294946816 }
  0xa5   : > { %4274 = dma.done.wait (%p77_p1), [#allocation18], 20480  }
  0xa6   : > { %4276 = vsyncadd (%p77_p1), [#allocation18], 4294946816  ;;  %s5673_s4 = sld [smem:[#allocation35_spill]]  ;;  %v896_v0 = vlaneseq  ;;  %v1104_v1 = vld [vmem:[#allocation8 + $0x178] sm:$0xff]  ;;  %v1103_v2 = vld [vmem:[#allocation8 + $0x170] sm:$0xff]  ;;  %vm1105_vm11 = vcmask 1045504  }
  0xa7   : > { %v993_v3 = vld [vmem:[#allocation8 + $0xf8] sm:$0xff]  ;;  %1123 = vmatpush.msra.mxu2 %v1104_v1  ;;  %v992_v5 = vld [vmem:[#allocation8 + $0xf0] sm:$0xff]  ;;  %v1102_v7 = vld [vmem:[#allocation8 + $0x168] sm:$0xff]  ;;  %vm1000_vm12 = vcmask 1046528   ;;  %s5686_s11 = sld [smem:[#allocation58_spill]]  ;;  %s879_s25 = scalar_lea.vmem [#allocation20], %s3583_s18 }
  0xa8   : > { %1018 = vmatpush.msra.mxu0 %v993_v3  ;;  %v976_v4 = vld [vmem:[#allocation8 + $0x78] sm:$0xff]  ;;  %v4797_v6 = vshrl.u32 %v896_v0, 7  ;;  %v975_v8 = vld [vmem:[#allocation8 + $0x70] sm:$0xff]  ;;  %v991_v9 = vld [vmem:[#allocation8 + $0xe8] sm:$0xff]  ;;  %s5687_s9 = sld [smem:[#allocation59_spill]]  ;;  %s3340_s30 = sshll.u32 %s879_s25, 4  ;;  %s3341_s30 = int_to_ptr.vmem [resolvable:$true] %s3340_s30 }
  0xa9   : > { %1053 = vmatpush.msra.mxu1 %v976_v4  ;;  %1124 = vmatpush.msra.mxu2 %v1103_v2  ;;  %v974_v10 = vld [vmem:[#allocation8 + $0x68] sm:$0xff]  ;;  %v1101_v11 = vld [vmem:[#allocation8 + $0x160] sm:$0xff]  ;;  %v1100_v16 = vld [vmem:[#allocation8 + $0x158] sm:$0xff]  ;;  %s5688_s20 = sld [smem:[#allocation60_spill]] }
  0xaa   : > { %1019 = vmatpush.msra.mxu0 %v992_v5  ;;  %v990_v12 = vld [vmem:[#allocation8 + $0xe0] sm:$0xff]  ;;  %v898_v14 = vadd.s32 8, %v4797_v6  ;;  %v989_v17 = vld [vmem:[#allocation8 + $0xd8] sm:$0xff]  ;;  %v1099_v19 = vld [vmem:[#allocation8 + $0x150] sm:$0xff]  ;;  %v899_v22 = vadd.s32 16, %v4797_v6  ;;  %v900_v38 = vadd.s32 24, %v4797_v6 }
  0xab   : > { %1054 = vmatpush.msra.mxu1 %v975_v8  ;;  %1125 = vmatpush.msra.mxu2 %v1102_v7  ;;  %v973_v13 = vld [vmem:[#allocation8 + $0x60] sm:$0xff]  ;;  %v972_v18 = vld [vmem:[#allocation8 + $0x58] sm:$0xff]  ;;  %v988_v20 = vld [vmem:[#allocation8 + $0xd0] sm:$0xff]  ;;  %v901_v1 = vadd.s32 32, %v4797_v6  ;;  %s5689_s8 = sld [smem:[#allocation62_spill]] }
  0xac   : > { %s3595_s16 = sshll.u32 %s5673_s4, 4  ;;  %1020 = vmatpush.msra.mxu0 %v991_v9  ;;  %v971_v23 = vld [vmem:[#allocation8 + $0x50] sm:$0xff]  ;;  %v1098_v25 = vld [vmem:[#allocation8 + $0x148] sm:$0xff]  ;;  %v1097_v28 = vld [vmem:[#allocation8 + $0x140] sm:$0xff]  ;;  %s5690_s2 = sld [smem:[#allocation63_spill]] }
  0xad   : > { %s3596_s27 = sadd.s32 4294967280, %s3595_s16  ;;  %1055 = vmatpush.msra.mxu1 %v974_v10  ;;  %1126 = vmatpush.msra.mxu2 %v1101_v11  ;;  %v987_v26 = vld [vmem:[#allocation8 + $0xc8] sm:$0xff]  ;;  %v986_v29 = vld [vmem:[#allocation8 + $0xc0] sm:$0xff]  ;;  %v1096_v32 = vld [vmem:[#allocation8 + $0x138] sm:$0xff]  ;;  %s5691_s15 = sld [smem:[#allocation64_spill]] }
  0xae   : > { %v4800_v15 = vstv %s3596_s27  ;;  %1021 = vmatpush.msra.mxu0 %v990_v12  ;;  %v970_v27 = vld [vmem:[#allocation8 + $0x48] sm:$0xff]  ;;  %v969_v31 = vld [vmem:[#allocation8 + $0x40] sm:$0xff]  ;;  %v985_v33 = vld [vmem:[#allocation8 + $0xb8] sm:$0xff]  ;;  %s5692_s16 = sld [smem:[#allocation61_spill]]  ;;  %s3598_s14 = sshll.u32 %s5673_s4, 1 }
  0xaf   : > { %1056 = vmatpush.msra.mxu1 %v973_v13  ;;  %v906_v21 = vadd.s32 %v4800_v15, %v4797_v6  ;;  %1127 = vmatpush.msra.mxu2 %v1100_v16  ;;  %v907_v24 = vadd.s32 %v4800_v15, %v898_v14  ;;  %v908_v30 = vadd.s32 %v4800_v15, %v899_v22  ;;  %v890_v34 = vld [vmem:[%s764_s24] sm:$0xff]  ;;  %v968_v35 = vld [vmem:[#allocation8 + $0x38] sm:$0xff]  ;;  %v1094_v46 = vld [vmem:[#allocation8 + $0x128] sm:$0xff]  ;;  %v902_v22 = vadd.s32 40, %v4797_v6  ;;  %s5693_s27 = sld [smem:[#allocation36_spill]] }
  0xb0   : > { %1022 = vmatpush.msra.mxu0 %v989_v17  ;;  %v891_v36 = vld [vmem:[%s764_s24 + $0x8] sm:$0xff]  ;;  %v1095_v39 = vld [vmem:[#allocation8 + $0x130] sm:$0xff]  ;;  %v909_v52 = vadd.s32 %v4800_v15, %v900_v38  ;;  %v1093_v53 = vld [vmem:[#allocation8 + $0x120] sm:$0xff]  ;;  %v910_v16 = vadd.s32 %v4800_v15, %v901_v1 }
  0xb1   : > { %1057 = vmatpush.msra.mxu1 %v972_v18  ;;  %1128 = vmatpush.msra.mxu2 %v1099_v19  ;;  %vm912_vm0 = vcmp.ge.s32.totalorder %v906_v21, 0  ;;  %vm918_vm1 = vcmp.lt.s32.totalorder %v906_v21, 40  ;;  %vm913_vm2 = vcmp.ge.s32.totalorder %v907_v24, 0  ;;  %vm919_vm3 = vcmp.lt.s32.totalorder %v907_v24, 40  ;;  %v984_v40 = vld [vmem:[#allocation8 + $0xb0] sm:$0xff]  ;;  %v983_v47 = vld [vmem:[#allocation8 + $0xa8] sm:$0xff] }
  0xb2   : > { %1023 = vmatpush.msra.mxu0 %v988_v20  ;;  %vm4813_vm4 = vmand %vm912_vm0, %vm918_vm1  ;;  %vm914_vm6 = vcmp.ge.s32.totalorder %v908_v30, 0  ;;  %vm920_vm7 = vcmp.lt.s32.totalorder %v908_v30, 40  ;;  %v967_v43 = vld [vmem:[#allocation8 + $0x30] sm:$0xff]  ;;  %v966_v48 = vld [vmem:[#allocation8 + $0x28] sm:$0xff]  ;;  %vm915_vm9 = vcmp.ge.s32.totalorder %v909_v52, 0  ;;  %vm921_vm10 = vcmp.lt.s32.totalorder %v909_v52, 40 }
  0xb3   : > { %1058 = vmatpush.msra.mxu1 %v971_v23  ;;  %1129 = vmatpush.msra.mxu2 %v1098_v25  ;;  %vm4819_vm5 = vmand %vm913_vm2, %vm919_vm3  ;;  %v4825_v42 = vsel %vm4813_vm4, %v890_v34, 0.0  ;;  %v892_v50 = vld [vmem:[%s4757_s6] sm:$0xff]  ;;  %v1092_v55 = vld [vmem:[#allocation8 + $0x118] sm:$0xff]  ;;  %vm916_vm14 = vcmp.ge.s32.totalorder %v910_v16, 0  ;;  %vm922_vm15 = vcmp.lt.s32.totalorder %v910_v16, 40  ;;  %v911_v6 = vadd.s32 %v4800_v15, %v902_v22 }
  0xb4   : > { %1024 = vmatpush.msra.mxu0 %v987_v26  ;;  %v4829_v44 = vsel %vm4819_vm5, %v891_v36, 0.0  ;;  %v948_v45 = vmul.f32 0.1, %v4825_v42  ;;  %vm4835_vm8 = vmand %vm914_vm6, %vm920_vm7  ;;  %v982_v54 = vld [vmem:[#allocation8 + $0xa0] sm:$0xff]  ;;  %v1091_v59 = vld [vmem:[#allocation8 + $0x110] sm:$0xff]  ;;  %vm1179_vm6 = vcmask 1040384  }
  0xb5   : > { %1059 = vmatpush.msra.mxu1 %v970_v27  ;;  %1130 = vmatpush.msra.mxu2 %v1097_v28  ;;  %v949_v49 = vmul.f32 0.1, %v4829_v44  ;;  %v965_v56 = vld [vmem:[#allocation8 + $0x20] sm:$0xff]  ;;  %v981_v60 = vld [vmem:[#allocation8 + $0x98] sm:$0xff]  ;;  %v4848_v61 = vsel %vm4835_vm8, %v892_v50, 0.0  ;;  %v980_v63 = vld [vmem:[#allocation8 + $0x90] sm:$0xff] }
  0xb6   : > { %1025 = vmatpush.msra.mxu0 %v986_v29  ;;  %v4841_v57 = vmax.f32 %v4825_v42, %v948_v45  ;;  %v964_v62 = vld [vmem:[#allocation8 + $0x18] sm:$0xff]  ;;  %v963_v0 = vld [vmem:[#allocation8 + $0x10] sm:$0xff]  ;;  %v950_v4 = vmul.f32 0.1, %v4848_v61  ;;  %v1090_v5 = vld [vmem:[#allocation8 + $0x108] sm:$0xff]  ;;  %vm917_vm1 = vcmp.ge.s32.totalorder %v911_v6, 0 }
  0xb7   : > { %1060 = vmatpush.msra.mxu1 %v969_v31  ;;  %1131 = vmatpush.msra.mxu2 %v1096_v32  ;;  %v4844_v58 = vmax.f32 %v4829_v44, %v949_v49  ;;  %v979_v7 = vld [vmem:[#allocation8 + $0x88] sm:$0xff]  ;;  %vm4859_vm13 = vmand %vm915_vm9, %vm921_vm10  ;;  %v1089_v13 = vld [vmem:[#allocation8 + $0x100] sm:$0xff]  ;;  %vm923_vm2 = vcmp.lt.s32.totalorder %v911_v6, 40  ;;  %vm1376_vm7 = vcmask 1044480   ;;  %vm1450_vm9 = vcmask 1041408   ;;  %s3605_s12 = smul.u32 6, %s5693_s27 }
  0xb8   : > { %1026 = vmatpush.msra.mxu0 %v985_v33  ;;  %v1106_v2 = vrot.slane %v4841_v57, 2  ;;  %v1001_v8 = vrot.slane %v4841_v57, 1  ;;  %v962_v10 = vld [vmem:[#allocation8 + $0x8] sm:$0xff]  ;;  %v978_v14 = vld [vmem:[#allocation8 + $0x80] sm:$0xff]  ;;  %v4868_v19 = vmax.f32 %v4848_v61, %v950_v4  ;;  %vm4886_vm0 = vmand %vm916_vm14, %vm922_vm15  ;;  %vm1532_vm10 = vcmask 1042432  }
  0xb9   : > { %1061 = vmatpush.msra.mxu1 %v968_v35  ;;  %1132 = vmatpush.msra.mxu2 %v1095_v39  ;;  %v1107_v3 = vrot.slane %v4844_v58, 2  ;;  %v1002_v9 = vrot.slane %v4844_v58, 1  ;;  %v893_v11 = vld [vmem:[%s4757_s6 + $0x8] sm:$0xff]  ;;  %v961_v18 = vld [vmem:[#allocation8] sm:$0xff]  ;;  %v1230_v35 = vld [vmem:[#allocation10 + $0x70] sm:$0xff]  ;;  %vm2201_vm14 = vcmask 1043456  }
  0xba   : > { %1027 = vmatpush.msra.mxu0 %v984_v40  ;;  %v4875_v21 = vsel %vm4859_vm13, %v893_v11, 0.0  ;;  %v1109_v23 = vrot.slane %v4868_v19, 2  ;;  %v1004_v25 = vrot.slane %v4868_v19, 1  ;;  %v894_v26 = vld [vmem:[%s774_s26] sm:$0xff]  ;;  %v1231_v33 = vld [vmem:[#allocation10 + $0x78] sm:$0xff]  ;;  %vm4912_vm3 = vmand %vm917_vm1, %vm923_vm2 }
  0xbb   : > { %1062 = vmatpush.msra.mxu1 %v967_v43  ;;  %1133 = vmatpush.msra.mxu2 %v1094_v46  ;;  %v4865_v17 = vsel %vm1105_vm11, %v1106_v2, %v1107_v3  ;;  %v4871_v20 = vsel %vm1000_vm12, %v1001_v8, %v1002_v9  ;;  %v951_v24 = vmul.f32 0.1, %v4875_v21  ;;  %v4902_v31 = vsel %vm4886_vm0, %v894_v26, 0.0  ;;  %v1375_v34 = vld [vmem:[#allocation10 + $0x178] sm:$0xff]  ;;  %v1374_v40 = vld [vmem:[#allocation10 + $0x170] sm:$0xff]  ;;  %v1229_v43 = vld [vmem:[#allocation10 + $0x68] sm:$0xff] }
  0xbc   : > { %1028 = vmatpush.msra.mxu0 %v983_v47  ;;  %v4892_v28 = vsel %vm1105_vm11, %v1107_v3, %v1109_v23  ;;  %v4898_v30 = vsel %vm1000_vm12, %v1002_v9, %v1004_v25  ;;  %v952_v32 = vmul.f32 0.1, %v4902_v31  ;;  %v895_v38 = vld [vmem:[%s774_s26 + $0x8] sm:$0xff]  ;;  %v1247_v47 = vld [vmem:[#allocation10 + $0xf0] sm:$0xff]  ;;  %v1228_v50 = vld [vmem:[#allocation10 + $0x60] sm:$0xff] }
  0xbd   : > { %1063 = vmatpush.msra.mxu1 %v966_v48  ;;  %1134 = vmatpush.msra.mxu2 %v1093_v53  ;;  %v4895_v29 = vmax.f32 %v4875_v21, %v951_v24  ;;  %v1373_v45 = vld [vmem:[#allocation10 + $0x168] sm:$0xff]  ;;  %v1248_v46 = vld [vmem:[#allocation10 + $0xf8] sm:$0xff]  ;;  %v4927_v53 = vsel %vm4912_vm3, %v895_v38, 0.0  ;;  %v1245_v9 = vld [vmem:[#allocation10 + $0xe0] sm:$0xff] }
  0xbe   : > { %1029 = vmatpush.msra.mxu0 %v982_v54  ;;  %v4920_v49 = vmax.f32 %v4902_v31, %v952_v32  ;;  %1272 = vmatpush.msra.mxu3 %v1248_v46  ;;  %v1372_v54 = vld [vmem:[#allocation10 + $0x160] sm:$0xff]  ;;  %v1244_v11 = vld [vmem:[#allocation10 + $0xd8] sm:$0xff]  ;;  %v1369_v16 = vld [vmem:[#allocation10 + $0x148] sm:$0xff] }
  0xbf   : > { %1064 = vmatpush.msra.mxu1 %v965_v56  ;;  %1135 = vmatpush.msra.mxu2 %v1092_v55  ;;  %v1111_v15 = vrot.slane %v4895_v29, 2  ;;  %v1006_v36 = vrot.slane %v4895_v29, 1  ;;  %v1227_v55 = vld [vmem:[#allocation10 + $0x58] sm:$0xff]  ;;  %v1246_v56 = vld [vmem:[#allocation10 + $0xe8] sm:$0xff]  ;;  %v1224_v22 = vld [vmem:[#allocation10 + $0x40] sm:$0xff] }
  0xc0   : > { %1030 = vmatpush.msra.mxu0 %v981_v60  ;;  %1273 = vmatpush.msra.mxu3 %v1247_v47  ;;  %v953_v60 = vmul.f32 0.1, %v4927_v53  ;;  %v1241_v24 = vld [vmem:[#allocation10 + $0xc0] sm:$0xff]  ;;  %v1367_v26 = vld [vmem:[#allocation10 + $0x138] sm:$0xff]  ;;  %v1239_v32 = vld [vmem:[#allocation10 + $0xb0] sm:$0xff] }
  0xc1   : > { %1065 = vmatpush.msra.mxu1 %v964_v62  ;;  %1136 = vmatpush.msra.mxu2 %v1091_v59  ;;  %v4917_v48 = vsel %vm1105_vm11, %v1109_v23, %v1111_v15  ;;  %v4923_v52 = vsel %vm1000_vm12, %v1004_v25, %v1006_v36  ;;  %v1113_v59 = vrot.slane %v4920_v49, 2  ;;  %v1371_v62 = vld [vmem:[#allocation10 + $0x158] sm:$0xff]  ;;  %v1368_v23 = vld [vmem:[#allocation10 + $0x140] sm:$0xff] }
  0xc2   : > { %1031 = vmatpush.msra.mxu0 %v980_v63  ;;  %v1226_v63 = vld [vmem:[#allocation10 + $0x50] sm:$0xff]  ;;  %1274 = vmatpush.msra.mxu3 %v1246_v56  ;;  %v4939_v2 = vmax.f32 %v4927_v53, %v953_v60  ;;  %v1223_v25 = vld [vmem:[#allocation10 + $0x38] sm:$0xff]  ;;  %v1237_v38 = vld [vmem:[#allocation10 + $0xa0] sm:$0xff] }
  0xc3   : > { %1066 = vmatpush.msra.mxu1 %v963_v0  ;;  %1137 = vmatpush.msra.mxu2 %v1090_v5  ;;  %v1008_v0 = vrot.slane %v4920_v49, 1  ;;  %v4936_v1 = vsel %vm1105_vm11, %v1111_v15, %v1113_v59  ;;  %v1240_v6 = vld [vmem:[#allocation10 + $0xb8] sm:$0xff]  ;;  %v1222_v15 = vld [vmem:[#allocation10 + $0x30] sm:$0xff]  ;;  %v1234_v56 = vld [vmem:[#allocation10 + $0x88] sm:$0xff] }
  0xc4   : > { %1032 = vmatpush.msra.mxu0 %v979_v7  ;;  %v4948_v4 = vrot.slane %v4939_v2, 2  ;;  %v4951_v5 = vrot.slane %v4939_v2, 1  ;;  %1275 = vmatpush.msra.mxu3 %v1245_v9  ;;  %v1219_v46 = vld [vmem:[#allocation10 + $0x18] sm:$0xff]  ;;  %v1361_v60 = vld [vmem:[#allocation10 + $0x108] sm:$0xff] }
  0xc5   : > { %1067 = vmatpush.msra.mxu1 %v962_v10  ;;  %1138 = vmatpush.msra.mxu2 %v1089_v13  ;;  %v4942_v3 = vsel %vm1000_vm12, %v1006_v36, %v1008_v0  ;;  %v1370_v10 = vld [vmem:[#allocation10 + $0x150] sm:$0xff]  ;;  %v1365_v36 = vld [vmem:[#allocation10 + $0x128] sm:$0xff]  ;;  %v1363_v47 = vld [vmem:[#allocation10 + $0x118] sm:$0xff] }
  0xc6   : > { %1033 = vmatpush.msra.mxu0 %v978_v14  ;;  %1139 = vmatmul.f32.vlgmr.msra.gmra.mxu2 %v4865_v17  ;;  %v4955_v7 = vsel %vm1105_vm11, %v1113_v59, %v4948_v4  ;;  %v4959_v8 = vsel %vm1000_vm12, %v1008_v0, %v4951_v5  ;;  %v1243_v13 = vld [vmem:[#allocation10 + $0xd0] sm:$0xff]  ;;  %v1225_v14 = vld [vmem:[#allocation10 + $0x48] sm:$0xff]  ;;  %v1360_v0 = vld [vmem:[#allocation10 + $0x100] sm:$0xff] }
  0xc7   : > { %1068 = vmatpush.msra.mxu1 %v961_v18  ;;  %1034 = vmatmul.f32.vlgmr.msra.gmra.mxu0 %v4871_v20  ;;  %v1242_v18 = vld [vmem:[#allocation10 + $0xc8] sm:$0xff]  ;;  %v2889_v37 = vld [vmem:[#allocation17 + $0x1b8] sm:$0xff] }
  0xc8   : > { %1069 = vmatmul.f32.vlgmr.msra.gmra.mxu1 %v4841_v57  ;;  %1324 = vmatpush.msrb.mxu0 %v1231_v33  ;;  %v1366_v33 = vld [vmem:[#allocation10 + $0x130] sm:$0xff]  ;;  %v1217_v59 = vld [vmem:[#allocation10 + $0x8] sm:$0xff] }
  0xc9   : > { %1394 = vmatpush.msrb.mxu1 %v1375_v34  ;;  %1276 = vmatpush.msra.mxu3 %v1244_v11  ;;  %v1221_v34 = vld [vmem:[#allocation10 + $0x28] sm:$0xff] }
  0xca   : > { %1325 = vmatpush.msrb.mxu0 %v1230_v35  ;;  %v1238_v35 = vld [vmem:[#allocation10 + $0xa8] sm:$0xff] }
  0xcb   : > { %1395 = vmatpush.msrb.mxu1 %v1374_v40  ;;  %1277 = vmatpush.msra.mxu3 %v1243_v13  ;;  %v1220_v40 = vld [vmem:[#allocation10 + $0x20] sm:$0xff] }
  0xcc   : > { %1326 = vmatpush.msrb.mxu0 %v1229_v43  ;;  %v1364_v43 = vld [vmem:[#allocation10 + $0x120] sm:$0xff] }
  0xcd   : > { %1396 = vmatpush.msrb.mxu1 %v1373_v45  ;;  %1278 = vmatpush.msra.mxu3 %v1242_v18  ;;  %v1236_v45 = vld [vmem:[#allocation10 + $0x98] sm:$0xff]  ;;  %v4970_v13 = vld [vmem:[%s5686_s11] ss:$0 sm:$0xff]  ;;  %s5694_s11 = sld [smem:[#allocation65_spill]] }
  0xce   : > { %1142 = vmatmul.f32.gmra.mxu2 %v4892_v28  ;;  %1327 = vmatpush.msrb.mxu0 %v1228_v50  ;;  %v1235_v50 = vld [vmem:[#allocation10 + $0x90] sm:$0xff] }
  0xcf   : > { %1037 = vmatmul.f32.gmra.mxu0 %v4898_v30  ;;  %1397 = vmatpush.msrb.mxu1 %v1372_v54  ;;  %v1218_v54 = vld [vmem:[#allocation10 + $0x10] sm:$0xff] }
  0xd0   : > { %1072 = vmatmul.f32.gmra.mxu1 %v4844_v58  ;;  %1328 = vmatpush.msrb.mxu0 %v1227_v55  ;;  %v1362_v55 = vld [vmem:[#allocation10 + $0x110] sm:$0xff] }
  0xd1   : > { %1398 = vmatpush.msrb.mxu1 %v1371_v62  ;;  %1279 = vmatpush.msra.mxu3 %v1241_v24  ;;  %v1233_v62 = vld [vmem:[#allocation10 + $0x80] sm:$0xff] }
  0xd2   : > { %1329 = vmatpush.msrb.mxu0 %v1226_v63  ;;  %v1216_v63 = vld [vmem:[#allocation10] sm:$0xff] }
  0xd3   : > { %1399 = vmatpush.msrb.mxu1 %v1370_v10  ;;  %1280 = vmatpush.msra.mxu3 %v1240_v6 }
  0xd4   : > { %1330 = vmatpush.msrb.mxu0 %v1225_v14 }
  0xd5   : > { %1400 = vmatpush.msrb.mxu1 %v1369_v16  ;;  %1281 = vmatpush.msra.mxu3 %v1239_v32 }
  0xd6   : > { %1145 = vmatmul.f32.gmra.mxu2 %v4917_v48  ;;  %1331 = vmatpush.msrb.mxu0 %v1224_v22 }
  0xd7   : > { %1040 = vmatmul.f32.gmra.mxu0 %v4923_v52  ;;  %1401 = vmatpush.msrb.mxu1 %v1368_v23 }
  0xd8   : > { %1075 = vmatmul.f32.gmra.mxu1 %v4868_v19  ;;  %1332 = vmatpush.msrb.mxu0 %v1223_v25 }
  0xd9   : > { %1402 = vmatpush.msrb.mxu1 %v1367_v26  ;;  %1282 = vmatpush.msra.mxu3 %v1238_v35 }
  0xda   : > { %1333 = vmatpush.msrb.mxu0 %v1222_v15 }
  0xdb   : > { %1403 = vmatpush.msrb.mxu1 %v1366_v33  ;;  %1283 = vmatpush.msra.mxu3 %v1237_v38 }
  0xdc   : > { %1334 = vmatpush.msrb.mxu0 %v1221_v34 }
  0xdd   : > { %1404 = vmatpush.msrb.mxu1 %v1365_v36  ;;  %1284 = vmatpush.msra.mxu3 %v1236_v45 }
  0xde   : > { %1148 = vmatmul.f32.gmra.mxu2 %v4936_v1  ;;  %1335 = vmatpush.msrb.mxu0 %v1220_v40 }
  0xdf   : > { %1043 = vmatmul.f32.gmra.mxu0 %v4942_v3  ;;  %1405 = vmatpush.msrb.mxu1 %v1364_v43 }
  0xe0   : > { %1078 = vmatmul.f32.gmra.mxu1 %v4895_v29  ;;  %1336 = vmatpush.msrb.mxu0 %v1219_v46 }
  0xe1   : > { %1406 = vmatpush.msrb.mxu1 %v1363_v47  ;;  %1285 = vmatpush.msra.mxu3 %v1235_v50 }
  0xe2   : > { %1337 = vmatpush.msrb.mxu0 %v1218_v54 }
  0xe3   : > { %1407 = vmatpush.msrb.mxu1 %v1362_v55  ;;  %1286 = vmatpush.msra.mxu3 %v1234_v56 }
  0xe4   : > { %1338 = vmatpush.msrb.mxu0 %v1217_v59 }
  0xe5   : > { %1408 = vmatpush.msrb.mxu1 %v1361_v60  ;;  %1287 = vmatpush.msra.mxu3 %v1233_v62 }
  0xe6   : > { %1151 = vmatmul.f32.gmra.mxu2 %v4955_v7  ;;  %1339 = vmatpush.msrb.mxu0 %v1216_v63 }
  0xe7   : > { %1046 = vmatmul.f32.gmra.mxu0 %v4959_v8  ;;  %1409 = vmatpush.msrb.mxu1 %v1360_v0 }
  0xe8   : > { %1081 = vmatmul.f32.gmra.mxu1 %v4920_v49 }
  0xee   : > { %1154 = vmatmul.f32.gmra.mxu2 %v4948_v4 }
  0xef   : > { %1049 = vmatmul.f32.gmra.mxu0 %v4951_v5 }
  0xf0   : > { %1084 = vmatmul.f32.gmra.mxu1 %v4939_v2 }
 0x144   : > { %v1035_v9 = vpop.f32.mrf.mxu0 }
 0x145   : > { %v1070_v10 = vpop.f32.mrf.mxu1 }
 0x146   : > { %v1071_v11 = vadd.f32 %v1070_v10, %v1035_v9 }
 0x149   : > { %v1140_v14 = vpop.f32.mrf.mxu2 }
 0x14a   : > { %v1158_v16 = vadd.f32 %v1140_v14, %v1071_v11 }
 0x14c   : > { %v1167_v18 = vadd.f32 %v4970_v13, %v1158_v16  ;;  %v1038_v22 = vpop.f32.mrf.mxu0 }
 0x14d   : > { %v1073_v23 = vpop.f32.mrf.mxu1 }
 0x14e   : > { %v1180_v24 = vrot.slane %v1167_v18, 7  ;;  %v1074_v25 = vadd.f32 %v1073_v23, %v1038_v22 }
 0x150   : > { %v1197_v6 = vsel %vm4813_vm4, %v1180_v24, 0.0 }
 0x151   : > { %v1143_v26 = vpop.f32.mrf.mxu2  ;;  %v1203_v35 = vmul.f32 0.1, %v1197_v6 }
 0x152   : > { %v1159_v15 = vadd.f32 %v1143_v26, %v1074_v25 }
 0x153   : > { %v1209_v43 = vmax.f32 %v1197_v6, %v1203_v35 }
 0x154   : > { %v1168_v32 = vadd.f32 %v4970_v13, %v1159_v15  ;;  %v1041_v33 = vpop.f32.mrf.mxu0 }
 0x155   : > { %v1076_v34 = vpop.f32.mrf.mxu1  ;;  %v1255_v62 = vrot.slane %v1209_v43, 2  ;;  %v1307_v63 = vrot.slane %v1209_v43, 1  ;;  %v1377_v0 = vrot.slane %v1209_v43, 3 }
 0x156   : > { %v1181_v36 = vrot.slane %v1168_v32, 7  ;;  %v1077_v38 = vadd.f32 %v1076_v34, %v1041_v33 }
 0x158   : > { %v1182_v40 = vsel %vm1179_vm6, %v1180_v24, %v1181_v36 }
 0x159   : > { %v1198_v45 = vsel %vm4819_vm5, %v1182_v40, 0.0  ;;  %v1146_v46 = vpop.f32.mrf.mxu2 }
 0x15a   : > { %v1204_v47 = vmul.f32 0.1, %v1198_v45  ;;  %v1160_v50 = vadd.f32 %v1146_v46, %v1077_v38 }
 0x15c   : > { %v1169_v54 = vadd.f32 %v4970_v13, %v1160_v50  ;;  %v1044_v55 = vpop.f32.mrf.mxu0  ;;  %v1210_v59 = vmax.f32 %v1198_v45, %v1204_v47 }
 0x15d   : > { %v1079_v56 = vpop.f32.mrf.mxu1 }
 0x15e   : > { %v1080_v60 = vadd.f32 %v1079_v56, %v1044_v55  ;;  %v1183_v9 = vrot.slane %v1169_v54, 7  ;;  %v1256_v10 = vrot.slane %v1210_v59, 2  ;;  %v1308_v11 = vrot.slane %v1210_v59, 1 }
 0x15f   : > { %v1378_v14 = vrot.slane %v1210_v59, 3 }
 0x160   : > { %v1184_v16 = vsel %vm1179_vm6, %v1181_v36, %v1183_v9  ;;  %v1257_v18 = vsel %vm1105_vm11, %v1255_v62, %v1256_v10  ;;  %v1309_v22 = vsel %vm1000_vm12, %v1307_v63, %v1308_v11  ;;  %v1524_v62 = vld [vmem:[#allocation11 + $0xf0] sm:$0xff] }
 0x161   : > { %v1379_v23 = vsel %vm1376_vm7, %v1377_v0, %v1378_v14  ;;  %v1199_v24 = vsel %vm4835_vm8, %v1184_v16, 0.0  ;;  %v1149_v25 = vpop.f32.mrf.mxu2  ;;  %1288 = vmatmul.f32.vlgmr.msra.gmra.mxu3 %v1257_v18  ;;  %1340 = vmatmul.f32.vlgmr.msrb.gmra.mxu0 %v1309_v22 }
 0x162   : > { %v1205_v26 = vmul.f32 0.1, %v1199_v24  ;;  %v1161_v6 = vadd.f32 %v1149_v25, %v1080_v60  ;;  %1410 = vmatmul.f32.vlgmr.msrb.gmra.mxu1 %v1379_v23  ;;  %v1525_v60 = vld [vmem:[#allocation11 + $0xf8] sm:$0xff] }
 0x163   : > { %1549 = vmatpush.msrb.mxu2 %v1525_v60 }
 0x164   : > { %v1170_v15 = vadd.f32 %v4970_v13, %v1161_v6  ;;  %v1047_v32 = vpop.f32.mrf.mxu0  ;;  %v1211_v34 = vmax.f32 %v1199_v24, %v1205_v26  ;;  %v1522_v24 = vld [vmem:[#allocation11 + $0xe0] sm:$0xff] }
 0x165   : > { %v1082_v33 = vpop.f32.mrf.mxu1  ;;  %1550 = vmatpush.msrb.mxu2 %v1524_v62 }
 0x166   : > { %v1083_v35 = vadd.f32 %v1082_v33, %v1047_v32  ;;  %v1185_v36 = vrot.slane %v1170_v15, 7  ;;  %v1258_v38 = vrot.slane %v1211_v34, 2  ;;  %v1310_v40 = vrot.slane %v1211_v34, 1 }
 0x167   : > { %v1380_v43 = vrot.slane %v1211_v34, 3  ;;  %v1521_v34 = vld [vmem:[#allocation11 + $0xd8] sm:$0xff] }
 0x168   : > { %v1186_v45 = vsel %vm1179_vm6, %v1183_v9, %v1185_v36  ;;  %v1259_v46 = vsel %vm1105_vm11, %v1256_v10, %v1258_v38  ;;  %v1311_v47 = vsel %vm1000_vm12, %v1308_v11, %v1310_v40  ;;  %v1523_v11 = vld [vmem:[#allocation11 + $0xe8] sm:$0xff] }
 0x169   : > { %v1381_v50 = vsel %vm1376_vm7, %v1378_v14, %v1380_v43  ;;  %v1200_v54 = vsel %vm4859_vm13, %v1186_v45, 0.0  ;;  %v1152_v55 = vpop.f32.mrf.mxu2  ;;  %1291 = vmatmul.f32.gmra.mxu3 %v1259_v46  ;;  %1343 = vmatmul.f32.gmra.mxu0 %v1311_v47 }
 0x16a   : > { %v1206_v56 = vmul.f32 0.1, %v1200_v54  ;;  %v1162_v59 = vadd.f32 %v1152_v55, %v1083_v35  ;;  %1413 = vmatmul.f32.gmra.mxu1 %v1381_v50  ;;  %1551 = vmatpush.msrb.mxu2 %v1523_v11 }
 0x16c   : > { %v1171_v63 = vadd.f32 %v4970_v13, %v1162_v59  ;;  %v1050_v0 = vpop.f32.mrf.mxu0  ;;  %v1212_v10 = vmax.f32 %v1200_v54, %v1206_v56  ;;  %1552 = vmatpush.msrb.mxu2 %v1522_v24  ;;  %v1505_v24 = vld [vmem:[#allocation11 + $0x60] sm:$0xff] }
 0x16d   : > { %v1085_v9 = vpop.f32.mrf.mxu1 }
 0x16e   : > { %v1086_v16 = vadd.f32 %v1085_v9, %v1050_v0  ;;  %v1187_v14 = vrot.slane %v1171_v63, 7  ;;  %v1260_v18 = vrot.slane %v1212_v10, 2  ;;  %v1312_v22 = vrot.slane %v1212_v10, 1  ;;  %1553 = vmatpush.msrb.mxu2 %v1521_v34  ;;  %v1516_v34 = vld [vmem:[#allocation11 + $0xb0] sm:$0xff] }
 0x16f   : > { %v1382_v23 = vrot.slane %v1212_v10, 3 }
 0x170   : > { %v1188_v25 = vsel %vm1179_vm6, %v1185_v36, %v1187_v14  ;;  %v1261_v26 = vsel %vm1105_vm11, %v1258_v38, %v1260_v18  ;;  %v1313_v6 = vsel %vm1000_vm12, %v1310_v40, %v1312_v22 }
 0x171   : > { %v1383_v15 = vsel %vm1376_vm7, %v1380_v43, %v1382_v23  ;;  %v1201_v32 = vsel %vm4886_vm0, %v1188_v25, 0.0  ;;  %v1155_v33 = vpop.f32.mrf.mxu2  ;;  %1294 = vmatmul.f32.gmra.mxu3 %v1261_v26  ;;  %1346 = vmatmul.f32.gmra.mxu0 %v1313_v6  ;;  %v1504_v25 = vld [vmem:[#allocation11 + $0x58] sm:$0xff]  ;;  %v1503_v26 = vld [vmem:[#allocation11 + $0x50] sm:$0xff]  ;;  %v1502_v6 = vld [vmem:[#allocation11 + $0x48] sm:$0xff] }
 0x172   : > { %v1207_v35 = vmul.f32 0.1, %v1201_v32  ;;  %v1163_v45 = vadd.f32 %v1155_v33, %v1086_v16  ;;  %1416 = vmatmul.f32.gmra.mxu1 %v1383_v15  ;;  %v1520_v16 = vld [vmem:[#allocation11 + $0xd0] sm:$0xff]  ;;  %v1518_v15 = vld [vmem:[#allocation11 + $0xc0] sm:$0xff] }
 0x173   : > { %1554 = vmatpush.msrb.mxu2 %v1520_v16  ;;  %v1501_v33 = vld [vmem:[#allocation11 + $0x40] sm:$0xff] }
 0x174   : > { %v1172_v46 = vadd.f32 %v4970_v13, %v1163_v45  ;;  %v1213_v36 = vmax.f32 %v1201_v32, %v1207_v35  ;;  %v1517_v32 = vld [vmem:[#allocation11 + $0xb8] sm:$0xff]  ;;  %v1499_v45 = vld [vmem:[#allocation11 + $0x30] sm:$0xff] }
 0x175   : > { %v1500_v35 = vld [vmem:[#allocation11 + $0x38] sm:$0xff] }
 0x176   : > { %v1189_v38 = vrot.slane %v1172_v46, 7  ;;  %v1262_v47 = vrot.slane %v1213_v36, 2  ;;  %v1314_v40 = vrot.slane %v1213_v36, 1  ;;  %v1384_v50 = vrot.slane %v1213_v36, 3  ;;  %v1515_v46 = vld [vmem:[#allocation11 + $0xa8] sm:$0xff] }
 0x177   : > { %v1498_v36 = vld [vmem:[#allocation11 + $0x28] sm:$0xff] }
 0x178   : > { %v1190_v43 = vsel %vm1179_vm6, %v1187_v14, %v1189_v38  ;;  %v1263_v54 = vsel %vm1105_vm11, %v1260_v18, %v1262_v47  ;;  %v1315_v55 = vsel %vm1000_vm12, %v1312_v22, %v1314_v40  ;;  %v1385_v56 = vsel %vm1376_vm7, %v1382_v23, %v1384_v50  ;;  %v1508_v14 = vld [vmem:[#allocation11 + $0x78] sm:$0xff]  ;;  %v1519_v18 = vld [vmem:[#allocation11 + $0xc8] sm:$0xff]  ;;  %v1507_v22 = vld [vmem:[#allocation11 + $0x70] sm:$0xff] }
 0x179   : > { %v1202_v59 = vsel %vm4912_vm3, %v1190_v43, 0.0  ;;  %1297 = vmatmul.f32.gmra.mxu3 %v1263_v54  ;;  %1349 = vmatmul.f32.gmra.mxu0 %v1315_v55  ;;  %v1506_v23 = vld [vmem:[#allocation11 + $0x68] sm:$0xff]  ;;  %v1514_v38 = vld [vmem:[#allocation11 + $0xa0] sm:$0xff]  ;;  %v1512_v43 = vld [vmem:[#allocation11 + $0x90] sm:$0xff] }
 0x17a   : > { %v1208_v13 = vmul.f32 0.1, %v1202_v59  ;;  %1419 = vmatmul.f32.gmra.mxu1 %v1385_v56  ;;  %1595 = vmatpush.msrb.mxu3 %v1508_v14  ;;  %v1495_v54 = vld [vmem:[#allocation11 + $0x10] sm:$0xff]  ;;  %v1511_v55 = vld [vmem:[#allocation11 + $0x88] sm:$0xff]  ;;  %v1643_v14 = vld [vmem:[#allocation11 + $0x178] sm:$0xff] }
 0x17b   : > { %1555 = vmatpush.msrb.mxu2 %v1519_v18  ;;  %v1494_v56 = vld [vmem:[#allocation11 + $0x8] sm:$0xff]  ;;  %v1642_v18 = vld [vmem:[#allocation11 + $0x170] sm:$0xff] }
 0x17c   : > { %v1214_v60 = vmax.f32 %v1202_v59, %v1208_v13  ;;  %1596 = vmatpush.msrb.mxu3 %v1507_v22 }
 0x17d   : > { %1556 = vmatpush.msrb.mxu2 %v1518_v15 }
 0x17e   : > { %v1264_v62 = vrot.slane %v1214_v60, 2  ;;  %v1316_v63 = vrot.slane %v1214_v60, 1  ;;  %v1386_v0 = vrot.slane %v1214_v60, 3  ;;  %1597 = vmatpush.msrb.mxu3 %v1506_v23  ;;  %v1510_v60 = vld [vmem:[#allocation11 + $0x80] sm:$0xff] }
 0x17f   : > { %1557 = vmatpush.msrb.mxu2 %v1517_v32  ;;  %v1640_v32 = vld [vmem:[#allocation11 + $0x160] sm:$0xff] }
 0x180   : > { %v1265_v9 = vsel %vm1105_vm11, %v1262_v47, %v1264_v62  ;;  %v1317_v10 = vsel %vm1000_vm12, %v1314_v40, %v1316_v63  ;;  %v1387_v11 = vsel %vm1376_vm7, %v1384_v50, %v1386_v0  ;;  %1598 = vmatpush.msrb.mxu3 %v1505_v24  ;;  %v1497_v47 = vld [vmem:[#allocation11 + $0x20] sm:$0xff]  ;;  %v1513_v40 = vld [vmem:[#allocation11 + $0x98] sm:$0xff] }
 0x181   : > { %1300 = vmatmul.f32.gmra.mxu3 %v1265_v9  ;;  %1352 = vmatmul.f32.gmra.mxu0 %v1317_v10  ;;  %v1496_v50 = vld [vmem:[#allocation11 + $0x18] sm:$0xff]  ;;  %v5013_v9 = vld [vmem:[%s5687_s9] ss:$0 sm:$0xff]  ;;  %s3337_s9 = sadd.s32 %s3605_s12, %s3598_s14 }
 0x182   : > { %1422 = vmatmul.f32.gmra.mxu1 %v1387_v11  ;;  %1599 = vmatpush.msrb.mxu3 %v1504_v25  ;;  %s3599_s4 = sshll.u32 %s3337_s9, 3 }
 0x183   : > { %1558 = vmatpush.msrb.mxu2 %v1516_v34  ;;  %v1639_v34 = vld [vmem:[#allocation11 + $0x158] sm:$0xff] }
 0x184   : > { %1600 = vmatpush.msrb.mxu3 %v1503_v26 }
 0x185   : > { %1559 = vmatpush.msrb.mxu2 %v1515_v46 }
 0x186   : > { %1601 = vmatpush.msrb.mxu3 %v1502_v6  ;;  %v1641_v6 = vld [vmem:[#allocation11 + $0x168] sm:$0xff] }
 0x187   : > { %1560 = vmatpush.msrb.mxu2 %v1514_v38  ;;  %v1638_v38 = vld [vmem:[#allocation11 + $0x150] sm:$0xff] }
 0x188   : > { %1602 = vmatpush.msrb.mxu3 %v1501_v33 }
 0x189   : > { %1303 = vmatmul.f32.gmra.mxu3 %v1264_v62  ;;  %1355 = vmatmul.f32.gmra.mxu0 %v1316_v63  ;;  %v1493_v62 = vld [vmem:[#allocation11] sm:$0xff] }
 0x18a   : > { %1425 = vmatmul.f32.gmra.mxu1 %v1386_v0  ;;  %1603 = vmatpush.msrb.mxu3 %v1500_v35 }
 0x18b   : > { %1561 = vmatpush.msrb.mxu2 %v1513_v40 }
 0x18c   : > { %1604 = vmatpush.msrb.mxu3 %v1499_v45 }
 0x18d   : > { %1562 = vmatpush.msrb.mxu2 %v1512_v43 }
 0x18e   : > { %1605 = vmatpush.msrb.mxu3 %v1498_v36 }
 0x18f   : > { %1563 = vmatpush.msrb.mxu2 %v1511_v55  ;;  %v1636_v55 = vld [vmem:[#allocation11 + $0x140] sm:$0xff] }
 0x190   : > { %1606 = vmatpush.msrb.mxu3 %v1497_v47 }
 0x191   : > { %1564 = vmatpush.msrb.mxu2 %v1510_v60  ;;  %v1635_v60 = vld [vmem:[#allocation11 + $0x138] sm:$0xff] }
 0x192   : > { %1607 = vmatpush.msrb.mxu3 %v1496_v50 }
 0x193   : > { %1644 = vmatpush.msra.mxu2 %v1643_v14 }
 0x194   : > { %1608 = vmatpush.msrb.mxu3 %v1495_v54  ;;  %v1637_v54 = vld [vmem:[#allocation11 + $0x148] sm:$0xff] }
 0x195   : > { %1645 = vmatpush.msra.mxu2 %v1642_v18 }
 0x196   : > { %1609 = vmatpush.msrb.mxu3 %v1494_v56 }
 0x197   : > { %1646 = vmatpush.msra.mxu2 %v1641_v6 }
 0x198   : > { %1610 = vmatpush.msrb.mxu3 %v1493_v62 }
 0x199   : > { %1647 = vmatpush.msra.mxu2 %v1640_v32 }
 0x19b   : > { %1648 = vmatpush.msra.mxu2 %v1639_v34  ;;  %v1632_v34 = vld [vmem:[#allocation11 + $0x120] sm:$0xff] }
 0x19d   : > { %1649 = vmatpush.msra.mxu2 %v1638_v38 }
 0x19f   : > { %1650 = vmatpush.msra.mxu2 %v1637_v54 }
 0x1a1   : > { %1651 = vmatpush.msra.mxu2 %v1636_v55 }
 0x1a3   : > { %1652 = vmatpush.msra.mxu2 %v1635_v60 }
 0x1de   : > { %v1341_v59 = vpop.f32.mrf.mxu0 }
 0x1df   : > { %v1411_v13 = vpop.f32.mrf.mxu1 }
 0x1e4   : > { %v1289_v63 = vpop.f32.mrf.mxu3 }
 0x1e5   : > { %v1342_v0 = vadd.f32 %v1341_v59, %v1289_v63 }
 0x1e6   : > { %v1344_v10 = vpop.f32.mrf.mxu0 }
 0x1e7   : > { %v1429_v11 = vadd.f32 %v1411_v13, %v1342_v0  ;;  %v1414_v16 = vpop.f32.mrf.mxu1 }
 0x1e9   : > { %v1438_v22 = vadd.f32 %v5013_v9, %v1429_v11  ;;  %v1634_v11 = vld [vmem:[#allocation11 + $0x130] sm:$0xff] }
 0x1ea   : > { %1653 = vmatpush.msra.mxu2 %v1634_v11  ;;  %v1628_v11 = vld [vmem:[#allocation11 + $0x100] sm:$0xff] }
 0x1eb   : > { %v1451_v23 = vrot.slane %v1438_v22, 6  ;;  %v1633_v22 = vld [vmem:[#allocation11 + $0x128] sm:$0xff] }
 0x1ec   : > { %v1292_v24 = vpop.f32.mrf.mxu3  ;;  %1654 = vmatpush.msra.mxu2 %v1633_v22 }
 0x1ed   : > { %v1468_v25 = vsel %vm4813_vm4, %v1451_v23, 0.0  ;;  %v1345_v26 = vadd.f32 %v1344_v10, %v1292_v24 }
 0x1ee   : > { %v1347_v15 = vpop.f32.mrf.mxu0  ;;  %v1474_v35 = vadd.f32 %v1468_v25, %v4825_v42  ;;  %1655 = vmatpush.msra.mxu2 %v1632_v34 }
 0x1ef   : > { %v1430_v33 = vadd.f32 %v1414_v16, %v1345_v26  ;;  %v1417_v45 = vpop.f32.mrf.mxu1 }
 0x1f0   : > { %v1480_v40 = vmul.f32 0.1, %v1474_v35 }
 0x1f1   : > { %v1439_v46 = vadd.f32 %v5013_v9, %v1430_v33 }
 0x1f2   : > { %v1486_v63 = vmax.f32 %v1474_v35, %v1480_v40 }
 0x1f3   : > { %v1452_v36 = vrot.slane %v1439_v46, 6 }
 0x1f4   : > { %v1295_v47 = vpop.f32.mrf.mxu3  ;;  %v1533_v24 = vrot.slane %v1486_v63, 5  ;;  %v1581_v25 = vrot.slane %v1486_v63, 2 }
 0x1f5   : > { %v1453_v50 = vsel %vm1450_vm9, %v1451_v23, %v1452_v36  ;;  %v1348_v43 = vadd.f32 %v1347_v15, %v1295_v47 }
 0x1f6   : > { %v1469_v56 = vsel %vm4819_vm5, %v1453_v50, 0.0  ;;  %v1350_v62 = vpop.f32.mrf.mxu0 }
 0x1f7   : > { %v1431_v59 = vadd.f32 %v1417_v45, %v1348_v43  ;;  %v1475_v13 = vadd.f32 %v1469_v56, %v4829_v44  ;;  %v1420_v16 = vpop.f32.mrf.mxu1  ;;  %v1630_v43 = vld [vmem:[#allocation11 + $0x110] sm:$0xff] }
 0x1f9   : > { %v1440_v0 = vadd.f32 %v5013_v9, %v1431_v59  ;;  %v1481_v10 = vmul.f32 0.1, %v1475_v13 }
 0x1fb   : > { %v1454_v14 = vrot.slane %v1440_v0, 6  ;;  %v5025_v18 = vmax.f32 %v1475_v13, %v1481_v10  ;;  %v1629_v13 = vld [vmem:[#allocation11 + $0x108] sm:$0xff] }
 0x1fc   : > { %v1298_v23 = vpop.f32.mrf.mxu3 }
 0x1fd   : > { %v1455_v26 = vsel %vm1450_vm9, %v1452_v36, %v1454_v14  ;;  %v1351_v6 = vadd.f32 %v1350_v62, %v1298_v23  ;;  %v1534_v15 = vrot.slane %v5025_v18, 5  ;;  %v1582_v32 = vrot.slane %v5025_v18, 2  ;;  %v1631_v36 = vld [vmem:[#allocation11 + $0x118] sm:$0xff] }
 0x1fe   : > { %v1470_v33 = vsel %vm4835_vm8, %v1455_v26, 0.0  ;;  %v1353_v50 = vpop.f32.mrf.mxu0  ;;  %1656 = vmatpush.msra.mxu2 %v1631_v36 }
 0x1ff   : > { %v5033_v35 = vadd.f32 %v1470_v33, %v4848_v61  ;;  %v1432_v45 = vadd.f32 %v1420_v16, %v1351_v6  ;;  %v1535_v46 = vsel %vm1532_vm10, %v1533_v24, %v1534_v15  ;;  %v1583_v38 = vsel %vm1105_vm11, %v1581_v25, %v1582_v32  ;;  %v1423_v56 = vpop.f32.mrf.mxu1 }
 0x200   : > { %1565 = vmatmul.f32.vlgmr.msrb.gmra.mxu2 %v1535_v46  ;;  %1611 = vmatmul.f32.vlgmr.msrb.gmra.mxu3 %v1583_v38 }
 0x201   : > { %v1441_v47 = vadd.f32 %v5013_v9, %v1432_v45  ;;  %v1482_v40 = vmul.f32 0.1, %v5033_v35  ;;  %1657 = vmatpush.msra.mxu2 %v1630_v43 }
 0x203   : > { %v1456_v54 = vrot.slane %v1441_v47, 6  ;;  %v1488_v55 = vmax.f32 %v5033_v35, %v1482_v40  ;;  %1658 = vmatpush.msra.mxu2 %v1629_v13 }
 0x204   : > { %v1301_v59 = vpop.f32.mrf.mxu3 }
 0x205   : > { %v1457_v60 = vsel %vm1450_vm9, %v1454_v14, %v1456_v54  ;;  %v1354_v62 = vadd.f32 %v1353_v50, %v1301_v59  ;;  %v1536_v63 = vrot.slane %v1488_v55, 5  ;;  %v1584_v0 = vrot.slane %v1488_v55, 2  ;;  %1659 = vmatpush.msra.mxu2 %v1628_v11 }
 0x206   : > { %v1471_v10 = vsel %vm4859_vm13, %v1457_v60, 0.0  ;;  %v1356_v33 = vpop.f32.mrf.mxu0 }
 0x207   : > { %v5044_v16 = vadd.f32 %v1471_v10, %v4875_v21  ;;  %v1433_v22 = vadd.f32 %v1423_v56, %v1354_v62  ;;  %v1537_v23 = vsel %vm1532_vm10, %v1534_v15, %v1536_v63  ;;  %v1585_v24 = vsel %vm1105_vm11, %v1582_v32, %v1584_v0  ;;  %v1426_v36 = vpop.f32.mrf.mxu1 }
 0x208   : > { %1568 = vmatmul.f32.gmra.mxu2 %v1537_v23  ;;  %1614 = vmatmul.f32.gmra.mxu3 %v1585_v24 }
 0x209   : > { %v1442_v14 = vadd.f32 %v5013_v9, %v1433_v22  ;;  %v1483_v25 = vmul.f32 0.1, %v5044_v16 }
 0x20b   : > { %v1458_v26 = vrot.slane %v1442_v14, 6  ;;  %v1489_v6 = vmax.f32 %v5044_v16, %v1483_v25  ;;  %v1980_v25 = vld [vmem:[#allocation14 + $0xf8] sm:$0xff] }
 0x20c   : > { %v1304_v34 = vpop.f32.mrf.mxu3  ;;  %1981 = vmatpush.msrb.mxu2 %v1980_v25  ;;  %v1972_v25 = vld [vmem:[#allocation14 + $0xb8] sm:$0xff] }
 0x20d   : > { %v1459_v45 = vsel %vm1450_vm9, %v1456_v54, %v1458_v26  ;;  %v1357_v46 = vadd.f32 %v1356_v33, %v1304_v34  ;;  %v1538_v38 = vrot.slane %v1489_v6, 5  ;;  %v1586_v15 = vrot.slane %v1489_v6, 2  ;;  %v1743_v33 = vld [vmem:[#allocation13 + $0x78] sm:$0xff]  ;;  %v1979_v34 = vld [vmem:[#allocation14 + $0xf0] sm:$0xff] }
 0x20e   : > { %v1472_v32 = vsel %vm4886_vm0, %v1459_v45, 0.0  ;;  %1829 = vmatpush.msra.mxu0 %v1743_v33  ;;  %v1875_v45 = vld [vmem:[#allocation13 + $0x178] sm:$0xff]  ;;  %1982 = vmatpush.msrb.mxu2 %v1979_v34  ;;  %v1868_v34 = vld [vmem:[#allocation13 + $0x140] sm:$0xff] }
 0x20f   : > { %v1434_v47 = vadd.f32 %v1426_v36, %v1357_v46  ;;  %v1539_v40 = vsel %vm1532_vm10, %v1536_v63, %v1538_v38  ;;  %v1587_v50 = vsel %vm1105_vm11, %v1584_v0, %v1586_v15  ;;  %v1478_v43 = vadd.f32 %v1472_v32, %v4902_v31  ;;  %v1759_v46 = vld [vmem:[#allocation13 + $0xf0] sm:$0xff]  ;;  %1892 = vmatpush.msra.mxu1 %v1875_v45  ;;  %v1758_v32 = vld [vmem:[#allocation13 + $0xe8] sm:$0xff]  ;;  %v1752_v45 = vld [vmem:[#allocation13 + $0xb8] sm:$0xff] }
 0x210   : > { %1571 = vmatmul.f32.gmra.mxu2 %v1539_v40  ;;  %1617 = vmatmul.f32.gmra.mxu3 %v1587_v50  ;;  %v1874_v36 = vld [vmem:[#allocation13 + $0x170] sm:$0xff]  ;;  %v1873_v40 = vld [vmem:[#allocation13 + $0x168] sm:$0xff]  ;;  %v1976_v50 = vld [vmem:[#allocation14 + $0xd8] sm:$0xff] }
 0x211   : > { %v1443_v56 = vadd.f32 %v5013_v9, %v1434_v47  ;;  %v1484_v59 = vmul.f32 0.1, %v1478_v43  ;;  %1893 = vmatpush.msra.mxu1 %v1874_v36  ;;  %v1757_v47 = vld [vmem:[#allocation13 + $0xe0] sm:$0xff]  ;;  %v1867_v36 = vld [vmem:[#allocation13 + $0x138] sm:$0xff] }
 0x213   : > { %v1460_v54 = vrot.slane %v1443_v56, 6  ;;  %v1490_v13 = vmax.f32 %v1478_v43, %v1484_v59  ;;  %1894 = vmatpush.msra.mxu1 %v1873_v40  ;;  %v1740_v43 = vld [vmem:[#allocation13 + $0x60] sm:$0xff]  ;;  %v1756_v56 = vld [vmem:[#allocation13 + $0xd8] sm:$0xff] }
 0x214   : > { %v1872_v59 = vld [vmem:[#allocation13 + $0x160] sm:$0xff] }
 0x215   : > { %v1461_v60 = vsel %vm1450_vm9, %v1458_v26, %v1460_v54  ;;  %v1540_v62 = vrot.slane %v1490_v13, 5  ;;  %v1588_v10 = vrot.slane %v1490_v13, 2  ;;  %v1760_v26 = vld [vmem:[#allocation13 + $0xf8] sm:$0xff]  ;;  %v1975_v54 = vld [vmem:[#allocation14 + $0xd0] sm:$0xff]  ;;  %1895 = vmatpush.msra.mxu1 %v1872_v59  ;;  %v1969_v40 = vld [vmem:[#allocation14 + $0xa0] sm:$0xff] }
 0x216   : > { %v1473_v11 = vsel %vm4912_vm3, %v1461_v60, 0.0  ;;  %1783 = vmatpush.msra.mxu3 %v1760_v26  ;;  %v1755_v60 = vld [vmem:[#allocation13 + $0xd0] sm:$0xff]  ;;  %v1736_v26 = vld [vmem:[#allocation13 + $0x40] sm:$0xff]  ;;  %v1968_v59 = vld [vmem:[#allocation14 + $0x98] sm:$0xff] }
 0x217   : > { %v1541_v63 = vsel %vm1532_vm10, %v1538_v38, %v1540_v62  ;;  %v1589_v0 = vsel %vm1105_vm11, %v1586_v15, %v1588_v10  ;;  %v1479_v22 = vadd.f32 %v1473_v11, %v4927_v53  ;;  %v1742_v38 = vld [vmem:[#allocation13 + $0x70] sm:$0xff]  ;;  %v1978_v15 = vld [vmem:[#allocation14 + $0xe8] sm:$0xff] }
 0x218   : > { %1574 = vmatmul.f32.gmra.mxu2 %v1541_v63  ;;  %1620 = vmatmul.f32.gmra.mxu3 %v1589_v0  ;;  %v1754_v11 = vld [vmem:[#allocation13 + $0xc8] sm:$0xff]  ;;  %v1738_v63 = vld [vmem:[#allocation13 + $0x50] sm:$0xff] }
 0x219   : > { %v1485_v23 = vmul.f32 0.1, %v1479_v22  ;;  %1784 = vmatpush.msra.mxu3 %v1759_v46  ;;  %1830 = vmatpush.msra.mxu0 %v1742_v38  ;;  %v1971_v46 = vld [vmem:[#allocation14 + $0xb0] sm:$0xff]  ;;  %v1735_v38 = vld [vmem:[#allocation13 + $0x38] sm:$0xff] }
 0x21a   : > { %1983 = vmatpush.msrb.mxu2 %v1978_v15  ;;  %v1751_v15 = vld [vmem:[#allocation13 + $0xb0] sm:$0xff] }
 0x21b   : > { %v1491_v9 = vmax.f32 %v1479_v22, %v1485_v23  ;;  %1785 = vmatpush.msra.mxu3 %v1758_v32  ;;  %v1870_v22 = vld [vmem:[#allocation13 + $0x150] sm:$0xff]  ;;  %v1973_v23 = vld [vmem:[#allocation14 + $0xc0] sm:$0xff]  ;;  %v1970_v32 = vld [vmem:[#allocation14 + $0xa8] sm:$0xff] }
 0x21d   : > { %v1542_v24 = vrot.slane %v1491_v9, 5  ;;  %1786 = vmatpush.msra.mxu3 %v1757_v47  ;;  %v1750_v47 = vld [vmem:[#allocation13 + $0xa8] sm:$0xff] }
 0x21f   : > { %v1543_v14 = vsel %vm1532_vm10, %v1540_v62, %v1542_v24  ;;  %1787 = vmatpush.msra.mxu3 %v1756_v56  ;;  %v1974_v62 = vld [vmem:[#allocation14 + $0xc8] sm:$0xff]  ;;  %v1749_v56 = vld [vmem:[#allocation13 + $0xa0] sm:$0xff] }
 0x220   : > { %1577 = vmatmul.f32.gmra.mxu2 %v1543_v14  ;;  %1623 = vmatmul.f32.gmra.mxu3 %v1588_v10  ;;  %v1871_v10 = vld [vmem:[#allocation13 + $0x158] sm:$0xff]  ;;  %v1869_v24 = vld [vmem:[#allocation13 + $0x148] sm:$0xff]  ;;  %v1753_v14 = vld [vmem:[#allocation13 + $0xc0] sm:$0xff] }
 0x221   : > { %1788 = vmatpush.msra.mxu3 %v1755_v60  ;;  %1896 = vmatpush.msra.mxu1 %v1871_v10  ;;  %v1864_v60 = vld [vmem:[#allocation13 + $0x120] sm:$0xff]  ;;  %v1967_v10 = vld [vmem:[#allocation14 + $0x90] sm:$0xff] }
 0x223   : > { %1789 = vmatpush.msra.mxu3 %v1754_v11  ;;  %1897 = vmatpush.msra.mxu1 %v1870_v22  ;;  %v1731_v11 = vld [vmem:[#allocation13 + $0x18] sm:$0xff] }
 0x225   : > { %1898 = vmatpush.msra.mxu1 %v1869_v24  ;;  %1790 = vmatpush.msra.mxu3 %v1753_v14  ;;  %v1730_v24 = vld [vmem:[#allocation13 + $0x10] sm:$0xff] }
 0x226   : > { %v1862_v14 = vld [vmem:[#allocation13 + $0x110] sm:$0xff] }
 0x227   : > { %1899 = vmatpush.msra.mxu1 %v1868_v34  ;;  %1791 = vmatpush.msra.mxu3 %v1752_v45  ;;  %v1729_v34 = vld [vmem:[#allocation13 + $0x8] sm:$0xff] }
 0x228   : > { %1660 = vmatmul.f32.vlgmr.msra.gmra.mxu2 %v5025_v18  ;;  %v1741_v18 = vld [vmem:[#allocation13 + $0x68] sm:$0xff] }
 0x229   : > { %1831 = vmatpush.msra.mxu0 %v1741_v18  ;;  %1900 = vmatpush.msra.mxu1 %v1867_v36  ;;  %v1734_v18 = vld [vmem:[#allocation13 + $0x30] sm:$0xff]  ;;  %v1861_v45 = vld [vmem:[#allocation13 + $0x108] sm:$0xff]  ;;  %v2200_v36 = vld [vmem:[#allocation14 + $0x278] sm:$0xff] }
 0x22a   : > { %1792 = vmatpush.msra.mxu3 %v1751_v15  ;;  %v1860_v15 = vld [vmem:[#allocation13 + $0x100] sm:$0xff] }
 0x22b   : > { %1832 = vmatpush.msra.mxu0 %v1740_v43  ;;  %v1865_v43 = vld [vmem:[#allocation13 + $0x128] sm:$0xff] }
 0x22c   : > { %1793 = vmatpush.msra.mxu3 %v1750_v47  ;;  %v5081_v47 = vld [vmem:[%s5688_s20] ss:$0 sm:$0xff]  ;;  %s5695_s20 = sld [smem:[#allocation66_spill]] }
 0x22e   : > { %1794 = vmatpush.msra.mxu3 %v1749_v56  ;;  %v2199_v56 = vld [vmem:[#allocation14 + $0x270] sm:$0xff] }
 0x230   : > { %1663 = vmatmul.f32.gmra.mxu2 %v1488_v55  ;;  %v1977_v55 = vld [vmem:[#allocation14 + $0xe0] sm:$0xff] }
 0x231   : > { %1984 = vmatpush.msrb.mxu2 %v1977_v55  ;;  %v1866_v55 = vld [vmem:[#allocation13 + $0x130] sm:$0xff] }
 0x232   : > { %1901 = vmatpush.msra.mxu1 %v1866_v55  ;;  %s3339_s1 = scalar_lea.hbm %s5695_s20, %s3599_s4 }
 0x233   : > { %1985 = vmatpush.msrb.mxu2 %v1976_v50  ;;  %v1733_v50 = vld [vmem:[#allocation13 + $0x28] sm:$0xff]  ;;  %s3342_s3 = sshll.u32 %s3339_s1, 4  ;;  %s3343_s3 = int_to_ptr.hbm [resolvable:$true] %s3342_s3 }
 0x234   : > { %1902 = vmatpush.msra.mxu1 %v1865_v43  ;;  %v1963_v43 = vld [vmem:[#allocation14 + $0x78] sm:$0xff]  ;;  %s4179_s24 = sshra.s32 %s3343_s3, 4  ;;  %s4180_s24 = int_to_ptr.hbm [resolvable:$true] %s4179_s24 }
 0x235   : > { %1986 = vmatpush.msrb.mxu2 %v1975_v54  ;;  %v1732_v54 = vld [vmem:[#allocation13 + $0x20] sm:$0xff]  ;;  %s4181_s18 = scalar_lea.hbm %s4180_s24, 16 }
 0x236   : > { %1903 = vmatpush.msra.mxu1 %v1864_v60  ;;  %v1961_v60 = vld [vmem:[#allocation14 + $0x68] sm:$0xff]  ;;  %p4182_p1 = scmp.ne.s32.totalorder %s4180_s24, %s4181_s18 }
 0x237   : > { %1987 = vmatpush.msrb.mxu2 %v1974_v62  ;;  %v1748_v62 = vld [vmem:[#allocation13 + $0x98] sm:$0xff] }
 0x238   : > { %1666 = vmatmul.f32.gmra.mxu2 %v1489_v6  ;;  %1795 = vmatpush.msra.mxu3 %v1748_v62  ;;  %v2197_v62 = vld [vmem:[#allocation14 + $0x260] sm:$0xff]  ;;  %p4183_p3 = pnand %p4182_p1, %p4690_p5 }
 0x239   : > { %1988 = vmatpush.msrb.mxu2 %v1973_v23  ;;  %v1747_v23 = vld [vmem:[#allocation13 + $0x90] sm:$0xff] }
 0x23a   : > { %1796 = vmatpush.msra.mxu3 %v1747_v23  ;;  %p4184_p2 = pneg %p4183_p3 }
 0x23b   : > { %1989 = vmatpush.msrb.mxu2 %v1972_v25  ;;  %v1746_v25 = vld [vmem:[#allocation13 + $0x88] sm:$0xff] }
 0x23c   : > { %1797 = vmatpush.msra.mxu3 %v1746_v25  ;;  %v2196_v25 = vld [vmem:[#allocation14 + $0x258] sm:$0xff] }
 0x23d   : > { %1990 = vmatpush.msrb.mxu2 %v1971_v46  ;;  %v1745_v46 = vld [vmem:[#allocation13 + $0x80] sm:$0xff] }
 0x23e   : > { %1798 = vmatpush.msra.mxu3 %v1745_v46  ;;  %v2124_v46 = vld [vmem:[#allocation14 + $0x1f0] sm:$0xff] }
 0x23f   : > { %1991 = vmatpush.msrb.mxu2 %v1970_v32 }
 0x240   : > { %1669 = vmatmul.f32.gmra.mxu2 %v1490_v13  ;;  %v1739_v13 = vld [vmem:[#allocation13 + $0x58] sm:$0xff]  ;;  %2016 = vmatpush.msrb.mxu3 %v1963_v43  ;;  %v2122_v43 = vld [vmem:[#allocation14 + $0x1e0] sm:$0xff] }
 0x241   : > { %1833 = vmatpush.msra.mxu0 %v1739_v13  ;;  %1992 = vmatpush.msrb.mxu2 %v1969_v40 }
 0x243   : > { %1834 = vmatpush.msra.mxu0 %v1738_v63  ;;  %1993 = vmatpush.msrb.mxu2 %v1968_v59  ;;  %v1863_v63 = vld [vmem:[#allocation13 + $0x118] sm:$0xff]  ;;  %v1962_v59 = vld [vmem:[#allocation14 + $0x70] sm:$0xff] }
 0x244   : > { %1904 = vmatpush.msra.mxu1 %v1863_v63  ;;  %2017 = vmatpush.msrb.mxu3 %v1962_v59 }
 0x245   : > { %1994 = vmatpush.msrb.mxu2 %v1967_v10 }
 0x246   : > { %1905 = vmatpush.msra.mxu1 %v1862_v14  ;;  %2018 = vmatpush.msrb.mxu3 %v1961_v60  ;;  %v2125_v14 = vld [vmem:[#allocation14 + $0x1f8] sm:$0xff] }
 0x247   : > { %v1955_v60 = vld [vmem:[#allocation14 + $0x38] sm:$0xff] }
 0x248   : > { %1672 = vmatmul.f32.gmra.mxu2 %v1491_v9  ;;  %v1737_v9 = vld [vmem:[#allocation13 + $0x48] sm:$0xff]  ;;  %1906 = vmatpush.msra.mxu1 %v1861_v45 }
 0x249   : > { %1835 = vmatpush.msra.mxu0 %v1737_v9  ;;  %v1966_v9 = vld [vmem:[#allocation14 + $0x88] sm:$0xff] }
 0x24a   : > { %1995 = vmatpush.msrb.mxu2 %v1966_v9  ;;  %1907 = vmatpush.msra.mxu1 %v1860_v15  ;;  %v2067_v9 = vld [vmem:[#allocation14 + $0x178] sm:$0xff]  ;;  %v2065_v45 = vld [vmem:[#allocation14 + $0x168] sm:$0xff] }
 0x24b   : > { %1836 = vmatpush.msra.mxu0 %v1736_v26  ;;  %v1965_v26 = vld [vmem:[#allocation14 + $0x80] sm:$0xff]  ;;  %v1957_v15 = vld [vmem:[#allocation14 + $0x48] sm:$0xff] }
 0x24c   : > { %1996 = vmatpush.msrb.mxu2 %v1965_v26  ;;  %v2066_v26 = vld [vmem:[#allocation14 + $0x170] sm:$0xff]  ;;  %2143 = vmatpush.msrb.mxu1 %v2125_v14 }
 0x24d   : > { %1837 = vmatpush.msra.mxu0 %v1735_v38  ;;  %v1728_v38 = vld [vmem:[#allocation13] sm:$0xff]  ;;  %v2120_v14 = vld [vmem:[#allocation14 + $0x1d0] sm:$0xff] }
 0x24e   : > { %2219 = vmatpush.msra.mxu2 %v2200_v36  ;;  %v2123_v36 = vld [vmem:[#allocation14 + $0x1e8] sm:$0xff]  ;;  %2144 = vmatpush.msrb.mxu1 %v2124_v46 }
 0x24f   : > { %1838 = vmatpush.msra.mxu0 %v1734_v18 }
 0x250   : > { %1997 = vmatmul.f32.vlgmr.msrb.gmra.mxu2 %v4871_v20  ;;  %v2198_v20 = vld [vmem:[#allocation14 + $0x268] sm:$0xff]  ;;  %2145 = vmatpush.msrb.mxu1 %v2123_v36 }
 0x251   : > { %1839 = vmatpush.msra.mxu0 %v1733_v50  ;;  %2220 = vmatpush.msra.mxu2 %v2199_v56  ;;  %v2193_v56 = vld [vmem:[#allocation14 + $0x240] sm:$0xff] }
 0x252   : > { %2146 = vmatpush.msrb.mxu1 %v2122_v43 }
 0x253   : > { %1840 = vmatpush.msra.mxu0 %v1732_v54  ;;  %2221 = vmatpush.msra.mxu2 %v2198_v20 }
 0x255   : > { %1841 = vmatpush.msra.mxu0 %v1731_v11  ;;  %2222 = vmatpush.msra.mxu2 %v2197_v62 }
 0x257   : > { %1842 = vmatpush.msra.mxu0 %v1730_v24  ;;  %v1959_v24 = vld [vmem:[#allocation14 + $0x58] sm:$0xff]  ;;  %2223 = vmatpush.msra.mxu2 %v2196_v25 }
 0x258   : > { %2000 = vmatmul.f32.gmra.mxu2 %v4898_v30  ;;  %v1960_v30 = vld [vmem:[#allocation14 + $0x60] sm:$0xff] }
 0x259   : > { %1843 = vmatpush.msra.mxu0 %v1729_v34  ;;  %2019 = vmatpush.msrb.mxu3 %v1960_v30 }
 0x25b   : > { %1844 = vmatpush.msra.mxu0 %v1728_v38  ;;  %2020 = vmatpush.msrb.mxu3 %v1959_v24  ;;  %v2195_v38 = vld [vmem:[#allocation14 + $0x250] sm:$0xff] }
 0x25c   : > { %2224 = vmatpush.msra.mxu2 %v2195_v38 }
 0x25d   : > { %2068 = vmatpush.msrb.mxu0 %v2067_v9 }
 0x25f   : > { %2069 = vmatpush.msrb.mxu0 %v2066_v26  ;;  %v2061_v26 = vld [vmem:[#allocation14 + $0x148] sm:$0xff] }
 0x260   : > { %2003 = vmatmul.f32.gmra.mxu2 %v4923_v52 }
 0x261   : > { %2070 = vmatpush.msrb.mxu0 %v2065_v45 }
 0x268   : > { %2006 = vmatmul.f32.gmra.mxu2 %v4942_v3 }
 0x270   : > { %2009 = vmatmul.f32.gmra.mxu2 %v4959_v8 }
 0x278   : > { %2012 = vmatmul.f32.gmra.mxu2 %v4951_v5 }
 0x283   : > { %v5066_v6 = vpop.f32.mrf.mxu2  ;;  %v1612_v22 = vpop.f32.mrf.mxu3 }
 0x284   : > { %v1613_v55 = vadd.f32 %v1612_v22, %v5066_v6 }
 0x28b   : > { %v5068_v0 = vpop.f32.mrf.mxu2  ;;  %v1615_v18 = vpop.f32.mrf.mxu3 }
 0x28c   : > { %v1616_v10 = vadd.f32 %v1615_v18, %v5068_v0  ;;  %v1958_v0 = vld [vmem:[#allocation14 + $0x50] sm:$0xff] }
 0x28d   : > { %2021 = vmatpush.msrb.mxu3 %v1958_v0 }
 0x28f   : > { %2022 = vmatpush.msrb.mxu3 %v1957_v15 }
 0x293   : > { %v5070_v33 = vpop.f32.mrf.mxu2  ;;  %v1618_v11 = vpop.f32.mrf.mxu3 }
 0x294   : > { %v1619_v59 = vadd.f32 %v1618_v11, %v5070_v33  ;;  %v2062_v33 = vld [vmem:[#allocation14 + $0x150] sm:$0xff]  ;;  %v2192_v11 = vld [vmem:[#allocation14 + $0x238] sm:$0xff] }
 0x29b   : > { %v5072_v13 = vpop.f32.mrf.mxu2 }
 0x2a3   : > { %v5074_v32 = vpop.f32.mrf.mxu2 }
 0x2ab   : > { %v1661_v40 = vpop.f32.mrf.mxu2 }
 0x2ac   : > { %v1676_v50 = vadd.f32 %v1661_v40, %v1613_v55  ;;  %v2064_v55 = vld [vmem:[#allocation14 + $0x160] sm:$0xff]  ;;  %v2194_v40 = vld [vmem:[#allocation14 + $0x248] sm:$0xff] }
 0x2ad   : > { %2225 = vmatpush.msra.mxu2 %v2194_v40  ;;  %2071 = vmatpush.msrb.mxu0 %v2064_v55  ;;  %v2060_v40 = vld [vmem:[#allocation14 + $0x140] sm:$0xff] }
 0x2ae   : > { %v1684_v54 = vadd.f32 %v5081_v47, %v1676_v50  ;;  %v1956_v50 = vld [vmem:[#allocation14 + $0x40] sm:$0xff] }
 0x2af   : > { %2023 = vmatpush.msrb.mxu3 %v1956_v50  ;;  %2226 = vmatpush.msra.mxu2 %v2193_v56 }
 0x2b0   : > { %v1694_v6 = vrot.slane %v1684_v54, 3  ;;  %v2063_v54 = vld [vmem:[#allocation14 + $0x158] sm:$0xff] }
 0x2b1   : > { %2072 = vmatpush.msrb.mxu0 %v2063_v54  ;;  %2024 = vmatpush.msrb.mxu3 %v1955_v60  ;;  %v1952_v54 = vld [vmem:[#allocation14 + $0x20] sm:$0xff] }
 0x2b2   : > { %v1709_v22 = vsel %vm4813_vm4, %v1694_v6, 0.0  ;;  %2227 = vmatpush.msra.mxu2 %v2192_v11 }
 0x2b3   : > { %v1664_v63 = vpop.f32.mrf.mxu2  ;;  %v1715_v52 = vmul.f32 0.1, %v1709_v22  ;;  %2073 = vmatpush.msrb.mxu0 %v2062_v33 }
 0x2b4   : > { %v1677_v23 = vadd.f32 %v1664_v63, %v1616_v10  ;;  %v2121_v63 = vld [vmem:[#allocation14 + $0x1d8] sm:$0xff] }
 0x2b5   : > { %v1721_v62 = vmax.f32 %v1709_v22, %v1715_v52  ;;  %2147 = vmatpush.msrb.mxu1 %v2121_v63  ;;  %v1953_v52 = vld [vmem:[#allocation14 + $0x28] sm:$0xff]  ;;  %2074 = vmatpush.msrb.mxu0 %v2061_v26 }
 0x2b6   : > { %v5090_v34 = vadd.f32 %v5081_v47, %v1677_v23  ;;  %v1621_v23 = vpop.f32.mrf.mxu3 }
 0x2b7   : > { %v1767_v0 = vrot.slane %v1721_v62, 6  ;;  %v1813_v45 = vrot.slane %v1721_v62, 5  ;;  %v1876_v46 = vrot.slane %v1721_v62, 7  ;;  %2148 = vmatpush.msrb.mxu1 %v2120_v14  ;;  %v1622_v3 = vadd.f32 %v1621_v23, %v5072_v13  ;;  %v2059_v13 = vld [vmem:[#allocation14 + $0x138] sm:$0xff]  ;;  %2075 = vmatpush.msrb.mxu0 %v2060_v40  ;;  %v2189_v14 = vld [vmem:[#allocation14 + $0x220] sm:$0xff] }
 0x2b8   : > { %v1695_v18 = vrot.slane %v5090_v34, 3  ;;  %v2191_v34 = vld [vmem:[#allocation14 + $0x230] sm:$0xff]  ;;  %v1951_v23 = vld [vmem:[#allocation14 + $0x18] sm:$0xff] }
 0x2b9   : > { %2228 = vmatpush.msra.mxu2 %v2191_v34  ;;  %2076 = vmatpush.msrb.mxu0 %v2059_v13  ;;  %v2055_v13 = vld [vmem:[#allocation14 + $0x118] sm:$0xff] }
 0x2ba   : > { %v1696_v20 = vsel %vm1376_vm7, %v1694_v6, %v1695_v18  ;;  %v1954_v6 = vld [vmem:[#allocation14 + $0x30] sm:$0xff] }
 0x2bb   : > { %v1710_v10 = vsel %vm4819_vm5, %v1696_v20, 0.0  ;;  %v1667_v30 = vpop.f32.mrf.mxu2  ;;  %2025 = vmatpush.msrb.mxu3 %v1954_v6  ;;  %v2119_v20 = vld [vmem:[#allocation14 + $0x1c8] sm:$0xff]  ;;  %v2117_v6 = vld [vmem:[#allocation14 + $0x1b8] sm:$0xff] }
 0x2bc   : > { %v1716_v9 = vmul.f32 0.1, %v1710_v10  ;;  %v1678_v24 = vadd.f32 %v1667_v30, %v1619_v59  ;;  %2149 = vmatpush.msrb.mxu1 %v2119_v20  ;;  %v2056_v20 = vld [vmem:[#allocation14 + $0x120] sm:$0xff] }
 0x2bd   : > { %2026 = vmatpush.msrb.mxu3 %v1953_v52 }
 0x2be   : > { %v5097_v25 = vmax.f32 %v1710_v10, %v1716_v9  ;;  %v5100_v22 = vadd.f32 %v5081_v47, %v1678_v24  ;;  %v2190_v10 = vld [vmem:[#allocation14 + $0x228] sm:$0xff]  ;;  %v2058_v9 = vld [vmem:[#allocation14 + $0x130] sm:$0xff]  ;;  %v1624_v24 = vpop.f32.mrf.mxu3 }
 0x2bf   : > { %2027 = vmatpush.msrb.mxu3 %v1952_v54  ;;  %2229 = vmatpush.msra.mxu2 %v2190_v10  ;;  %v2114_v10 = vld [vmem:[#allocation14 + $0x1a0] sm:$0xff] }
 0x2c0   : > { %v1697_v38 = vrot.slane %v5100_v22, 3  ;;  %v1768_v15 = vrot.slane %v5097_v25, 6  ;;  %v1814_v36 = vrot.slane %v5097_v25, 5  ;;  %v1877_v55 = vrot.slane %v5097_v25, 7  ;;  %v1950_v25 = vld [vmem:[#allocation14 + $0x10] sm:$0xff]  ;;  %2077 = vmatpush.msrb.mxu0 %v2058_v9 }
 0x2c1   : > { %2028 = vmatpush.msrb.mxu3 %v1951_v23  ;;  %2230 = vmatpush.msra.mxu2 %v2189_v14 }
 0x2c2   : > { %v1698_v50 = vsel %vm1376_vm7, %v1695_v18, %v1697_v38  ;;  %v1769_v43 = vsel %vm1450_vm9, %v1767_v0, %v1768_v15  ;;  %v1815_v56 = vsel %vm1532_vm10, %v1813_v45, %v1814_v36  ;;  %v1878_v59 = vsel %vm1179_vm6, %v1876_v46, %v1877_v55  ;;  %v2118_v18 = vld [vmem:[#allocation14 + $0x1c0] sm:$0xff]  ;;  %v2057_v46 = vld [vmem:[#allocation14 + $0x128] sm:$0xff] }
 0x2c3   : > { %v1711_v60 = vsel %vm4835_vm8, %v1698_v50, 0.0  ;;  %v1670_v62 = vpop.f32.mrf.mxu2  ;;  %1799 = vmatmul.f32.vlgmr.msra.gmra.mxu3 %v1769_v43  ;;  %1845 = vmatmul.f32.vlgmr.msra.gmra.mxu0 %v1815_v56  ;;  %v1625_v45 = vadd.f32 %v1624_v24, %v5074_v32  ;;  %v2116_v50 = vld [vmem:[#allocation14 + $0x1b0] sm:$0xff]  ;;  %v2188_v43 = vld [vmem:[#allocation14 + $0x218] sm:$0xff]  ;;  %v1949_v32 = vld [vmem:[#allocation14 + $0x8] sm:$0xff] }
 0x2c4   : > { %v1717_v30 = vmul.f32 0.1, %v1711_v60  ;;  %v1679_v63 = vadd.f32 %v1670_v62, %v1622_v3  ;;  %1908 = vmatmul.f32.vlgmr.msra.gmra.mxu1 %v1878_v59  ;;  %2029 = vmatpush.msrb.mxu3 %v1950_v25  ;;  %v2054_v24 = vld [vmem:[#allocation14 + $0x110] sm:$0xff]  ;;  %v2113_v25 = vld [vmem:[#allocation14 + $0x198] sm:$0xff] }
 0x2c5   : > { %2150 = vmatpush.msrb.mxu1 %v2118_v18  ;;  %2078 = vmatpush.msrb.mxu0 %v2057_v46 }
 0x2c6   : > { %v5115_v33 = vadd.f32 %v5081_v47, %v1679_v63  ;;  %v5117_v11 = vmax.f32 %v1711_v60, %v1717_v30  ;;  %2231 = vmatpush.msra.mxu2 %v2188_v43  ;;  %2030 = vmatpush.msrb.mxu3 %v1949_v32  ;;  %v2186_v30 = vld [vmem:[#allocation14 + $0x208] sm:$0xff] }
 0x2c7   : > { %2151 = vmatpush.msrb.mxu1 %v2117_v6  ;;  %2079 = vmatpush.msrb.mxu0 %v2056_v20  ;;  %v2111_v43 = vld [vmem:[#allocation14 + $0x188] sm:$0xff] }
 0x2c8   : > { %v1699_v22 = vrot.slane %v5115_v33, 3  ;;  %v1770_v26 = vrot.slane %v5117_v11, 6  ;;  %v1816_v34 = vrot.slane %v5117_v11, 5  ;;  %v1879_v0 = vrot.slane %v5117_v11, 7 }
 0x2c9   : > { %2152 = vmatpush.msrb.mxu1 %v2116_v50  ;;  %2080 = vmatpush.msrb.mxu0 %v2055_v13  ;;  %v2203_v33 = vrot.slane %v4844_v58, 4 }
 0x2ca   : > { %v1700_v52 = vsel %vm1376_vm7, %v1697_v38, %v1699_v22  ;;  %v1771_v8 = vsel %vm1450_vm9, %v1768_v15, %v1770_v26  ;;  %v1817_v3 = vsel %vm1532_vm10, %v1814_v36, %v1816_v34  ;;  %v1880_v40 = vsel %vm1179_vm6, %v1877_v55, %v1879_v0  ;;  %v2115_v38 = vld [vmem:[#allocation14 + $0x1a8] sm:$0xff]  ;;  %v2187_v15 = vld [vmem:[#allocation14 + $0x210] sm:$0xff]  ;;  %v1948_v36 = vld [vmem:[#allocation14] sm:$0xff] }
 0x2cb   : > { %v1712_v56 = vsel %vm4859_vm13, %v1700_v52, 0.0  ;;  %v1673_v59 = vpop.f32.mrf.mxu2  ;;  %1801 = vmatmul.f32.gmra.mxu3 %v1771_v8  ;;  %1847 = vmatmul.f32.gmra.mxu0 %v1817_v3  ;;  %v2053_v8 = vld [vmem:[#allocation14 + $0x108] sm:$0xff] }
 0x2cc   : > { %v1718_v54 = vmul.f32 0.1, %v1712_v56  ;;  %v1680_v60 = vadd.f32 %v1673_v59, %v1625_v45  ;;  %1910 = vmatmul.f32.gmra.mxu1 %v1880_v40  ;;  %2232 = vmatpush.msra.mxu2 %v2187_v15  ;;  %v2185_v45 = vld [vmem:[#allocation14 + $0x200] sm:$0xff] }
 0x2cd   : > { %2153 = vmatpush.msrb.mxu1 %v2115_v38  ;;  %2031 = vmatpush.msrb.mxu3 %v1948_v36  ;;  %v2110_v15 = vld [vmem:[#allocation14 + $0x180] sm:$0xff] }
 0x2ce   : > { %v1688_v55 = vadd.f32 %v5081_v47, %v1680_v60  ;;  %v1724_v62 = vmax.f32 %v1712_v56, %v1718_v54  ;;  %v2202_v47 = vrot.slane %v4841_v57, 4  ;;  %2233 = vmatpush.msra.mxu2 %v2186_v30  ;;  %2081 = vmatpush.msrb.mxu0 %v2054_v24 }
 0x2cf   : > { %2154 = vmatpush.msrb.mxu1 %v2114_v10  ;;  %v2207_v10 = vrot.slane %v4895_v29, 4 }
 0x2d0   : > { %v1701_v63 = vrot.slane %v1688_v55, 3  ;;  %v1772_v18 = vrot.slane %v1724_v62, 6  ;;  %v1818_v23 = vrot.slane %v1724_v62, 5  ;;  %v1881_v9 = vrot.slane %v1724_v62, 7  ;;  %2234 = vmatpush.msra.mxu2 %v2185_v45  ;;  %2082 = vmatpush.msrb.mxu0 %v2053_v8  ;;  %v2343_v8 = vld [vmem:[#allocation16 + $0xf8] sm:$0xff] }
 0x2d1   : > { %2155 = vmatpush.msrb.mxu1 %v2113_v25  ;;  %v2204_v3 = vsel %vm2201_vm14, %v2202_v47, %v2203_v33  ;;  %v2211_v25 = vrot.slane %v4939_v2, 4  ;;  %v2131_v45 = vrot.slane %v4895_v29, 3  ;;  %2366 = vmatpush.msra.mxu3 %v2343_v8  ;;  %v2452_v8 = vld [vmem:[#allocation16 + $0x128] sm:$0xff] }
 0x2d2   : > { %v1702_v11 = vsel %vm1376_vm7, %v1699_v22, %v1701_v63  ;;  %v1773_v6 = vsel %vm1450_vm9, %v1770_v26, %v1772_v18  ;;  %v1819_v14 = vsel %vm1532_vm10, %v1816_v34, %v1818_v23  ;;  %v1714_v46 = vsel %vm4912_vm3, %v1701_v63, 0.0  ;;  %v2112_v26 = vld [vmem:[#allocation14 + $0x190] sm:$0xff]  ;;  %v2052_v34 = vld [vmem:[#allocation14 + $0x100] sm:$0xff]  ;;  %2235 = vmatmul.f32.vlgmr.msra.gmra.mxu2 %v2204_v3 }
 0x2d3   : > { %v1713_v5 = vsel %vm4886_vm0, %v1702_v11, 0.0  ;;  %1804 = vmatmul.f32.gmra.mxu3 %v1773_v6  ;;  %1850 = vmatmul.f32.gmra.mxu0 %v1819_v14  ;;  %v1882_v52 = vsel %vm1179_vm6, %v1879_v0, %v1881_v9  ;;  %v1720_v40 = vmul.f32 0.1, %v1714_v46  ;;  %v2205_v0 = vrot.slane %v4868_v19, 4  ;;  %v2325_v3 = vld [vmem:[#allocation16 + $0x70] sm:$0xff] }
 0x2d4   : > { %v1719_v22 = vmul.f32 0.1, %v1713_v5  ;;  %1913 = vmatmul.f32.gmra.mxu1 %v1882_v52  ;;  %2083 = vmatpush.msrb.mxu0 %v2052_v34  ;;  %v2129_v11 = vrot.slane %v4868_v19, 3  ;;  %v2326_v34 = vld [vmem:[#allocation16 + $0x78] sm:$0xff] }
 0x2d5   : > { %2156 = vmatpush.msrb.mxu1 %v2112_v26  ;;  %v1726_v20 = vmax.f32 %v1714_v46, %v1720_v40  ;;  %v2206_v36 = vsel %vm2201_vm14, %v2203_v33, %v2205_v0  ;;  %v2208_v24 = vsel %vm2201_vm14, %v2205_v0, %v2207_v10  ;;  %v2209_v33 = vrot.slane %v4920_v49, 4  ;;  %v2342_v26 = vld [vmem:[#allocation16 + $0xf0] sm:$0xff]  ;;  %v2340_v40 = vld [vmem:[#allocation16 + $0xe0] sm:$0xff] }
 0x2d6   : > { %v1725_v50 = vmax.f32 %v1713_v5, %v1719_v22  ;;  %v2133_v5 = vrot.slane %v4920_v49, 3  ;;  %2367 = vmatpush.msra.mxu3 %v2342_v26  ;;  %2414 = vmatpush.msra.mxu0 %v2326_v34  ;;  %v2338_v0 = vld [vmem:[#allocation16 + $0xd0] sm:$0xff]  ;;  %v2315_v26 = vld [vmem:[#allocation16 + $0x20] sm:$0xff]  ;;  %v2331_v34 = vld [vmem:[#allocation16 + $0x98] sm:$0xff] }
 0x2d7   : > { %2157 = vmatpush.msrb.mxu1 %v2111_v43  ;;  %v1776_v55 = vrot.slane %v1726_v20, 6  ;;  %v1822_v62 = vrot.slane %v1726_v20, 5  ;;  %v1885_v13 = vrot.slane %v1726_v20, 7  ;;  %v2210_v6 = vsel %vm2201_vm14, %v2207_v10, %v2209_v33  ;;  %v2462_v43 = vld [vmem:[#allocation16 + $0x178] sm:$0xff]  ;;  %v2461_v20 = vld [vmem:[#allocation16 + $0x170] sm:$0xff] }
 0x2d8   : > { %v1774_v56 = vrot.slane %v1725_v50, 6  ;;  %v1820_v59 = vrot.slane %v1725_v50, 5  ;;  %v1883_v32 = vrot.slane %v1725_v50, 7  ;;  %v2324_v50 = vld [vmem:[#allocation16 + $0x68] sm:$0xff]  ;;  %2415 = vmatpush.msra.mxu0 %v2325_v3  ;;  %v2314_v3 = vld [vmem:[#allocation16 + $0x18] sm:$0xff] }
 0x2d9   : > { %2158 = vmatpush.msrb.mxu1 %v2110_v15  ;;  %v2322_v15 = vld [vmem:[#allocation16 + $0x58] sm:$0xff] }
 0x2da   : > { %v1775_v54 = vsel %vm1450_vm9, %v1772_v18, %v1774_v56  ;;  %v1821_v60 = vsel %vm1532_vm10, %v1818_v23, %v1820_v59  ;;  %v1884_v38 = vsel %vm1179_vm6, %v1881_v9, %v1883_v32  ;;  %2238 = vmatmul.f32.gmra.mxu2 %v2206_v36  ;;  %v1777_v30 = vsel %vm1450_vm9, %v1774_v56, %v1776_v55  ;;  %v2339_v56 = vld [vmem:[#allocation16 + $0xd8] sm:$0xff]  ;;  %v2460_v36 = vld [vmem:[#allocation16 + $0x168] sm:$0xff]  ;;  %v2336_v55 = vld [vmem:[#allocation16 + $0xc0] sm:$0xff] }
 0x2db   : > { %1807 = vmatmul.f32.gmra.mxu3 %v1775_v54  ;;  %1853 = vmatmul.f32.gmra.mxu0 %v1821_v60  ;;  %v1823_v63 = vsel %vm1532_vm10, %v1820_v59, %v1822_v62  ;;  %v1886_v18 = vsel %vm1179_vm6, %v1883_v32, %v1885_v13  ;;  %v2126_v23 = vrot.slane %v4841_v57, 3  ;;  %v2127_v9 = vrot.slane %v4844_v58, 3  ;;  %v2323_v59 = vld [vmem:[#allocation16 + $0x60] sm:$0xff]  ;;  %v2321_v62 = vld [vmem:[#allocation16 + $0x50] sm:$0xff] }
 0x2dc   : > { %1916 = vmatmul.f32.gmra.mxu1 %v1884_v38  ;;  %2416 = vmatpush.msra.mxu0 %v2324_v50  ;;  %v2337_v38 = vld [vmem:[#allocation16 + $0xc8] sm:$0xff]  ;;  %v2459_v13 = vld [vmem:[#allocation16 + $0x160] sm:$0xff] }
 0x2dd   : > { %v2128_v47 = vsel %vm1376_vm7, %v2126_v23, %v2127_v9  ;;  %v2130_v14 = vsel %vm1376_vm7, %v2127_v9, %v2129_v11  ;;  %2479 = vmatpush.msra.mxu1 %v2462_v43  ;;  %v2330_v43 = vld [vmem:[#allocation16 + $0x90] sm:$0xff] }
 0x2de   : > { %2417 = vmatpush.msra.mxu0 %v2323_v59  ;;  %v2449_v59 = vld [vmem:[#allocation16 + $0x110] sm:$0xff] }
 0x2df   : > { %2480 = vmatpush.msra.mxu1 %v2461_v20 }
 0x2e0   : > { %2418 = vmatpush.msra.mxu0 %v2322_v15  ;;  %v2329_v15 = vld [vmem:[#allocation16 + $0x88] sm:$0xff] }
 0x2e1   : > { %2481 = vmatpush.msra.mxu1 %v2460_v36  ;;  %v2312_v36 = vld [vmem:[#allocation16 + $0x8] sm:$0xff] }
 0x2e2   : > { %2241 = vmatmul.f32.gmra.mxu2 %v2208_v24  ;;  %2419 = vmatpush.msra.mxu0 %v2321_v62  ;;  %v2320_v24 = vld [vmem:[#allocation16 + $0x48] sm:$0xff]  ;;  %v2328_v62 = vld [vmem:[#allocation16 + $0x80] sm:$0xff] }
 0x2e3   : > { %1810 = vmatmul.f32.gmra.mxu3 %v1777_v30  ;;  %1856 = vmatmul.f32.gmra.mxu0 %v1823_v63  ;;  %v2458_v30 = vld [vmem:[#allocation16 + $0x158] sm:$0xff] }
 0x2e4   : > { %1919 = vmatmul.f32.gmra.mxu1 %v1886_v18  ;;  %v2457_v18 = vld [vmem:[#allocation16 + $0x150] sm:$0xff]  ;;  %2420 = vmatpush.msra.mxu0 %v2320_v24 }
 0x2e5   : > { %2482 = vmatpush.msra.mxu1 %v2459_v13  ;;  %v2311_v13 = vld [vmem:[#allocation16] sm:$0xff] }
 0x2e7   : > { %2483 = vmatpush.msra.mxu1 %v2458_v30  ;;  %v2447_v30 = vld [vmem:[#allocation16 + $0x100] sm:$0xff] }
 0x2e9   : > { %2484 = vmatpush.msra.mxu1 %v2457_v18 }
 0x2ea   : > { %2244 = vmatmul.f32.gmra.mxu2 %v2210_v6  ;;  %v2335_v6 = vld [vmem:[#allocation16 + $0xb8] sm:$0xff] }
 0x2eb   : > { %2032 = vmatmul.f32.vlgmr.msrb.gmra.mxu3 %v4841_v57  ;;  %2084 = vmatmul.f32.vlgmr.msrb.gmra.mxu0 %v4865_v17  ;;  %v2212_v57 = vsel %vm2201_vm14, %v2209_v33, %v2211_v25  ;;  %v2132_v17 = vsel %vm1376_vm7, %v2129_v11, %v2131_v45  ;;  %v2319_v33 = vld [vmem:[#allocation16 + $0x40] sm:$0xff] }
 0x2ec   : > { %2159 = vmatmul.f32.vlgmr.msrb.gmra.mxu1 %v2128_v47  ;;  %v2456_v47 = vld [vmem:[#allocation16 + $0x148] sm:$0xff]  ;;  %v2455_v11 = vld [vmem:[#allocation16 + $0x140] sm:$0xff]  ;;  %2421 = vmatpush.msra.mxu0 %v2319_v33 }
 0x2ed   : > { %2485 = vmatpush.msra.mxu1 %v2456_v47 }
 0x2ef   : > { %2486 = vmatpush.msra.mxu1 %v2455_v11 }
 0x2f2   : > { %2247 = vmatmul.f32.gmra.mxu2 %v2212_v57 }
 0x2f3   : > { %2035 = vmatmul.f32.gmra.mxu3 %v4844_v58  ;;  %2087 = vmatmul.f32.gmra.mxu0 %v4892_v28  ;;  %v2134_v58 = vsel %vm1376_vm7, %v2131_v45, %v2133_v5  ;;  %v2135_v28 = vrot.slane %v4939_v2, 3 }
 0x2f4   : > { %2162 = vmatmul.f32.gmra.mxu1 %v2130_v14  ;;  %v2318_v14 = vld [vmem:[#allocation16 + $0x38] sm:$0xff] }
 0x2f5   : > { %v2136_v46 = vsel %vm1376_vm7, %v2133_v5, %v2135_v28  ;;  %2422 = vmatpush.msra.mxu0 %v2318_v14  ;;  %v2333_v5 = vld [vmem:[#allocation16 + $0xa8] sm:$0xff] }
 0x2fa   : > { %2250 = vmatmul.f32.gmra.mxu2 %v2211_v25  ;;  %v2454_v25 = vld [vmem:[#allocation16 + $0x138] sm:$0xff] }
 0x2fb   : > { %2038 = vmatmul.f32.gmra.mxu3 %v4868_v19  ;;  %2090 = vmatmul.f32.gmra.mxu0 %v4917_v48  ;;  %v5181_v19 = vpop.f32.mrf.mxu2 }
 0x2fc   : > { %2165 = vmatmul.f32.gmra.mxu1 %v2132_v17  ;;  %v2334_v17 = vld [vmem:[#allocation16 + $0xb0] sm:$0xff] }
 0x2fd   : > { %2487 = vmatpush.msra.mxu1 %v2454_v25  ;;  %v5215_v25 = vld [vmem:[%s5689_s8] ss:$0 sm:$0xff]  ;;  %s5696_s8 = smov %s5695_s20 }
 0x2fe   : > { %s4185_s13 = scalar_lea.hbm %s5696_s8, 96  ;;  %p4186_p4 = scmp.lt.s32.totalorder %s4180_s24, %s5696_s8 }
 0x2ff   : > { %p4187_p6 = scmp.lt.s32.totalorder %s4185_s13, %s4181_s18 }
 0x301   : > { %p4188_p10 = por %p4187_p6, %p4186_p4 }
 0x303   : > { %2041 = vmatmul.f32.gmra.mxu3 %v4895_v29  ;;  %2093 = vmatmul.f32.gmra.mxu0 %v4936_v1  ;;  %v5183_v29 = vpop.f32.mrf.mxu2  ;;  %p4189_p11 = pnand %p4188_p10, %p4184_p2 }
 0x304   : > { %2168 = vmatmul.f32.gmra.mxu1 %v2134_v58  ;;  %v2317_v58 = vld [vmem:[#allocation16 + $0x30] sm:$0xff] }
 0x305   : > { %2423 = vmatpush.msra.mxu0 %v2317_v58  ;;  %v2602_v58 = vld [vmem:[#allocation16 + $0x278] sm:$0xff] }
 0x30b   : > { %2044 = vmatmul.f32.gmra.mxu3 %v4920_v49  ;;  %2096 = vmatmul.f32.gmra.mxu0 %v4955_v7  ;;  %v5185_v1 = vpop.f32.mrf.mxu2 }
 0x30c   : > { %2171 = vmatmul.f32.gmra.mxu1 %v2136_v46 }
 0x313   : > { %2047 = vmatmul.f32.gmra.mxu3 %v4939_v2  ;;  %2099 = vmatmul.f32.gmra.mxu0 %v4948_v4  ;;  %v2341_v2 = vld [vmem:[#allocation16 + $0xe8] sm:$0xff]  ;;  %v5191_v4 = vpop.f32.mrf.mxu2 }
 0x314   : > { %2174 = vmatmul.f32.gmra.mxu1 %v2135_v28  ;;  %2368 = vmatpush.msra.mxu3 %v2341_v2  ;;  %v2453_v28 = vld [vmem:[#allocation16 + $0x130] sm:$0xff]  ;;  %v2451_v2 = vld [vmem:[#allocation16 + $0x120] sm:$0xff] }
 0x315   : > { %2488 = vmatpush.msra.mxu1 %v2453_v28 }
 0x316   : > { %2369 = vmatpush.msra.mxu3 %v2340_v40  ;;  %v2450_v40 = vld [vmem:[#allocation16 + $0x118] sm:$0xff] }
 0x317   : > { %2489 = vmatpush.msra.mxu1 %v2452_v8  ;;  %v2601_v8 = vld [vmem:[#allocation16 + $0x270] sm:$0xff] }
 0x318   : > { %2370 = vmatpush.msra.mxu3 %v2339_v56  ;;  %v2313_v56 = vld [vmem:[#allocation16 + $0x10] sm:$0xff] }
 0x319   : > { %2490 = vmatpush.msra.mxu1 %v2451_v2 }
 0x31a   : > { %2371 = vmatpush.msra.mxu3 %v2338_v0 }
 0x31b   : > { %v5199_v10 = vpop.f32.mrf.mxu2  ;;  %2491 = vmatpush.msra.mxu1 %v2450_v40 }
 0x31c   : > { %2372 = vmatpush.msra.mxu3 %v2337_v38 }
 0x31d   : > { %2492 = vmatpush.msra.mxu1 %v2449_v59 }
 0x31e   : > { %2373 = vmatpush.msra.mxu3 %v2336_v55  ;;  %v2448_v55 = vld [vmem:[#allocation16 + $0x108] sm:$0xff] }
 0x31f   : > { %2493 = vmatpush.msra.mxu1 %v2448_v55  ;;  %v2527_v55 = vld [vmem:[#allocation16 + $0x1d0] sm:$0xff] }
 0x320   : > { %2374 = vmatpush.msra.mxu3 %v2335_v6 }
 0x321   : > { %2494 = vmatpush.msra.mxu1 %v2447_v30 }
 0x322   : > { %2375 = vmatpush.msra.mxu3 %v2334_v17 }
 0x323   : > { %v5209_v57 = vpop.f32.mrf.mxu2 }
 0x324   : > { %2376 = vmatpush.msra.mxu3 %v2333_v5  ;;  %v2532_v5 = vld [vmem:[#allocation16 + $0x1f8] sm:$0xff] }
 0x340   : > { %v1846_v48 = vpop.f32.mrf.mxu0 }
 0x341   : > { %v1909_v52 = vpop.f32.mrf.mxu1 }
 0x342   : > { %v2316_v52 = vld [vmem:[#allocation16 + $0x28] sm:$0xff] }
 0x343   : > { %2424 = vmatpush.msra.mxu0 %v2316_v52  ;;  %v2530_v52 = vld [vmem:[#allocation16 + $0x1e8] sm:$0xff] }
 0x345   : > { %2425 = vmatpush.msra.mxu0 %v2315_v26 }
 0x346   : > { %v1800_v22 = vpop.f32.mrf.mxu3 }
 0x347   : > { %v2332_v22 = vld [vmem:[#allocation16 + $0xa0] sm:$0xff]  ;;  %2426 = vmatpush.msra.mxu0 %v2314_v3 }
 0x348   : > { %v5187_v49 = vpop.f32.mrf.mxu0  ;;  %2377 = vmatpush.msra.mxu3 %v2332_v22 }
 0x349   : > { %v5189_v7 = vpop.f32.mrf.mxu1  ;;  %2427 = vmatpush.msra.mxu0 %v2313_v56 }
 0x34a   : > { %2378 = vmatpush.msra.mxu3 %v2331_v34  ;;  %v2600_v34 = vld [vmem:[#allocation16 + $0x268] sm:$0xff] }
 0x34b   : > { %2428 = vmatpush.msra.mxu0 %v2312_v36 }
 0x34c   : > { %2379 = vmatpush.msra.mxu3 %v2330_v43  ;;  %v2599_v43 = vld [vmem:[#allocation16 + $0x260] sm:$0xff] }
 0x34d   : > { %2429 = vmatpush.msra.mxu0 %v2311_v13  ;;  %v2597_v13 = vld [vmem:[#allocation16 + $0x250] sm:$0xff] }
 0x34e   : > { %v5193_v32 = vpop.f32.mrf.mxu3  ;;  %2380 = vmatpush.msra.mxu3 %v2329_v15 }
 0x34f   : > { %2619 = vmatpush.msrb.mxu0 %v2602_v58 }
 0x350   : > { %v5195_v54 = vpop.f32.mrf.mxu0  ;;  %2381 = vmatpush.msra.mxu3 %v2328_v62  ;;  %v2526_v62 = vld [vmem:[#allocation16 + $0x1c8] sm:$0xff] }
 0x351   : > { %v5197_v60 = vpop.f32.mrf.mxu1  ;;  %2620 = vmatpush.msrb.mxu0 %v2601_v8 }
 0x352   : > { %2549 = vmatpush.msrb.mxu3 %v2532_v5 }
 0x353   : > { %2621 = vmatpush.msrb.mxu0 %v2600_v34  ;;  %v2523_v34 = vld [vmem:[#allocation16 + $0x1b0] sm:$0xff] }
 0x355   : > { %v2236_v20 = vpop.f32.mrf.mxu2  ;;  %2622 = vmatpush.msrb.mxu0 %v2599_v43 }
 0x356   : > { %v5201_v63 = vpop.f32.mrf.mxu3 }
 0x358   : > { %v5203_v23 = vpop.f32.mrf.mxu0 }
 0x359   : > { %v5205_v9 = vpop.f32.mrf.mxu1 }
 0x35d   : > { %v2239_v6 = vpop.f32.mrf.mxu2 }
 0x35e   : > { %v5207_v45 = vpop.f32.mrf.mxu3 }
 0x360   : > { %v1857_v46 = vpop.f32.mrf.mxu0 }
 0x361   : > { %v1920_v48 = vpop.f32.mrf.mxu1 }
 0x362   : > { %v2531_v48 = vld [vmem:[#allocation16 + $0x1f0] sm:$0xff] }
 0x363   : > { %2550 = vmatpush.msrb.mxu3 %v2531_v48  ;;  %v2594_v48 = vld [vmem:[#allocation16 + $0x238] sm:$0xff] }
 0x365   : > { %2551 = vmatpush.msrb.mxu3 %v2530_v52  ;;  %v2242_v56 = vpop.f32.mrf.mxu2 }
 0x366   : > { %v1811_v50 = vpop.f32.mrf.mxu3 }
 0x367   : > { %v2529_v50 = vld [vmem:[#allocation16 + $0x1e0] sm:$0xff] }
 0x368   : > { %v2085_v0 = vpop.f32.mrf.mxu0  ;;  %2552 = vmatpush.msrb.mxu3 %v2529_v50 }
 0x369   : > { %v2160_v38 = vpop.f32.mrf.mxu1 }
 0x36d   : > { %v2245_v8 = vpop.f32.mrf.mxu2 }
 0x36e   : > { %v2033_v18 = vpop.f32.mrf.mxu3 }
 0x36f   : > { %v2034_v24 = vadd.f32 %v2033_v18, %v5181_v19 }
 0x370   : > { %v2088_v47 = vpop.f32.mrf.mxu0 }
 0x371   : > { %v2103_v33 = vadd.f32 %v2085_v0, %v2034_v24  ;;  %v2163_v11 = vpop.f32.mrf.mxu1  ;;  %v2528_v0 = vld [vmem:[#allocation16 + $0x1d8] sm:$0xff] }
 0x372   : > { %2553 = vmatpush.msrb.mxu3 %v2528_v0 }
 0x373   : > { %v2178_v14 = vadd.f32 %v2160_v38, %v2103_v33 }
 0x374   : > { %2554 = vmatpush.msrb.mxu3 %v2527_v55 }
 0x375   : > { %v2254_v17 = vadd.f32 %v2236_v20, %v2178_v14  ;;  %v2598_v20 = vld [vmem:[#allocation16 + $0x258] sm:$0xff]  ;;  %v2525_v14 = vld [vmem:[#allocation16 + $0x1c0] sm:$0xff] }
 0x376   : > { %v2036_v28 = vpop.f32.mrf.mxu3  ;;  %2623 = vmatpush.msrb.mxu0 %v2598_v20  ;;  %2555 = vmatpush.msrb.mxu3 %v2526_v62 }
 0x377   : > { %v2263_v46 = vadd.f32 %v5215_v25, %v2254_v17  ;;  %v2037_v19 = vadd.f32 %v2036_v28, %v5183_v29  ;;  %v2595_v17 = vld [vmem:[#allocation16 + $0x240] sm:$0xff] }
 0x378   : > { %v2091_v22 = vpop.f32.mrf.mxu0  ;;  %2624 = vmatpush.msrb.mxu0 %v2597_v13  ;;  %2556 = vmatpush.msrb.mxu3 %v2525_v14 }
 0x379   : > { %v2275_v26 = vrot.slane %v2263_v46, 6  ;;  %v2104_v2 = vadd.f32 %v2088_v47, %v2037_v19  ;;  %v2166_v3 = vpop.f32.mrf.mxu1  ;;  %v2596_v47 = vld [vmem:[#allocation16 + $0x248] sm:$0xff]  ;;  %v2524_v19 = vld [vmem:[#allocation16 + $0x1b8] sm:$0xff] }
 0x37a   : > { %2625 = vmatpush.msrb.mxu0 %v2596_v47  ;;  %2557 = vmatpush.msrb.mxu3 %v2524_v19 }
 0x37b   : > { %v2179_v40 = vadd.f32 %v2163_v11, %v2104_v2  ;;  %v2292_v29 = vsel %vm4813_vm4, %v2275_v26, 0.0 }
 0x37c   : > { %v2298_v30 = vmul.f32 0.1, %v2292_v29  ;;  %2626 = vmatpush.msrb.mxu0 %v2595_v17  ;;  %2558 = vmatpush.msrb.mxu3 %v2523_v34 }
 0x37d   : > { %v2255_v59 = vadd.f32 %v2239_v6, %v2179_v40  ;;  %v2593_v40 = vld [vmem:[#allocation16 + $0x230] sm:$0xff] }
 0x37e   : > { %v2039_v38 = vpop.f32.mrf.mxu3  ;;  %v5224_v5 = vmax.f32 %v2292_v29, %v2298_v30  ;;  %2627 = vmatpush.msrb.mxu0 %v2594_v48  ;;  %v2591_v30 = vld [vmem:[#allocation16 + $0x220] sm:$0xff]  ;;  %v2589_v48 = vld [vmem:[#allocation16 + $0x210] sm:$0xff] }
 0x37f   : > { %v2264_v15 = vadd.f32 %v5215_v25, %v2255_v59  ;;  %v2040_v36 = vadd.f32 %v2039_v38, %v5185_v1 }
 0x380   : > { %v2094_v33 = vpop.f32.mrf.mxu0  ;;  %v2350_v50 = vrot.slane %v5224_v5, 3  ;;  %v2398_v43 = vrot.slane %v5224_v5, 2  ;;  %2628 = vmatpush.msrb.mxu0 %v2593_v40  ;;  %v2463_v38 = vrot.slane %v5224_v5, 4 }
 0x381   : > { %v2276_v18 = vrot.slane %v2264_v15, 6  ;;  %v2105_v24 = vadd.f32 %v2091_v22, %v2040_v36  ;;  %v2169_v58 = vpop.f32.mrf.mxu1  ;;  %v2521_v15 = vld [vmem:[#allocation16 + $0x1a0] sm:$0xff] }
 0x383   : > { %v2277_v11 = vsel %vm1450_vm9, %v2275_v26, %v2276_v18  ;;  %v2180_v6 = vadd.f32 %v2166_v3, %v2105_v24  ;;  %v2522_v3 = vld [vmem:[#allocation16 + $0x1a8] sm:$0xff] }
 0x384   : > { %v2293_v1 = vsel %vm4819_vm5, %v2277_v11, 0.0  ;;  %2559 = vmatpush.msrb.mxu3 %v2522_v3  ;;  %v2520_v11 = vld [vmem:[#allocation16 + $0x198] sm:$0xff] }
 0x385   : > { %v2299_v28 = vmul.f32 0.1, %v2293_v1  ;;  %v2256_v46 = vadd.f32 %v2242_v56, %v2180_v6  ;;  %v2592_v56 = vld [vmem:[#allocation16 + $0x228] sm:$0xff] }
 0x386   : > { %v2042_v52 = vpop.f32.mrf.mxu3  ;;  %2629 = vmatpush.msrb.mxu0 %v2592_v56  ;;  %2560 = vmatpush.msrb.mxu3 %v2521_v15 }
 0x387   : > { %v5228_v22 = vmax.f32 %v2293_v1, %v2299_v28  ;;  %v2265_v26 = vadd.f32 %v5215_v25, %v2256_v46  ;;  %v2043_v2 = vadd.f32 %v2042_v52, %v5191_v4  ;;  %v2248_v52 = vpop.f32.mrf.mxu2 }
 0x388   : > { %2630 = vmatpush.msrb.mxu0 %v2591_v30  ;;  %2561 = vmatpush.msrb.mxu3 %v2520_v11 }
 0x389   : > { %v2278_v29 = vrot.slane %v2265_v26, 6  ;;  %v2106_v59 = vadd.f32 %v2094_v33, %v2043_v2  ;;  %v2351_v0 = vrot.slane %v5228_v22, 3  ;;  %v2399_v20 = vrot.slane %v5228_v22, 2  ;;  %v2097_v33 = vpop.f32.mrf.mxu0  ;;  %v2172_v1 = vpop.f32.mrf.mxu1  ;;  %v2518_v26 = vld [vmem:[#allocation16 + $0x188] sm:$0xff] }
 0x38a   : > { %v2464_v4 = vrot.slane %v5228_v22, 4 }
 0x38b   : > { %v2279_v36 = vsel %vm1450_vm9, %v2276_v18, %v2278_v29  ;;  %v2181_v55 = vadd.f32 %v2169_v58, %v2106_v59  ;;  %v2352_v62 = vsel %vm1376_vm7, %v2350_v50, %v2351_v0  ;;  %v2400_v13 = vsel %vm1105_vm11, %v2398_v43, %v2399_v20  ;;  %v2590_v18 = vld [vmem:[#allocation16 + $0x218] sm:$0xff]  ;;  %v2519_v58 = vld [vmem:[#allocation16 + $0x190] sm:$0xff]  ;;  %v2588_v50 = vld [vmem:[#allocation16 + $0x208] sm:$0xff] }
 0x38c   : > { %v2294_v24 = vsel %vm4835_vm8, %v2279_v36, 0.0  ;;  %2382 = vmatmul.f32.vlgmr.msra.gmra.mxu3 %v2352_v62  ;;  %2430 = vmatmul.f32.vlgmr.msra.gmra.mxu0 %v2400_v13  ;;  %v2465_v47 = vsel %vm2201_vm14, %v2463_v38, %v2464_v4  ;;  %v2517_v38 = vld [vmem:[#allocation16 + $0x180] sm:$0xff] }
 0x38d   : > { %v2300_v6 = vmul.f32 0.1, %v2294_v24  ;;  %v2257_v14 = vadd.f32 %v2245_v8, %v2181_v55  ;;  %2495 = vmatmul.f32.vlgmr.msra.gmra.mxu1 %v2465_v47  ;;  %2631 = vmatpush.msrb.mxu0 %v2590_v18  ;;  %v2587_v55 = vld [vmem:[#allocation16 + $0x200] sm:$0xff] }
 0x38e   : > { %v2045_v17 = vpop.f32.mrf.mxu3  ;;  %2562 = vmatpush.msrb.mxu3 %v2519_v58 }
 0x38f   : > { %v5244_v28 = vmax.f32 %v2294_v24, %v2300_v6  ;;  %v2266_v46 = vadd.f32 %v5215_v25, %v2257_v14  ;;  %v2046_v19 = vadd.f32 %v2045_v17, %v5199_v10  ;;  %2632 = vmatpush.msrb.mxu0 %v2589_v48  ;;  %v2251_v14 = vpop.f32.mrf.mxu2 }
 0x390   : > { %2563 = vmatpush.msrb.mxu3 %v2518_v26 }
 0x391   : > { %v2280_v2 = vrot.slane %v2266_v46, 6  ;;  %v2107_v8 = vadd.f32 %v2097_v33, %v2046_v19  ;;  %v2353_v34 = vrot.slane %v5244_v28, 3  ;;  %v2401_v3 = vrot.slane %v5244_v28, 2  ;;  %2633 = vmatpush.msrb.mxu0 %v2588_v50  ;;  %v2100_v30 = vpop.f32.mrf.mxu0  ;;  %v2175_v47 = vpop.f32.mrf.mxu1 }
 0x392   : > { %v2466_v40 = vrot.slane %v5244_v28, 4  ;;  %2564 = vmatpush.msrb.mxu3 %v2517_v38 }
 0x393   : > { %v2281_v43 = vsel %vm1450_vm9, %v2278_v29, %v2280_v2  ;;  %v2182_v56 = vadd.f32 %v2172_v1, %v2107_v8  ;;  %v2354_v10 = vsel %vm1376_vm7, %v2351_v0, %v2353_v34  ;;  %v2402_v59 = vsel %vm1105_vm11, %v2399_v20, %v2401_v3  ;;  %2634 = vmatpush.msrb.mxu0 %v2587_v55 }
 0x394   : > { %v2295_v15 = vsel %vm4859_vm13, %v2281_v43, 0.0  ;;  %2385 = vmatmul.f32.gmra.mxu3 %v2354_v10  ;;  %2433 = vmatmul.f32.gmra.mxu0 %v2402_v59  ;;  %v2467_v36 = vsel %vm2201_vm14, %v2464_v4, %v2466_v40 }
 0x395   : > { %v2301_v62 = vmul.f32 0.1, %v2295_v15  ;;  %v2258_v13 = vadd.f32 %v2248_v52, %v2182_v56  ;;  %2498 = vmatmul.f32.gmra.mxu1 %v2467_v36 }
 0x396   : > { %v2048_v29 = vpop.f32.mrf.mxu3 }
 0x397   : > { %v5257_v0 = vmax.f32 %v2295_v15, %v2301_v62  ;;  %v2267_v20 = vadd.f32 %v5215_v25, %v2258_v13  ;;  %v2049_v24 = vadd.f32 %v2048_v29, %v5209_v57 }
 0x399   : > { %v2282_v33 = vrot.slane %v2267_v20, 6  ;;  %v2108_v11 = vadd.f32 %v2100_v30, %v2049_v24  ;;  %v2355_v4 = vrot.slane %v5257_v0, 3  ;;  %v2403_v6 = vrot.slane %v5257_v0, 2 }
 0x39a   : > { %v2468_v18 = vrot.slane %v5257_v0, 4  ;;  %v2534_v30 = vrot.slane %v5228_v22, 5  ;;  %v2604_v20 = vrot.slane %v5228_v22, 6  ;;  %v2533_v24 = vrot.slane %v5224_v5, 5 }
 0x39b   : > { %v2283_v17 = vsel %vm1450_vm9, %v2280_v2, %v2282_v33  ;;  %v2183_v1 = vadd.f32 %v2175_v47, %v2108_v11  ;;  %v2356_v58 = vsel %vm1376_vm7, %v2353_v34, %v2355_v4  ;;  %v2404_v46 = vsel %vm1105_vm11, %v2401_v3, %v2403_v6 }
 0x39c   : > { %v2296_v57 = vsel %vm4886_vm0, %v2283_v17, 0.0  ;;  %2388 = vmatmul.f32.gmra.mxu3 %v2356_v58  ;;  %2436 = vmatmul.f32.gmra.mxu0 %v2404_v46  ;;  %v2469_v19 = vsel %vm2201_vm14, %v2466_v40, %v2468_v18  ;;  %v2603_v47 = vrot.slane %v5224_v5, 6  ;;  %v2538_v22 = vrot.slane %v5257_v0, 5 }
 0x39d   : > { %v2302_v48 = vmul.f32 0.1, %v2296_v57  ;;  %v2259_v52 = vadd.f32 %v2251_v14, %v2183_v1  ;;  %2501 = vmatmul.f32.gmra.mxu1 %v2469_v19  ;;  %v2608_v5 = vrot.slane %v5257_v0, 6 }
 0x39e   : > { %v2605_v11 = vsel %vm1450_vm9, %v2603_v47, %v2604_v20  ;;  %v2959_v47 = vld [vmem:[#allocation17 + $0x268] sm:$0xff] }
 0x39f   : > { %v2308_v26 = vmax.f32 %v2296_v57, %v2302_v48  ;;  %v2268_v8 = vadd.f32 %v5215_v25, %v2259_v52 }
 0x3a1   : > { %v2284_v50 = vrot.slane %v2268_v8, 6  ;;  %v2357_v2 = vrot.slane %v2308_v26, 3  ;;  %v2405_v43 = vrot.slane %v2308_v26, 2  ;;  %v2470_v56 = vrot.slane %v2308_v26, 4  ;;  %v2724_v8 = vld [vmem:[#allocation17 + $0x78] sm:$0xff] }
 0x3a2   : > { %v2540_v58 = vrot.slane %v2308_v26, 5  ;;  %v2610_v46 = vrot.slane %v2308_v26, 6  ;;  %2802 = vmatpush.msrb.mxu2 %v2724_v8  ;;  %v2722_v26 = vld [vmem:[#allocation17 + $0x68] sm:$0xff]  ;;  %v2712_v8 = vld [vmem:[#allocation17 + $0x18] sm:$0xff] }
 0x3a3   : > { %v2285_v34 = vsel %vm1450_vm9, %v2282_v33, %v2284_v50  ;;  %v2358_v3 = vsel %vm1376_vm7, %v2355_v4, %v2357_v2  ;;  %v2406_v10 = vsel %vm1105_vm11, %v2403_v6, %v2405_v43  ;;  %v2471_v59 = vsel %vm2201_vm14, %v2468_v18, %v2470_v56  ;;  %v2723_v50 = vld [vmem:[#allocation17 + $0x70] sm:$0xff] }
 0x3a4   : > { %v2297_v40 = vsel %vm4912_vm3, %v2285_v34, 0.0  ;;  %2391 = vmatmul.f32.gmra.mxu3 %v2358_v3  ;;  %2439 = vmatmul.f32.gmra.mxu0 %v2406_v10  ;;  %v2535_v33 = vsel %vm1532_vm10, %v2533_v24, %v2534_v30  ;;  %v2536_v4 = vrot.slane %v5244_v28, 5  ;;  %v2606_v6 = vrot.slane %v5244_v28, 6  ;;  %v2741_v34 = vld [vmem:[#allocation17 + $0xf8] sm:$0xff]  ;;  %v2735_v24 = vld [vmem:[#allocation17 + $0xc8] sm:$0xff] }
 0x3a5   : > { %v2303_v38 = vmul.f32 0.1, %v2297_v40  ;;  %2504 = vmatmul.f32.gmra.mxu1 %v2471_v59  ;;  %v2541_v28 = vsel %vm1532_vm10, %v2538_v22, %v2540_v58  ;;  %v2611_v57 = vsel %vm1450_vm9, %v2608_v5, %v2610_v46  ;;  %2803 = vmatpush.msrb.mxu2 %v2723_v50  ;;  %v2720_v3 = vld [vmem:[#allocation17 + $0x58] sm:$0xff]  ;;  %v2740_v59 = vld [vmem:[#allocation17 + $0xf0] sm:$0xff] }
 0x3a6   : > { %v2537_v14 = vsel %vm1532_vm10, %v2534_v30, %v2536_v4  ;;  %v2607_v18 = vsel %vm1450_vm9, %v2604_v20, %v2606_v6  ;;  %v2539_v17 = vsel %vm1532_vm10, %v2536_v4, %v2538_v22  ;;  %v2609_v1 = vsel %vm1450_vm9, %v2606_v6, %v2608_v5  ;;  %2760 = vmatpush.msrb.mxu1 %v2741_v34  ;;  %v2960_v30 = vld [vmem:[#allocation17 + $0x270] sm:$0xff]  ;;  %v2734_v4 = vld [vmem:[#allocation17 + $0xc0] sm:$0xff]  ;;  %v2957_v22 = vld [vmem:[#allocation17 + $0x258] sm:$0xff] }
 0x3a7   : > { %v2309_v25 = vmax.f32 %v2297_v40, %v2303_v38  ;;  %2804 = vmatpush.msrb.mxu2 %v2722_v26  ;;  %v2719_v40 = vld [vmem:[#allocation17 + $0x50] sm:$0xff]  ;;  %v2739_v38 = vld [vmem:[#allocation17 + $0xe8] sm:$0xff]  ;;  %v2958_v6 = vld [vmem:[#allocation17 + $0x260] sm:$0xff] }
 0x3a8   : > { %2761 = vmatpush.msrb.mxu1 %v2740_v59  ;;  %v2715_v5 = vld [vmem:[#allocation17 + $0x30] sm:$0xff]  ;;  %v2729_v50 = vld [vmem:[#allocation17 + $0x98] sm:$0xff] }
 0x3a9   : > { %v2359_v15 = vrot.slane %v2309_v25, 3  ;;  %v2407_v36 = vrot.slane %v2309_v25, 2  ;;  %v2472_v55 = vrot.slane %v2309_v25, 4  ;;  %v2542_v19 = vrot.slane %v2309_v25, 5  ;;  %v2953_v26 = vld [vmem:[#allocation17 + $0x238] sm:$0xff]  ;;  %v2711_v34 = vld [vmem:[#allocation17 + $0x10] sm:$0xff] }
 0x3aa   : > { %v2612_v48 = vrot.slane %v2309_v25, 6  ;;  %v2718_v25 = vld [vmem:[#allocation17 + $0x48] sm:$0xff]  ;;  %2762 = vmatpush.msrb.mxu1 %v2739_v38  ;;  %v2952_v59 = vld [vmem:[#allocation17 + $0x230] sm:$0xff] }
 0x3ab   : > { %v2360_v62 = vsel %vm1376_vm7, %v2357_v2, %v2359_v15  ;;  %v2408_v13 = vsel %vm1105_vm11, %v2405_v43, %v2407_v36  ;;  %v2473_v29 = vsel %vm2201_vm14, %v2470_v56, %v2472_v55  ;;  %v2543_v52 = vsel %vm1532_vm10, %v2540_v58, %v2542_v19  ;;  %v2721_v43 = vld [vmem:[#allocation17 + $0x60] sm:$0xff]  ;;  %v2710_v38 = vld [vmem:[#allocation17 + $0x8] sm:$0xff] }
 0x3ac   : > { %2394 = vmatmul.f32.gmra.mxu3 %v2360_v62  ;;  %2442 = vmatmul.f32.gmra.mxu0 %v2408_v13  ;;  %v2613_v0 = vsel %vm1450_vm9, %v2610_v46, %v2612_v48  ;;  %v2738_v55 = vld [vmem:[#allocation17 + $0xe0] sm:$0xff]  ;;  %v2737_v62 = vld [vmem:[#allocation17 + $0xd8] sm:$0xff]  ;;  %v2714_v46 = vld [vmem:[#allocation17 + $0x28] sm:$0xff] }
 0x3ad   : > { %2507 = vmatmul.f32.gmra.mxu1 %v2473_v29  ;;  %2805 = vmatpush.msrb.mxu2 %v2721_v43  ;;  %v2961_v13 = vld [vmem:[#allocation17 + $0x278] sm:$0xff]  ;;  %v2736_v29 = vld [vmem:[#allocation17 + $0xd0] sm:$0xff]  ;;  %v2713_v48 = vld [vmem:[#allocation17 + $0x20] sm:$0xff] }
 0x3ae   : > { %2763 = vmatpush.msrb.mxu1 %v2738_v55  ;;  %2965 = vmatpush.msra.mxu3 %v2961_v13  ;;  %v2951_v55 = vld [vmem:[#allocation17 + $0x228] sm:$0xff] }
 0x3af   : > { %2806 = vmatpush.msrb.mxu2 %v2720_v3  ;;  %v2728_v3 = vld [vmem:[#allocation17 + $0x90] sm:$0xff] }
 0x3b0   : > { %2764 = vmatpush.msrb.mxu1 %v2737_v62  ;;  %2966 = vmatpush.msra.mxu3 %v2960_v30  ;;  %v2726_v30 = vld [vmem:[#allocation17 + $0x80] sm:$0xff] }
 0x3b1   : > { %2807 = vmatpush.msrb.mxu2 %v2719_v40 }
 0x3b2   : > { %2765 = vmatpush.msrb.mxu1 %v2736_v29  ;;  %2967 = vmatpush.msra.mxu3 %v2959_v47  ;;  %v2709_v29 = vld [vmem:[#allocation17] sm:$0xff]  ;;  %v2897_v47 = vld [vmem:[#allocation17 + $0x1f8] sm:$0xff] }
 0x3b3   : > { %2808 = vmatpush.msrb.mxu2 %v2718_v25  ;;  %v2727_v25 = vld [vmem:[#allocation17 + $0x88] sm:$0xff] }
 0x3b4   : > { %2565 = vmatmul.f32.vlgmr.msrb.gmra.mxu3 %v2535_v33  ;;  %2635 = vmatmul.f32.vlgmr.msrb.gmra.mxu0 %v2605_v11  ;;  %v2717_v11 = vld [vmem:[#allocation17 + $0x40] sm:$0xff] }
 0x3b5   : > { %2766 = vmatpush.msrb.mxu1 %v2735_v24  ;;  %2809 = vmatpush.msrb.mxu2 %v2717_v11  ;;  %v2950_v24 = vld [vmem:[#allocation17 + $0x220] sm:$0xff]  ;;  %v2847_v11 = vld [vmem:[#allocation17 + $0x178] sm:$0xff] }
 0x3b6   : > { %2968 = vmatpush.msra.mxu3 %v2958_v6 }
 0x3b7   : > { %2767 = vmatpush.msrb.mxu1 %v2734_v4  ;;  %v2949_v4 = vld [vmem:[#allocation17 + $0x218] sm:$0xff] }
 0x3b8   : > { %2969 = vmatpush.msra.mxu3 %v2957_v22  ;;  %v2948_v22 = vld [vmem:[#allocation17 + $0x210] sm:$0xff] }
 0x3bc   : > { %2568 = vmatmul.f32.gmra.mxu3 %v2537_v14  ;;  %2638 = vmatmul.f32.gmra.mxu0 %v2607_v18  ;;  %v2716_v14 = vld [vmem:[#allocation17 + $0x38] sm:$0xff] }
 0x3bd   : > { %v2733_v18 = vld [vmem:[#allocation17 + $0xb8] sm:$0xff]  ;;  %2810 = vmatpush.msrb.mxu2 %v2716_v14  ;;  %v2896_v14 = vld [vmem:[#allocation17 + $0x1f0] sm:$0xff] }
 0x3be   : > { %2768 = vmatpush.msrb.mxu1 %v2733_v18  ;;  %v2846_v18 = vld [vmem:[#allocation17 + $0x170] sm:$0xff] }
 0x3bf   : > { %2811 = vmatpush.msrb.mxu2 %v2715_v5 }
 0x3c1   : > { %2812 = vmatpush.msrb.mxu2 %v2714_v46  ;;  %v2845_v46 = vld [vmem:[#allocation17 + $0x168] sm:$0xff] }
 0x3c3   : > { %2813 = vmatpush.msrb.mxu2 %v2713_v48 }
 0x3c4   : > { %2571 = vmatmul.f32.gmra.mxu3 %v2539_v17  ;;  %2641 = vmatmul.f32.gmra.mxu0 %v2609_v1  ;;  %v2732_v17 = vld [vmem:[#allocation17 + $0xb0] sm:$0xff] }
 0x3c5   : > { %v2956_v1 = vld [vmem:[#allocation17 + $0x250] sm:$0xff]  ;;  %2769 = vmatpush.msrb.mxu1 %v2732_v17  ;;  %2814 = vmatpush.msrb.mxu2 %v2712_v8  ;;  %v2946_v8 = vld [vmem:[#allocation17 + $0x200] sm:$0xff] }
 0x3c6   : > { %2970 = vmatpush.msra.mxu3 %v2956_v1  ;;  %v2895_v1 = vld [vmem:[#allocation17 + $0x1e8] sm:$0xff] }
 0x3c7   : > { %2815 = vmatpush.msrb.mxu2 %v2711_v34  ;;  %v2843_v34 = vld [vmem:[#allocation17 + $0x158] sm:$0xff] }
 0x3c9   : > { %2816 = vmatpush.msrb.mxu2 %v2710_v38  ;;  %v2892_v38 = vld [vmem:[#allocation17 + $0x1d0] sm:$0xff] }
 0x3cb   : > { %2817 = vmatpush.msrb.mxu2 %v2709_v29 }
 0x3cc   : > { %2574 = vmatmul.f32.gmra.mxu3 %v2541_v28  ;;  %2644 = vmatmul.f32.gmra.mxu0 %v2611_v57  ;;  %v2731_v28 = vld [vmem:[#allocation17 + $0xa8] sm:$0xff] }
 0x3cd   : > { %v2955_v57 = vld [vmem:[#allocation17 + $0x248] sm:$0xff]  ;;  %2770 = vmatpush.msrb.mxu1 %v2731_v28  ;;  %2912 = vmatpush.msra.mxu2 %v2897_v47  ;;  %v2890_v47 = vld [vmem:[#allocation17 + $0x1c0] sm:$0xff] }
 0x3ce   : > { %2971 = vmatpush.msra.mxu3 %v2955_v57  ;;  %v2947_v28 = vld [vmem:[#allocation17 + $0x208] sm:$0xff] }
 0x3cf   : > { %2913 = vmatpush.msra.mxu2 %v2896_v14  ;;  %v2839_v14 = vld [vmem:[#allocation17 + $0x138] sm:$0xff] }
 0x3d1   : > { %2914 = vmatpush.msra.mxu2 %v2895_v1  ;;  %v2887_v1 = vld [vmem:[#allocation17 + $0x1a8] sm:$0xff] }
 0x3d4   : > { %2577 = vmatmul.f32.gmra.mxu3 %v2543_v52  ;;  %2647 = vmatmul.f32.gmra.mxu0 %v2613_v0  ;;  %v2730_v52 = vld [vmem:[#allocation17 + $0xa0] sm:$0xff] }
 0x3d5   : > { %v2954_v0 = vld [vmem:[#allocation17 + $0x240] sm:$0xff]  ;;  %2771 = vmatpush.msrb.mxu1 %v2730_v52 }
 0x3d6   : > { %2972 = vmatpush.msra.mxu3 %v2954_v0  ;;  %v2894_v52 = vld [vmem:[#allocation17 + $0x1e0] sm:$0xff] }
 0x3d7   : > { %2772 = vmatpush.msrb.mxu1 %v2729_v50  ;;  %v2844_v0 = vld [vmem:[#allocation17 + $0x160] sm:$0xff]  ;;  %2915 = vmatpush.msra.mxu2 %v2894_v52 }
 0x3d8   : > { %2973 = vmatpush.msra.mxu3 %v2953_v26 }
 0x3d9   : > { %2773 = vmatpush.msrb.mxu1 %v2728_v3 }
 0x3da   : > { %2974 = vmatpush.msra.mxu3 %v2952_v59 }
 0x3db   : > { %2774 = vmatpush.msrb.mxu1 %v2727_v25  ;;  %v2842_v25 = vld [vmem:[#allocation17 + $0x150] sm:$0xff] }
 0x3dc   : > { %2975 = vmatpush.msra.mxu3 %v2951_v55 }
 0x3dd   : > { %2775 = vmatpush.msrb.mxu1 %v2726_v30 }
 0x3de   : > { %2976 = vmatpush.msra.mxu3 %v2950_v24 }
 0x3df   : > { %2848 = vmatpush.msra.mxu1 %v2847_v11  ;;  %v2840_v11 = vld [vmem:[#allocation17 + $0x140] sm:$0xff] }
 0x3e0   : > { %2977 = vmatpush.msra.mxu3 %v2949_v4 }
 0x3e1   : > { %2849 = vmatpush.msra.mxu1 %v2846_v18 }
 0x3e2   : > { %2978 = vmatpush.msra.mxu3 %v2948_v22 }
 0x3e3   : > { %2850 = vmatpush.msra.mxu1 %v2845_v46  ;;  %v2837_v46 = vld [vmem:[#allocation17 + $0x128] sm:$0xff] }
 0x3e4   : > { %2979 = vmatpush.msra.mxu3 %v2947_v28 }
 0x3e5   : > { %2851 = vmatpush.msra.mxu1 %v2844_v0 }
 0x3e6   : > { %2980 = vmatpush.msra.mxu3 %v2946_v8 }
 0x3e7   : > { %2852 = vmatpush.msra.mxu1 %v2843_v34  ;;  %v2885_v34 = vld [vmem:[#allocation17 + $0x198] sm:$0xff] }
 0x3e9   : > { %2853 = vmatpush.msra.mxu1 %v2842_v25  ;;  %v2884_v25 = vld [vmem:[#allocation17 + $0x190] sm:$0xff] }
 0x409   : > { %v5298_v2 = vpop.f32.mrf.mxu0 }
 0x40a   : > { %v2496_v43 = vpop.f32.mrf.mxu1 }
 0x40f   : > { %v5300_v56 = vpop.f32.mrf.mxu3 }
 0x410   : > { %v2432_v13 = vadd.f32 %v5298_v2, %v5300_v56  ;;  %v5323_v2 = vld [vmem:[%s5690_s2] ss:$0 sm:$0xff]  ;;  %s3326_s2 = scalar_lea.sflag [#allocation4], %s4751_s19 }
 0x411   : > { %v5302_v10 = vpop.f32.mrf.mxu0 }
 0x412   : > { %v2511_v6 = vadd.f32 %v2496_v43, %v2432_v13  ;;  %v2499_v5 = vpop.f32.mrf.mxu1  ;;  %v2893_v43 = vld [vmem:[#allocation17 + $0x1d8] sm:$0xff]  ;;  %v2841_v13 = vld [vmem:[#allocation17 + $0x148] sm:$0xff] }
 0x413   : > { %2916 = vmatpush.msra.mxu2 %v2893_v43  ;;  %2854 = vmatpush.msra.mxu1 %v2841_v13 }
 0x415   : > { %2917 = vmatpush.msra.mxu2 %v2892_v38  ;;  %2855 = vmatpush.msra.mxu1 %v2840_v11  ;;  %v2835_v38 = vld [vmem:[#allocation17 + $0x118] sm:$0xff] }
 0x417   : > { %v5304_v15 = vpop.f32.mrf.mxu3  ;;  %2856 = vmatpush.msra.mxu1 %v2839_v14  ;;  %v2882_v14 = vld [vmem:[#allocation17 + $0x180] sm:$0xff] }
 0x418   : > { %v2435_v57 = vadd.f32 %v5302_v10, %v5304_v15 }
 0x419   : > { %v5306_v36 = vpop.f32.mrf.mxu0 }
 0x41a   : > { %v2512_v59 = vadd.f32 %v2499_v5, %v2435_v57  ;;  %v2502_v29 = vpop.f32.mrf.mxu1  ;;  %v2886_v57 = vld [vmem:[#allocation17 + $0x1a0] sm:$0xff] }
 0x41f   : > { %v5308_v20 = vpop.f32.mrf.mxu3 }
 0x420   : > { %v2438_v30 = vadd.f32 %v5306_v36, %v5308_v20 }
 0x421   : > { %v5310_v33 = vpop.f32.mrf.mxu0 }
 0x422   : > { %v2513_v5 = vadd.f32 %v2502_v29, %v2438_v30 }
 0x427   : > { %v5312_v58 = vpop.f32.mrf.mxu3 }
 0x428   : > { %v2441_v0 = vadd.f32 %v5310_v33, %v5312_v58  ;;  %v2883_v58 = vld [vmem:[#allocation17 + $0x188] sm:$0xff] }
 0x429   : > { %v5314_v19 = vpop.f32.mrf.mxu0 }
 0x42f   : > { %v5316_v40 = vpop.f32.mrf.mxu3 }
 0x431   : > { %v2636_v62 = vpop.f32.mrf.mxu0 }
 0x437   : > { %v2566_v17 = vpop.f32.mrf.mxu3 }
 0x438   : > { %v2581_v56 = vadd.f32 %v2566_v17, %v2511_v6  ;;  %v2888_v17 = vld [vmem:[#allocation17 + $0x1b0] sm:$0xff] }
 0x439   : > { %v2639_v50 = vpop.f32.mrf.mxu0 }
 0x43a   : > { %v2651_v48 = vadd.f32 %v2636_v62, %v2581_v56  ;;  %v2891_v62 = vld [vmem:[#allocation17 + $0x1c8] sm:$0xff]  ;;  %v2838_v56 = vld [vmem:[#allocation17 + $0x130] sm:$0xff] }
 0x43b   : > { %2918 = vmatpush.msra.mxu2 %v2891_v62  ;;  %2857 = vmatpush.msra.mxu1 %v2838_v56 }
 0x43c   : > { %v2659_v26 = vadd.f32 %v5323_v2, %v2651_v48  ;;  %v2836_v48 = vld [vmem:[#allocation17 + $0x120] sm:$0xff] }
 0x43d   : > { %2919 = vmatpush.msra.mxu2 %v2890_v47  ;;  %2858 = vmatpush.msra.mxu1 %v2837_v46 }
 0x43e   : > { %v2669_v3 = vrot.slane %v2659_v26, 4  ;;  %v2505_v26 = vpop.f32.mrf.mxu1 }
 0x43f   : > { %v2569_v10 = vpop.f32.mrf.mxu3  ;;  %2920 = vmatpush.msra.mxu2 %v2889_v37  ;;  %2859 = vmatpush.msra.mxu1 %v2836_v48  ;;  %v2514_v33 = vadd.f32 %v2505_v26, %v2441_v0 }
 0x440   : > { %v2684_v15 = vsel %vm4813_vm4, %v2669_v3, 0.0  ;;  %v2582_v55 = vadd.f32 %v2569_v10, %v2512_v59  ;;  %v2834_v10 = vld [vmem:[#allocation17 + $0x110] sm:$0xff] }
 0x441   : > { %v2690_v4 = vadd.f32 %v2684_v15, %v4825_v42  ;;  %v2642_v18 = vpop.f32.mrf.mxu0  ;;  %2921 = vmatpush.msra.mxu2 %v2888_v17  ;;  %2860 = vmatpush.msra.mxu1 %v2835_v38 }
 0x442   : > { %v2652_v24 = vadd.f32 %v2639_v50, %v2582_v55 }
 0x443   : > { %v2696_v36 = vmul.f32 0.1, %v2690_v4  ;;  %2922 = vmatpush.msra.mxu2 %v2887_v1  ;;  %2861 = vmatpush.msra.mxu1 %v2834_v10 }
 0x444   : > { %v2660_v6 = vadd.f32 %v5323_v2, %v2652_v24 }
 0x445   : > { %v2702_v43 = vmax.f32 %v2690_v4, %v2696_v36  ;;  %2923 = vmatpush.msra.mxu2 %v2886_v57 }
 0x446   : > { %v2670_v22 = vrot.slane %v2660_v6, 4  ;;  %v2444_v6 = vadd.f32 %v5314_v19, %v5316_v40  ;;  %v2508_v40 = vpop.f32.mrf.mxu1 }
 0x447   : > { %v2572_v20 = vpop.f32.mrf.mxu3  ;;  %2924 = vmatpush.msra.mxu2 %v2885_v34  ;;  %v2747_v29 = vrot.slane %v2702_v43, 6  ;;  %v2789_v30 = vrot.slane %v2702_v43, 4 }
 0x448   : > { %v2671_v42 = vsel %vm2201_vm14, %v2669_v3, %v2670_v22  ;;  %v2583_v28 = vadd.f32 %v2572_v20, %v2513_v5  ;;  %v2515_v20 = vadd.f32 %v2508_v40, %v2444_v6  ;;  %v3050_v40 = vld [vmem:[#allocation19 + $0xf8] sm:$0xff] }
 0x449   : > { %v2685_v52 = vsel %vm4819_vm5, %v2671_v42, 0.0  ;;  %v2645_v62 = vpop.f32.mrf.mxu0  ;;  %2925 = vmatpush.msra.mxu2 %v2884_v25  ;;  %3066 = vmatpush.msra.mxu0 %v3050_v40  ;;  %v3129_v40 = vld [vmem:[#allocation19 + $0x130] sm:$0xff] }
 0x44a   : > { %v2691_v8 = vadd.f32 %v2685_v52, %v4829_v44  ;;  %v2653_v50 = vadd.f32 %v2642_v18, %v2583_v28  ;;  %v2833_v44 = vld [vmem:[#allocation17 + $0x108] sm:$0xff]  ;;  %v2832_v18 = vld [vmem:[#allocation17 + $0x100] sm:$0xff] }
 0x44b   : > { %2926 = vmatpush.msra.mxu2 %v2883_v58  ;;  %2862 = vmatpush.msra.mxu1 %v2833_v44 }
 0x44c   : > { %v2697_v3 = vmul.f32 0.1, %v2691_v8  ;;  %v2661_v59 = vadd.f32 %v5323_v2, %v2653_v50 }
 0x44d   : > { %2927 = vmatpush.msra.mxu2 %v2882_v14  ;;  %2863 = vmatpush.msra.mxu1 %v2832_v18 }
 0x44e   : > { %v5341_v15 = vmax.f32 %v2691_v8, %v2697_v3  ;;  %v2672_v55 = vrot.slane %v2661_v59, 4 }
 0x44f   : > { %v2575_v13 = vpop.f32.mrf.mxu3 }
 0x450   : > { %v2673_v24 = vsel %vm2201_vm14, %v2670_v22, %v2672_v55  ;;  %v2584_v47 = vadd.f32 %v2575_v13, %v2514_v33  ;;  %v2748_v11 = vrot.slane %v5341_v15, 6  ;;  %v2790_v4 = vrot.slane %v5341_v15, 4 }
 0x451   : > { %v2686_v37 = vsel %vm4835_vm8, %v2673_v24, 0.0  ;;  %v2648_v0 = vpop.f32.mrf.mxu0 }
 0x452   : > { %v5351_v5 = vadd.f32 %v2686_v37, %v4848_v61  ;;  %v2654_v17 = vadd.f32 %v2645_v62, %v2584_v47  ;;  %v2749_v22 = vsel %vm1450_vm9, %v2747_v29, %v2748_v11  ;;  %v2791_v56 = vsel %vm2201_vm14, %v2789_v30, %v2790_v4 }
 0x453   : > { %2776 = vmatmul.f32.vlgmr.msrb.gmra.mxu1 %v2749_v22  ;;  %2818 = vmatmul.f32.vlgmr.msrb.gmra.mxu2 %v2791_v56 }
 0x454   : > { %v2698_v1 = vmul.f32 0.1, %v5351_v5  ;;  %v2662_v19 = vadd.f32 %v5323_v2, %v2654_v17 }
 0x456   : > { %v2674_v36 = vrot.slane %v2662_v19, 4  ;;  %v2704_v46 = vmax.f32 %v5351_v5, %v2698_v1 }
 0x457   : > { %v2578_v61 = vpop.f32.mrf.mxu3 }
 0x458   : > { %v2675_v42 = vsel %vm2201_vm14, %v2672_v55, %v2674_v36  ;;  %v2585_v28 = vadd.f32 %v2578_v61, %v2515_v20  ;;  %v2750_v57 = vrot.slane %v2704_v46, 6  ;;  %v2792_v48 = vrot.slane %v2704_v46, 4  ;;  %v3031_v20 = vld [vmem:[#allocation19 + $0x68] sm:$0xff]  ;;  %v3030_v61 = vld [vmem:[#allocation19 + $0x60] sm:$0xff] }
 0x459   : > { %v2687_v52 = vsel %vm4859_vm13, %v2675_v42, 0.0  ;;  %v3048_v42 = vld [vmem:[#allocation19 + $0xe8] sm:$0xff] }
 0x45a   : > { %v5362_v8 = vadd.f32 %v2687_v52, %v4875_v21  ;;  %v2655_v50 = vadd.f32 %v2648_v0, %v2585_v28  ;;  %v2751_v26 = vsel %vm1450_vm9, %v2748_v11, %v2750_v57  ;;  %v2793_v43 = vsel %vm2201_vm14, %v2790_v4, %v2792_v48  ;;  %v3029_v28 = vld [vmem:[#allocation19 + $0x58] sm:$0xff] }
 0x45b   : > { %2779 = vmatmul.f32.gmra.mxu1 %v2751_v26  ;;  %2821 = vmatmul.f32.gmra.mxu2 %v2793_v43  ;;  %v2900_v4 = vrot.slane %v2704_v46, 2  ;;  %v3138_v52 = vld [vmem:[#allocation19 + $0x178] sm:$0xff]  ;;  %v3027_v26 = vld [vmem:[#allocation19 + $0x48] sm:$0xff] }
 0x45c   : > { %v2699_v34 = vmul.f32 0.1, %v5362_v8  ;;  %v2663_v3 = vadd.f32 %v5323_v2, %v2655_v50  ;;  %2981 = vmatmul.f32.vlgmr.msra.gmra.mxu3 %v2793_v43  ;;  %v3197_v0 = vld [vmem:[#allocation19 + $0x1f8] sm:$0xff]  ;;  %3150 = vmatpush.msrb.mxu2 %v3138_v52 }
 0x45d   : > { %3209 = vmatpush.msrb.mxu3 %v3197_v0  ;;  %v3046_v50 = vld [vmem:[#allocation19 + $0xd8] sm:$0xff] }
 0x45e   : > { %v2676_v59 = vrot.slane %v2663_v3, 4  ;;  %v2705_v38 = vmax.f32 %v5362_v8, %v2699_v34  ;;  %v3137_v34 = vld [vmem:[#allocation19 + $0x170] sm:$0xff]  ;;  %v3038_v0 = vld [vmem:[#allocation19 + $0x98] sm:$0xff] }
 0x45f   : > { %v3196_v3 = vld [vmem:[#allocation19 + $0x1f0] sm:$0xff]  ;;  %3151 = vmatpush.msrb.mxu2 %v3137_v34 }
 0x460   : > { %v2677_v25 = vsel %vm2201_vm14, %v2674_v36, %v2676_v59  ;;  %v2689_v21 = vsel %vm4912_vm3, %v2676_v59, 0.0  ;;  %v2752_v10 = vrot.slane %v2705_v38, 6  ;;  %v2794_v55 = vrot.slane %v2705_v38, 4  ;;  %v3032_v36 = vld [vmem:[#allocation19 + $0x70] sm:$0xff]  ;;  %3210 = vmatpush.msrb.mxu3 %v3196_v3  ;;  %v3026_v59 = vld [vmem:[#allocation19 + $0x40] sm:$0xff] }
 0x461   : > { %v2688_v33 = vsel %vm4886_vm0, %v2677_v25, 0.0  ;;  %v2695_v62 = vadd.f32 %v2689_v21, %v4927_v53  ;;  %v2899_v53 = vrot.slane %v5341_v15, 2  ;;  %v2902_v18 = vrot.slane %v2705_v38, 2  ;;  %v3136_v25 = vld [vmem:[#allocation19 + $0x168] sm:$0xff]  ;;  %v3037_v3 = vld [vmem:[#allocation19 + $0x90] sm:$0xff] }
 0x462   : > { %v2694_v58 = vadd.f32 %v2688_v33, %v4902_v31  ;;  %v2753_v44 = vsel %vm1450_vm9, %v2750_v57, %v2752_v10  ;;  %v2795_v2 = vsel %vm2201_vm14, %v2792_v48, %v2794_v55  ;;  %v3047_v57 = vld [vmem:[#allocation19 + $0xe0] sm:$0xff]  ;;  %v3028_v48 = vld [vmem:[#allocation19 + $0x50] sm:$0xff]  ;;  %v3195_v21 = vld [vmem:[#allocation19 + $0x1e8] sm:$0xff]  ;;  %3152 = vmatpush.msrb.mxu2 %v3136_v25 }
 0x463   : > { %2782 = vmatmul.f32.gmra.mxu1 %v2753_v44  ;;  %2824 = vmatmul.f32.gmra.mxu2 %v2795_v2  ;;  %v2701_v39 = vmul.f32 0.1, %v2695_v62  ;;  %v2901_v37 = vsel %vm1105_vm11, %v2899_v53, %v2900_v4  ;;  %v2903_v17 = vsel %vm1105_vm11, %v2900_v4, %v2902_v18  ;;  %v3135_v33 = vld [vmem:[#allocation19 + $0x160] sm:$0xff]  ;;  %v3024_v44 = vld [vmem:[#allocation19 + $0x30] sm:$0xff]  ;;  %v3021_v4 = vld [vmem:[#allocation19 + $0x18] sm:$0xff] }
 0x464   : > { %v2700_v13 = vmul.f32 0.1, %v2694_v58  ;;  %2984 = vmatmul.f32.gmra.mxu3 %v2795_v2  ;;  %3153 = vmatpush.msrb.mxu2 %v3135_v33  ;;  %v3131_v53 = vld [vmem:[#allocation19 + $0x140] sm:$0xff]  ;;  %v3036_v25 = vld [vmem:[#allocation19 + $0x88] sm:$0xff] }
 0x465   : > { %v2707_v31 = vmax.f32 %v2695_v62, %v2701_v39  ;;  %3211 = vmatpush.msrb.mxu3 %v3195_v21  ;;  %v3134_v62 = vld [vmem:[#allocation19 + $0x158] sm:$0xff]  ;;  %v3124_v21 = vld [vmem:[#allocation19 + $0x108] sm:$0xff]  ;;  %v3123_v33 = vld [vmem:[#allocation19 + $0x100] sm:$0xff] }
 0x466   : > { %v2706_v29 = vmax.f32 %v2694_v58, %v2700_v13  ;;  %v3194_v58 = vld [vmem:[#allocation19 + $0x1e0] sm:$0xff]  ;;  %v3193_v13 = vld [vmem:[#allocation19 + $0x1d8] sm:$0xff]  ;;  %3154 = vmatpush.msrb.mxu2 %v3134_v62 }
 0x467   : > { %v2962_v6 = vrot.slane %v2707_v31, 4  ;;  %v2906_v1 = vrot.slane %v2707_v31, 2  ;;  %3212 = vmatpush.msrb.mxu3 %v3194_v58  ;;  %v3191_v31 = vld [vmem:[#allocation19 + $0x1c8] sm:$0xff]  ;;  %v3182_v58 = vld [vmem:[#allocation19 + $0x180] sm:$0xff]  ;;  %v3256_v62 = vld [vmem:[#allocation19 + $0x278] sm:$0xff] }
 0x468   : > { %v2754_v30 = vrot.slane %v2706_v29, 6  ;;  %v2796_v24 = vrot.slane %v2706_v29, 4  ;;  %v2904_v22 = vrot.slane %v2706_v29, 2 }
 0x469   : > { %3213 = vmatpush.msrb.mxu3 %v3193_v13 }
 0x46a   : > { %v2755_v47 = vsel %vm1450_vm9, %v2752_v10, %v2754_v30  ;;  %v2797_v11 = vsel %vm2201_vm14, %v2794_v55, %v2796_v24  ;;  %v2963_v14 = vsel %vm2201_vm14, %v2796_v24, %v2962_v6  ;;  %v2905_v56 = vsel %vm1105_vm11, %v2902_v18, %v2904_v22  ;;  %v3025_v10 = vld [vmem:[#allocation19 + $0x38] sm:$0xff]  ;;  %v3044_v55 = vld [vmem:[#allocation19 + $0xc8] sm:$0xff]  ;;  %v3133_v30 = vld [vmem:[#allocation19 + $0x150] sm:$0xff] }
 0x46b   : > { %2785 = vmatmul.f32.gmra.mxu1 %v2755_v47  ;;  %2827 = vmatmul.f32.gmra.mxu2 %v2797_v11  ;;  %v2907_v19 = vsel %vm1105_vm11, %v2904_v22, %v2906_v1  ;;  %v3192_v24 = vld [vmem:[#allocation19 + $0x1d0] sm:$0xff]  ;;  %v3022_v47 = vld [vmem:[#allocation19 + $0x20] sm:$0xff]  ;;  %v3130_v22 = vld [vmem:[#allocation19 + $0x138] sm:$0xff] }
 0x46c   : > { %2987 = vmatmul.f32.gmra.mxu3 %v2797_v11  ;;  %3155 = vmatpush.msrb.mxu2 %v3133_v30  ;;  %v3132_v11 = vld [vmem:[#allocation19 + $0x148] sm:$0xff]  ;;  %v3043_v6 = vld [vmem:[#allocation19 + $0xc0] sm:$0xff] }
 0x46d   : > { %3214 = vmatpush.msrb.mxu3 %v3192_v24  ;;  %v3019_v1 = vld [vmem:[#allocation19 + $0x8] sm:$0xff] }
 0x46e   : > { %3156 = vmatpush.msrb.mxu2 %v3132_v11  ;;  %v3254_v24 = vld [vmem:[#allocation19 + $0x268] sm:$0xff]  ;;  %v3253_v11 = vld [vmem:[#allocation19 + $0x260] sm:$0xff] }
 0x46f   : > { %3215 = vmatpush.msrb.mxu3 %v3191_v31 }
 0x470   : > { %3157 = vmatpush.msrb.mxu2 %v3131_v53 }
 0x472   : > { %3158 = vmatpush.msrb.mxu2 %v3130_v22  ;;  %v3250_v22 = vld [vmem:[#allocation19 + $0x248] sm:$0xff] }
 0x473   : > { %2864 = vmatmul.f32.vlgmr.msra.gmra.mxu1 %v5341_v15  ;;  %2928 = vmatmul.f32.vlgmr.msra.gmra.mxu2 %v2901_v37  ;;  %v3033_v15 = vld [vmem:[#allocation19 + $0x78] sm:$0xff]  ;;  %v3190_v37 = vld [vmem:[#allocation19 + $0x1c0] sm:$0xff] }
 0x474   : > { %2990 = vmatmul.f32.gmra.mxu3 %v2963_v14  ;;  %3094 = vmatpush.msrb.mxu1 %v3033_v15  ;;  %v3020_v14 = vld [vmem:[#allocation19 + $0x10] sm:$0xff] }
 0x475   : > { %3216 = vmatpush.msrb.mxu3 %v3190_v37  ;;  %v3041_v15 = vld [vmem:[#allocation19 + $0xb0] sm:$0xff]  ;;  %3159 = vmatpush.msrb.mxu2 %v3129_v40  ;;  %v5408_v37 = vld [vmem:[%s5691_s15] ss:$0 sm:$0xff] }
 0x476   : > { %3095 = vmatpush.msrb.mxu1 %v3032_v36  ;;  %v3188_v36 = vld [vmem:[#allocation19 + $0x1b0] sm:$0xff] }
 0x478   : > { %3096 = vmatpush.msrb.mxu1 %v3031_v20  ;;  %v3018_v20 = vld [vmem:[#allocation19] sm:$0xff] }
 0x47a   : > { %3097 = vmatpush.msrb.mxu1 %v3030_v61  ;;  %v3128_v61 = vld [vmem:[#allocation19 + $0x128] sm:$0xff] }
 0x47b   : > { %2867 = vmatmul.f32.gmra.mxu1 %v2704_v46  ;;  %2931 = vmatmul.f32.gmra.mxu2 %v2903_v17  ;;  %v3049_v46 = vld [vmem:[#allocation19 + $0xf0] sm:$0xff]  ;;  %v3042_v17 = vld [vmem:[#allocation19 + $0xb8] sm:$0xff] }
 0x47c   : > { %3067 = vmatpush.msra.mxu0 %v3049_v46  ;;  %3098 = vmatpush.msrb.mxu1 %v3029_v28  ;;  %v3040_v46 = vld [vmem:[#allocation19 + $0xa8] sm:$0xff]  ;;  %v3039_v28 = vld [vmem:[#allocation19 + $0xa0] sm:$0xff] }
 0x47d   : > { %3160 = vmatpush.msrb.mxu2 %v3128_v61  ;;  %v3248_v61 = vld [vmem:[#allocation19 + $0x238] sm:$0xff] }
 0x47e   : > { %3068 = vmatpush.msra.mxu0 %v3048_v42  ;;  %3099 = vmatpush.msrb.mxu1 %v3028_v48  ;;  %v3187_v42 = vld [vmem:[#allocation19 + $0x1a8] sm:$0xff]  ;;  %v3186_v48 = vld [vmem:[#allocation19 + $0x1a0] sm:$0xff] }
 0x480   : > { %3069 = vmatpush.msra.mxu0 %v3047_v57  ;;  %3100 = vmatpush.msrb.mxu1 %v3027_v26  ;;  %v3127_v57 = vld [vmem:[#allocation19 + $0x120] sm:$0xff]  ;;  %v3185_v26 = vld [vmem:[#allocation19 + $0x198] sm:$0xff] }
 0x481   : > { %3161 = vmatpush.msrb.mxu2 %v3127_v57 }
 0x482   : > { %3070 = vmatpush.msra.mxu0 %v3046_v50  ;;  %3101 = vmatpush.msrb.mxu1 %v3026_v59  ;;  %v3126_v50 = vld [vmem:[#allocation19 + $0x118] sm:$0xff]  ;;  %v3125_v59 = vld [vmem:[#allocation19 + $0x110] sm:$0xff] }
 0x483   : > { %2870 = vmatmul.f32.gmra.mxu1 %v2705_v38  ;;  %2934 = vmatmul.f32.gmra.mxu2 %v2905_v56  ;;  %v3045_v38 = vld [vmem:[#allocation19 + $0xd0] sm:$0xff]  ;;  %v3189_v56 = vld [vmem:[#allocation19 + $0x1b8] sm:$0xff] }
 0x484   : > { %3071 = vmatpush.msra.mxu0 %v3045_v38  ;;  %3102 = vmatpush.msrb.mxu1 %v3025_v10  ;;  %v3184_v38 = vld [vmem:[#allocation19 + $0x190] sm:$0xff]  ;;  %v3183_v10 = vld [vmem:[#allocation19 + $0x188] sm:$0xff] }
 0x485   : > { %3217 = vmatpush.msrb.mxu3 %v3189_v56  ;;  %3162 = vmatpush.msrb.mxu2 %v3126_v50 }
 0x486   : > { %3072 = vmatpush.msra.mxu0 %v3044_v55  ;;  %3103 = vmatpush.msrb.mxu1 %v3024_v44  ;;  %v3035_v55 = vld [vmem:[#allocation19 + $0x80] sm:$0xff] }
 0x487   : > { %3218 = vmatpush.msrb.mxu3 %v3188_v36  ;;  %3163 = vmatpush.msrb.mxu2 %v3125_v59 }
 0x488   : > { %3073 = vmatpush.msra.mxu0 %v3043_v6  ;;  %v3252_v6 = vld [vmem:[#allocation19 + $0x258] sm:$0xff] }
 0x489   : > { %3219 = vmatpush.msrb.mxu3 %v3187_v42  ;;  %3164 = vmatpush.msrb.mxu2 %v3124_v21  ;;  %v3247_v42 = vld [vmem:[#allocation19 + $0x230] sm:$0xff]  ;;  %v3244_v21 = vld [vmem:[#allocation19 + $0x218] sm:$0xff] }
 0x48a   : > { %3074 = vmatpush.msra.mxu0 %v3042_v17  ;;  %v3251_v17 = vld [vmem:[#allocation19 + $0x250] sm:$0xff] }
 0x48b   : > { %2873 = vmatmul.f32.gmra.mxu1 %v2706_v29  ;;  %2937 = vmatmul.f32.gmra.mxu2 %v2907_v19  ;;  %v3023_v29 = vld [vmem:[#allocation19 + $0x28] sm:$0xff] }
 0x48c   : > { %3104 = vmatpush.msrb.mxu1 %v3023_v29  ;;  %3075 = vmatpush.msra.mxu0 %v3041_v15  ;;  %v3255_v29 = vld [vmem:[#allocation19 + $0x270] sm:$0xff] }
 0x48d   : > { %3220 = vmatpush.msrb.mxu3 %v3186_v48  ;;  %3165 = vmatpush.msrb.mxu2 %v3123_v33 }
 0x48e   : > { %3105 = vmatpush.msrb.mxu1 %v3022_v47  ;;  %3076 = vmatpush.msra.mxu0 %v3040_v46 }
 0x48f   : > { %3221 = vmatpush.msrb.mxu3 %v3185_v26 }
 0x490   : > { %3106 = vmatpush.msrb.mxu1 %v3021_v4  ;;  %3077 = vmatpush.msra.mxu0 %v3039_v28 }
 0x491   : > { %3222 = vmatpush.msrb.mxu3 %v3184_v38 }
 0x492   : > { %3107 = vmatpush.msrb.mxu1 %v3020_v14  ;;  %3078 = vmatpush.msra.mxu0 %v3038_v0  ;;  %v3246_v0 = vld [vmem:[#allocation19 + $0x228] sm:$0xff] }
 0x493   : > { %3223 = vmatpush.msrb.mxu3 %v3183_v10  ;;  %v3243_v10 = vld [vmem:[#allocation19 + $0x210] sm:$0xff] }
 0x494   : > { %3108 = vmatpush.msrb.mxu1 %v3019_v1  ;;  %3079 = vmatpush.msra.mxu0 %v3037_v3  ;;  %v3249_v1 = vld [vmem:[#allocation19 + $0x240] sm:$0xff] }
 0x495   : > { %3224 = vmatpush.msrb.mxu3 %v3182_v58  ;;  %v3242_v58 = vld [vmem:[#allocation19 + $0x208] sm:$0xff] }
 0x496   : > { %3109 = vmatpush.msrb.mxu1 %v3018_v20  ;;  %3080 = vmatpush.msra.mxu0 %v3036_v25 }
 0x498   : > { %3081 = vmatpush.msra.mxu0 %v3035_v55 }
 0x49a   : > { %3268 = vmatpush.msrb.mxu0 %v3256_v62 }
 0x49c   : > { %3269 = vmatpush.msrb.mxu0 %v3255_v29 }
 0x49e   : > { %3270 = vmatpush.msrb.mxu0 %v3254_v24 }
 0x4a0   : > { %3271 = vmatpush.msrb.mxu0 %v3253_v11 }
 0x4a2   : > { %3272 = vmatpush.msrb.mxu0 %v3252_v6 }
 0x4a4   : > { %3273 = vmatpush.msrb.mxu0 %v3251_v17 }
 0x4a6   : > { %3274 = vmatpush.msrb.mxu0 %v3250_v22 }
 0x4a8   : > { %3275 = vmatpush.msrb.mxu0 %v3249_v1 }
 0x4aa   : > { %3276 = vmatpush.msrb.mxu0 %v3248_v61 }
 0x4ac   : > { %3277 = vmatpush.msrb.mxu0 %v3247_v42 }
 0x4ae   : > { %3278 = vmatpush.msrb.mxu0 %v3246_v0 }
 0x4d0   : > { %v5387_v43 = vpop.f32.mrf.mxu1 }
 0x4d6   : > { %v5389_v2 = vpop.f32.mrf.mxu2 }
 0x4d7   : > { %v2820_v47 = vadd.f32 %v5389_v2, %v5387_v43 }
 0x4d8   : > { %v5391_v39 = vpop.f32.mrf.mxu1 }
 0x4de   : > { %v5393_v18 = vpop.f32.mrf.mxu2 }
 0x4df   : > { %v2982_v30 = vpop.f32.mrf.mxu3  ;;  %v2823_v43 = vadd.f32 %v5393_v18, %v5391_v39  ;;  %v3245_v18 = vld [vmem:[#allocation19 + $0x220] sm:$0xff] }
 0x4e0   : > { %v5395_v19 = vpop.f32.mrf.mxu1  ;;  %3279 = vmatpush.msrb.mxu0 %v3245_v18 }
 0x4e2   : > { %3280 = vmatpush.msrb.mxu0 %v3244_v21 }
 0x4e4   : > { %3281 = vmatpush.msrb.mxu0 %v3243_v10 }
 0x4e6   : > { %v5397_v52 = vpop.f32.mrf.mxu2  ;;  %3282 = vmatpush.msrb.mxu0 %v3242_v58 }
 0x4e7   : > { %v2985_v15 = vpop.f32.mrf.mxu3  ;;  %v2826_v41 = vadd.f32 %v5397_v52, %v5395_v19 }
 0x4e8   : > { %v5399_v34 = vpop.f32.mrf.mxu1 }
 0x4ee   : > { %v5401_v44 = vpop.f32.mrf.mxu2 }
 0x4ef   : > { %v2988_v59 = vpop.f32.mrf.mxu3  ;;  %v2829_v11 = vadd.f32 %v5401_v44, %v5399_v34 }
 0x4f0   : > { %v2865_v13 = vpop.f32.mrf.mxu1 }
 0x4f1   : > { %v2877_v31 = vadd.f32 %v2865_v13, %v2820_v47 }
 0x4f6   : > { %v2929_v4 = vpop.f32.mrf.mxu2 }
 0x4f7   : > { %v2941_v53 = vadd.f32 %v2929_v4, %v2877_v31  ;;  %v3241_v4 = vld [vmem:[#allocation19 + $0x200] sm:$0xff]  ;;  %v2991_v44 = vpop.f32.mrf.mxu3 }
 0x4f8   : > { %v2868_v14 = vpop.f32.mrf.mxu1  ;;  %3283 = vmatpush.msrb.mxu0 %v3241_v4  ;;  %v1852_v4 = vadd.f32 %v5195_v54, %v5201_v63  ;;  %v1855_v54 = vadd.f32 %v5203_v23, %v5207_v45 }
 0x4f9   : > { %v2994_v56 = vadd.f32 %v2982_v30, %v2941_v53  ;;  %v2878_v36 = vadd.f32 %v2868_v14, %v2823_v43 }
 0x4fb   : > { %v3001_v2 = vadd.f32 %v5408_v37, %v2994_v56 }
 0x4fd   : > { %v3005_v40 = vsel %vm4819_vm5, %v3001_v2, 0.0 }
 0x4fe   : > { %v3009_v20 = vmul.f32 0.1, %v3005_v40  ;;  %v2932_v46 = vpop.f32.mrf.mxu2 }
 0x4ff   : > { %v2942_v28 = vadd.f32 %v2932_v46, %v2878_v36 }
 0x500   : > { %v5415_v57 = vmax.f32 %v3005_v40, %v3009_v20  ;;  %v2871_v48 = vpop.f32.mrf.mxu1 }
 0x501   : > { %v2995_v39 = vadd.f32 %v2985_v15, %v2942_v28  ;;  %v2879_v3 = vadd.f32 %v2871_v48, %v2826_v41 }
 0x502   : > { %3110 = vmatmul.f32.vlgmr.msrb.gmra.mxu1 %v5415_v57  ;;  %v3055_v19 = vrot.slane %v5415_v57, 1  ;;  %v3139_v52 = vrot.slane %v5415_v57, 2  ;;  %v3198_v24 = vrot.slane %v5415_v57, 3 }
 0x503   : > { %v3002_v50 = vadd.f32 %v5408_v37, %v2995_v39 }
 0x505   : > { %v3006_v26 = vsel %vm4835_vm8, %v3002_v50, 0.0 }
 0x506   : > { %v3010_v38 = vmul.f32 0.1, %v3006_v26  ;;  %v2935_v25 = vpop.f32.mrf.mxu2 }
 0x507   : > { %v2943_v55 = vadd.f32 %v2935_v25, %v2879_v3  ;;  %v3257_v3 = vrot.slane %v5415_v57, 4 }
 0x508   : > { %v5423_v33 = vmax.f32 %v3006_v26, %v3010_v38  ;;  %v2874_v13 = vpop.f32.mrf.mxu1 }
 0x509   : > { %v2996_v62 = vadd.f32 %v2988_v59, %v2943_v55  ;;  %v2880_v22 = vadd.f32 %v2874_v13, %v2829_v11 }
 0x50a   : > { %3113 = vmatmul.f32.gmra.mxu1 %v5423_v33  ;;  %v3056_v29 = vrot.slane %v5423_v33, 1  ;;  %v3140_v30 = vrot.slane %v5423_v33, 2  ;;  %v3199_v47 = vrot.slane %v5423_v33, 3  ;;  %v3258_v27 = vrot.slane %v5423_v33, 4 }
 0x50b   : > { %v3003_v31 = vadd.f32 %v5408_v37, %v2996_v62 }
 0x50c   : > { %v3057_v6 = vsel %vm1000_vm12, %v3055_v19, %v3056_v29  ;;  %v3141_v53 = vsel %vm1105_vm11, %v3139_v52, %v3140_v30  ;;  %v3200_v14 = vsel %vm1376_vm7, %v3198_v24, %v3199_v47  ;;  %v3259_v59 = vsel %vm2201_vm14, %v3257_v3, %v3258_v27 }
 0x50d   : > { %v3007_v17 = vsel %vm4859_vm13, %v3003_v31, 0.0  ;;  %3082 = vmatmul.f32.vlgmr.msra.gmra.mxu0 %v3057_v6  ;;  %3166 = vmatmul.f32.vlgmr.msrb.gmra.mxu2 %v3141_v53  ;;  %v1849_v6 = vadd.f32 %v5187_v49, %v5193_v32 }
 0x50e   : > { %v3011_v56 = vmul.f32 0.1, %v3007_v17  ;;  %3225 = vmatmul.f32.vlgmr.msrb.gmra.mxu3 %v3200_v14  ;;  %v2938_v1 = vpop.f32.mrf.mxu2 }
 0x50f   : > { %v2944_v34 = vadd.f32 %v2938_v1, %v2880_v22 }
 0x510   : > { %v3015_v43 = vmax.f32 %v3007_v17, %v3011_v56  ;;  %v1923_v17 = vadd.f32 %v5197_v60, %v1852_v4  ;;  %v3834_v60 = vld [vmem:[%s5694_s11] ss:$0 sm:$0xff] }
 0x511   : > { %v2997_v2 = vadd.f32 %v2991_v44, %v2944_v34  ;;  %v1922_v34 = vadd.f32 %v5189_v7, %v1849_v6  ;;  %v3830_v44 = vld [vmem:[%s5692_s16] ss:$0 sm:$0xff] }
 0x512   : > { %3116 = vmatmul.f32.gmra.mxu1 %v3015_v43  ;;  %v3058_v15 = vrot.slane %v3015_v43, 1  ;;  %v3142_v40 = vrot.slane %v3015_v43, 2  ;;  %v3201_v36 = vrot.slane %v3015_v43, 3  ;;  %v3260_v38 = vrot.slane %v3015_v43, 4 }
 0x513   : > { %v3004_v20 = vadd.f32 %v5408_v37, %v2997_v2  ;;  %v1929_v2 = vadd.f32 %v3830_v44, %v1923_v17  ;;  %v1928_v32 = vadd.f32 %v3830_v44, %v1922_v34 }
 0x514   : > { %v3059_v46 = vsel %vm1000_vm12, %v3056_v29, %v3058_v15  ;;  %v3143_v61 = vsel %vm1105_vm11, %v3140_v30, %v3142_v40  ;;  %v3202_v42 = vsel %vm1376_vm7, %v3199_v47, %v3201_v36  ;;  %v3261_v25 = vsel %vm2201_vm14, %v3258_v27, %v3260_v38 }
 0x515   : > { %v3008_v28 = vsel %vm4886_vm0, %v3004_v20, 0.0  ;;  %3085 = vmatmul.f32.gmra.mxu0 %v3059_v46  ;;  %3169 = vmatmul.f32.gmra.mxu2 %v3143_v61  ;;  %v1935_v7 = vrot.slane %v1929_v2, 2  ;;  %v1934_v46 = vrot.slane %v1928_v32, 2 }
 0x516   : > { %v3012_v48 = vmul.f32 0.1, %v3008_v28  ;;  %3228 = vmatmul.f32.gmra.mxu3 %v3202_v42 }
 0x517   : > { %v1936_v23 = vsel %vm1105_vm11, %v1934_v46, %v1935_v7 }
 0x518   : > { %v3016_v0 = vmax.f32 %v3008_v28, %v3012_v48 }
 0x51a   : > { %3119 = vmatmul.f32.gmra.mxu1 %v3016_v0  ;;  %v3060_v39 = vrot.slane %v3016_v0, 1  ;;  %v3144_v18 = vrot.slane %v3016_v0, 2  ;;  %v3203_v41 = vrot.slane %v3016_v0, 3  ;;  %v3262_v21 = vrot.slane %v3016_v0, 4 }
 0x51c   : > { %v3061_v37 = vsel %vm1000_vm12, %v3058_v15, %v3060_v39  ;;  %v3145_v50 = vsel %vm1105_vm11, %v3142_v40, %v3144_v18  ;;  %v3204_v26 = vsel %vm1376_vm7, %v3201_v36, %v3203_v41  ;;  %v3263_v10 = vsel %vm2201_vm14, %v3260_v38, %v3262_v21 }
 0x51d   : > { %3088 = vmatmul.f32.gmra.mxu0 %v3061_v37  ;;  %3172 = vmatmul.f32.gmra.mxu2 %v3145_v50  ;;  %v1924_v40 = vadd.f32 %v5205_v9, %v1855_v54 }
 0x51e   : > { %3231 = vmatmul.f32.gmra.mxu3 %v3204_v26 }
 0x51f   : > { %v1930_v45 = vadd.f32 %v3830_v44, %v1924_v40 }
 0x521   : > { %v1937_v37 = vrot.slane %v1930_v45, 2 }
 0x525   : > { %3091 = vmatmul.f32.gmra.mxu0 %v3060_v39  ;;  %3175 = vmatmul.f32.gmra.mxu2 %v3144_v18 }
 0x526   : > { %3234 = vmatmul.f32.gmra.mxu3 %v3203_v41  ;;  %v1941_v41 = vsel %vm4835_vm8, %v1936_v23, 0.0 }
 0x527   : > { %v1943_v3 = vadd.f32 %v1941_v41, %v5033_v35 }
 0x52d   : > { %3284 = vmatmul.f32.vlgmr.msrb.gmra.mxu0 %v3259_v59 }
 0x535   : > { %3287 = vmatmul.f32.gmra.mxu0 %v3261_v25  ;;  %v1938_v25 = vsel %vm1105_vm11, %v1935_v7, %v1937_v37 }
 0x53d   : > { %3290 = vmatmul.f32.gmra.mxu0 %v3263_v10 }
 0x545   : > { %3293 = vmatmul.f32.gmra.mxu0 %v3262_v21 }
 0x57f   : > { %v3111_v55 = vpop.f32.mrf.mxu1 }
 0x587   : > { %v3114_v58 = vpop.f32.mrf.mxu1 }
 0x58a   : > { %v3083_v62 = vpop.f32.mrf.mxu0 }
 0x58b   : > { %v3112_v53 = vadd.f32 %v3111_v55, %v3083_v62  ;;  %v1942_v62 = vsel %vm4859_vm13, %v1938_v25, 0.0 }
 0x58f   : > { %v3117_v19 = vpop.f32.mrf.mxu1 }
 0x590   : > { %v3167_v52 = vpop.f32.mrf.mxu2 }
 0x591   : > { %v3226_v33 = vpop.f32.mrf.mxu3  ;;  %v3178_v22 = vadd.f32 %v3167_v52, %v3112_v53 }
 0x592   : > { %v3086_v13 = vpop.f32.mrf.mxu0 }
 0x593   : > { %v3115_v43 = vadd.f32 %v3114_v58, %v3086_v13  ;;  %v3237_v63 = vadd.f32 %v3226_v33, %v3178_v22 }
 0x597   : > { %v3120_v57 = vpop.f32.mrf.mxu1 }
 0x598   : > { %v3170_v29 = vpop.f32.mrf.mxu2 }
 0x599   : > { %v3229_v30 = vpop.f32.mrf.mxu3  ;;  %v3179_v49 = vadd.f32 %v3170_v29, %v3115_v43 }
 0x59a   : > { %v3089_v24 = vpop.f32.mrf.mxu0 }
 0x59b   : > { %v3238_v36 = vadd.f32 %v3229_v30, %v3179_v49  ;;  %v3118_v61 = vadd.f32 %v3117_v19, %v3089_v24  ;;  %v1944_v19 = vadd.f32 %v1942_v62, %v5044_v16 }
 0x5a0   : > { %v3173_v47 = vpop.f32.mrf.mxu2 }
 0x5a1   : > { %v3232_v11 = vpop.f32.mrf.mxu3  ;;  %v3180_v48 = vadd.f32 %v3173_v47, %v3118_v61 }
 0x5a2   : > { %v3092_v31 = vpop.f32.mrf.mxu0 }
 0x5a3   : > { %v3239_v9 = vadd.f32 %v3232_v11, %v3180_v48 }
 0x5a8   : > { %v3176_v14 = vpop.f32.mrf.mxu2 }
 0x5a9   : > { %v3235_v56 = vpop.f32.mrf.mxu3 }
 0x5aa   : > { %v3285_v1 = vpop.f32.mrf.mxu0 }
 0x5ab   : > { %v3296_v15 = vadd.f32 %v3285_v1, %v3237_v63 }
 0x5ad   : > { %v3302_v42 = vadd.f32 %v3834_v60, %v3296_v15 }
 0x5af   : > { %v3308_v39 = vrot.slane %v3302_v42, 6 }
 0x5b2   : > { %v3288_v20 = vpop.f32.mrf.mxu0 }
 0x5b3   : > { %v3297_v28 = vadd.f32 %v3288_v20, %v3238_v36 }
 0x5b5   : > { %v3303_v0 = vadd.f32 %v3834_v60, %v3297_v28 }
 0x5b7   : > { %v3309_v18 = vrot.slane %v3303_v0, 6 }
 0x5b9   : > { %v3310_v50 = vsel %vm1450_vm9, %v3308_v39, %v3309_v18 }
 0x5ba   : > { %v3315_v26 = vsel %vm4835_vm8, %v3310_v50, 0.0  ;;  %v3291_v27 = vpop.f32.mrf.mxu0 }
 0x5bb   : > { %v3317_v59 = vadd.f32 %v3315_v26, %v5351_v5  ;;  %v3298_v38 = vadd.f32 %v3291_v27, %v3239_v9 }
 0x5bd   : > { %v3319_v21 = vadd.f32 %v3317_v59, %v1943_v3  ;;  %v3304_v10 = vadd.f32 %v3834_v60, %v3298_v38 }
 0x5bf   : > { %v3321_v55 = vmul.f32 0.5, %v3319_v21  ;;  %v3311_v58 = vrot.slane %v3304_v10, 6 }
 0x5c1   : > { %v3312_v51 = vsel %vm1450_vm9, %v3309_v18, %v3311_v58  ;;  %3323 = vst [vmem:[%s879_s25] sm:$0xff] %v3321_v55 }
 0x5c2   : > { %v3316_v35 = vsel %vm4859_vm13, %v3312_v51, 0.0  ;;  %v3294_v5 = vpop.f32.mrf.mxu0 }
 0x5c3   : > { %v3318_v52 = vadd.f32 %v3316_v35, %v5362_v8 }
 0x5c5   : > { %v3320_v33 = vadd.f32 %v3318_v52, %v1944_v19 }
 0x5c7   : > { %v3322_v13 = vmul.f32 0.5, %v3320_v33 }
 0x5c9   : > { %3324 = vst [vmem:[%s879_s25 + $0x8] sm:$0xff] %v3322_v13 }
 0x5ca   : > { %4192 = shalt.err (!%p4189_p11)
}
 0x5cb   : > { %s4347_s19 = smov 128   ;;  %s4348_s27 = smov 8  }
 0x5cc   : > { %3644 = dma.vmem_to_hbm [thread:$0]  (%p4690_p5), %s3341_s30, 256, %s3343_s3, %s3326_s2, %s4347_s19, %s4347_s19, %s4348_s27  }
 0x5cd PF: > { %s5697_s29 = sld [smem:[#allocation33_spill]]  ;;  %p3702_p12 = scmp.ge.s32.totalorder %s4335_s28, 2 }
 0x5cf   : > { %p3682_p13 = pnand %p3702_p12, %p4694_p0 }
 0x5d1   : > { %p3683_p8 = pneg %p3682_p13 }
 0x5d3   : > { %s3357_s10 = sand.u32 1, %s5697_s29  }
 0x5d4   : > { %s3358_s11 = scalar_lea.sflag [#allocation4], %s3357_s10 }
 0x5d5   : > { %4278 = dma.done.wait (%p3683_p8), %s3358_s11, 256  }
 0x5d6   : > { %4280 = vsyncadd (%p3683_p8), %s3358_s11, 4294967040  ;;  %s42_s28 = sadd.s32 1, %s4335_s28   ;;  %s5699_s0 = sld [smem:[#allocation30_spill]] }
 0x5d7   : > { %p5508_p7 = scmp.ge.s32.totalorder %s42_s28, 8   ;;  %s5700_s30 = sld [smem:[#allocation31_spill]] }
 0x5d8   : > { %s5701_s21 = sld [smem:[#allocation32_spill]]  ;;  %s5709_s20 = smov %s5727_s5 }
 0x5d9   : > { %s5702_s17 = sld [smem:[#allocation45_spill]]  ;;  %s5710_s1 = smov %s4303_s22 }
 0x5da   : > { %s5703_s14 = sld [smem:[#allocation34_spill]]  ;;  %s5712_s2 = smov %s4311_s23 }
 0x5db   : > { %s5704_s24 = sld [smem:[#allocation46_spill]] }
 0x5dc   : > { %s5705_s25 = sld [smem:[#allocation37_spill]]  ;;  %41 = sbr.rel (!%p5508_p7) target bundleno = 37 (0x25), region = 221 }
 0x5dd   : > { %s5706_s3 = sld [smem:[#allocation38_spill]] }
 0x5de   : > { %s5707_s26 = sld [smem:[#allocation42_spill]] }
 0x5df   : > { %s5708_s27 = sld [smem:[#allocation43_spill]]  ;;  %s5711_s22 = smov %s5702_s17 }
 0x5e0   : > { %s5713_s23 = smov %s5703_s14 }
 0x5e1   :  { %3364 = vsyncpa [#allocation3], 1 }
 0x5e2   :  { %3366 = vsyncpa [#allocation3 + $0x1], 1 }
 0x5e3   :  { %3367 = vsyncpa [#allocation6], 1 }
 0x5e4   :  { %3369 = vsyncpa [#allocation6 + $0x1], 1 }
 0x5e5   :  { %3370 = vsyncpa [#allocation9], 1 }
 0x5e6   :  { %3371 = vsyncpa [#allocation12], 1 }
 0x5e7   :  { %3372 = vsyncpa [#allocation15], 1 }
 0x5e8   :  { %3373 = vsyncpa [#allocation18], 1 }
 0x5e9   :  { %3374 = vsyncpa [#allocation4], 1 }
 0x5ea   :  { %3376 = vsyncpa [#allocation4 + $0x1], 1 }

// kernel: tpu_custom_call.1
= control target key start
LH: loop header
LB: loop body
LE: loop exit
PB: predicated region body
PF: predicated region fallthrough
CT: control target
= control target key end

     0   :  { %s5555_s0 = inlined_call_operand.hbm [shape: f32[2,48,128], index: 0, kind: input, shape index: {}]   ;;  %s5556_s1 = inlined_call_operand.hbm [shape: f32[2,48,128], index: 1, kind: input, shape index: {}]   ;;  %s5557_s2 = inlined_call_operand.hbm [shape: f32[2,48,128], index: 2, kind: input, shape index: {}]   ;;  %s5558_s3 = inlined_call_operand.hbm [shape: f32[3,128,128], index: 3, kind: input, shape index: {}]   ;;  %s5559_s4 = inlined_call_operand.hbm [shape: f32[3,128,128], index: 4, kind: input, shape index: {}]   ;;  %s5560_s5 = inlined_call_operand.hbm [shape: f32[3,128,128], index: 5, kind: input, shape index: {}]   ;;  %s5561_s6 = inlined_call_operand.hbm [shape: f32[3,128,128], index: 6, kind: input, shape index: {}]   ;;  %s5562_s7 = inlined_call_operand.hbm [shape: f32[5,128,128], index: 7, kind: input, shape index: {}]   ;;  %s5563_s8 = inlined_call_operand.hbm [shape: f32[5,128,128], index: 8, kind: input, shape index: {}]   ;;  %s5564_s9 = inlined_call_operand.hbm [shape: f32[5,128,128], index: 9, kind: input, shape index: {}]   ;;  %s5565_s10 = inlined_call_operand.hbm [shape: f32[5,128,128], index: 10, kind: input, shape index: {}]   ;;  %s5566_s11 = inlined_call_operand.vmem [shape: f32[1,128], index: 11, kind: input, shape index: {}]   ;;  %s5567_s12 = inlined_call_operand.vmem [shape: f32[1,128], index: 12, kind: input, shape index: {}]   ;;  %s5568_s13 = inlined_call_operand.vmem [shape: f32[1,128], index: 13, kind: input, shape index: {}]   ;;  %s5569_s14 = inlined_call_operand.vmem [shape: f32[1,128], index: 14, kind: input, shape index: {}]   ;;  %s5570_s15 = inlined_call_operand.vmem [shape: f32[1,128], index: 15, kind: input, shape index: {}]   ;;  %s5571_s16 = inlined_call_operand.vmem [shape: f32[1,128], index: 16, kind: input, shape index: {}]   ;;  %s5572_s17 = inlined_call_operand.vmem [shape: f32[1,128], index: 17, kind: input, shape index: {}]   ;;  %s5573_s18 = inlined_call_operand.vmem [shape: f32[1,128], index: 18, kind: input, shape index: {}]   ;;  %s5574_s19 = inlined_call_operand.hbm [shape: f32[2,48,128], index: 19, kind: output, shape index: {}]  }
   0x1   :  { %5598 = sst [smem:[#allocation47_spill]] %s5555_s0 }
   0x2   :  { %5599 = sst [smem:[#allocation48_spill]] %s5556_s1 }
   0x3   :  { %5600 = sst [smem:[#allocation49_spill]] %s5557_s2 }
   0x4   :  { %5601 = sst [smem:[#allocation50_spill]] %s5558_s3 }
   0x5   :  { %5602 = sst [smem:[#allocation51_spill]] %s5559_s4 }
   0x6   :  { %5603 = sst [smem:[#allocation52_spill]] %s5560_s5 }
   0x7   :  { %5604 = sst [smem:[#allocation53_spill]] %s5561_s6 }
   0x8   :  { %5605 = sst [smem:[#allocation54_spill]] %s5562_s7 }
   0x9   :  { %5606 = sst [smem:[#allocation55_spill]] %s5563_s8 }
   0xa   :  { %5607 = sst [smem:[#allocation56_spill]] %s5564_s9 }
   0xb   :  { %5608 = sst [smem:[#allocation57_spill]] %s5565_s10 }
   0xc   :  { %5609 = sst [smem:[#allocation58_spill]] %s5566_s11 }
   0xd   :  { %5610 = sst [smem:[#allocation59_spill]] %s5567_s12 }
   0xe   :  { %5611 = sst [smem:[#allocation60_spill]] %s5568_s13 }
   0xf   :  { %5612 = sst [smem:[#allocation61_spill]] %s5569_s14 }
  0x10   :  { %5613 = sst [smem:[#allocation62_spill]] %s5570_s15 }
  0x11   :  { %5614 = sst [smem:[#allocation63_spill]] %s5571_s16 }
  0x12   :  { %5615 = sst [smem:[#allocation64_spill]] %s5572_s17 }
  0x13   :  { %5616 = sst [smem:[#allocation65_spill]] %s5573_s18 }
  0x14   :  { %5617 = sst [smem:[#allocation66_spill]] %s5574_s19 }
  0x15   :  { %24 = vsyncpa [#allocation3], 0 }
  0x16   :  { %26 = vsyncpa [#allocation3 + $0x1], 0 }
  0x17   :  { %27 = vsyncpa [#allocation6], 0 }
  0x18   :  { %29 = vsyncpa [#allocation6 + $0x1], 0 }
  0x19   :  { %30 = vsyncpa [#allocation9], 0 }
  0x1a   :  { %31 = vsyncpa [#allocation12], 0 }
  0x1b   :  { %32 = vsyncpa [#allocation15], 0 }
  0x1c   :  { %33 = vsyncpa [#allocation18], 0 }
  0x1d   :  { %34 = vsyncpa [#allocation4], 0 }
  0x1e   :  { %36 = vsyncpa [#allocation4 + $0x1], 0  ;;  %s4449_s0 = smov 0   ;;  %s4451_s30 = smov 0  }
  0x1f   :  { %s4453_s20 = smov 0   ;;  %s4455_s21 = smov 0  }
  0x20   :  { %s4457_s1 = smov 0   ;;  %s4459_s22 = smov 0  }
  0x21   :  { %s4461_s2 = smov 0   ;;  %s4463_s23 = smov 0  }
  0x22   :  { %s4465_s24 = smov 0   ;;  %s4467_s25 = smov 0  }
  0x23   :  { %s4469_s3 = smov 0   ;;  %s4471_s26 = smov 0  }
  0x24   :  { %s4473_s27 = smov 0   ;;  %s4475_s28 = smov 0  }
  0x25 LB: > { %5618 = sst [smem:[#allocation29_spill]] %s4283_s0  ;;  %s4520_s29 = sadd.s32 4294967295, %s4335_s28   ;;  %s4335_s28 = sphi %s4475_s28, %s42_s28   ;;  %s4331_s27 = sphi %s4473_s27, %s5708_s27   ;;  %s4327_s26 = sphi %s4471_s26, %s5707_s26   ;;  %s4323_s3 = sphi %s4469_s3, %s5706_s3   ;;  %s4319_s25 = sphi %s4467_s25, %s5705_s25   ;;  %s4315_s24 = sphi %s4465_s24, %s5704_s24   ;;  %s4311_s23 = sphi %s4463_s23, %s5713_s23   ;;  %s4307_s2 = sphi %s4461_s2, %s5712_s2   ;;  %s4303_s22 = sphi %s4459_s22, %s5711_s22   ;;  %s4299_s1 = sphi %s4457_s1, %s5710_s1   ;;  %s4295_s21 = sphi %s4455_s21, %s5701_s21   ;;  %s4291_s20 = sphi %s4453_s20, %s5709_s20   ;;  %s4287_s30 = sphi %s4451_s30, %s5700_s30   ;;  %s4283_s0 = sphi %s4449_s0, %s5699_s0  }
  0x26   : > { %5619 = sst [smem:[#allocation30_spill]] %s4287_s30  ;;  %p3562_p0 = scmp.ge.s32.totalorder %s4335_s28, 1 }
  0x27   : > { %5620 = sst [smem:[#allocation31_spill]] %s4291_s20  ;;  %p77_p1 = scmp.eq.s32.totalorder %s4520_s29, 0 }
  0x28   : > { %5621 = sst [smem:[#allocation32_spill]] %s4299_s1  ;;  %p519_p2 = scmp.lt.s32.totalorder %s4335_s28, 7 }
  0x29   : > { %5622 = sst [smem:[#allocation33_spill]] %s4307_s2  ;;  %s4337_s16 = smov [#allocation8]  }
  0x2a   : > { %5623 = sst [smem:[#allocation34_spill]] %s4315_s24  ;;  %p4528_p3 = pnand %p3562_p0, %p519_p2 }
  0x2b   : > { %5624 = sst [smem:[#allocation35_spill]] %s4319_s25  ;;  %s532_s15 = sshll.u32 %s4337_s16, 4  ;;  %s533_s15 = int_to_ptr.vmem [resolvable:$true] %s532_s15 }
  0x2c   : > { %5625 = sst [smem:[#allocation36_spill]] %s4323_s3  ;;  %p3646_p4 = pneg %p4528_p3 }
  0x2d   : > { %5626 = sst [smem:[#allocation37_spill]] %s4327_s26  ;;  %s5578_s18 = smov 128  }
  0x2e   : > { %5627 = sst [smem:[#allocation38_spill]] %s4331_s27  ;;  %p4536_p5 = pnand %p3646_p4, %p77_p1 }
  0x2f   : > { %5628 = sst [smem:[#allocation39_spill]] %s4520_s29  ;;  %s5580_s19 = smov 8  }
  0x30   : > { %s5629_s14 = sld [smem:[#allocation50_spill]]  ;;  %s4340_s16 = smov [#allocation11]  }
  0x31   : > { %s5630_s17 = scalar_select %p4528_p3, 1, 0 }
  0x32   : > { %s5633_s5 = sld [smem:[#allocation52_spill]]  ;;  %s560_s25 = sshll.u32 %s4340_s16, 4  ;;  %s561_s25 = int_to_ptr.vmem [resolvable:$true] %s560_s25 }
  0x33   : > { %5631 = sst [smem:[#allocation40_spill]] %s5630_s17  ;;  %s4341_s16 = smov [#allocation14]  }
  0x34   : > { %s5634_s7 = sld [smem:[#allocation54_spill]]  ;;  %s4342_s17 = smov [#allocation17]  }
  0x35   : > { %s5635_s9 = sld [smem:[#allocation56_spill]]  ;;  %s616_s0 = sshll.u32 %s4342_s17, 4  ;;  %s617_s0 = int_to_ptr.vmem [resolvable:$true] %s616_s0 }
  0x36   : > { %s530_s3 = sshll.u32 %s5629_s14, 4  ;;  %p71_p7 = scmp.eq.s32.totalorder %s4335_s28, 0  ;;  %s531_s3 = int_to_ptr.hbm [resolvable:$true] %s530_s3 }
  0x37   : > { %3649 = dma.hbm_to_vmem [thread:$0]  (!%p4536_p5), %s531_s3, 6144, %s533_s15, [#allocation9], %s5578_s18, %s5578_s18, %s5580_s19  }
  0x38   : > { %s558_s14 = sshll.u32 %s5633_s5, 4  ;;  %s588_s5 = sshll.u32 %s4341_s16, 4  ;;  %s559_s14 = int_to_ptr.hbm [resolvable:$true] %s558_s14  ;;  %s589_s5 = int_to_ptr.vmem [resolvable:$true] %s588_s5 }
  0x39   : > { %3655 = dma.hbm_to_vmem [thread:$0]  (!%p4536_p5), %s559_s14, 6144, %s561_s25, [#allocation12], %s5578_s18, %s5578_s18, %s5580_s19  }
  0x3a   : > { %s586_s11 = sshll.u32 %s5634_s7, 4  ;;  %s4570_s25 = sadd.s32 1, %s4327_s26  ;;  %s587_s11 = int_to_ptr.hbm [resolvable:$true] %s586_s11 }
  0x3b   : > { %s614_s3 = sshll.u32 %s5635_s9, 4  ;;  %5636 = sst [smem:[#allocation41_spill]] %s4570_s25  ;;  %s615_s3 = int_to_ptr.hbm [resolvable:$true] %s614_s3 }
  0x3c   : > { %3661 = dma.hbm_to_vmem [thread:$0]  (!%p4536_p5), %s587_s11, 10240, %s589_s5, [#allocation15], %s5578_s18, %s5578_s18, %s5580_s19  }
  0x3d   : > { %3667 = dma.hbm_to_vmem [thread:$0]  (!%p4536_p5), %s615_s3, 10240, %s617_s0, [#allocation18], %s5578_s18, %s5578_s18, %s5580_s19  }
  0x3e   : > { %s54_s14 = sadd.s32 1, %s4331_s27  ;;  %p52_p6 = scmp.ge.s32.totalorder %s4570_s25, 3 }
  0x3f   : > { %s3560_s5 = sadd.s32 4294967295, %s4327_s26  ;;  %s97_s11 = sadd.s32 1, %s4303_s22 }
  0x40   : > { %s4578_s12 = scalar_select %p52_p6, 0, %s4570_s25  }
  0x41   : > { %s5715_s14 = smov (!%p52_p6, %s54_s14), %s4331_s27  ;;  %p87_p8 = scmp.gt.s32.totalorder %s3560_s5, 0 }
  0x42   : > { %5637 = sst [smem:[#allocation42_spill]] %s4578_s12  ;;  %s59_s15 = ssub.s32 %s4327_s26, %s4578_s12 }
  0x43   : > { %p56_p9 = scmp.ge.s32.totalorder %s5715_s14, 2  ;;  %s3561_s3 = sadd.s32 4294967295, %s4578_s12 }
  0x44   : > { %s5717_s5 = smov (!%p87_p8, %s3560_s5), 0  ;;  %p90_p10 = scmp.gt.s32.totalorder %s3561_s3, 0 }
  0x45   : > { %s5719_s14 = smov (%p56_p9, %s5715_s14), 0  ;;  %p104_p11 = scmp.ne.s32.totalorder %s4303_s22, %s4299_s1 }
  0x46   : > { %5638 = sst [smem:[#allocation43_spill]] %s5719_s14  ;;  %s4590_s16 = ssub.s32 %s4331_s27, %s5719_s14 }
  0x47   : > { %p110_p12 = scmp.ne.s32.totalorder %s4299_s1, %s4295_s21  ;;  %s4595_s17 = sor.u32 %s59_s15, %s4590_s16 }
  0x48   : > { %p4599_p13 = por %p104_p11, %p71_p7  ;;  %p61_p0 = scmp.eq.s32.totalorder %s4595_s17, 0 }
  0x49   : > { %p4606_p2 = por %p110_p12, %p77_p1  ;;  %s5721_s3 = smov (!%p90_p10, %s3561_s3), 0 }
  0x4a   : > { %p5597_p4 = scmp.lt.s32.totalorder %s4335_s28, 6  ;;  %s4612_s19 = smul.u32 6, %s4331_s27 }
  0x4b   : > { %s5640_s18 = scalar_select %p4606_p2, 1, 0 }
  0x4c   : > { %s93_s21 = ssub.s32 %s5717_s5, %s5721_s3  ;;  %s692_s15 = sand.u32 1, %s4335_s28  }
  0x4d   : > { %5641 = sst [smem:[#allocation44_spill]] %s5640_s18  ;;  %s94_s7 = sor.u32 %s93_s21, %s4590_s16 }
  0x4e   : > { %p95_p6 = scmp.eq.s32.totalorder %s94_s7, 0  ;;  %s694_s9 = sand.u32 1, %s4303_s22  }
  0x4f   : > { %s3575_s14 = sshll.u32 %s694_s9, 4  ;;  %s3577_s1 = sshll.u32 %s5717_s5, 1 }
  0x50   : > { %s4618_s30 = scalar_select %p95_p6, %s4303_s22, %s97_s11  }
  0x51   : > { %s704_s20 = sadd.s32 %s4612_s19, %s3577_s1  ;;  %s696_s25 = scalar_lea.vmem [#allocation5], %s3575_s14 }
  0x52   : > { %5642 = sst [smem:[#allocation45_spill]] %s4618_s30  ;;  %s3578_s12 = sshll.u32 %s704_s20, 3 }
  0x53   : > { %s709_s18 = sshll.u32 %s696_s25, 4  ;;  %s5643_s29 = sld [smem:[#allocation48_spill]]  ;;  %s710_s18 = int_to_ptr.vmem [resolvable:$true] %s709_s18 }
  0x54   : > { %p3675_p8 = pnand %p5597_p4, %p4599_p13  ;;  %s5644_s4 = sld [smem:[#allocation51_spill]] }
  0x55   : > { %s4631_s20 = scalar_lea.sflag [#allocation6], %s692_s15  ;;  %s5645_s1 = smov 8  }
  0x56   : > { %s5646_s25 = smov 128   ;;  %s5647_s6 = sld [smem:[#allocation53_spill]] }
  0x57   : > { %s4344_s11 = smov [#allocation13]   ;;  %s5648_s8 = sld [smem:[#allocation55_spill]] }
  0x58   : > { %s5649_s0 = sld [smem:[#allocation33_spill]]  ;;  %s4345_s26 = smov [#allocation16]  }
  0x59   : > { %s706_s10 = scalar_lea.hbm %s5643_s29, %s3578_s12  ;;  %s4343_s29 = smov [#allocation10]  }
  0x5a   : > { %s707_s2 = sshll.u32 %s706_s10, 4  ;;  %s544_s5 = sshll.u32 %s5644_s4, 4  ;;  %s708_s2 = int_to_ptr.hbm [resolvable:$true] %s707_s2  ;;  %s545_s5 = int_to_ptr.hbm [resolvable:$true] %s544_s5 }
  0x5b   : > { %3677 = dma.hbm_to_vmem [thread:$0]  (!%p3675_p8), %s708_s2, 256, %s710_s18, %s4631_s20, %s5646_s25, %s5646_s25, %s5645_s1  }
  0x5c   : > { %s572_s10 = sshll.u32 %s5647_s6, 4  ;;  %s546_s14 = sshll.u32 %s4343_s29, 4  ;;  %s573_s10 = int_to_ptr.hbm [resolvable:$true] %s572_s10  ;;  %s547_s14 = int_to_ptr.vmem [resolvable:$true] %s546_s14 }
  0x5d   : > { %3652 = dma.hbm_to_vmem [thread:$0]  (!%p4536_p5), %s545_s5, 6144, %s547_s14, [#allocation9], %s5646_s25, %s5646_s25, %s5645_s1  }
  0x5e   : > { %s574_s12 = sshll.u32 %s4344_s11, 4  ;;  %s600_s18 = sshll.u32 %s5648_s8, 4  ;;  %s575_s12 = int_to_ptr.vmem [resolvable:$true] %s574_s12  ;;  %s601_s18 = int_to_ptr.hbm [resolvable:$true] %s600_s18 }
  0x5f   : > { %3658 = dma.hbm_to_vmem [thread:$0]  (!%p4536_p5), %s573_s10, 6144, %s575_s12, [#allocation12], %s5646_s25, %s5646_s25, %s5645_s1  }
  0x60   : > { %s5650_s7 = sld [smem:[#allocation57_spill]]  ;;  %s602_s27 = sshll.u32 %s4345_s26, 4  ;;  %s603_s27 = int_to_ptr.vmem [resolvable:$true] %s602_s27 }
  0x61   : > { %s5651_s9 = sld [smem:[#allocation39_spill]]  ;;  %s4346_s29 = smov [#allocation19]  }
  0x62   : > { %3664 = dma.hbm_to_vmem [thread:$0]  (!%p4536_p5), %s601_s18, 10240, %s603_s27, [#allocation15], %s5646_s25, %s5646_s25, %s5645_s1  }
  0x63   : > { %s5652_s14 = sld [smem:[#allocation37_spill]]  ;;  %s630_s10 = sshll.u32 %s4346_s29, 4  ;;  %s631_s10 = int_to_ptr.vmem [resolvable:$true] %s630_s10 }
  0x64   : > { %s3559_s11 = sadd.s32 4294967294, %s4335_s28   ;;  %s63_s12 = sadd.s32 1, %s4315_s24 }
  0x65   : > { %s4671_s3 = scalar_select %p61_p0, %s4315_s24, %s63_s12  }
  0x66   : > { %s628_s5 = sshll.u32 %s5650_s7, 4  ;;  %p70_p9 = scmp.ne.s32.totalorder %s4315_s24, %s4311_s23  ;;  %s629_s5 = int_to_ptr.hbm [resolvable:$true] %s628_s5 }
  0x67   : > { %3670 = dma.hbm_to_vmem [thread:$0]  (!%p4536_p5), %s629_s5, 10240, %s631_s10, [#allocation18], %s5646_s25, %s5646_s25, %s5645_s1  }
  0x68   : > { %5653 = sst [smem:[#allocation46_spill]] %s4671_s3  ;;  %p76_p10 = scmp.ne.s32.totalorder %s4311_s23, %s5649_s0 }
  0x69   : > { %p506_p11 = scmp.eq.s32.totalorder %s5651_s9, 5  ;;  %p512_p12 = scmp.eq.s32.totalorder %s3559_s11, 5 }
  0x6a   : > { %p4680_p13 = por %p71_p7, %p70_p9  ;;  %p4686_p6 = por %p77_p1, %p76_p10 }
  0x6b   : > { %p4690_p5 = por %p506_p11, %p70_p9  ;;  %s5657_s18 = sld [smem:[#allocation41_spill]] }
  0x6c   : > { %p4694_p0 = por %p512_p12, %p76_p10  ;;  %s5659_s21 = sld [smem:[#allocation42_spill]] }
  0x6d   : > { %s668_s15 = sand.u32 1, %s4315_s24   ;;  %s3573_s7 = sshll.u32 %s5652_s14, 1 }
  0x6e   : > { %s5660_s5 = sld [smem:[#allocation31_spill]]  ;;  %s3572_s26 = sshll.u32 %s668_s15, 4 }
  0x6f   : > { %s677_s27 = sadd.s32 %s4612_s19, %s3573_s7  ;;  %s5661_s10 = sld [smem:[#allocation30_spill]] }
  0x70   : > { %s3574_s29 = sshll.u32 %s677_s27, 3  ;;  %s672_s11 = scalar_lea.vmem [#allocation2], %s3572_s26 }
  0x71   : > { %s5662_s12 = sld [smem:[#allocation29_spill]]  ;;  %s682_s4 = sshll.u32 %s672_s11, 4  ;;  %s683_s4 = int_to_ptr.vmem [resolvable:$true] %s682_s4 }
  0x72   : > { %s5663_s3 = sld [smem:[#allocation47_spill]]  ;;  %p3672_p8 = pnand %p5597_p4, %p4680_p13 }
  0x73   : > { %s669_s14 = scalar_lea.sflag [#allocation3], %s668_s15  ;;  %p121_p9 = scmp.lt.s32.totalorder %s5657_s18, 2 }
  0x74   : > { %s123_s7 = sadd.s32 1, %s5659_s21  ;;  %s131_s6 = sadd.s32 1, %s5660_s5 }
  0x75   : > { %p124_p10 = scmp.lt.s32.totalorder %s123_s7, 2  ;;  %s5723_s18 = smov (!%p121_p9, %s5657_s18), 2 }
  0x76   : > { %p138_p11 = scmp.ne.s32.totalorder %s5660_s5, %s5661_s10  ;;  %s3580_s21 = sshll.u32 %s5723_s18, 1 }
  0x77   : > { %s5725_s7 = smov (!%p124_p10, %s123_s7), 2  ;;  %p144_p12 = scmp.ne.s32.totalorder %s5661_s10, %s5662_s12 }
  0x78   : > { %s679_s30 = scalar_lea.hbm %s5663_s3, %s3574_s29  ;;  %s127_s8 = ssub.s32 %s5723_s18, %s5725_s7 }
  0x79   : > { %s680_s24 = sshll.u32 %s679_s30, 4  ;;  %s721_s30 = sand.u32 1, %s5660_s5   ;;  %s681_s24 = int_to_ptr.hbm [resolvable:$true] %s680_s24 }
  0x7a   : > { %3674 = dma.hbm_to_vmem [thread:$0]  (!%p3672_p8), %s681_s24, 256, %s683_s4, %s669_s14, %s5646_s25, %s5646_s25, %s5645_s1  }
  0x7b   : > { %s128_s3 = sor.u32 %s127_s8, %s4590_s16  ;;  %p4723_p13 = por %p138_p11, %p71_p7 }
  0x7c   : > { %p129_p8 = scmp.eq.s32.totalorder %s128_s3, 0  ;;  %p4729_p4 = por %p144_p12, %p77_p1 }
  0x7d   : > { %s3579_s24 = sshll.u32 %s721_s30, 4  ;;  %s731_s15 = sadd.s32 %s4612_s19, %s3580_s21 }
  0x7e   : > { %s5727_s5 = smov (!%p129_p8, %s5660_s5), %s131_s6  ;;  %s3581_s26 = sshll.u32 %s731_s15, 3 }
  0x7f   : > { %s723_s16 = scalar_lea.vmem [#allocation7], %s3579_s24  ;;  %s5666_s11 = sld [smem:[#allocation49_spill]] }
  0x80   : > { %s736_s27 = sshll.u32 %s723_s16, 4  ;;  %p5667_p7 = scmp.lt.s32.totalorder %s4335_s28, 6  ;;  %s737_s27 = int_to_ptr.vmem [resolvable:$true] %s736_s27 }
  0x81   : > { %s4751_s19 = sand.u32 (!%p4528_p3), 1, %s4311_s23  }
  0x82   : > { %p3678_p9 = pnand %p5667_p7, %p4723_p13  ;;  %s3583_s18 = sshll.u32 (!%p4528_p3), %s4751_s19, 4 }
  0x83   : > { %748 = sbr.rel (%p4528_p3) target bundleno = 1485 (0x5cd), region = 96  ;;  %s751_s7 = scalar_lea.sflag (!%p4528_p3), [#allocation3], %s4751_s19 }
  0x84   : > { %s4757_s6 = scalar_lea.vmem (!%p4528_p3), [#allocation2], %s3583_s18 }
  0x85   : > { %s733_s12 = scalar_lea.hbm %s5666_s11, %s3581_s26 }
  0x86   : > { %s734_s14 = sshll.u32 %s733_s12, 4  ;;  %s735_s14 = int_to_ptr.hbm [resolvable:$true] %s734_s14 }
  0x87   : > { %3680 = dma.hbm_to_vmem [thread:$0]  (!%p3678_p9), %s735_s14, 256, %s737_s27, %s4631_s20, %s5646_s25, %s5646_s25, %s5645_s1  }
  0x88   : > { %4250 = dma.done.wait (%p4686_p6), %s751_s7, 256  }
  0x89   : > { %4252 = vsyncadd (%p4686_p6), %s751_s7, 4294967040  ;;  %s5669_s20 = sld [smem:[#allocation39_spill]] }
  0x8a   : > { %s5670_s1 = sld [smem:[#allocation32_spill]] }
  0x8f   : > { %s760_s8 = sand.u32 1, %s5669_s20  }
  0x90   : > { %s762_s30 = sand.u32 1, %s5670_s1   ;;  %s761_s2 = scalar_lea.sflag [#allocation6], %s760_s8 }
  0x91   : > { %s4765_s3 = sshll.u32 %s762_s30, 4 }
  0x92   : > { %s764_s24 = scalar_lea.vmem [#allocation5], %s4765_s3 }
  0x93   : > { %4254 = dma.done.wait (%p4606_p2), %s761_s2, 256  }
  0x94   : > { %4256 = vsyncadd (%p4606_p2), %s761_s2, 4294967040  ;;  %s5672_s21 = sld [smem:[#allocation30_spill]] }
  0x9a   : > { %s772_s15 = sand.u32 1, %s5672_s21  }
  0x9b   : > { %s4773_s13 = sshll.u32 %s772_s15, 4 }
  0x9c   : > { %s774_s26 = scalar_lea.vmem [#allocation7], %s4773_s13 }
  0x9d   : > { %4258 = dma.done.wait (%p4729_p4), %s761_s2, 256  }
  0x9e   : > { %4260 = vsyncadd (%p4729_p4), %s761_s2, 4294967040 }
  0x9f   : > { %4262 = dma.done.wait (%p77_p1), [#allocation9], 12288  }
  0xa0   : > { %4264 = vsyncadd (%p77_p1), [#allocation9], 4294955008 }
  0xa1   : > { %4266 = dma.done.wait (%p77_p1), [#allocation12], 12288  }
  0xa2   : > { %4268 = vsyncadd (%p77_p1), [#allocation12], 4294955008 }
  0xa3   : > { %4270 = dma.done.wait (%p77_p1), [#allocation15], 20480  }
  0xa4   : > { %4272 = vsyncadd (%p77_p1), [#allocation15], 4294946816 }
  0xa5   : > { %4274 = dma.done.wait (%p77_p1), [#allocation18], 20480  }
  0xa6   : > { %4276 = vsyncadd (%p77_p1), [#allocation18], 4294946816  ;;  %s5673_s4 = sld [smem:[#allocation35_spill]]  ;;  %v896_v0 = vlaneseq  ;;  %v1104_v1 = vld [vmem:[#allocation8 + $0x178] sm:$0xff]  ;;  %v1103_v2 = vld [vmem:[#allocation8 + $0x170] sm:$0xff]  ;;  %vm1105_vm11 = vcmask 1045504  }
  0xa7   : > { %v993_v3 = vld [vmem:[#allocation8 + $0xf8] sm:$0xff]  ;;  %1123 = vmatpush.msra.mxu2 %v1104_v1  ;;  %v992_v5 = vld [vmem:[#allocation8 + $0xf0] sm:$0xff]  ;;  %v1102_v7 = vld [vmem:[#allocation8 + $0x168] sm:$0xff]  ;;  %vm1000_vm12 = vcmask 1046528   ;;  %s5686_s11 = sld [smem:[#allocation58_spill]]  ;;  %s879_s25 = scalar_lea.vmem [#allocation20], %s3583_s18 }
  0xa8   : > { %1018 = vmatpush.msra.mxu0 %v993_v3  ;;  %v976_v4 = vld [vmem:[#allocation8 + $0x78] sm:$0xff]  ;;  %v4797_v6 = vshrl.u32 %v896_v0, 7  ;;  %v975_v8 = vld [vmem:[#allocation8 + $0x70] sm:$0xff]  ;;  %v991_v9 = vld [vmem:[#allocation8 + $0xe8] sm:$0xff]  ;;  %s5687_s9 = sld [smem:[#allocation59_spill]]  ;;  %s3340_s30 = sshll.u32 %s879_s25, 4  ;;  %s3341_s30 = int_to_ptr.vmem [resolvable:$true] %s3340_s30 }
  0xa9   : > { %1053 = vmatpush.msra.mxu1 %v976_v4  ;;  %1124 = vmatpush.msra.mxu2 %v1103_v2  ;;  %v974_v10 = vld [vmem:[#allocation8 + $0x68] sm:$0xff]  ;;  %v1101_v11 = vld [vmem:[#allocation8 + $0x160] sm:$0xff]  ;;  %v1100_v16 = vld [vmem:[#allocation8 + $0x158] sm:$0xff]  ;;  %s5688_s20 = sld [smem:[#allocation60_spill]] }
  0xaa   : > { %1019 = vmatpush.msra.mxu0 %v992_v5  ;;  %v990_v12 = vld [vmem:[#allocation8 + $0xe0] sm:$0xff]  ;;  %v898_v14 = vadd.s32 8, %v4797_v6  ;;  %v989_v17 = vld [vmem:[#allocation8 + $0xd8] sm:$0xff]  ;;  %v1099_v19 = vld [vmem:[#allocation8 + $0x150] sm:$0xff]  ;;  %v899_v22 = vadd.s32 16, %v4797_v6  ;;  %v900_v38 = vadd.s32 24, %v4797_v6 }
  0xab   : > { %1054 = vmatpush.msra.mxu1 %v975_v8  ;;  %1125 = vmatpush.msra.mxu2 %v1102_v7  ;;  %v973_v13 = vld [vmem:[#allocation8 + $0x60] sm:$0xff]  ;;  %v972_v18 = vld [vmem:[#allocation8 + $0x58] sm:$0xff]  ;;  %v988_v20 = vld [vmem:[#allocation8 + $0xd0] sm:$0xff]  ;;  %v901_v1 = vadd.s32 32, %v4797_v6  ;;  %s5689_s8 = sld [smem:[#allocation62_spill]] }
  0xac   : > { %s3595_s16 = sshll.u32 %s5673_s4, 4  ;;  %1020 = vmatpush.msra.mxu0 %v991_v9  ;;  %v971_v23 = vld [vmem:[#allocation8 + $0x50] sm:$0xff]  ;;  %v1098_v25 = vld [vmem:[#allocation8 + $0x148] sm:$0xff]  ;;  %v1097_v28 = vld [vmem:[#allocation8 + $0x140] sm:$0xff]  ;;  %s5690_s2 = sld [smem:[#allocation63_spill]] }
  0xad   : > { %s3596_s27 = sadd.s32 4294967280, %s3595_s16  ;;  %1055 = vmatpush.msra.mxu1 %v974_v10  ;;  %1126 = vmatpush.msra.mxu2 %v1101_v11  ;;  %v987_v26 = vld [vmem:[#allocation8 + $0xc8] sm:$0xff]  ;;  %v986_v29 = vld [vmem:[#allocation8 + $0xc0] sm:$0xff]  ;;  %v1096_v32 = vld [vmem:[#allocation8 + $0x138] sm:$0xff]  ;;  %s5691_s15 = sld [smem:[#allocation64_spill]] }
  0xae   : > { %v4800_v15 = vstv %s3596_s27  ;;  %1021 = vmatpush.msra.mxu0 %v990_v12  ;;  %v970_v27 = vld [vmem:[#allocation8 + $0x48] sm:$0xff]  ;;  %v969_v31 = vld [vmem:[#allocation8 + $0x40] sm:$0xff]  ;;  %v985_v33 = vld [vmem:[#allocation8 + $0xb8] sm:$0xff]  ;;  %s5692_s16 = sld [smem:[#allocation61_spill]]  ;;  %s3598_s14 = sshll.u32 %s5673_s4, 1 }
  0xaf   : > { %1056 = vmatpush.msra.mxu1 %v973_v13  ;;  %v906_v21 = vadd.s32 %v4800_v15, %v4797_v6  ;;  %1127 = vmatpush.msra.mxu2 %v1100_v16  ;;  %v907_v24 = vadd.s32 %v4800_v15, %v898_v14  ;;  %v908_v30 = vadd.s32 %v4800_v15, %v899_v22  ;;  %v890_v34 = vld [vmem:[%s764_s24] sm:$0xff]  ;;  %v968_v35 = vld [vmem:[#allocation8 + $0x38] sm:$0xff]  ;;  %v1094_v46 = vld [vmem:[#allocation8 + $0x128] sm:$0xff]  ;;  %v902_v22 = vadd.s32 40, %v4797_v6  ;;  %s5693_s27 = sld [smem:[#allocation36_spill]] }
  0xb0   : > { %1022 = vmatpush.msra.mxu0 %v989_v17  ;;  %v891_v36 = vld [vmem:[%s764_s24 + $0x8] sm:$0xff]  ;;  %v1095_v39 = vld [vmem:[#allocation8 + $0x130] sm:$0xff]  ;;  %v909_v52 = vadd.s32 %v4800_v15, %v900_v38  ;;  %v1093_v53 = vld [vmem:[#allocation8 + $0x120] sm:$0xff]  ;;  %v910_v16 = vadd.s32 %v4800_v15, %v901_v1 }
  0xb1   : > { %1057 = vmatpush.msra.mxu1 %v972_v18  ;;  %1128 = vmatpush.msra.mxu2 %v1099_v19  ;;  %vm912_vm0 = vcmp.ge.s32.totalorder %v906_v21, 0  ;;  %vm918_vm1 = vcmp.lt.s32.totalorder %v906_v21, 40  ;;  %vm913_vm2 = vcmp.ge.s32.totalorder %v907_v24, 0  ;;  %vm919_vm3 = vcmp.lt.s32.totalorder %v907_v24, 40  ;;  %v984_v40 = vld [vmem:[#allocation8 + $0xb0] sm:$0xff]  ;;  %v983_v47 = vld [vmem:[#allocation8 + $0xa8] sm:$0xff] }
  0xb2   : > { %1023 = vmatpush.msra.mxu0 %v988_v20  ;;  %vm4813_vm4 = vmand %vm912_vm0, %vm918_vm1  ;;  %vm914_vm6 = vcmp.ge.s32.totalorder %v908_v30, 0  ;;  %vm920_vm7 = vcmp.lt.s32.totalorder %v908_v30, 40  ;;  %v967_v43 = vld [vmem:[#allocation8 + $0x30] sm:$0xff]  ;;  %v966_v48 = vld [vmem:[#allocation8 + $0x28] sm:$0xff]  ;;  %vm915_vm9 = vcmp.ge.s32.totalorder %v909_v52, 0  ;;  %vm921_vm10 = vcmp.lt.s32.totalorder %v909_v52, 40 }
  0xb3   : > { %1058 = vmatpush.msra.mxu1 %v971_v23  ;;  %1129 = vmatpush.msra.mxu2 %v1098_v25  ;;  %vm4819_vm5 = vmand %vm913_vm2, %vm919_vm3  ;;  %v4825_v42 = vsel %vm4813_vm4, %v890_v34, 0.0  ;;  %v892_v50 = vld [vmem:[%s4757_s6] sm:$0xff]  ;;  %v1092_v55 = vld [vmem:[#allocation8 + $0x118] sm:$0xff]  ;;  %vm916_vm14 = vcmp.ge.s32.totalorder %v910_v16, 0  ;;  %vm922_vm15 = vcmp.lt.s32.totalorder %v910_v16, 40  ;;  %v911_v6 = vadd.s32 %v4800_v15, %v902_v22 }
  0xb4   : > { %1024 = vmatpush.msra.mxu0 %v987_v26  ;;  %v4829_v44 = vsel %vm4819_vm5, %v891_v36, 0.0  ;;  %v948_v45 = vmul.f32 0.1, %v4825_v42  ;;  %vm4835_vm8 = vmand %vm914_vm6, %vm920_vm7  ;;  %v982_v54 = vld [vmem:[#allocation8 + $0xa0] sm:$0xff]  ;;  %v1091_v59 = vld [vmem:[#allocation8 + $0x110] sm:$0xff]  ;;  %vm1179_vm6 = vcmask 1040384  }
  0xb5   : > { %1059 = vmatpush.msra.mxu1 %v970_v27  ;;  %1130 = vmatpush.msra.mxu2 %v1097_v28  ;;  %v949_v49 = vmul.f32 0.1, %v4829_v44  ;;  %v965_v56 = vld [vmem:[#allocation8 + $0x20] sm:$0xff]  ;;  %v981_v60 = vld [vmem:[#allocation8 + $0x98] sm:$0xff]  ;;  %v4848_v61 = vsel %vm4835_vm8, %v892_v50, 0.0  ;;  %v980_v63 = vld [vmem:[#allocation8 + $0x90] sm:$0xff] }
  0xb6   : > { %1025 = vmatpush.msra.mxu0 %v986_v29  ;;  %v4841_v57 = vmax.f32 %v4825_v42, %v948_v45  ;;  %v964_v62 = vld [vmem:[#allocation8 + $0x18] sm:$0xff]  ;;  %v963_v0 = vld [vmem:[#allocation8 + $0x10] sm:$0xff]  ;;  %v950_v4 = vmul.f32 0.1, %v4848_v61  ;;  %v1090_v5 = vld [vmem:[#allocation8 + $0x108] sm:$0xff]  ;;  %vm917_vm1 = vcmp.ge.s32.totalorder %v911_v6, 0 }
  0xb7   : > { %1060 = vmatpush.msra.mxu1 %v969_v31  ;;  %1131 = vmatpush.msra.mxu2 %v1096_v32  ;;  %v4844_v58 = vmax.f32 %v4829_v44, %v949_v49  ;;  %v979_v7 = vld [vmem:[#allocation8 + $0x88] sm:$0xff]  ;;  %vm4859_vm13 = vmand %vm915_vm9, %vm921_vm10  ;;  %v1089_v13 = vld [vmem:[#allocation8 + $0x100] sm:$0xff]  ;;  %vm923_vm2 = vcmp.lt.s32.totalorder %v911_v6, 40  ;;  %vm1376_vm7 = vcmask 1044480   ;;  %vm1450_vm9 = vcmask 1041408   ;;  %s3605_s12 = smul.u32 6, %s5693_s27 }
  0xb8   : > { %1026 = vmatpush.msra.mxu0 %v985_v33  ;;  %v1106_v2 = vrot.slane %v4841_v57, 2  ;;  %v1001_v8 = vrot.slane %v4841_v57, 1  ;;  %v962_v10 = vld [vmem:[#allocation8 + $0x8] sm:$0xff]  ;;  %v978_v14 = vld [vmem:[#allocation8 + $0x80] sm:$0xff]  ;;  %v4868_v19 = vmax.f32 %v4848_v61, %v950_v4  ;;  %vm4886_vm0 = vmand %vm916_vm14, %vm922_vm15  ;;  %vm1532_vm10 = vcmask 1042432  }
  0xb9   : > { %1061 = vmatpush.msra.mxu1 %v968_v35  ;;  %1132 = vmatpush.msra.mxu2 %v1095_v39  ;;  %v1107_v3 = vrot.slane %v4844_v58, 2  ;;  %v1002_v9 = vrot.slane %v4844_v58, 1  ;;  %v893_v11 = vld [vmem:[%s4757_s6 + $0x8] sm:$0xff]  ;;  %v961_v18 = vld [vmem:[#allocation8] sm:$0xff]  ;;  %v1230_v35 = vld [vmem:[#allocation10 + $0x70] sm:$0xff]  ;;  %vm2201_vm14 = vcmask 1043456  }
  0xba   : > { %1027 = vmatpush.msra.mxu0 %v984_v40  ;;  %v4875_v21 = vsel %vm4859_vm13, %v893_v11, 0.0  ;;  %v1109_v23 = vrot.slane %v4868_v19, 2  ;;  %v1004_v25 = vrot.slane %v4868_v19, 1  ;;  %v894_v26 = vld [vmem:[%s774_s26] sm:$0xff]  ;;  %v1231_v33 = vld [vmem:[#allocation10 + $0x78] sm:$0xff]  ;;  %vm4912_vm3 = vmand %vm917_vm1, %vm923_vm2 }
  0xbb   : > { %1062 = vmatpush.msra.mxu1 %v967_v43  ;;  %1133 = vmatpush.msra.mxu2 %v1094_v46  ;;  %v4865_v17 = vsel %vm1105_vm11, %v1106_v2, %v1107_v3  ;;  %v4871_v20 = vsel %vm1000_vm12, %v1001_v8, %v1002_v9  ;;  %v951_v24 = vmul.f32 0.1, %v4875_v21  ;;  %v4902_v31 = vsel %vm4886_vm0, %v894_v26, 0.0  ;;  %v1375_v34 = vld [vmem:[#allocation10 + $0x178] sm:$0xff]  ;;  %v1374_v40 = vld [vmem:[#allocation10 + $0x170] sm:$0xff]  ;;  %v1229_v43 = vld [vmem:[#allocation10 + $0x68] sm:$0xff] }
  0xbc   : > { %1028 = vmatpush.msra.mxu0 %v983_v47  ;;  %v4892_v28 = vsel %vm1105_vm11, %v1107_v3, %v1109_v23  ;;  %v4898_v30 = vsel %vm1000_vm12, %v1002_v9, %v1004_v25  ;;  %v952_v32 = vmul.f32 0.1, %v4902_v31  ;;  %v895_v38 = vld [vmem:[%s774_s26 + $0x8] sm:$0xff]  ;;  %v1247_v47 = vld [vmem:[#allocation10 + $0xf0] sm:$0xff]  ;;  %v1228_v50 = vld [vmem:[#allocation10 + $0x60] sm:$0xff] }
  0xbd   : > { %1063 = vmatpush.msra.mxu1 %v966_v48  ;;  %1134 = vmatpush.msra.mxu2 %v1093_v53  ;;  %v4895_v29 = vmax.f32 %v4875_v21, %v951_v24  ;;  %v1373_v45 = vld [vmem:[#allocation10 + $0x168] sm:$0xff]  ;;  %v1248_v46 = vld [vmem:[#allocation10 + $0xf8] sm:$0xff]  ;;  %v4927_v53 = vsel %vm4912_vm3, %v895_v38, 0.0  ;;  %v1245_v9 = vld [vmem:[#allocation10 + $0xe0] sm:$0xff] }
  0xbe   : > { %1029 = vmatpush.msra.mxu0 %v982_v54  ;;  %v4920_v49 = vmax.f32 %v4902_v31, %v952_v32  ;;  %1272 = vmatpush.msra.mxu3 %v1248_v46  ;;  %v1372_v54 = vld [vmem:[#allocation10 + $0x160] sm:$0xff]  ;;  %v1244_v11 = vld [vmem:[#allocation10 + $0xd8] sm:$0xff]  ;;  %v1369_v16 = vld [vmem:[#allocation10 + $0x148] sm:$0xff] }
  0xbf   : > { %1064 = vmatpush.msra.mxu1 %v965_v56  ;;  %1135 = vmatpush.msra.mxu2 %v1092_v55  ;;  %v1111_v15 = vrot.slane %v4895_v29, 2  ;;  %v1006_v36 = vrot.slane %v4895_v29, 1  ;;  %v1227_v55 = vld [vmem:[#allocation10 + $0x58] sm:$0xff]  ;;  %v1246_v56 = vld [vmem:[#allocation10 + $0xe8] sm:$0xff]  ;;  %v1224_v22 = vld [vmem:[#allocation10 + $0x40] sm:$0xff] }
  0xc0   : > { %1030 = vmatpush.msra.mxu0 %v981_v60  ;;  %1273 = vmatpush.msra.mxu3 %v1247_v47  ;;  %v953_v60 = vmul.f32 0.1, %v4927_v53  ;;  %v1241_v24 = vld [vmem:[#allocation10 + $0xc0] sm:$0xff]  ;;  %v1367_v26 = vld [vmem:[#allocation10 + $0x138] sm:$0xff]  ;;  %v1239_v32 = vld [vmem:[#allocation10 + $0xb0] sm:$0xff] }
  0xc1   : > { %1065 = vmatpush.msra.mxu1 %v964_v62  ;;  %1136 = vmatpush.msra.mxu2 %v1091_v59  ;;  %v4917_v48 = vsel %vm1105_vm11, %v1109_v23, %v1111_v15  ;;  %v4923_v52 = vsel %vm1000_vm12, %v1004_v25, %v1006_v36  ;;  %v1113_v59 = vrot.slane %v4920_v49, 2  ;;  %v1371_v62 = vld [vmem:[#allocation10 + $0x158] sm:$0xff]  ;;  %v1368_v23 = vld [vmem:[#allocation10 + $0x140] sm:$0xff] }
  0xc2   : > { %1031 = vmatpush.msra.mxu0 %v980_v63  ;;  %v1226_v63 = vld [vmem:[#allocation10 + $0x50] sm:$0xff]  ;;  %1274 = vmatpush.msra.mxu3 %v1246_v56  ;;  %v4939_v2 = vmax.f32 %v4927_v53, %v953_v60  ;;  %v1223_v25 = vld [vmem:[#allocation10 + $0x38] sm:$0xff]  ;;  %v1237_v38 = vld [vmem:[#allocation10 + $0xa0] sm:$0xff] }
  0xc3   : > { %1066 = vmatpush.msra.mxu1 %v963_v0  ;;  %1137 = vmatpush.msra.mxu2 %v1090_v5  ;;  %v1008_v0 = vrot.slane %v4920_v49, 1  ;;  %v4936_v1 = vsel %vm1105_vm11, %v1111_v15, %v1113_v59  ;;  %v1240_v6 = vld [vmem:[#allocation10 + $0xb8] sm:$0xff]  ;;  %v1222_v15 = vld [vmem:[#allocation10 + $0x30] sm:$0xff]  ;;  %v1234_v56 = vld [vmem:[#allocation10 + $0x88] sm:$0xff] }
  0xc4   : > { %1032 = vmatpush.msra.mxu0 %v979_v7  ;;  %v4948_v4 = vrot.slane %v4939_v2, 2  ;;  %v4951_v5 = vrot.slane %v4939_v2, 1  ;;  %1275 = vmatpush.msra.mxu3 %v1245_v9  ;;  %v1219_v46 = vld [vmem:[#allocation10 + $0x18] sm:$0xff]  ;;  %v1361_v60 = vld [vmem:[#allocation10 + $0x108] sm:$0xff] }
  0xc5   : > { %1067 = vmatpush.msra.mxu1 %v962_v10  ;;  %1138 = vmatpush.msra.mxu2 %v1089_v13  ;;  %v4942_v3 = vsel %vm1000_vm12, %v1006_v36, %v1008_v0  ;;  %v1370_v10 = vld [vmem:[#allocation10 + $0x150] sm:$0xff]  ;;  %v1365_v36 = vld [vmem:[#allocation10 + $0x128] sm:$0xff]  ;;  %v1363_v47 = vld [vmem:[#allocation10 + $0x118] sm:$0xff] }
  0xc6   : > { %1033 = vmatpush.msra.mxu0 %v978_v14  ;;  %1139 = vmatmul.f32.vlgmr.msra.gmra.mxu2 %v4865_v17  ;;  %v4955_v7 = vsel %vm1105_vm11, %v1113_v59, %v4948_v4  ;;  %v4959_v8 = vsel %vm1000_vm12, %v1008_v0, %v4951_v5  ;;  %v1243_v13 = vld [vmem:[#allocation10 + $0xd0] sm:$0xff]  ;;  %v1225_v14 = vld [vmem:[#allocation10 + $0x48] sm:$0xff]  ;;  %v1360_v0 = vld [vmem:[#allocation10 + $0x100] sm:$0xff] }
  0xc7   : > { %1068 = vmatpush.msra.mxu1 %v961_v18  ;;  %1034 = vmatmul.f32.vlgmr.msra.gmra.mxu0 %v4871_v20  ;;  %v1242_v18 = vld [vmem:[#allocation10 + $0xc8] sm:$0xff]  ;;  %v2889_v37 = vld [vmem:[#allocation17 + $0x1b8] sm:$0xff] }
  0xc8   : > { %1069 = vmatmul.f32.vlgmr.msra.gmra.mxu1 %v4841_v57  ;;  %1324 = vmatpush.msrb.mxu0 %v1231_v33  ;;  %v1366_v33 = vld [vmem:[#allocation10 + $0x130] sm:$0xff]  ;;  %v1217_v59 = vld [vmem:[#allocation10 + $0x8] sm:$0xff] }
  0xc9   : > { %1394 = vmatpush.msrb.mxu1 %v1375_v34  ;;  %1276 = vmatpush.msra.mxu3 %v1244_v11  ;;  %v1221_v34 = vld [vmem:[#allocation10 + $0x28] sm:$0xff] }
  0xca   : > { %1325 = vmatpush.msrb.mxu0 %v1230_v35  ;;  %v1238_v35 = vld [vmem:[#allocation10 + $0xa8] sm:$0xff] }
  0xcb   : > { %1395 = vmatpush.msrb.mxu1 %v1374_v40  ;;  %1277 = vmatpush.msra.mxu3 %v1243_v13  ;;  %v1220_v40 = vld [vmem:[#allocation10 + $0x20] sm:$0xff] }
  0xcc   : > { %1326 = vmatpush.msrb.mxu0 %v1229_v43  ;;  %v1364_v43 = vld [vmem:[#allocation10 + $0x120] sm:$0xff] }
  0xcd   : > { %1396 = vmatpush.msrb.mxu1 %v1373_v45  ;;  %1278 = vmatpush.msra.mxu3 %v1242_v18  ;;  %v1236_v45 = vld [vmem:[#allocation10 + $0x98] sm:$0xff]  ;;  %v4970_v13 = vld [vmem:[%s5686_s11] ss:$0 sm:$0xff]  ;;  %s5694_s11 = sld [smem:[#allocation65_spill]] }
  0xce   : > { %1142 = vmatmul.f32.gmra.mxu2 %v4892_v28  ;;  %1327 = vmatpush.msrb.mxu0 %v1228_v50  ;;  %v1235_v50 = vld [vmem:[#allocation10 + $0x90] sm:$0xff] }
  0xcf   : > { %1037 = vmatmul.f32.gmra.mxu0 %v4898_v30  ;;  %1397 = vmatpush.msrb.mxu1 %v1372_v54  ;;  %v1218_v54 = vld [vmem:[#allocation10 + $0x10] sm:$0xff] }
  0xd0   : > { %1072 = vmatmul.f32.gmra.mxu1 %v4844_v58  ;;  %1328 = vmatpush.msrb.mxu0 %v1227_v55  ;;  %v1362_v55 = vld [vmem:[#allocation10 + $0x110] sm:$0xff] }
  0xd1   : > { %1398 = vmatpush.msrb.mxu1 %v1371_v62  ;;  %1279 = vmatpush.msra.mxu3 %v1241_v24  ;;  %v1233_v62 = vld [vmem:[#allocation10 + $0x80] sm:$0xff] }
  0xd2   : > { %1329 = vmatpush.msrb.mxu0 %v1226_v63  ;;  %v1216_v63 = vld [vmem:[#allocation10] sm:$0xff] }
  0xd3   : > { %1399 = vmatpush.msrb.mxu1 %v1370_v10  ;;  %1280 = vmatpush.msra.mxu3 %v1240_v6 }
  0xd4   : > { %1330 = vmatpush.msrb.mxu0 %v1225_v14 }
  0xd5   : > { %1400 = vmatpush.msrb.mxu1 %v1369_v16  ;;  %1281 = vmatpush.msra.mxu3 %v1239_v32 }
  0xd6   : > { %1145 = vmatmul.f32.gmra.mxu2 %v4917_v48  ;;  %1331 = vmatpush.msrb.mxu0 %v1224_v22 }
  0xd7   : > { %1040 = vmatmul.f32.gmra.mxu0 %v4923_v52  ;;  %1401 = vmatpush.msrb.mxu1 %v1368_v23 }
  0xd8   : > { %1075 = vmatmul.f32.gmra.mxu1 %v4868_v19  ;;  %1332 = vmatpush.msrb.mxu0 %v1223_v25 }
  0xd9   : > { %1402 = vmatpush.msrb.mxu1 %v1367_v26  ;;  %1282 = vmatpush.msra.mxu3 %v1238_v35 }
  0xda   : > { %1333 = vmatpush.msrb.mxu0 %v1222_v15 }
  0xdb   : > { %1403 = vmatpush.msrb.mxu1 %v1366_v33  ;;  %1283 = vmatpush.msra.mxu3 %v1237_v38 }
  0xdc   : > { %1334 = vmatpush.msrb.mxu0 %v1221_v34 }
  0xdd   : > { %1404 = vmatpush.msrb.mxu1 %v1365_v36  ;;  %1284 = vmatpush.msra.mxu3 %v1236_v45 }
  0xde   : > { %1148 = vmatmul.f32.gmra.mxu2 %v4936_v1  ;;  %1335 = vmatpush.msrb.mxu0 %v1220_v40 }
  0xdf   : > { %1043 = vmatmul.f32.gmra.mxu0 %v4942_v3  ;;  %1405 = vmatpush.msrb.mxu1 %v1364_v43 }
  0xe0   : > { %1078 = vmatmul.f32.gmra.mxu1 %v4895_v29  ;;  %1336 = vmatpush.msrb.mxu0 %v1219_v46 }
  0xe1   : > { %1406 = vmatpush.msrb.mxu1 %v1363_v47  ;;  %1285 = vmatpush.msra.mxu3 %v1235_v50 }
  0xe2   : > { %1337 = vmatpush.msrb.mxu0 %v1218_v54 }
  0xe3   : > { %1407 = vmatpush.msrb.mxu1 %v1362_v55  ;;  %1286 = vmatpush.msra.mxu3 %v1234_v56 }
  0xe4   : > { %1338 = vmatpush.msrb.mxu0 %v1217_v59 }
  0xe5   : > { %1408 = vmatpush.msrb.mxu1 %v1361_v60  ;;  %1287 = vmatpush.msra.mxu3 %v1233_v62 }
  0xe6   : > { %1151 = vmatmul.f32.gmra.mxu2 %v4955_v7  ;;  %1339 = vmatpush.msrb.mxu0 %v1216_v63 }
  0xe7   : > { %1046 = vmatmul.f32.gmra.mxu0 %v4959_v8  ;;  %1409 = vmatpush.msrb.mxu1 %v1360_v0 }
  0xe8   : > { %1081 = vmatmul.f32.gmra.mxu1 %v4920_v49 }
  0xee   : > { %1154 = vmatmul.f32.gmra.mxu2 %v4948_v4 }
  0xef   : > { %1049 = vmatmul.f32.gmra.mxu0 %v4951_v5 }
  0xf0   : > { %1084 = vmatmul.f32.gmra.mxu1 %v4939_v2 }
 0x144   : > { %v1035_v9 = vpop.f32.mrf.mxu0 }
 0x145   : > { %v1070_v10 = vpop.f32.mrf.mxu1 }
 0x146   : > { %v1071_v11 = vadd.f32 %v1070_v10, %v1035_v9 }
 0x149   : > { %v1140_v14 = vpop.f32.mrf.mxu2 }
 0x14a   : > { %v1158_v16 = vadd.f32 %v1140_v14, %v1071_v11 }
 0x14c   : > { %v1167_v18 = vadd.f32 %v4970_v13, %v1158_v16  ;;  %v1038_v22 = vpop.f32.mrf.mxu0 }
 0x14d   : > { %v1073_v23 = vpop.f32.mrf.mxu1 }
 0x14e   : > { %v1180_v24 = vrot.slane %v1167_v18, 7  ;;  %v1074_v25 = vadd.f32 %v1073_v23, %v1038_v22 }
 0x150   : > { %v1197_v6 = vsel %vm4813_vm4, %v1180_v24, 0.0 }
 0x151   : > { %v1143_v26 = vpop.f32.mrf.mxu2  ;;  %v1203_v35 = vmul.f32 0.1, %v1197_v6 }
 0x152   : > { %v1159_v15 = vadd.f32 %v1143_v26, %v1074_v25 }
 0x153   : > { %v1209_v43 = vmax.f32 %v1197_v6, %v1203_v35 }
 0x154   : > { %v1168_v32 = vadd.f32 %v4970_v13, %v1159_v15  ;;  %v1041_v33 = vpop.f32.mrf.mxu0 }
 0x155   : > { %v1076_v34 = vpop.f32.mrf.mxu1  ;;  %v1255_v62 = vrot.slane %v1209_v43, 2  ;;  %v1307_v63 = vrot.slane %v1209_v43, 1  ;;  %v1377_v0 = vrot.slane %v1209_v43, 3 }
 0x156   : > { %v1181_v36 = vrot.slane %v1168_v32, 7  ;;  %v1077_v38 = vadd.f32 %v1076_v34, %v1041_v33 }
 0x158   : > { %v1182_v40 = vsel %vm1179_vm6, %v1180_v24, %v1181_v36 }
 0x159   : > { %v1198_v45 = vsel %vm4819_vm5, %v1182_v40, 0.0  ;;  %v1146_v46 = vpop.f32.mrf.mxu2 }
 0x15a   : > { %v1204_v47 = vmul.f32 0.1, %v1198_v45  ;;  %v1160_v50 = vadd.f32 %v1146_v46, %v1077_v38 }
 0x15c   : > { %v1169_v54 = vadd.f32 %v4970_v13, %v1160_v50  ;;  %v1044_v55 = vpop.f32.mrf.mxu0  ;;  %v1210_v59 = vmax.f32 %v1198_v45, %v1204_v47 }
 0x15d   : > { %v1079_v56 = vpop.f32.mrf.mxu1 }
 0x15e   : > { %v1080_v60 = vadd.f32 %v1079_v56, %v1044_v55  ;;  %v1183_v9 = vrot.slane %v1169_v54, 7  ;;  %v1256_v10 = vrot.slane %v1210_v59, 2  ;;  %v1308_v11 = vrot.slane %v1210_v59, 1 }
 0x15f   : > { %v1378_v14 = vrot.slane %v1210_v59, 3 }
 0x160   : > { %v1184_v16 = vsel %vm1179_vm6, %v1181_v36, %v1183_v9  ;;  %v1257_v18 = vsel %vm1105_vm11, %v1255_v62, %v1256_v10  ;;  %v1309_v22 = vsel %vm1000_vm12, %v1307_v63, %v1308_v11  ;;  %v1524_v62 = vld [vmem:[#allocation11 + $0xf0] sm:$0xff] }
 0x161   : > { %v1379_v23 = vsel %vm1376_vm7, %v1377_v0, %v1378_v14  ;;  %v1199_v24 = vsel %vm4835_vm8, %v1184_v16, 0.0  ;;  %v1149_v25 = vpop.f32.mrf.mxu2  ;;  %1288 = vmatmul.f32.vlgmr.msra.gmra.mxu3 %v1257_v18  ;;  %1340 = vmatmul.f32.vlgmr.msrb.gmra.mxu0 %v1309_v22 }
 0x162   : > { %v1205_v26 = vmul.f32 0.1, %v1199_v24  ;;  %v1161_v6 = vadd.f32 %v1149_v25, %v1080_v60  ;;  %1410 = vmatmul.f32.vlgmr.msrb.gmra.mxu1 %v1379_v23  ;;  %v1525_v60 = vld [vmem:[#allocation11 + $0xf8] sm:$0xff] }
 0x163   : > { %1549 = vmatpush.msrb.mxu2 %v1525_v60 }
 0x164   : > { %v1170_v15 = vadd.f32 %v4970_v13, %v1161_v6  ;;  %v1047_v32 = vpop.f32.mrf.mxu0  ;;  %v1211_v34 = vmax.f32 %v1199_v24, %v1205_v26  ;;  %v1522_v24 = vld [vmem:[#allocation11 + $0xe0] sm:$0xff] }
 0x165   : > { %v1082_v33 = vpop.f32.mrf.mxu1  ;;  %1550 = vmatpush.msrb.mxu2 %v1524_v62 }
 0x166   : > { %v1083_v35 = vadd.f32 %v1082_v33, %v1047_v32  ;;  %v1185_v36 = vrot.slane %v1170_v15, 7  ;;  %v1258_v38 = vrot.slane %v1211_v34, 2  ;;  %v1310_v40 = vrot.slane %v1211_v34, 1 }
 0x167   : > { %v1380_v43 = vrot.slane %v1211_v34, 3  ;;  %v1521_v34 = vld [vmem:[#allocation11 + $0xd8] sm:$0xff] }
 0x168   : > { %v1186_v45 = vsel %vm1179_vm6, %v1183_v9, %v1185_v36  ;;  %v1259_v46 = vsel %vm1105_vm11, %v1256_v10, %v1258_v38  ;;  %v1311_v47 = vsel %vm1000_vm12, %v1308_v11, %v1310_v40  ;;  %v1523_v11 = vld [vmem:[#allocation11 + $0xe8] sm:$0xff] }
 0x169   : > { %v1381_v50 = vsel %vm1376_vm7, %v1378_v14, %v1380_v43  ;;  %v1200_v54 = vsel %vm4859_vm13, %v1186_v45, 0.0  ;;  %v1152_v55 = vpop.f32.mrf.mxu2  ;;  %1291 = vmatmul.f32.gmra.mxu3 %v1259_v46  ;;  %1343 = vmatmul.f32.gmra.mxu0 %v1311_v47 }
 0x16a   : > { %v1206_v56 = vmul.f32 0.1, %v1200_v54  ;;  %v1162_v59 = vadd.f32 %v1152_v55, %v1083_v35  ;;  %1413 = vmatmul.f32.gmra.mxu1 %v1381_v50  ;;  %1551 = vmatpush.msrb.mxu2 %v1523_v11 }
 0x16c   : > { %v1171_v63 = vadd.f32 %v4970_v13, %v1162_v59  ;;  %v1050_v0 = vpop.f32.mrf.mxu0  ;;  %v1212_v10 = vmax.f32 %v1200_v54, %v1206_v56  ;;  %1552 = vmatpush.msrb.mxu2 %v1522_v24  ;;  %v1505_v24 = vld [vmem:[#allocation11 + $0x60] sm:$0xff] }
 0x16d   : > { %v1085_v9 = vpop.f32.mrf.mxu1 }
 0x16e   : > { %v1086_v16 = vadd.f32 %v1085_v9, %v1050_v0  ;;  %v1187_v14 = vrot.slane %v1171_v63, 7  ;;  %v1260_v18 = vrot.slane %v1212_v10, 2  ;;  %v1312_v22 = vrot.slane %v1212_v10, 1  ;;  %1553 = vmatpush.msrb.mxu2 %v1521_v34  ;;  %v1516_v34 = vld [vmem:[#allocation11 + $0xb0] sm:$0xff] }
 0x16f   : > { %v1382_v23 = vrot.slane %v1212_v10, 3 }
 0x170   : > { %v1188_v25 = vsel %vm1179_vm6, %v1185_v36, %v1187_v14  ;;  %v1261_v26 = vsel %vm1105_vm11, %v1258_v38, %v1260_v18  ;;  %v1313_v6 = vsel %vm1000_vm12, %v1310_v40, %v1312_v22 }
 0x171   : > { %v1383_v15 = vsel %vm1376_vm7, %v1380_v43, %v1382_v23  ;;  %v1201_v32 = vsel %vm4886_vm0, %v1188_v25, 0.0  ;;  %v1155_v33 = vpop.f32.mrf.mxu2  ;;  %1294 = vmatmul.f32.gmra.mxu3 %v1261_v26  ;;  %1346 = vmatmul.f32.gmra.mxu0 %v1313_v6  ;;  %v1504_v25 = vld [vmem:[#allocation11 + $0x58] sm:$0xff]  ;;  %v1503_v26 = vld [vmem:[#allocation11 + $0x50] sm:$0xff]  ;;  %v1502_v6 = vld [vmem:[#allocation11 + $0x48] sm:$0xff] }
 0x172   : > { %v1207_v35 = vmul.f32 0.1, %v1201_v32  ;;  %v1163_v45 = vadd.f32 %v1155_v33, %v1086_v16  ;;  %1416 = vmatmul.f32.gmra.mxu1 %v1383_v15  ;;  %v1520_v16 = vld [vmem:[#allocation11 + $0xd0] sm:$0xff]  ;;  %v1518_v15 = vld [vmem:[#allocation11 + $0xc0] sm:$0xff] }
 0x173   : > { %1554 = vmatpush.msrb.mxu2 %v1520_v16  ;;  %v1501_v33 = vld [vmem:[#allocation11 + $0x40] sm:$0xff] }
 0x174   : > { %v1172_v46 = vadd.f32 %v4970_v13, %v1163_v45  ;;  %v1213_v36 = vmax.f32 %v1201_v32, %v1207_v35  ;;  %v1517_v32 = vld [vmem:[#allocation11 + $0xb8] sm:$0xff]  ;;  %v1499_v45 = vld [vmem:[#allocation11 + $0x30] sm:$0xff] }
 0x175   : > { %v1500_v35 = vld [vmem:[#allocation11 + $0x38] sm:$0xff] }
 0x176   : > { %v1189_v38 = vrot.slane %v1172_v46, 7  ;;  %v1262_v47 = vrot.slane %v1213_v36, 2  ;;  %v1314_v40 = vrot.slane %v1213_v36, 1  ;;  %v1384_v50 = vrot.slane %v1213_v36, 3  ;;  %v1515_v46 = vld [vmem:[#allocation11 + $0xa8] sm:$0xff] }
 0x177   : > { %v1498_v36 = vld [vmem:[#allocation11 + $0x28] sm:$0xff] }
 0x178   : > { %v1190_v43 = vsel %vm1179_vm6, %v1187_v14, %v1189_v38  ;;  %v1263_v54 = vsel %vm1105_vm11, %v1260_v18, %v1262_v47  ;;  %v1315_v55 = vsel %vm1000_vm12, %v1312_v22, %v1314_v40  ;;  %v1385_v56 = vsel %vm1376_vm7, %v1382_v23, %v1384_v50  ;;  %v1508_v14 = vld [vmem:[#allocation11 + $0x78] sm:$0xff]  ;;  %v1519_v18 = vld [vmem:[#allocation11 + $0xc8] sm:$0xff]  ;;  %v1507_v22 = vld [vmem:[#allocation11 + $0x70] sm:$0xff] }
 0x179   : > { %v1202_v59 = vsel %vm4912_vm3, %v1190_v43, 0.0  ;;  %1297 = vmatmul.f32.gmra.mxu3 %v1263_v54  ;;  %1349 = vmatmul.f32.gmra.mxu0 %v1315_v55  ;;  %v1506_v23 = vld [vmem:[#allocation11 + $0x68] sm:$0xff]  ;;  %v1514_v38 = vld [vmem:[#allocation11 + $0xa0] sm:$0xff]  ;;  %v1512_v43 = vld [vmem:[#allocation11 + $0x90] sm:$0xff] }
 0x17a   : > { %v1208_v13 = vmul.f32 0.1, %v1202_v59  ;;  %1419 = vmatmul.f32.gmra.mxu1 %v1385_v56  ;;  %1595 = vmatpush.msrb.mxu3 %v1508_v14  ;;  %v1495_v54 = vld [vmem:[#allocation11 + $0x10] sm:$0xff]  ;;  %v1511_v55 = vld [vmem:[#allocation11 + $0x88] sm:$0xff]  ;;  %v1643_v14 = vld [vmem:[#allocation11 + $0x178] sm:$0xff] }
 0x17b   : > { %1555 = vmatpush.msrb.mxu2 %v1519_v18  ;;  %v1494_v56 = vld [vmem:[#allocation11 + $0x8] sm:$0xff]  ;;  %v1642_v18 = vld [vmem:[#allocation11 + $0x170] sm:$0xff] }
 0x17c   : > { %v1214_v60 = vmax.f32 %v1202_v59, %v1208_v13  ;;  %1596 = vmatpush.msrb.mxu3 %v1507_v22 }
 0x17d   : > { %1556 = vmatpush.msrb.mxu2 %v1518_v15 }
 0x17e   : > { %v1264_v62 = vrot.slane %v1214_v60, 2  ;;  %v1316_v63 = vrot.slane %v1214_v60, 1  ;;  %v1386_v0 = vrot.slane %v1214_v60, 3  ;;  %1597 = vmatpush.msrb.mxu3 %v1506_v23  ;;  %v1510_v60 = vld [vmem:[#allocation11 + $0x80] sm:$0xff] }
 0x17f   : > { %1557 = vmatpush.msrb.mxu2 %v1517_v32  ;;  %v1640_v32 = vld [vmem:[#allocation11 + $0x160] sm:$0xff] }
 0x180   : > { %v1265_v9 = vsel %vm1105_vm11, %v1262_v47, %v1264_v62  ;;  %v1317_v10 = vsel %vm1000_vm12, %v1314_v40, %v1316_v63  ;;  %v1387_v11 = vsel %vm1376_vm7, %v1384_v50, %v1386_v0  ;;  %1598 = vmatpush.msrb.mxu3 %v1505_v24  ;;  %v1497_v47 = vld [vmem:[#allocation11 + $0x20] sm:$0xff]  ;;  %v1513_v40 = vld [vmem:[#allocation11 + $0x98] sm:$0xff] }
 0x181   : > { %1300 = vmatmul.f32.gmra.mxu3 %v1265_v9  ;;  %1352 = vmatmul.f32.gmra.mxu0 %v1317_v10  ;;  %v1496_v50 = vld [vmem:[#allocation11 + $0x18] sm:$0xff]  ;;  %v5013_v9 = vld [vmem:[%s5687_s9] ss:$0 sm:$0xff]  ;;  %s3337_s9 = sadd.s32 %s3605_s12, %s3598_s14 }
 0x182   : > { %1422 = vmatmul.f32.gmra.mxu1 %v1387_v11  ;;  %1599 = vmatpush.msrb.mxu3 %v1504_v25  ;;  %s3599_s4 = sshll.u32 %s3337_s9, 3 }
 0x183   : > { %1558 = vmatpush.msrb.mxu2 %v1516_v34  ;;  %v1639_v34 = vld [vmem:[#allocation11 + $0x158] sm:$0xff] }
 0x184   : > { %1600 = vmatpush.msrb.mxu3 %v1503_v26 }
 0x185   : > { %1559 = vmatpush.msrb.mxu2 %v1515_v46 }
 0x186   : > { %1601 = vmatpush.msrb.mxu3 %v1502_v6  ;;  %v1641_v6 = vld [vmem:[#allocation11 + $0x168] sm:$0xff] }
 0x187   : > { %1560 = vmatpush.msrb.mxu2 %v1514_v38  ;;  %v1638_v38 = vld [vmem:[#allocation11 + $0x150] sm:$0xff] }
 0x188   : > { %1602 = vmatpush.msrb.mxu3 %v1501_v33 }
 0x189   : > { %1303 = vmatmul.f32.gmra.mxu3 %v1264_v62  ;;  %1355 = vmatmul.f32.gmra.mxu0 %v1316_v63  ;;  %v1493_v62 = vld [vmem:[#allocation11] sm:$0xff] }
 0x18a   : > { %1425 = vmatmul.f32.gmra.mxu1 %v1386_v0  ;;  %1603 = vmatpush.msrb.mxu3 %v1500_v35 }
 0x18b   : > { %1561 = vmatpush.msrb.mxu2 %v1513_v40 }
 0x18c   : > { %1604 = vmatpush.msrb.mxu3 %v1499_v45 }
 0x18d   : > { %1562 = vmatpush.msrb.mxu2 %v1512_v43 }
 0x18e   : > { %1605 = vmatpush.msrb.mxu3 %v1498_v36 }
 0x18f   : > { %1563 = vmatpush.msrb.mxu2 %v1511_v55  ;;  %v1636_v55 = vld [vmem:[#allocation11 + $0x140] sm:$0xff] }
 0x190   : > { %1606 = vmatpush.msrb.mxu3 %v1497_v47 }
 0x191   : > { %1564 = vmatpush.msrb.mxu2 %v1510_v60  ;;  %v1635_v60 = vld [vmem:[#allocation11 + $0x138] sm:$0xff] }
 0x192   : > { %1607 = vmatpush.msrb.mxu3 %v1496_v50 }
 0x193   : > { %1644 = vmatpush.msra.mxu2 %v1643_v14 }
 0x194   : > { %1608 = vmatpush.msrb.mxu3 %v1495_v54  ;;  %v1637_v54 = vld [vmem:[#allocation11 + $0x148] sm:$0xff] }
 0x195   : > { %1645 = vmatpush.msra.mxu2 %v1642_v18 }
 0x196   : > { %1609 = vmatpush.msrb.mxu3 %v1494_v56 }
 0x197   : > { %1646 = vmatpush.msra.mxu2 %v1641_v6 }
 0x198   : > { %1610 = vmatpush.msrb.mxu3 %v1493_v62 }
 0x199   : > { %1647 = vmatpush.msra.mxu2 %v1640_v32 }
 0x19b   : > { %1648 = vmatpush.msra.mxu2 %v1639_v34  ;;  %v1632_v34 = vld [vmem:[#allocation11 + $0x120] sm:$0xff] }
 0x19d   : > { %1649 = vmatpush.msra.mxu2 %v1638_v38 }
 0x19f   : > { %1650 = vmatpush.msra.mxu2 %v1637_v54 }
 0x1a1   : > { %1651 = vmatpush.msra.mxu2 %v1636_v55 }
 0x1a3   : > { %1652 = vmatpush.msra.mxu2 %v1635_v60 }
 0x1de   : > { %v1341_v59 = vpop.f32.mrf.mxu0 }
 0x1df   : > { %v1411_v13 = vpop.f32.mrf.mxu1 }
 0x1e4   : > { %v1289_v63 = vpop.f32.mrf.mxu3 }
 0x1e5   : > { %v1342_v0 = vadd.f32 %v1341_v59, %v1289_v63 }
 0x1e6   : > { %v1344_v10 = vpop.f32.mrf.mxu0 }
 0x1e7   : > { %v1429_v11 = vadd.f32 %v1411_v13, %v1342_v0  ;;  %v1414_v16 = vpop.f32.mrf.mxu1 }
 0x1e9   : > { %v1438_v22 = vadd.f32 %v5013_v9, %v1429_v11  ;;  %v1634_v11 = vld [vmem:[#allocation11 + $0x130] sm:$0xff] }
 0x1ea   : > { %1653 = vmatpush.msra.mxu2 %v1634_v11  ;;  %v1628_v11 = vld [vmem:[#allocation11 + $0x100] sm:$0xff] }
 0x1eb   : > { %v1451_v23 = vrot.slane %v1438_v22, 6  ;;  %v1633_v22 = vld [vmem:[#allocation11 + $0x128] sm:$0xff] }
 0x1ec   : > { %v1292_v24 = vpop.f32.mrf.mxu3  ;;  %1654 = vmatpush.msra.mxu2 %v1633_v22 }
 0x1ed   : > { %v1468_v25 = vsel %vm4813_vm4, %v1451_v23, 0.0  ;;  %v1345_v26 = vadd.f32 %v1344_v10, %v1292_v24 }
 0x1ee   : > { %v1347_v15 = vpop.f32.mrf.mxu0  ;;  %v1474_v35 = vadd.f32 %v1468_v25, %v4825_v42  ;;  %1655 = vmatpush.msra.mxu2 %v1632_v34 }
 0x1ef   : > { %v1430_v33 = vadd.f32 %v1414_v16, %v1345_v26  ;;  %v1417_v45 = vpop.f32.mrf.mxu1 }
 0x1f0   : > { %v1480_v40 = vmul.f32 0.1, %v1474_v35 }
 0x1f1   : > { %v1439_v46 = vadd.f32 %v5013_v9, %v1430_v33 }
 0x1f2   : > { %v1486_v63 = vmax.f32 %v1474_v35, %v1480_v40 }
 0x1f3   : > { %v1452_v36 = vrot.slane %v1439_v46, 6 }
 0x1f4   : > { %v1295_v47 = vpop.f32.mrf.mxu3  ;;  %v1533_v24 = vrot.slane %v1486_v63, 5  ;;  %v1581_v25 = vrot.slane %v1486_v63, 2 }
 0x1f5   : > { %v1453_v50 = vsel %vm1450_vm9, %v1451_v23, %v1452_v36  ;;  %v1348_v43 = vadd.f32 %v1347_v15, %v1295_v47 }
 0x1f6   : > { %v1469_v56 = vsel %vm4819_vm5, %v1453_v50, 0.0  ;;  %v1350_v62 = vpop.f32.mrf.mxu0 }
 0x1f7   : > { %v1431_v59 = vadd.f32 %v1417_v45, %v1348_v43  ;;  %v1475_v13 = vadd.f32 %v1469_v56, %v4829_v44  ;;  %v1420_v16 = vpop.f32.mrf.mxu1  ;;  %v1630_v43 = vld [vmem:[#allocation11 + $0x110] sm:$0xff] }
 0x1f9   : > { %v1440_v0 = vadd.f32 %v5013_v9, %v1431_v59  ;;  %v1481_v10 = vmul.f32 0.1, %v1475_v13 }
 0x1fb   : > { %v1454_v14 = vrot.slane %v1440_v0, 6  ;;  %v5025_v18 = vmax.f32 %v1475_v13, %v1481_v10  ;;  %v1629_v13 = vld [vmem:[#allocation11 + $0x108] sm:$0xff] }
 0x1fc   : > { %v1298_v23 = vpop.f32.mrf.mxu3 }
 0x1fd   : > { %v1455_v26 = vsel %vm1450_vm9, %v1452_v36, %v1454_v14  ;;  %v1351_v6 = vadd.f32 %v1350_v62, %v1298_v23  ;;  %v1534_v15 = vrot.slane %v5025_v18, 5  ;;  %v1582_v32 = vrot.slane %v5025_v18, 2  ;;  %v1631_v36 = vld [vmem:[#allocation11 + $0x118] sm:$0xff] }
 0x1fe   : > { %v1470_v33 = vsel %vm4835_vm8, %v1455_v26, 0.0  ;;  %v1353_v50 = vpop.f32.mrf.mxu0  ;;  %1656 = vmatpush.msra.mxu2 %v1631_v36 }
 0x1ff   : > { %v5033_v35 = vadd.f32 %v1470_v33, %v4848_v61  ;;  %v1432_v45 = vadd.f32 %v1420_v16, %v1351_v6  ;;  %v1535_v46 = vsel %vm1532_vm10, %v1533_v24, %v1534_v15  ;;  %v1583_v38 = vsel %vm1105_vm11, %v1581_v25, %v1582_v32  ;;  %v1423_v56 = vpop.f32.mrf.mxu1 }
 0x200   : > { %1565 = vmatmul.f32.vlgmr.msrb.gmra.mxu2 %v1535_v46  ;;  %1611 = vmatmul.f32.vlgmr.msrb.gmra.mxu3 %v1583_v38 }
 0x201   : > { %v1441_v47 = vadd.f32 %v5013_v9, %v1432_v45  ;;  %v1482_v40 = vmul.f32 0.1, %v5033_v35  ;;  %1657 = vmatpush.msra.mxu2 %v1630_v43 }
 0x203   : > { %v1456_v54 = vrot.slane %v1441_v47, 6  ;;  %v1488_v55 = vmax.f32 %v5033_v35, %v1482_v40  ;;  %1658 = vmatpush.msra.mxu2 %v1629_v13 }
 0x204   : > { %v1301_v59 = vpop.f32.mrf.mxu3 }
 0x205   : > { %v1457_v60 = vsel %vm1450_vm9, %v1454_v14, %v1456_v54  ;;  %v1354_v62 = vadd.f32 %v1353_v50, %v1301_v59  ;;  %v1536_v63 = vrot.slane %v1488_v55, 5  ;;  %v1584_v0 = vrot.slane %v1488_v55, 2  ;;  %1659 = vmatpush.msra.mxu2 %v1628_v11 }
 0x206   : > { %v1471_v10 = vsel %vm4859_vm13, %v1457_v60, 0.0  ;;  %v1356_v33 = vpop.f32.mrf.mxu0 }
 0x207   : > { %v5044_v16 = vadd.f32 %v1471_v10, %v4875_v21  ;;  %v1433_v22 = vadd.f32 %v1423_v56, %v1354_v62  ;;  %v1537_v23 = vsel %vm1532_vm10, %v1534_v15, %v1536_v63  ;;  %v1585_v24 = vsel %vm1105_vm11, %v1582_v32, %v1584_v0  ;;  %v1426_v36 = vpop.f32.mrf.mxu1 }
 0x208   : > { %1568 = vmatmul.f32.gmra.mxu2 %v1537_v23  ;;  %1614 = vmatmul.f32.gmra.mxu3 %v1585_v24 }
 0x209   : > { %v1442_v14 = vadd.f32 %v5013_v9, %v1433_v22  ;;  %v1483_v25 = vmul.f32 0.1, %v5044_v16 }
 0x20b   : > { %v1458_v26 = vrot.slane %v1442_v14, 6  ;;  %v1489_v6 = vmax.f32 %v5044_v16, %v1483_v25  ;;  %v1980_v25 = vld [vmem:[#allocation14 + $0xf8] sm:$0xff] }
 0x20c   : > { %v1304_v34 = vpop.f32.mrf.mxu3  ;;  %1981 = vmatpush.msrb.mxu2 %v1980_v25  ;;  %v1972_v25 = vld [vmem:[#allocation14 + $0xb8] sm:$0xff] }
 0x20d   : > { %v1459_v45 = vsel %vm1450_vm9, %v1456_v54, %v1458_v26  ;;  %v1357_v46 = vadd.f32 %v1356_v33, %v1304_v34  ;;  %v1538_v38 = vrot.slane %v1489_v6, 5  ;;  %v1586_v15 = vrot.slane %v1489_v6, 2  ;;  %v1743_v33 = vld [vmem:[#allocation13 + $0x78] sm:$0xff]  ;;  %v1979_v34 = vld [vmem:[#allocation14 + $0xf0] sm:$0xff] }
 0x20e   : > { %v1472_v32 = vsel %vm4886_vm0, %v1459_v45, 0.0  ;;  %1829 = vmatpush.msra.mxu0 %v1743_v33  ;;  %v1875_v45 = vld [vmem:[#allocation13 + $0x178] sm:$0xff]  ;;  %1982 = vmatpush.msrb.mxu2 %v1979_v34  ;;  %v1868_v34 = vld [vmem:[#allocation13 + $0x140] sm:$0xff] }
 0x20f   : > { %v1434_v47 = vadd.f32 %v1426_v36, %v1357_v46  ;;  %v1539_v40 = vsel %vm1532_vm10, %v1536_v63, %v1538_v38  ;;  %v1587_v50 = vsel %vm1105_vm11, %v1584_v0, %v1586_v15  ;;  %v1478_v43 = vadd.f32 %v1472_v32, %v4902_v31  ;;  %v1759_v46 = vld [vmem:[#allocation13 + $0xf0] sm:$0xff]  ;;  %1892 = vmatpush.msra.mxu1 %v1875_v45  ;;  %v1758_v32 = vld [vmem:[#allocation13 + $0xe8] sm:$0xff]  ;;  %v1752_v45 = vld [vmem:[#allocation13 + $0xb8] sm:$0xff] }
 0x210   : > { %1571 = vmatmul.f32.gmra.mxu2 %v1539_v40  ;;  %1617 = vmatmul.f32.gmra.mxu3 %v1587_v50  ;;  %v1874_v36 = vld [vmem:[#allocation13 + $0x170] sm:$0xff]  ;;  %v1873_v40 = vld [vmem:[#allocation13 + $0x168] sm:$0xff]  ;;  %v1976_v50 = vld [vmem:[#allocation14 + $0xd8] sm:$0xff] }
 0x211   : > { %v1443_v56 = vadd.f32 %v5013_v9, %v1434_v47  ;;  %v1484_v59 = vmul.f32 0.1, %v1478_v43  ;;  %1893 = vmatpush.msra.mxu1 %v1874_v36  ;;  %v1757_v47 = vld [vmem:[#allocation13 + $0xe0] sm:$0xff]  ;;  %v1867_v36 = vld [vmem:[#allocation13 + $0x138] sm:$0xff] }
 0x213   : > { %v1460_v54 = vrot.slane %v1443_v56, 6  ;;  %v1490_v13 = vmax.f32 %v1478_v43, %v1484_v59  ;;  %1894 = vmatpush.msra.mxu1 %v1873_v40  ;;  %v1740_v43 = vld [vmem:[#allocation13 + $0x60] sm:$0xff]  ;;  %v1756_v56 = vld [vmem:[#allocation13 + $0xd8] sm:$0xff] }
 0x214   : > { %v1872_v59 = vld [vmem:[#allocation13 + $0x160] sm:$0xff] }
 0x215   : > { %v1461_v60 = vsel %vm1450_vm9, %v1458_v26, %v1460_v54  ;;  %v1540_v62 = vrot.slane %v1490_v13, 5  ;;  %v1588_v10 = vrot.slane %v1490_v13, 2  ;;  %v1760_v26 = vld [vmem:[#allocation13 + $0xf8] sm:$0xff]  ;;  %v1975_v54 = vld [vmem:[#allocation14 + $0xd0] sm:$0xff]  ;;  %1895 = vmatpush.msra.mxu1 %v1872_v59  ;;  %v1969_v40 = vld [vmem:[#allocation14 + $0xa0] sm:$0xff] }
 0x216   : > { %v1473_v11 = vsel %vm4912_vm3, %v1461_v60, 0.0  ;;  %1783 = vmatpush.msra.mxu3 %v1760_v26  ;;  %v1755_v60 = vld [vmem:[#allocation13 + $0xd0] sm:$0xff]  ;;  %v1736_v26 = vld [vmem:[#allocation13 + $0x40] sm:$0xff]  ;;  %v1968_v59 = vld [vmem:[#allocation14 + $0x98] sm:$0xff] }
 0x217   : > { %v1541_v63 = vsel %vm1532_vm10, %v1538_v38, %v1540_v62  ;;  %v1589_v0 = vsel %vm1105_vm11, %v1586_v15, %v1588_v10  ;;  %v1479_v22 = vadd.f32 %v1473_v11, %v4927_v53  ;;  %v1742_v38 = vld [vmem:[#allocation13 + $0x70] sm:$0xff]  ;;  %v1978_v15 = vld [vmem:[#allocation14 + $0xe8] sm:$0xff] }
 0x218   : > { %1574 = vmatmul.f32.gmra.mxu2 %v1541_v63  ;;  %1620 = vmatmul.f32.gmra.mxu3 %v1589_v0  ;;  %v1754_v11 = vld [vmem:[#allocation13 + $0xc8] sm:$0xff]  ;;  %v1738_v63 = vld [vmem:[#allocation13 + $0x50] sm:$0xff] }
 0x219   : > { %v1485_v23 = vmul.f32 0.1, %v1479_v22  ;;  %1784 = vmatpush.msra.mxu3 %v1759_v46  ;;  %1830 = vmatpush.msra.mxu0 %v1742_v38  ;;  %v1971_v46 = vld [vmem:[#allocation14 + $0xb0] sm:$0xff]  ;;  %v1735_v38 = vld [vmem:[#allocation13 + $0x38] sm:$0xff] }
 0x21a   : > { %1983 = vmatpush.msrb.mxu2 %v1978_v15  ;;  %v1751_v15 = vld [vmem:[#allocation13 + $0xb0] sm:$0xff] }
 0x21b   : > { %v1491_v9 = vmax.f32 %v1479_v22, %v1485_v23  ;;  %1785 = vmatpush.msra.mxu3 %v1758_v32  ;;  %v1870_v22 = vld [vmem:[#allocation13 + $0x150] sm:$0xff]  ;;  %v1973_v23 = vld [vmem:[#allocation14 + $0xc0] sm:$0xff]  ;;  %v1970_v32 = vld [vmem:[#allocation14 + $0xa8] sm:$0xff] }
 0x21d   : > { %v1542_v24 = vrot.slane %v1491_v9, 5  ;;  %1786 = vmatpush.msra.mxu3 %v1757_v47  ;;  %v1750_v47 = vld [vmem:[#allocation13 + $0xa8] sm:$0xff] }
 0x21f   : > { %v1543_v14 = vsel %vm1532_vm10, %v1540_v62, %v1542_v24  ;;  %1787 = vmatpush.msra.mxu3 %v1756_v56  ;;  %v1974_v62 = vld [vmem:[#allocation14 + $0xc8] sm:$0xff]  ;;  %v1749_v56 = vld [vmem:[#allocation13 + $0xa0] sm:$0xff] }
 0x220   : > { %1577 = vmatmul.f32.gmra.mxu2 %v1543_v14  ;;  %1623 = vmatmul.f32.gmra.mxu3 %v1588_v10  ;;  %v1871_v10 = vld [vmem:[#allocation13 + $0x158] sm:$0xff]  ;;  %v1869_v24 = vld [vmem:[#allocation13 + $0x148] sm:$0xff]  ;;  %v1753_v14 = vld [vmem:[#allocation13 + $0xc0] sm:$0xff] }
 0x221   : > { %1788 = vmatpush.msra.mxu3 %v1755_v60  ;;  %1896 = vmatpush.msra.mxu1 %v1871_v10  ;;  %v1864_v60 = vld [vmem:[#allocation13 + $0x120] sm:$0xff]  ;;  %v1967_v10 = vld [vmem:[#allocation14 + $0x90] sm:$0xff] }
 0x223   : > { %1789 = vmatpush.msra.mxu3 %v1754_v11  ;;  %1897 = vmatpush.msra.mxu1 %v1870_v22  ;;  %v1731_v11 = vld [vmem:[#allocation13 + $0x18] sm:$0xff] }
 0x225   : > { %1898 = vmatpush.msra.mxu1 %v1869_v24  ;;  %1790 = vmatpush.msra.mxu3 %v1753_v14  ;;  %v1730_v24 = vld [vmem:[#allocation13 + $0x10] sm:$0xff] }
 0x226   : > { %v1862_v14 = vld [vmem:[#allocation13 + $0x110] sm:$0xff] }
 0x227   : > { %1899 = vmatpush.msra.mxu1 %v1868_v34  ;;  %1791 = vmatpush.msra.mxu3 %v1752_v45  ;;  %v1729_v34 = vld [vmem:[#allocation13 + $0x8] sm:$0xff] }
 0x228   : > { %1660 = vmatmul.f32.vlgmr.msra.gmra.mxu2 %v5025_v18  ;;  %v1741_v18 = vld [vmem:[#allocation13 + $0x68] sm:$0xff] }
 0x229   : > { %1831 = vmatpush.msra.mxu0 %v1741_v18  ;;  %1900 = vmatpush.msra.mxu1 %v1867_v36  ;;  %v1734_v18 = vld [vmem:[#allocation13 + $0x30] sm:$0xff]  ;;  %v1861_v45 = vld [vmem:[#allocation13 + $0x108] sm:$0xff]  ;;  %v2200_v36 = vld [vmem:[#allocation14 + $0x278] sm:$0xff] }
 0x22a   : > { %1792 = vmatpush.msra.mxu3 %v1751_v15  ;;  %v1860_v15 = vld [vmem:[#allocation13 + $0x100] sm:$0xff] }
 0x22b   : > { %1832 = vmatpush.msra.mxu0 %v1740_v43  ;;  %v1865_v43 = vld [vmem:[#allocation13 + $0x128] sm:$0xff] }
 0x22c   : > { %1793 = vmatpush.msra.mxu3 %v1750_v47  ;;  %v5081_v47 = vld [vmem:[%s5688_s20] ss:$0 sm:$0xff]  ;;  %s5695_s20 = sld [smem:[#allocation66_spill]] }
 0x22e   : > { %1794 = vmatpush.msra.mxu3 %v1749_v56  ;;  %v2199_v56 = vld [vmem:[#allocation14 + $0x270] sm:$0xff] }
 0x230   : > { %1663 = vmatmul.f32.gmra.mxu2 %v1488_v55  ;;  %v1977_v55 = vld [vmem:[#allocation14 + $0xe0] sm:$0xff] }
 0x231   : > { %1984 = vmatpush.msrb.mxu2 %v1977_v55  ;;  %v1866_v55 = vld [vmem:[#allocation13 + $0x130] sm:$0xff] }
 0x232   : > { %1901 = vmatpush.msra.mxu1 %v1866_v55  ;;  %s3339_s1 = scalar_lea.hbm %s5695_s20, %s3599_s4 }
 0x233   : > { %1985 = vmatpush.msrb.mxu2 %v1976_v50  ;;  %v1733_v50 = vld [vmem:[#allocation13 + $0x28] sm:$0xff]  ;;  %s3342_s3 = sshll.u32 %s3339_s1, 4  ;;  %s3343_s3 = int_to_ptr.hbm [resolvable:$true] %s3342_s3 }
 0x234   : > { %1902 = vmatpush.msra.mxu1 %v1865_v43  ;;  %v1963_v43 = vld [vmem:[#allocation14 + $0x78] sm:$0xff]  ;;  %s4179_s24 = sshra.s32 %s3343_s3, 4  ;;  %s4180_s24 = int_to_ptr.hbm [resolvable:$true] %s4179_s24 }
 0x235   : > { %1986 = vmatpush.msrb.mxu2 %v1975_v54  ;;  %v1732_v54 = vld [vmem:[#allocation13 + $0x20] sm:$0xff]  ;;  %s4181_s18 = scalar_lea.hbm %s4180_s24, 16 }
 0x236   : > { %1903 = vmatpush.msra.mxu1 %v1864_v60  ;;  %v1961_v60 = vld [vmem:[#allocation14 + $0x68] sm:$0xff]  ;;  %p4182_p1 = scmp.ne.s32.totalorder %s4180_s24, %s4181_s18 }
 0x237   : > { %1987 = vmatpush.msrb.mxu2 %v1974_v62  ;;  %v1748_v62 = vld [vmem:[#allocation13 + $0x98] sm:$0xff] }
 0x238   : > { %1666 = vmatmul.f32.gmra.mxu2 %v1489_v6  ;;  %1795 = vmatpush.msra.mxu3 %v1748_v62  ;;  %v2197_v62 = vld [vmem:[#allocation14 + $0x260] sm:$0xff]  ;;  %p4183_p3 = pnand %p4182_p1, %p4690_p5 }
 0x239   : > { %1988 = vmatpush.msrb.mxu2 %v1973_v23  ;;  %v1747_v23 = vld [vmem:[#allocation13 + $0x90] sm:$0xff] }
 0x23a   : > { %1796 = vmatpush.msra.mxu3 %v1747_v23  ;;  %p4184_p2 = pneg %p4183_p3 }
 0x23b   : > { %1989 = vmatpush.msrb.mxu2 %v1972_v25  ;;  %v1746_v25 = vld [vmem:[#allocation13 + $0x88] sm:$0xff] }
 0x23c   : > { %1797 = vmatpush.msra.mxu3 %v1746_v25  ;;  %v2196_v25 = vld [vmem:[#allocation14 + $0x258] sm:$0xff] }
 0x23d   : > { %1990 = vmatpush.msrb.mxu2 %v1971_v46  ;;  %v1745_v46 = vld [vmem:[#allocation13 + $0x80] sm:$0xff] }
 0x23e   : > { %1798 = vmatpush.msra.mxu3 %v1745_v46  ;;  %v2124_v46 = vld [vmem:[#allocation14 + $0x1f0] sm:$0xff] }
 0x23f   : > { %1991 = vmatpush.msrb.mxu2 %v1970_v32 }
 0x240   : > { %1669 = vmatmul.f32.gmra.mxu2 %v1490_v13  ;;  %v1739_v13 = vld [vmem:[#allocation13 + $0x58] sm:$0xff]  ;;  %2016 = vmatpush.msrb.mxu3 %v1963_v43  ;;  %v2122_v43 = vld [vmem:[#allocation14 + $0x1e0] sm:$0xff] }
 0x241   : > { %1833 = vmatpush.msra.mxu0 %v1739_v13  ;;  %1992 = vmatpush.msrb.mxu2 %v1969_v40 }
 0x243   : > { %1834 = vmatpush.msra.mxu0 %v1738_v63  ;;  %1993 = vmatpush.msrb.mxu2 %v1968_v59  ;;  %v1863_v63 = vld [vmem:[#allocation13 + $0x118] sm:$0xff]  ;;  %v1962_v59 = vld [vmem:[#allocation14 + $0x70] sm:$0xff] }
 0x244   : > { %1904 = vmatpush.msra.mxu1 %v1863_v63  ;;  %2017 = vmatpush.msrb.mxu3 %v1962_v59 }
 0x245   : > { %1994 = vmatpush.msrb.mxu2 %v1967_v10 }
 0x246   : > { %1905 = vmatpush.msra.mxu1 %v1862_v14  ;;  %2018 = vmatpush.msrb.mxu3 %v1961_v60  ;;  %v2125_v14 = vld [vmem:[#allocation14 + $0x1f8] sm:$0xff] }
 0x247   : > { %v1955_v60 = vld [vmem:[#allocation14 + $0x38] sm:$0xff] }
 0x248   : > { %1672 = vmatmul.f32.gmra.mxu2 %v1491_v9  ;;  %v1737_v9 = vld [vmem:[#allocation13 + $0x48] sm:$0xff]  ;;  %1906 = vmatpush.msra.mxu1 %v1861_v45 }
 0x249   : > { %1835 = vmatpush.msra.mxu0 %v1737_v9  ;;  %v1966_v9 = vld [vmem:[#allocation14 + $0x88] sm:$0xff] }
 0x24a   : > { %1995 = vmatpush.msrb.mxu2 %v1966_v9  ;;  %1907 = vmatpush.msra.mxu1 %v1860_v15  ;;  %v2067_v9 = vld [vmem:[#allocation14 + $0x178] sm:$0xff]  ;;  %v2065_v45 = vld [vmem:[#allocation14 + $0x168] sm:$0xff] }
 0x24b   : > { %1836 = vmatpush.msra.mxu0 %v1736_v26  ;;  %v1965_v26 = vld [vmem:[#allocation14 + $0x80] sm:$0xff]  ;;  %v1957_v15 = vld [vmem:[#allocation14 + $0x48] sm:$0xff] }
 0x24c   : > { %1996 = vmatpush.msrb.mxu2 %v1965_v26  ;;  %v2066_v26 = vld [vmem:[#allocation14 + $0x170] sm:$0xff]  ;;  %2143 = vmatpush.msrb.mxu1 %v2125_v14 }
 0x24d   : > { %1837 = vmatpush.msra.mxu0 %v1735_v38  ;;  %v1728_v38 = vld [vmem:[#allocation13] sm:$0xff]  ;;  %v2120_v14 = vld [vmem:[#allocation14 + $0x1d0] sm:$0xff] }
 0x24e   : > { %2219 = vmatpush.msra.mxu2 %v2200_v36  ;;  %v2123_v36 = vld [vmem:[#allocation14 + $0x1e8] sm:$0xff]  ;;  %2144 = vmatpush.msrb.mxu1 %v2124_v46 }
 0x24f   : > { %1838 = vmatpush.msra.mxu0 %v1734_v18 }
 0x250   : > { %1997 = vmatmul.f32.vlgmr.msrb.gmra.mxu2 %v4871_v20  ;;  %v2198_v20 = vld [vmem:[#allocation14 + $0x268] sm:$0xff]  ;;  %2145 = vmatpush.msrb.mxu1 %v2123_v36 }
 0x251   : > { %1839 = vmatpush.msra.mxu0 %v1733_v50  ;;  %2220 = vmatpush.msra.mxu2 %v2199_v56  ;;  %v2193_v56 = vld [vmem:[#allocation14 + $0x240] sm:$0xff] }
 0x252   : > { %2146 = vmatpush.msrb.mxu1 %v2122_v43 }
 0x253   : > { %1840 = vmatpush.msra.mxu0 %v1732_v54  ;;  %2221 = vmatpush.msra.mxu2 %v2198_v20 }
 0x255   : > { %1841 = vmatpush.msra.mxu0 %v1731_v11  ;;  %2222 = vmatpush.msra.mxu2 %v2197_v62 }
 0x257   : > { %1842 = vmatpush.msra.mxu0 %v1730_v24  ;;  %v1959_v24 = vld [vmem:[#allocation14 + $0x58] sm:$0xff]  ;;  %2223 = vmatpush.msra.mxu2 %v2196_v25 }
 0x258   : > { %2000 = vmatmul.f32.gmra.mxu2 %v4898_v30  ;;  %v1960_v30 = vld [vmem:[#allocation14 + $0x60] sm:$0xff] }
 0x259   : > { %1843 = vmatpush.msra.mxu0 %v1729_v34  ;;  %2019 = vmatpush.msrb.mxu3 %v1960_v30 }
 0x25b   : > { %1844 = vmatpush.msra.mxu0 %v1728_v38  ;;  %2020 = vmatpush.msrb.mxu3 %v1959_v24  ;;  %v2195_v38 = vld [vmem:[#allocation14 + $0x250] sm:$0xff] }
 0x25c   : > { %2224 = vmatpush.msra.mxu2 %v2195_v38 }
 0x25d   : > { %2068 = vmatpush.msrb.mxu0 %v2067_v9 }
 0x25f   : > { %2069 = vmatpush.msrb.mxu0 %v2066_v26  ;;  %v2061_v26 = vld [vmem:[#allocation14 + $0x148] sm:$0xff] }
 0x260   : > { %2003 = vmatmul.f32.gmra.mxu2 %v4923_v52 }
 0x261   : > { %2070 = vmatpush.msrb.mxu0 %v2065_v45 }
 0x268   : > { %2006 = vmatmul.f32.gmra.mxu2 %v4942_v3 }
 0x270   : > { %2009 = vmatmul.f32.gmra.mxu2 %v4959_v8 }
 0x278   : > { %2012 = vmatmul.f32.gmra.mxu2 %v4951_v5 }
 0x283   : > { %v5066_v6 = vpop.f32.mrf.mxu2  ;;  %v1612_v22 = vpop.f32.mrf.mxu3 }
 0x284   : > { %v1613_v55 = vadd.f32 %v1612_v22, %v5066_v6 }
 0x28b   : > { %v5068_v0 = vpop.f32.mrf.mxu2  ;;  %v1615_v18 = vpop.f32.mrf.mxu3 }
 0x28c   : > { %v1616_v10 = vadd.f32 %v1615_v18, %v5068_v0  ;;  %v1958_v0 = vld [vmem:[#allocation14 + $0x50] sm:$0xff] }
 0x28d   : > { %2021 = vmatpush.msrb.mxu3 %v1958_v0 }
 0x28f   : > { %2022 = vmatpush.msrb.mxu3 %v1957_v15 }
 0x293   : > { %v5070_v33 = vpop.f32.mrf.mxu2  ;;  %v1618_v11 = vpop.f32.mrf.mxu3 }
 0x294   : > { %v1619_v59 = vadd.f32 %v1618_v11, %v5070_v33  ;;  %v2062_v33 = vld [vmem:[#allocation14 + $0x150] sm:$0xff]  ;;  %v2192_v11 = vld [vmem:[#allocation14 + $0x238] sm:$0xff] }
 0x29b   : > { %v5072_v13 = vpop.f32.mrf.mxu2 }
 0x2a3   : > { %v5074_v32 = vpop.f32.mrf.mxu2 }
 0x2ab   : > { %v1661_v40 = vpop.f32.mrf.mxu2 }
 0x2ac   : > { %v1676_v50 = vadd.f32 %v1661_v40, %v1613_v55  ;;  %v2064_v55 = vld [vmem:[#allocation14 + $0x160] sm:$0xff]  ;;  %v2194_v40 = vld [vmem:[#allocation14 + $0x248] sm:$0xff] }
 0x2ad   : > { %2225 = vmatpush.msra.mxu2 %v2194_v40  ;;  %2071 = vmatpush.msrb.mxu0 %v2064_v55  ;;  %v2060_v40 = vld [vmem:[#allocation14 + $0x140] sm:$0xff] }
 0x2ae   : > { %v1684_v54 = vadd.f32 %v5081_v47, %v1676_v50  ;;  %v1956_v50 = vld [vmem:[#allocation14 + $0x40] sm:$0xff] }
 0x2af   : > { %2023 = vmatpush.msrb.mxu3 %v1956_v50  ;;  %2226 = vmatpush.msra.mxu2 %v2193_v56 }
 0x2b0   : > { %v1694_v6 = vrot.slane %v1684_v54, 3  ;;  %v2063_v54 = vld [vmem:[#allocation14 + $0x158] sm:$0xff] }
 0x2b1   : > { %2072 = vmatpush.msrb.mxu0 %v2063_v54  ;;  %2024 = vmatpush.msrb.mxu3 %v1955_v60  ;;  %v1952_v54 = vld [vmem:[#allocation14 + $0x20] sm:$0xff] }
 0x2b2   : > { %v1709_v22 = vsel %vm4813_vm4, %v1694_v6, 0.0  ;;  %2227 = vmatpush.msra.mxu2 %v2192_v11 }
 0x2b3   : > { %v1664_v63 = vpop.f32.mrf.mxu2  ;;  %v1715_v52 = vmul.f32 0.1, %v1709_v22  ;;  %2073 = vmatpush.msrb.mxu0 %v2062_v33 }
 0x2b4   : > { %v1677_v23 = vadd.f32 %v1664_v63, %v1616_v10  ;;  %v2121_v63 = vld [vmem:[#allocation14 + $0x1d8] sm:$0xff] }
 0x2b5   : > { %v1721_v62 = vmax.f32 %v1709_v22, %v1715_v52  ;;  %2147 = vmatpush.msrb.mxu1 %v2121_v63  ;;  %v1953_v52 = vld [vmem:[#allocation14 + $0x28] sm:$0xff]  ;;  %2074 = vmatpush.msrb.mxu0 %v2061_v26 }
 0x2b6   : > { %v5090_v34 = vadd.f32 %v5081_v47, %v1677_v23  ;;  %v1621_v23 = vpop.f32.mrf.mxu3 }
 0x2b7   : > { %v1767_v0 = vrot.slane %v1721_v62, 6  ;;  %v1813_v45 = vrot.slane %v1721_v62, 5  ;;  %v1876_v46 = vrot.slane %v1721_v62, 7  ;;  %2148 = vmatpush.msrb.mxu1 %v2120_v14  ;;  %v1622_v3 = vadd.f32 %v1621_v23, %v5072_v13  ;;  %v2059_v13 = vld [vmem:[#allocation14 + $0x138] sm:$0xff]  ;;  %2075 = vmatpush.msrb.mxu0 %v2060_v40  ;;  %v2189_v14 = vld [vmem:[#allocation14 + $0x220] sm:$0xff] }
 0x2b8   : > { %v1695_v18 = vrot.slane %v5090_v34, 3  ;;  %v2191_v34 = vld [vmem:[#allocation14 + $0x230] sm:$0xff]  ;;  %v1951_v23 = vld [vmem:[#allocation14 + $0x18] sm:$0xff] }
 0x2b9   : > { %2228 = vmatpush.msra.mxu2 %v2191_v34  ;;  %2076 = vmatpush.msrb.mxu0 %v2059_v13  ;;  %v2055_v13 = vld [vmem:[#allocation14 + $0x118] sm:$0xff] }
 0x2ba   : > { %v1696_v20 = vsel %vm1376_vm7, %v1694_v6, %v1695_v18  ;;  %v1954_v6 = vld [vmem:[#allocation14 + $0x30] sm:$0xff] }
 0x2bb   : > { %v1710_v10 = vsel %vm4819_vm5, %v1696_v20, 0.0  ;;  %v1667_v30 = vpop.f32.mrf.mxu2  ;;  %2025 = vmatpush.msrb.mxu3 %v1954_v6  ;;  %v2119_v20 = vld [vmem:[#allocation14 + $0x1c8] sm:$0xff]  ;;  %v2117_v6 = vld [vmem:[#allocation14 + $0x1b8] sm:$0xff] }
 0x2bc   : > { %v1716_v9 = vmul.f32 0.1, %v1710_v10  ;;  %v1678_v24 = vadd.f32 %v1667_v30, %v1619_v59  ;;  %2149 = vmatpush.msrb.mxu1 %v2119_v20  ;;  %v2056_v20 = vld [vmem:[#allocation14 + $0x120] sm:$0xff] }
 0x2bd   : > { %2026 = vmatpush.msrb.mxu3 %v1953_v52 }
 0x2be   : > { %v5097_v25 = vmax.f32 %v1710_v10, %v1716_v9  ;;  %v5100_v22 = vadd.f32 %v5081_v47, %v1678_v24  ;;  %v2190_v10 = vld [vmem:[#allocation14 + $0x228] sm:$0xff]  ;;  %v2058_v9 = vld [vmem:[#allocation14 + $0x130] sm:$0xff]  ;;  %v1624_v24 = vpop.f32.mrf.mxu3 }
 0x2bf   : > { %2027 = vmatpush.msrb.mxu3 %v1952_v54  ;;  %2229 = vmatpush.msra.mxu2 %v2190_v10  ;;  %v2114_v10 = vld [vmem:[#allocation14 + $0x1a0] sm:$0xff] }
 0x2c0   : > { %v1697_v38 = vrot.slane %v5100_v22, 3  ;;  %v1768_v15 = vrot.slane %v5097_v25, 6  ;;  %v1814_v36 = vrot.slane %v5097_v25, 5  ;;  %v1877_v55 = vrot.slane %v5097_v25, 7  ;;  %v1950_v25 = vld [vmem:[#allocation14 + $0x10] sm:$0xff]  ;;  %2077 = vmatpush.msrb.mxu0 %v2058_v9 }
 0x2c1   : > { %2028 = vmatpush.msrb.mxu3 %v1951_v23  ;;  %2230 = vmatpush.msra.mxu2 %v2189_v14 }
 0x2c2   : > { %v1698_v50 = vsel %vm1376_vm7, %v1695_v18, %v1697_v38  ;;  %v1769_v43 = vsel %vm1450_vm9, %v1767_v0, %v1768_v15  ;;  %v1815_v56 = vsel %vm1532_vm10, %v1813_v45, %v1814_v36  ;;  %v1878_v59 = vsel %vm1179_vm6, %v1876_v46, %v1877_v55  ;;  %v2118_v18 = vld [vmem:[#allocation14 + $0x1c0] sm:$0xff]  ;;  %v2057_v46 = vld [vmem:[#allocation14 + $0x128] sm:$0xff] }
 0x2c3   : > { %v1711_v60 = vsel %vm4835_vm8, %v1698_v50, 0.0  ;;  %v1670_v62 = vpop.f32.mrf.mxu2  ;;  %1799 = vmatmul.f32.vlgmr.msra.gmra.mxu3 %v1769_v43  ;;  %1845 = vmatmul.f32.vlgmr.msra.gmra.mxu0 %v1815_v56  ;;  %v1625_v45 = vadd.f32 %v1624_v24, %v5074_v32  ;;  %v2116_v50 = vld [vmem:[#allocation14 + $0x1b0] sm:$0xff]  ;;  %v2188_v43 = vld [vmem:[#allocation14 + $0x218] sm:$0xff]  ;;  %v1949_v32 = vld [vmem:[#allocation14 + $0x8] sm:$0xff] }
 0x2c4   : > { %v1717_v30 = vmul.f32 0.1, %v1711_v60  ;;  %v1679_v63 = vadd.f32 %v1670_v62, %v1622_v3  ;;  %1908 = vmatmul.f32.vlgmr.msra.gmra.mxu1 %v1878_v59  ;;  %2029 = vmatpush.msrb.mxu3 %v1950_v25  ;;  %v2054_v24 = vld [vmem:[#allocation14 + $0x110] sm:$0xff]  ;;  %v2113_v25 = vld [vmem:[#allocation14 + $0x198] sm:$0xff] }
 0x2c5   : > { %2150 = vmatpush.msrb.mxu1 %v2118_v18  ;;  %2078 = vmatpush.msrb.mxu0 %v2057_v46 }
 0x2c6   : > { %v5115_v33 = vadd.f32 %v5081_v47, %v1679_v63  ;;  %v5117_v11 = vmax.f32 %v1711_v60, %v1717_v30  ;;  %2231 = vmatpush.msra.mxu2 %v2188_v43  ;;  %2030 = vmatpush.msrb.mxu3 %v1949_v32  ;;  %v2186_v30 = vld [vmem:[#allocation14 + $0x208] sm:$0xff] }
 0x2c7   : > { %2151 = vmatpush.msrb.mxu1 %v2117_v6  ;;  %2079 = vmatpush.msrb.mxu0 %v2056_v20  ;;  %v2111_v43 = vld [vmem:[#allocation14 + $0x188] sm:$0xff] }
 0x2c8   : > { %v1699_v22 = vrot.slane %v5115_v33, 3  ;;  %v1770_v26 = vrot.slane %v5117_v11, 6  ;;  %v1816_v34 = vrot.slane %v5117_v11, 5  ;;  %v1879_v0 = vrot.slane %v5117_v11, 7 }
 0x2c9   : > { %2152 = vmatpush.msrb.mxu1 %v2116_v50  ;;  %2080 = vmatpush.msrb.mxu0 %v2055_v13  ;;  %v2203_v33 = vrot.slane %v4844_v58, 4 }
 0x2ca   : > { %v1700_v52 = vsel %vm1376_vm7, %v1697_v38, %v1699_v22  ;;  %v1771_v8 = vsel %vm1450_vm9, %v1768_v15, %v1770_v26  ;;  %v1817_v3 = vsel %vm1532_vm10, %v1814_v36, %v1816_v34  ;;  %v1880_v40 = vsel %vm1179_vm6, %v1877_v55, %v1879_v0  ;;  %v2115_v38 = vld [vmem:[#allocation14 + $0x1a8] sm:$0xff]  ;;  %v2187_v15 = vld [vmem:[#allocation14 + $0x210] sm:$0xff]  ;;  %v1948_v36 = vld [vmem:[#allocation14] sm:$0xff] }
 0x2cb   : > { %v1712_v56 = vsel %vm4859_vm13, %v1700_v52, 0.0  ;;  %v1673_v59 = vpop.f32.mrf.mxu2  ;;  %1801 = vmatmul.f32.gmra.mxu3 %v1771_v8  ;;  %1847 = vmatmul.f32.gmra.mxu0 %v1817_v3  ;;  %v2053_v8 = vld [vmem:[#allocation14 + $0x108] sm:$0xff] }
 0x2cc   : > { %v1718_v54 = vmul.f32 0.1, %v1712_v56  ;;  %v1680_v60 = vadd.f32 %v1673_v59, %v1625_v45  ;;  %1910 = vmatmul.f32.gmra.mxu1 %v1880_v40  ;;  %2232 = vmatpush.msra.mxu2 %v2187_v15  ;;  %v2185_v45 = vld [vmem:[#allocation14 + $0x200] sm:$0xff] }
 0x2cd   : > { %2153 = vmatpush.msrb.mxu1 %v2115_v38  ;;  %2031 = vmatpush.msrb.mxu3 %v1948_v36  ;;  %v2110_v15 = vld [vmem:[#allocation14 + $0x180] sm:$0xff] }
 0x2ce   : > { %v1688_v55 = vadd.f32 %v5081_v47, %v1680_v60  ;;  %v1724_v62 = vmax.f32 %v1712_v56, %v1718_v54  ;;  %v2202_v47 = vrot.slane %v4841_v57, 4  ;;  %2233 = vmatpush.msra.mxu2 %v2186_v30  ;;  %2081 = vmatpush.msrb.mxu0 %v2054_v24 }
 0x2cf   : > { %2154 = vmatpush.msrb.mxu1 %v2114_v10  ;;  %v2207_v10 = vrot.slane %v4895_v29, 4 }
 0x2d0   : > { %v1701_v63 = vrot.slane %v1688_v55, 3  ;;  %v1772_v18 = vrot.slane %v1724_v62, 6  ;;  %v1818_v23 = vrot.slane %v1724_v62, 5  ;;  %v1881_v9 = vrot.slane %v1724_v62, 7  ;;  %2234 = vmatpush.msra.mxu2 %v2185_v45  ;;  %2082 = vmatpush.msrb.mxu0 %v2053_v8  ;;  %v2343_v8 = vld [vmem:[#allocation16 + $0xf8] sm:$0xff] }
 0x2d1   : > { %2155 = vmatpush.msrb.mxu1 %v2113_v25  ;;  %v2204_v3 = vsel %vm2201_vm14, %v2202_v47, %v2203_v33  ;;  %v2211_v25 = vrot.slane %v4939_v2, 4  ;;  %v2131_v45 = vrot.slane %v4895_v29, 3  ;;  %2366 = vmatpush.msra.mxu3 %v2343_v8  ;;  %v2452_v8 = vld [vmem:[#allocation16 + $0x128] sm:$0xff] }
 0x2d2   : > { %v1702_v11 = vsel %vm1376_vm7, %v1699_v22, %v1701_v63  ;;  %v1773_v6 = vsel %vm1450_vm9, %v1770_v26, %v1772_v18  ;;  %v1819_v14 = vsel %vm1532_vm10, %v1816_v34, %v1818_v23  ;;  %v1714_v46 = vsel %vm4912_vm3, %v1701_v63, 0.0  ;;  %v2112_v26 = vld [vmem:[#allocation14 + $0x190] sm:$0xff]  ;;  %v2052_v34 = vld [vmem:[#allocation14 + $0x100] sm:$0xff]  ;;  %2235 = vmatmul.f32.vlgmr.msra.gmra.mxu2 %v2204_v3 }
 0x2d3   : > { %v1713_v5 = vsel %vm4886_vm0, %v1702_v11, 0.0  ;;  %1804 = vmatmul.f32.gmra.mxu3 %v1773_v6  ;;  %1850 = vmatmul.f32.gmra.mxu0 %v1819_v14  ;;  %v1882_v52 = vsel %vm1179_vm6, %v1879_v0, %v1881_v9  ;;  %v1720_v40 = vmul.f32 0.1, %v1714_v46  ;;  %v2205_v0 = vrot.slane %v4868_v19, 4  ;;  %v2325_v3 = vld [vmem:[#allocation16 + $0x70] sm:$0xff] }
 0x2d4   : > { %v1719_v22 = vmul.f32 0.1, %v1713_v5  ;;  %1913 = vmatmul.f32.gmra.mxu1 %v1882_v52  ;;  %2083 = vmatpush.msrb.mxu0 %v2052_v34  ;;  %v2129_v11 = vrot.slane %v4868_v19, 3  ;;  %v2326_v34 = vld [vmem:[#allocation16 + $0x78] sm:$0xff] }
 0x2d5   : > { %2156 = vmatpush.msrb.mxu1 %v2112_v26  ;;  %v1726_v20 = vmax.f32 %v1714_v46, %v1720_v40  ;;  %v2206_v36 = vsel %vm2201_vm14, %v2203_v33, %v2205_v0  ;;  %v2208_v24 = vsel %vm2201_vm14, %v2205_v0, %v2207_v10  ;;  %v2209_v33 = vrot.slane %v4920_v49, 4  ;;  %v2342_v26 = vld [vmem:[#allocation16 + $0xf0] sm:$0xff]  ;;  %v2340_v40 = vld [vmem:[#allocation16 + $0xe0] sm:$0xff] }
 0x2d6   : > { %v1725_v50 = vmax.f32 %v1713_v5, %v1719_v22  ;;  %v2133_v5 = vrot.slane %v4920_v49, 3  ;;  %2367 = vmatpush.msra.mxu3 %v2342_v26  ;;  %2414 = vmatpush.msra.mxu0 %v2326_v34  ;;  %v2338_v0 = vld [vmem:[#allocation16 + $0xd0] sm:$0xff]  ;;  %v2315_v26 = vld [vmem:[#allocation16 + $0x20] sm:$0xff]  ;;  %v2331_v34 = vld [vmem:[#allocation16 + $0x98] sm:$0xff] }
 0x2d7   : > { %2157 = vmatpush.msrb.mxu1 %v2111_v43  ;;  %v1776_v55 = vrot.slane %v1726_v20, 6  ;;  %v1822_v62 = vrot.slane %v1726_v20, 5  ;;  %v1885_v13 = vrot.slane %v1726_v20, 7  ;;  %v2210_v6 = vsel %vm2201_vm14, %v2207_v10, %v2209_v33  ;;  %v2462_v43 = vld [vmem:[#allocation16 + $0x178] sm:$0xff]  ;;  %v2461_v20 = vld [vmem:[#allocation16 + $0x170] sm:$0xff] }
 0x2d8   : > { %v1774_v56 = vrot.slane %v1725_v50, 6  ;;  %v1820_v59 = vrot.slane %v1725_v50, 5  ;;  %v1883_v32 = vrot.slane %v1725_v50, 7  ;;  %v2324_v50 = vld [vmem:[#allocation16 + $0x68] sm:$0xff]  ;;  %2415 = vmatpush.msra.mxu0 %v2325_v3  ;;  %v2314_v3 = vld [vmem:[#allocation16 + $0x18] sm:$0xff] }
 0x2d9   : > { %2158 = vmatpush.msrb.mxu1 %v2110_v15  ;;  %v2322_v15 = vld [vmem:[#allocation16 + $0x58] sm:$0xff] }
 0x2da   : > { %v1775_v54 = vsel %vm1450_vm9, %v1772_v18, %v1774_v56  ;;  %v1821_v60 = vsel %vm1532_vm10, %v1818_v23, %v1820_v59  ;;  %v1884_v38 = vsel %vm1179_vm6, %v1881_v9, %v1883_v32  ;;  %2238 = vmatmul.f32.gmra.mxu2 %v2206_v36  ;;  %v1777_v30 = vsel %vm1450_vm9, %v1774_v56, %v1776_v55  ;;  %v2339_v56 = vld [vmem:[#allocation16 + $0xd8] sm:$0xff]  ;;  %v2460_v36 = vld [vmem:[#allocation16 + $0x168] sm:$0xff]  ;;  %v2336_v55 = vld [vmem:[#allocation16 + $0xc0] sm:$0xff] }
 0x2db   : > { %1807 = vmatmul.f32.gmra.mxu3 %v1775_v54  ;;  %1853 = vmatmul.f32.gmra.mxu0 %v1821_v60  ;;  %v1823_v63 = vsel %vm1532_vm10, %v1820_v59, %v1822_v62  ;;  %v1886_v18 = vsel %vm1179_vm6, %v1883_v32, %v1885_v13  ;;  %v2126_v23 = vrot.slane %v4841_v57, 3  ;;  %v2127_v9 = vrot.slane %v4844_v58, 3  ;;  %v2323_v59 = vld [vmem:[#allocation16 + $0x60] sm:$0xff]  ;;  %v2321_v62 = vld [vmem:[#allocation16 + $0x50] sm:$0xff] }
 0x2dc   : > { %1916 = vmatmul.f32.gmra.mxu1 %v1884_v38  ;;  %2416 = vmatpush.msra.mxu0 %v2324_v50  ;;  %v2337_v38 = vld [vmem:[#allocation16 + $0xc8] sm:$0xff]  ;;  %v2459_v13 = vld [vmem:[#allocation16 + $0x160] sm:$0xff] }
 0x2dd   : > { %v2128_v47 = vsel %vm1376_vm7, %v2126_v23, %v2127_v9  ;;  %v2130_v14 = vsel %vm1376_vm7, %v2127_v9, %v2129_v11  ;;  %2479 = vmatpush.msra.mxu1 %v2462_v43  ;;  %v2330_v43 = vld [vmem:[#allocation16 + $0x90] sm:$0xff] }
 0x2de   : > { %2417 = vmatpush.msra.mxu0 %v2323_v59  ;;  %v2449_v59 = vld [vmem:[#allocation16 + $0x110] sm:$0xff] }
 0x2df   : > { %2480 = vmatpush.msra.mxu1 %v2461_v20 }
 0x2e0   : > { %2418 = vmatpush.msra.mxu0 %v2322_v15  ;;  %v2329_v15 = vld [vmem:[#allocation16 + $0x88] sm:$0xff] }
 0x2e1   : > { %2481 = vmatpush.msra.mxu1 %v2460_v36  ;;  %v2312_v36 = vld [vmem:[#allocation16 + $0x8] sm:$0xff] }
 0x2e2   : > { %2241 = vmatmul.f32.gmra.mxu2 %v2208_v24  ;;  %2419 = vmatpush.msra.mxu0 %v2321_v62  ;;  %v2320_v24 = vld [vmem:[#allocation16 + $0x48] sm:$0xff]  ;;  %v2328_v62 = vld [vmem:[#allocation16 + $0x80] sm:$0xff] }
 0x2e3   : > { %1810 = vmatmul.f32.gmra.mxu3 %v1777_v30  ;;  %1856 = vmatmul.f32.gmra.mxu0 %v1823_v63  ;;  %v2458_v30 = vld [vmem:[#allocation16 + $0x158] sm:$0xff] }
 0x2e4   : > { %1919 = vmatmul.f32.gmra.mxu1 %v1886_v18  ;;  %v2457_v18 = vld [vmem:[#allocation16 + $0x150] sm:$0xff]  ;;  %2420 = vmatpush.msra.mxu0 %v2320_v24 }
 0x2e5   : > { %2482 = vmatpush.msra.mxu1 %v2459_v13  ;;  %v2311_v13 = vld [vmem:[#allocation16] sm:$0xff] }
 0x2e7   : > { %2483 = vmatpush.msra.mxu1 %v2458_v30  ;;  %v2447_v30 = vld [vmem:[#allocation16 + $0x100] sm:$0xff] }
 0x2e9   : > { %2484 = vmatpush.msra.mxu1 %v2457_v18 }
 0x2ea   : > { %2244 = vmatmul.f32.gmra.mxu2 %v2210_v6  ;;  %v2335_v6 = vld [vmem:[#allocation16 + $0xb8] sm:$0xff] }
 0x2eb   : > { %2032 = vmatmul.f32.vlgmr.msrb.gmra.mxu3 %v4841_v57  ;;  %2084 = vmatmul.f32.vlgmr.msrb.gmra.mxu0 %v4865_v17  ;;  %v2212_v57 = vsel %vm2201_vm14, %v2209_v33, %v2211_v25  ;;  %v2132_v17 = vsel %vm1376_vm7, %v2129_v11, %v2131_v45  ;;  %v2319_v33 = vld [vmem:[#allocation16 + $0x40] sm:$0xff] }
 0x2ec   : > { %2159 = vmatmul.f32.vlgmr.msrb.gmra.mxu1 %v2128_v47  ;;  %v2456_v47 = vld [vmem:[#allocation16 + $0x148] sm:$0xff]  ;;  %v2455_v11 = vld [vmem:[#allocation16 + $0x140] sm:$0xff]  ;;  %2421 = vmatpush.msra.mxu0 %v2319_v33 }
 0x2ed   : > { %2485 = vmatpush.msra.mxu1 %v2456_v47 }
 0x2ef   : > { %2486 = vmatpush.msra.mxu1 %v2455_v11 }
 0x2f2   : > { %2247 = vmatmul.f32.gmra.mxu2 %v2212_v57 }
 0x2f3   : > { %2035 = vmatmul.f32.gmra.mxu3 %v4844_v58  ;;  %2087 = vmatmul.f32.gmra.mxu0 %v4892_v28  ;;  %v2134_v58 = vsel %vm1376_vm7, %v2131_v45, %v2133_v5  ;;  %v2135_v28 = vrot.slane %v4939_v2, 3 }
 0x2f4   : > { %2162 = vmatmul.f32.gmra.mxu1 %v2130_v14  ;;  %v2318_v14 = vld [vmem:[#allocation16 + $0x38] sm:$0xff] }
 0x2f5   : > { %v2136_v46 = vsel %vm1376_vm7, %v2133_v5, %v2135_v28  ;;  %2422 = vmatpush.msra.mxu0 %v2318_v14  ;;  %v2333_v5 = vld [vmem:[#allocation16 + $0xa8] sm:$0xff] }
 0x2fa   : > { %2250 = vmatmul.f32.gmra.mxu2 %v2211_v25  ;;  %v2454_v25 = vld [vmem:[#allocation16 + $0x138] sm:$0xff] }
 0x2fb   : > { %2038 = vmatmul.f32.gmra.mxu3 %v4868_v19  ;;  %2090 = vmatmul.f32.gmra.mxu0 %v4917_v48  ;;  %v5181_v19 = vpop.f32.mrf.mxu2 }
 0x2fc   : > { %2165 = vmatmul.f32.gmra.mxu1 %v2132_v17  ;;  %v2334_v17 = vld [vmem:[#allocation16 + $0xb0] sm:$0xff] }
 0x2fd   : > { %2487 = vmatpush.msra.mxu1 %v2454_v25  ;;  %v5215_v25 = vld [vmem:[%s5689_s8] ss:$0 sm:$0xff]  ;;  %s5696_s8 = smov %s5695_s20 }
 0x2fe   : > { %s4185_s13 = scalar_lea.hbm %s5696_s8, 96  ;;  %p4186_p4 = scmp.lt.s32.totalorder %s4180_s24, %s5696_s8 }
 0x2ff   : > { %p4187_p6 = scmp.lt.s32.totalorder %s4185_s13, %s4181_s18 }
 0x301   : > { %p4188_p10 = por %p4187_p6, %p4186_p4 }
 0x303   : > { %2041 = vmatmul.f32.gmra.mxu3 %v4895_v29  ;;  %2093 = vmatmul.f32.gmra.mxu0 %v4936_v1  ;;  %v5183_v29 = vpop.f32.mrf.mxu2  ;;  %p4189_p11 = pnand %p4188_p10, %p4184_p2 }
 0x304   : > { %2168 = vmatmul.f32.gmra.mxu1 %v2134_v58  ;;  %v2317_v58 = vld [vmem:[#allocation16 + $0x30] sm:$0xff] }
 0x305   : > { %2423 = vmatpush.msra.mxu0 %v2317_v58  ;;  %v2602_v58 = vld [vmem:[#allocation16 + $0x278] sm:$0xff] }
 0x30b   : > { %2044 = vmatmul.f32.gmra.mxu3 %v4920_v49  ;;  %2096 = vmatmul.f32.gmra.mxu0 %v4955_v7  ;;  %v5185_v1 = vpop.f32.mrf.mxu2 }
 0x30c   : > { %2171 = vmatmul.f32.gmra.mxu1 %v2136_v46 }
 0x313   : > { %2047 = vmatmul.f32.gmra.mxu3 %v4939_v2  ;;  %2099 = vmatmul.f32.gmra.mxu0 %v4948_v4  ;;  %v2341_v2 = vld [vmem:[#allocation16 + $0xe8] sm:$0xff]  ;;  %v5191_v4 = vpop.f32.mrf.mxu2 }
 0x314   : > { %2174 = vmatmul.f32.gmra.mxu1 %v2135_v28  ;;  %2368 = vmatpush.msra.mxu3 %v2341_v2  ;;  %v2453_v28 = vld [vmem:[#allocation16 + $0x130] sm:$0xff]  ;;  %v2451_v2 = vld [vmem:[#allocation16 + $0x120] sm:$0xff] }
 0x315   : > { %2488 = vmatpush.msra.mxu1 %v2453_v28 }
 0x316   : > { %2369 = vmatpush.msra.mxu3 %v2340_v40  ;;  %v2450_v40 = vld [vmem:[#allocation16 + $0x118] sm:$0xff] }
 0x317   : > { %2489 = vmatpush.msra.mxu1 %v2452_v8  ;;  %v2601_v8 = vld [vmem:[#allocation16 + $0x270] sm:$0xff] }
 0x318   : > { %2370 = vmatpush.msra.mxu3 %v2339_v56  ;;  %v2313_v56 = vld [vmem:[#allocation16 + $0x10] sm:$0xff] }
 0x319   : > { %2490 = vmatpush.msra.mxu1 %v2451_v2 }
 0x31a   : > { %2371 = vmatpush.msra.mxu3 %v2338_v0 }
 0x31b   : > { %v5199_v10 = vpop.f32.mrf.mxu2  ;;  %2491 = vmatpush.msra.mxu1 %v2450_v40 }
 0x31c   : > { %2372 = vmatpush.msra.mxu3 %v2337_v38 }
 0x31d   : > { %2492 = vmatpush.msra.mxu1 %v2449_v59 }
 0x31e   : > { %2373 = vmatpush.msra.mxu3 %v2336_v55  ;;  %v2448_v55 = vld [vmem:[#allocation16 + $0x108] sm:$0xff] }
 0x31f   : > { %2493 = vmatpush.msra.mxu1 %v2448_v55  ;;  %v2527_v55 = vld [vmem:[#allocation16 + $0x1d0] sm:$0xff] }
 0x320   : > { %2374 = vmatpush.msra.mxu3 %v2335_v6 }
 0x321   : > { %2494 = vmatpush.msra.mxu1 %v2447_v30 }
 0x322   : > { %2375 = vmatpush.msra.mxu3 %v2334_v17 }
 0x323   : > { %v5209_v57 = vpop.f32.mrf.mxu2 }
 0x324   : > { %2376 = vmatpush.msra.mxu3 %v2333_v5  ;;  %v2532_v5 = vld [vmem:[#allocation16 + $0x1f8] sm:$0xff] }
 0x340   : > { %v1846_v48 = vpop.f32.mrf.mxu0 }
 0x341   : > { %v1909_v52 = vpop.f32.mrf.mxu1 }
 0x342   : > { %v2316_v52 = vld [vmem:[#allocation16 + $0x28] sm:$0xff] }
 0x343   : > { %2424 = vmatpush.msra.mxu0 %v2316_v52  ;;  %v2530_v52 = vld [vmem:[#allocation16 + $0x1e8] sm:$0xff] }
 0x345   : > { %2425 = vmatpush.msra.mxu0 %v2315_v26 }
 0x346   : > { %v1800_v22 = vpop.f32.mrf.mxu3 }
 0x347   : > { %v2332_v22 = vld [vmem:[#allocation16 + $0xa0] sm:$0xff]  ;;  %2426 = vmatpush.msra.mxu0 %v2314_v3 }
 0x348   : > { %v5187_v49 = vpop.f32.mrf.mxu0  ;;  %2377 = vmatpush.msra.mxu3 %v2332_v22 }
 0x349   : > { %v5189_v7 = vpop.f32.mrf.mxu1  ;;  %2427 = vmatpush.msra.mxu0 %v2313_v56 }
 0x34a   : > { %2378 = vmatpush.msra.mxu3 %v2331_v34  ;;  %v2600_v34 = vld [vmem:[#allocation16 + $0x268] sm:$0xff] }
 0x34b   : > { %2428 = vmatpush.msra.mxu0 %v2312_v36 }
 0x34c   : > { %2379 = vmatpush.msra.mxu3 %v2330_v43  ;;  %v2599_v43 = vld [vmem:[#allocation16 + $0x260] sm:$0xff] }
 0x34d   : > { %2429 = vmatpush.msra.mxu0 %v2311_v13  ;;  %v2597_v13 = vld [vmem:[#allocation16 + $0x250] sm:$0xff] }
 0x34e   : > { %v5193_v32 = vpop.f32.mrf.mxu3  ;;  %2380 = vmatpush.msra.mxu3 %v2329_v15 }
 0x34f   : > { %2619 = vmatpush.msrb.mxu0 %v2602_v58 }
 0x350   : > { %v5195_v54 = vpop.f32.mrf.mxu0  ;;  %2381 = vmatpush.msra.mxu3 %v2328_v62  ;;  %v2526_v62 = vld [vmem:[#allocation16 + $0x1c8] sm:$0xff] }
 0x351   : > { %v5197_v60 = vpop.f32.mrf.mxu1  ;;  %2620 = vmatpush.msrb.mxu0 %v2601_v8 }
 0x352   : > { %2549 = vmatpush.msrb.mxu3 %v2532_v5 }
 0x353   : > { %2621 = vmatpush.msrb.mxu0 %v2600_v34  ;;  %v2523_v34 = vld [vmem:[#allocation16 + $0x1b0] sm:$0xff] }
 0x355   : > { %v2236_v20 = vpop.f32.mrf.mxu2  ;;  %2622 = vmatpush.msrb.mxu0 %v2599_v43 }
 0x356   : > { %v5201_v63 = vpop.f32.mrf.mxu3 }
 0x358   : > { %v5203_v23 = vpop.f32.mrf.mxu0 }
 0x359   : > { %v5205_v9 = vpop.f32.mrf.mxu1 }
 0x35d   : > { %v2239_v6 = vpop.f32.mrf.mxu2 }
 0x35e   : > { %v5207_v45 = vpop.f32.mrf.mxu3 }
 0x360   : > { %v1857_v46 = vpop.f32.mrf.mxu0 }
 0x361   : > { %v1920_v48 = vpop.f32.mrf.mxu1 }
 0x362   : > { %v2531_v48 = vld [vmem:[#allocation16 + $0x1f0] sm:$0xff] }
 0x363   : > { %2550 = vmatpush.msrb.mxu3 %v2531_v48  ;;  %v2594_v48 = vld [vmem:[#allocation16 + $0x238] sm:$0xff] }
 0x365   : > { %2551 = vmatpush.msrb.mxu3 %v2530_v52  ;;  %v2242_v56 = vpop.f32.mrf.mxu2 }
 0x366   : > { %v1811_v50 = vpop.f32.mrf.mxu3 }
 0x367   : > { %v2529_v50 = vld [vmem:[#allocation16 + $0x1e0] sm:$0xff] }
 0x368   : > { %v2085_v0 = vpop.f32.mrf.mxu0  ;;  %2552 = vmatpush.msrb.mxu3 %v2529_v50 }
 0x369   : > { %v2160_v38 = vpop.f32.mrf.mxu1 }
 0x36d   : > { %v2245_v8 = vpop.f32.mrf.mxu2 }
 0x36e   : > { %v2033_v18 = vpop.f32.mrf.mxu3 }
 0x36f   : > { %v2034_v24 = vadd.f32 %v2033_v18, %v5181_v19 }
 0x370   : > { %v2088_v47 = vpop.f32.mrf.mxu0 }
 0x371   : > { %v2103_v33 = vadd.f32 %v2085_v0, %v2034_v24  ;;  %v2163_v11 = vpop.f32.mrf.mxu1  ;;  %v2528_v0 = vld [vmem:[#allocation16 + $0x1d8] sm:$0xff] }
 0x372   : > { %2553 = vmatpush.msrb.mxu3 %v2528_v0 }
 0x373   : > { %v2178_v14 = vadd.f32 %v2160_v38, %v2103_v33 }
 0x374   : > { %2554 = vmatpush.msrb.mxu3 %v2527_v55 }
 0x375   : > { %v2254_v17 = vadd.f32 %v2236_v20, %v2178_v14  ;;  %v2598_v20 = vld [vmem:[#allocation16 + $0x258] sm:$0xff]  ;;  %v2525_v14 = vld [vmem:[#allocation16 + $0x1c0] sm:$0xff] }
 0x376   : > { %v2036_v28 = vpop.f32.mrf.mxu3  ;;  %2623 = vmatpush.msrb.mxu0 %v2598_v20  ;;  %2555 = vmatpush.msrb.mxu3 %v2526_v62 }
 0x377   : > { %v2263_v46 = vadd.f32 %v5215_v25, %v2254_v17  ;;  %v2037_v19 = vadd.f32 %v2036_v28, %v5183_v29  ;;  %v2595_v17 = vld [vmem:[#allocation16 + $0x240] sm:$0xff] }
 0x378   : > { %v2091_v22 = vpop.f32.mrf.mxu0  ;;  %2624 = vmatpush.msrb.mxu0 %v2597_v13  ;;  %2556 = vmatpush.msrb.mxu3 %v2525_v14 }
 0x379   : > { %v2275_v26 = vrot.slane %v2263_v46, 6  ;;  %v2104_v2 = vadd.f32 %v2088_v47, %v2037_v19  ;;  %v2166_v3 = vpop.f32.mrf.mxu1  ;;  %v2596_v47 = vld [vmem:[#allocation16 + $0x248] sm:$0xff]  ;;  %v2524_v19 = vld [vmem:[#allocation16 + $0x1b8] sm:$0xff] }
 0x37a   : > { %2625 = vmatpush.msrb.mxu0 %v2596_v47  ;;  %2557 = vmatpush.msrb.mxu3 %v2524_v19 }
 0x37b   : > { %v2179_v40 = vadd.f32 %v2163_v11, %v2104_v2  ;;  %v2292_v29 = vsel %vm4813_vm4, %v2275_v26, 0.0 }
 0x37c   : > { %v2298_v30 = vmul.f32 0.1, %v2292_v29  ;;  %2626 = vmatpush.msrb.mxu0 %v2595_v17  ;;  %2558 = vmatpush.msrb.mxu3 %v2523_v34 }
 0x37d   : > { %v2255_v59 = vadd.f32 %v2239_v6, %v2179_v40  ;;  %v2593_v40 = vld [vmem:[#allocation16 + $0x230] sm:$0xff] }
 0x37e   : > { %v2039_v38 = vpop.f32.mrf.mxu3  ;;  %v5224_v5 = vmax.f32 %v2292_v29, %v2298_v30  ;;  %2627 = vmatpush.msrb.mxu0 %v2594_v48  ;;  %v2591_v30 = vld [vmem:[#allocation16 + $0x220] sm:$0xff]  ;;  %v2589_v48 = vld [vmem:[#allocation16 + $0x210] sm:$0xff] }
 0x37f   : > { %v2264_v15 = vadd.f32 %v5215_v25, %v2255_v59  ;;  %v2040_v36 = vadd.f32 %v2039_v38, %v5185_v1 }
 0x380   : > { %v2094_v33 = vpop.f32.mrf.mxu0  ;;  %v2350_v50 = vrot.slane %v5224_v5, 3  ;;  %v2398_v43 = vrot.slane %v5224_v5, 2  ;;  %2628 = vmatpush.msrb.mxu0 %v2593_v40  ;;  %v2463_v38 = vrot.slane %v5224_v5, 4 }
 0x381   : > { %v2276_v18 = vrot.slane %v2264_v15, 6  ;;  %v2105_v24 = vadd.f32 %v2091_v22, %v2040_v36  ;;  %v2169_v58 = vpop.f32.mrf.mxu1  ;;  %v2521_v15 = vld [vmem:[#allocation16 + $0x1a0] sm:$0xff] }
 0x383   : > { %v2277_v11 = vsel %vm1450_vm9, %v2275_v26, %v2276_v18  ;;  %v2180_v6 = vadd.f32 %v2166_v3, %v2105_v24  ;;  %v2522_v3 = vld [vmem:[#allocation16 + $0x1a8] sm:$0xff] }
 0x384   : > { %v2293_v1 = vsel %vm4819_vm5, %v2277_v11, 0.0  ;;  %2559 = vmatpush.msrb.mxu3 %v2522_v3  ;;  %v2520_v11 = vld [vmem:[#allocation16 + $0x198] sm:$0xff] }
 0x385   : > { %v2299_v28 = vmul.f32 0.1, %v2293_v1  ;;  %v2256_v46 = vadd.f32 %v2242_v56, %v2180_v6  ;;  %v2592_v56 = vld [vmem:[#allocation16 + $0x228] sm:$0xff] }
 0x386   : > { %v2042_v52 = vpop.f32.mrf.mxu3  ;;  %2629 = vmatpush.msrb.mxu0 %v2592_v56  ;;  %2560 = vmatpush.msrb.mxu3 %v2521_v15 }
 0x387   : > { %v5228_v22 = vmax.f32 %v2293_v1, %v2299_v28  ;;  %v2265_v26 = vadd.f32 %v5215_v25, %v2256_v46  ;;  %v2043_v2 = vadd.f32 %v2042_v52, %v5191_v4  ;;  %v2248_v52 = vpop.f32.mrf.mxu2 }
 0x388   : > { %2630 = vmatpush.msrb.mxu0 %v2591_v30  ;;  %2561 = vmatpush.msrb.mxu3 %v2520_v11 }
 0x389   : > { %v2278_v29 = vrot.slane %v2265_v26, 6  ;;  %v2106_v59 = vadd.f32 %v2094_v33, %v2043_v2  ;;  %v2351_v0 = vrot.slane %v5228_v22, 3  ;;  %v2399_v20 = vrot.slane %v5228_v22, 2  ;;  %v2097_v33 = vpop.f32.mrf.mxu0  ;;  %v2172_v1 = vpop.f32.mrf.mxu1  ;;  %v2518_v26 = vld [vmem:[#allocation16 + $0x188] sm:$0xff] }
 0x38a   : > { %v2464_v4 = vrot.slane %v5228_v22, 4 }
 0x38b   : > { %v2279_v36 = vsel %vm1450_vm9, %v2276_v18, %v2278_v29  ;;  %v2181_v55 = vadd.f32 %v2169_v58, %v2106_v59  ;;  %v2352_v62 = vsel %vm1376_vm7, %v2350_v50, %v2351_v0  ;;  %v2400_v13 = vsel %vm1105_vm11, %v2398_v43, %v2399_v20  ;;  %v2590_v18 = vld [vmem:[#allocation16 + $0x218] sm:$0xff]  ;;  %v2519_v58 = vld [vmem:[#allocation16 + $0x190] sm:$0xff]  ;;  %v2588_v50 = vld [vmem:[#allocation16 + $0x208] sm:$0xff] }
 0x38c   : > { %v2294_v24 = vsel %vm4835_vm8, %v2279_v36, 0.0  ;;  %2382 = vmatmul.f32.vlgmr.msra.gmra.mxu3 %v2352_v62  ;;  %2430 = vmatmul.f32.vlgmr.msra.gmra.mxu0 %v2400_v13  ;;  %v2465_v47 = vsel %vm2201_vm14, %v2463_v38, %v2464_v4  ;;  %v2517_v38 = vld [vmem:[#allocation16 + $0x180] sm:$0xff] }
 0x38d   : > { %v2300_v6 = vmul.f32 0.1, %v2294_v24  ;;  %v2257_v14 = vadd.f32 %v2245_v8, %v2181_v55  ;;  %2495 = vmatmul.f32.vlgmr.msra.gmra.mxu1 %v2465_v47  ;;  %2631 = vmatpush.msrb.mxu0 %v2590_v18  ;;  %v2587_v55 = vld [vmem:[#allocation16 + $0x200] sm:$0xff] }
 0x38e   : > { %v2045_v17 = vpop.f32.mrf.mxu3  ;;  %2562 = vmatpush.msrb.mxu3 %v2519_v58 }
 0x38f   : > { %v5244_v28 = vmax.f32 %v2294_v24, %v2300_v6  ;;  %v2266_v46 = vadd.f32 %v5215_v25, %v2257_v14  ;;  %v2046_v19 = vadd.f32 %v2045_v17, %v5199_v10  ;;  %2632 = vmatpush.msrb.mxu0 %v2589_v48  ;;  %v2251_v14 = vpop.f32.mrf.mxu2 }
 0x390   : > { %2563 = vmatpush.msrb.mxu3 %v2518_v26 }
 0x391   : > { %v2280_v2 = vrot.slane %v2266_v46, 6  ;;  %v2107_v8 = vadd.f32 %v2097_v33, %v2046_v19  ;;  %v2353_v34 = vrot.slane %v5244_v28, 3  ;;  %v2401_v3 = vrot.slane %v5244_v28, 2  ;;  %2633 = vmatpush.msrb.mxu0 %v2588_v50  ;;  %v2100_v30 = vpop.f32.mrf.mxu0  ;;  %v2175_v47 = vpop.f32.mrf.mxu1 }
 0x392   : > { %v2466_v40 = vrot.slane %v5244_v28, 4  ;;  %2564 = vmatpush.msrb.mxu3 %v2517_v38 }
 0x393   : > { %v2281_v43 = vsel %vm1450_vm9, %v2278_v29, %v2280_v2  ;;  %v2182_v56 = vadd.f32 %v2172_v1, %v2107_v8  ;;  %v2354_v10 = vsel %vm1376_vm7, %v2351_v0, %v2353_v34  ;;  %v2402_v59 = vsel %vm1105_vm11, %v2399_v20, %v2401_v3  ;;  %2634 = vmatpush.msrb.mxu0 %v2587_v55 }
 0x394   : > { %v2295_v15 = vsel %vm4859_vm13, %v2281_v43, 0.0  ;;  %2385 = vmatmul.f32.gmra.mxu3 %v2354_v10  ;;  %2433 = vmatmul.f32.gmra.mxu0 %v2402_v59  ;;  %v2467_v36 = vsel %vm2201_vm14, %v2464_v4, %v2466_v40 }
 0x395   : > { %v2301_v62 = vmul.f32 0.1, %v2295_v15  ;;  %v2258_v13 = vadd.f32 %v2248_v52, %v2182_v56  ;;  %2498 = vmatmul.f32.gmra.mxu1 %v2467_v36 }
 0x396   : > { %v2048_v29 = vpop.f32.mrf.mxu3 }
 0x397   : > { %v5257_v0 = vmax.f32 %v2295_v15, %v2301_v62  ;;  %v2267_v20 = vadd.f32 %v5215_v25, %v2258_v13  ;;  %v2049_v24 = vadd.f32 %v2048_v29, %v5209_v57 }
 0x399   : > { %v2282_v33 = vrot.slane %v2267_v20, 6  ;;  %v2108_v11 = vadd.f32 %v2100_v30, %v2049_v24  ;;  %v2355_v4 = vrot.slane %v5257_v0, 3  ;;  %v2403_v6 = vrot.slane %v5257_v0, 2 }
 0x39a   : > { %v2468_v18 = vrot.slane %v5257_v0, 4  ;;  %v2534_v30 = vrot.slane %v5228_v22, 5  ;;  %v2604_v20 = vrot.slane %v5228_v22, 6  ;;  %v2533_v24 = vrot.slane %v5224_v5, 5 }
 0x39b   : > { %v2283_v17 = vsel %vm1450_vm9, %v2280_v2, %v2282_v33  ;;  %v2183_v1 = vadd.f32 %v2175_v47, %v2108_v11  ;;  %v2356_v58 = vsel %vm1376_vm7, %v2353_v34, %v2355_v4  ;;  %v2404_v46 = vsel %vm1105_vm11, %v2401_v3, %v2403_v6 }
 0x39c   : > { %v2296_v57 = vsel %vm4886_vm0, %v2283_v17, 0.0  ;;  %2388 = vmatmul.f32.gmra.mxu3 %v2356_v58  ;;  %2436 = vmatmul.f32.gmra.mxu0 %v2404_v46  ;;  %v2469_v19 = vsel %vm2201_vm14, %v2466_v40, %v2468_v18  ;;  %v2603_v47 = vrot.slane %v5224_v5, 6  ;;  %v2538_v22 = vrot.slane %v5257_v0, 5 }
 0x39d   : > { %v2302_v48 = vmul.f32 0.1, %v2296_v57  ;;  %v2259_v52 = vadd.f32 %v2251_v14, %v2183_v1  ;;  %2501 = vmatmul.f32.gmra.mxu1 %v2469_v19  ;;  %v2608_v5 = vrot.slane %v5257_v0, 6 }
 0x39e   : > { %v2605_v11 = vsel %vm1450_vm9, %v2603_v47, %v2604_v20  ;;  %v2959_v47 = vld [vmem:[#allocation17 + $0x268] sm:$0xff] }
 0x39f   : > { %v2308_v26 = vmax.f32 %v2296_v57, %v2302_v48  ;;  %v2268_v8 = vadd.f32 %v5215_v25, %v2259_v52 }
 0x3a1   : > { %v2284_v50 = vrot.slane %v2268_v8, 6  ;;  %v2357_v2 = vrot.slane %v2308_v26, 3  ;;  %v2405_v43 = vrot.slane %v2308_v26, 2  ;;  %v2470_v56 = vrot.slane %v2308_v26, 4  ;;  %v2724_v8 = vld [vmem:[#allocation17 + $0x78] sm:$0xff] }
 0x3a2   : > { %v2540_v58 = vrot.slane %v2308_v26, 5  ;;  %v2610_v46 = vrot.slane %v2308_v26, 6  ;;  %2802 = vmatpush.msrb.mxu2 %v2724_v8  ;;  %v2722_v26 = vld [vmem:[#allocation17 + $0x68] sm:$0xff]  ;;  %v2712_v8 = vld [vmem:[#allocation17 + $0x18] sm:$0xff] }
 0x3a3   : > { %v2285_v34 = vsel %vm1450_vm9, %v2282_v33, %v2284_v50  ;;  %v2358_v3 = vsel %vm1376_vm7, %v2355_v4, %v2357_v2  ;;  %v2406_v10 = vsel %vm1105_vm11, %v2403_v6, %v2405_v43  ;;  %v2471_v59 = vsel %vm2201_vm14, %v2468_v18, %v2470_v56  ;;  %v2723_v50 = vld [vmem:[#allocation17 + $0x70] sm:$0xff] }
 0x3a4   : > { %v2297_v40 = vsel %vm4912_vm3, %v2285_v34, 0.0  ;;  %2391 = vmatmul.f32.gmra.mxu3 %v2358_v3  ;;  %2439 = vmatmul.f32.gmra.mxu0 %v2406_v10  ;;  %v2535_v33 = vsel %vm1532_vm10, %v2533_v24, %v2534_v30  ;;  %v2536_v4 = vrot.slane %v5244_v28, 5  ;;  %v2606_v6 = vrot.slane %v5244_v28, 6  ;;  %v2741_v34 = vld [vmem:[#allocation17 + $0xf8] sm:$0xff]  ;;  %v2735_v24 = vld [vmem:[#allocation17 + $0xc8] sm:$0xff] }
 0x3a5   : > { %v2303_v38 = vmul.f32 0.1, %v2297_v40  ;;  %2504 = vmatmul.f32.gmra.mxu1 %v2471_v59  ;;  %v2541_v28 = vsel %vm1532_vm10, %v2538_v22, %v2540_v58  ;;  %v2611_v57 = vsel %vm1450_vm9, %v2608_v5, %v2610_v46  ;;  %2803 = vmatpush.msrb.mxu2 %v2723_v50  ;;  %v2720_v3 = vld [vmem:[#allocation17 + $0x58] sm:$0xff]  ;;  %v2740_v59 = vld [vmem:[#allocation17 + $0xf0] sm:$0xff] }
 0x3a6   : > { %v2537_v14 = vsel %vm1532_vm10, %v2534_v30, %v2536_v4  ;;  %v2607_v18 = vsel %vm1450_vm9, %v2604_v20, %v2606_v6  ;;  %v2539_v17 = vsel %vm1532_vm10, %v2536_v4, %v2538_v22  ;;  %v2609_v1 = vsel %vm1450_vm9, %v2606_v6, %v2608_v5  ;;  %2760 = vmatpush.msrb.mxu1 %v2741_v34  ;;  %v2960_v30 = vld [vmem:[#allocation17 + $0x270] sm:$0xff]  ;;  %v2734_v4 = vld [vmem:[#allocation17 + $0xc0] sm:$0xff]  ;;  %v2957_v22 = vld [vmem:[#allocation17 + $0x258] sm:$0xff] }
 0x3a7   : > { %v2309_v25 = vmax.f32 %v2297_v40, %v2303_v38  ;;  %2804 = vmatpush.msrb.mxu2 %v2722_v26  ;;  %v2719_v40 = vld [vmem:[#allocation17 + $0x50] sm:$0xff]  ;;  %v2739_v38 = vld [vmem:[#allocation17 + $0xe8] sm:$0xff]  ;;  %v2958_v6 = vld [vmem:[#allocation17 + $0x260] sm:$0xff] }
 0x3a8   : > { %2761 = vmatpush.msrb.mxu1 %v2740_v59  ;;  %v2715_v5 = vld [vmem:[#allocation17 + $0x30] sm:$0xff]  ;;  %v2729_v50 = vld [vmem:[#allocation17 + $0x98] sm:$0xff] }
 0x3a9   : > { %v2359_v15 = vrot.slane %v2309_v25, 3  ;;  %v2407_v36 = vrot.slane %v2309_v25, 2  ;;  %v2472_v55 = vrot.slane %v2309_v25, 4  ;;  %v2542_v19 = vrot.slane %v2309_v25, 5  ;;  %v2953_v26 = vld [vmem:[#allocation17 + $0x238] sm:$0xff]  ;;  %v2711_v34 = vld [vmem:[#allocation17 + $0x10] sm:$0xff] }
 0x3aa   : > { %v2612_v48 = vrot.slane %v2309_v25, 6  ;;  %v2718_v25 = vld [vmem:[#allocation17 + $0x48] sm:$0xff]  ;;  %2762 = vmatpush.msrb.mxu1 %v2739_v38  ;;  %v2952_v59 = vld [vmem:[#allocation17 + $0x230] sm:$0xff] }
 0x3ab   : > { %v2360_v62 = vsel %vm1376_vm7, %v2357_v2, %v2359_v15  ;;  %v2408_v13 = vsel %vm1105_vm11, %v2405_v43, %v2407_v36  ;;  %v2473_v29 = vsel %vm2201_vm14, %v2470_v56, %v2472_v55  ;;  %v2543_v52 = vsel %vm1532_vm10, %v2540_v58, %v2542_v19  ;;  %v2721_v43 = vld [vmem:[#allocation17 + $0x60] sm:$0xff]  ;;  %v2710_v38 = vld [vmem:[#allocation17 + $0x8] sm:$0xff] }
 0x3ac   : > { %2394 = vmatmul.f32.gmra.mxu3 %v2360_v62  ;;  %2442 = vmatmul.f32.gmra.mxu0 %v2408_v13  ;;  %v2613_v0 = vsel %vm1450_vm9, %v2610_v46, %v2612_v48  ;;  %v2738_v55 = vld [vmem:[#allocation17 + $0xe0] sm:$0xff]  ;;  %v2737_v62 = vld [vmem:[#allocation17 + $0xd8] sm:$0xff]  ;;  %v2714_v46 = vld [vmem:[#allocation17 + $0x28] sm:$0xff] }
 0x3ad   : > { %2507 = vmatmul.f32.gmra.mxu1 %v2473_v29  ;;  %2805 = vmatpush.msrb.mxu2 %v2721_v43  ;;  %v2961_v13 = vld [vmem:[#allocation17 + $0x278] sm:$0xff]  ;;  %v2736_v29 = vld [vmem:[#allocation17 + $0xd0] sm:$0xff]  ;;  %v2713_v48 = vld [vmem:[#allocation17 + $0x20] sm:$0xff] }
 0x3ae   : > { %2763 = vmatpush.msrb.mxu1 %v2738_v55  ;;  %2965 = vmatpush.msra.mxu3 %v2961_v13  ;;  %v2951_v55 = vld [vmem:[#allocation17 + $0x228] sm:$0xff] }
 0x3af   : > { %2806 = vmatpush.msrb.mxu2 %v2720_v3  ;;  %v2728_v3 = vld [vmem:[#allocation17 + $0x90] sm:$0xff] }
 0x3b0   : > { %2764 = vmatpush.msrb.mxu1 %v2737_v62  ;;  %2966 = vmatpush.msra.mxu3 %v2960_v30  ;;  %v2726_v30 = vld [vmem:[#allocation17 + $0x80] sm:$0xff] }
 0x3b1   : > { %2807 = vmatpush.msrb.mxu2 %v2719_v40 }
 0x3b2   : > { %2765 = vmatpush.msrb.mxu1 %v2736_v29  ;;  %2967 = vmatpush.msra.mxu3 %v2959_v47  ;;  %v2709_v29 = vld [vmem:[#allocation17] sm:$0xff]  ;;  %v2897_v47 = vld [vmem:[#allocation17 + $0x1f8] sm:$0xff] }
 0x3b3   : > { %2808 = vmatpush.msrb.mxu2 %v2718_v25  ;;  %v2727_v25 = vld [vmem:[#allocation17 + $0x88] sm:$0xff] }
 0x3b4   : > { %2565 = vmatmul.f32.vlgmr.msrb.gmra.mxu3 %v2535_v33  ;;  %2635 = vmatmul.f32.vlgmr.msrb.gmra.mxu0 %v2605_v11  ;;  %v2717_v11 = vld [vmem:[#allocation17 + $0x40] sm:$0xff] }
 0x3b5   : > { %2766 = vmatpush.msrb.mxu1 %v2735_v24  ;;  %2809 = vmatpush.msrb.mxu2 %v2717_v11  ;;  %v2950_v24 = vld [vmem:[#allocation17 + $0x220] sm:$0xff]  ;;  %v2847_v11 = vld [vmem:[#allocation17 + $0x178] sm:$0xff] }
 0x3b6   : > { %2968 = vmatpush.msra.mxu3 %v2958_v6 }
 0x3b7   : > { %2767 = vmatpush.msrb.mxu1 %v2734_v4  ;;  %v2949_v4 = vld [vmem:[#allocation17 + $0x218] sm:$0xff] }
 0x3b8   : > { %2969 = vmatpush.msra.mxu3 %v2957_v22  ;;  %v2948_v22 = vld [vmem:[#allocation17 + $0x210] sm:$0xff] }
 0x3bc   : > { %2568 = vmatmul.f32.gmra.mxu3 %v2537_v14  ;;  %2638 = vmatmul.f32.gmra.mxu0 %v2607_v18  ;;  %v2716_v14 = vld [vmem:[#allocation17 + $0x38] sm:$0xff] }
 0x3bd   : > { %v2733_v18 = vld [vmem:[#allocation17 + $0xb8] sm:$0xff]  ;;  %2810 = vmatpush.msrb.mxu2 %v2716_v14  ;;  %v2896_v14 = vld [vmem:[#allocation17 + $0x1f0] sm:$0xff] }
 0x3be   : > { %2768 = vmatpush.msrb.mxu1 %v2733_v18  ;;  %v2846_v18 = vld [vmem:[#allocation17 + $0x170] sm:$0xff] }
 0x3bf   : > { %2811 = vmatpush.msrb.mxu2 %v2715_v5 }
 0x3c1   : > { %2812 = vmatpush.msrb.mxu2 %v2714_v46  ;;  %v2845_v46 = vld [vmem:[#allocation17 + $0x168] sm:$0xff] }
 0x3c3   : > { %2813 = vmatpush.msrb.mxu2 %v2713_v48 }
 0x3c4   : > { %2571 = vmatmul.f32.gmra.mxu3 %v2539_v17  ;;  %2641 = vmatmul.f32.gmra.mxu0 %v2609_v1  ;;  %v2732_v17 = vld [vmem:[#allocation17 + $0xb0] sm:$0xff] }
 0x3c5   : > { %v2956_v1 = vld [vmem:[#allocation17 + $0x250] sm:$0xff]  ;;  %2769 = vmatpush.msrb.mxu1 %v2732_v17  ;;  %2814 = vmatpush.msrb.mxu2 %v2712_v8  ;;  %v2946_v8 = vld [vmem:[#allocation17 + $0x200] sm:$0xff] }
 0x3c6   : > { %2970 = vmatpush.msra.mxu3 %v2956_v1  ;;  %v2895_v1 = vld [vmem:[#allocation17 + $0x1e8] sm:$0xff] }
 0x3c7   : > { %2815 = vmatpush.msrb.mxu2 %v2711_v34  ;;  %v2843_v34 = vld [vmem:[#allocation17 + $0x158] sm:$0xff] }
 0x3c9   : > { %2816 = vmatpush.msrb.mxu2 %v2710_v38  ;;  %v2892_v38 = vld [vmem:[#allocation17 + $0x1d0] sm:$0xff] }
 0x3cb   : > { %2817 = vmatpush.msrb.mxu2 %v2709_v29 }
 0x3cc   : > { %2574 = vmatmul.f32.gmra.mxu3 %v2541_v28  ;;  %2644 = vmatmul.f32.gmra.mxu0 %v2611_v57  ;;  %v2731_v28 = vld [vmem:[#allocation17 + $0xa8] sm:$0xff] }
 0x3cd   : > { %v2955_v57 = vld [vmem:[#allocation17 + $0x248] sm:$0xff]  ;;  %2770 = vmatpush.msrb.mxu1 %v2731_v28  ;;  %2912 = vmatpush.msra.mxu2 %v2897_v47  ;;  %v2890_v47 = vld [vmem:[#allocation17 + $0x1c0] sm:$0xff] }
 0x3ce   : > { %2971 = vmatpush.msra.mxu3 %v2955_v57  ;;  %v2947_v28 = vld [vmem:[#allocation17 + $0x208] sm:$0xff] }
 0x3cf   : > { %2913 = vmatpush.msra.mxu2 %v2896_v14  ;;  %v2839_v14 = vld [vmem:[#allocation17 + $0x138] sm:$0xff] }
 0x3d1   : > { %2914 = vmatpush.msra.mxu2 %v2895_v1  ;;  %v2887_v1 = vld [vmem:[#allocation17 + $0x1a8] sm:$0xff] }
 0x3d4   : > { %2577 = vmatmul.f32.gmra.mxu3 %v2543_v52  ;;  %2647 = vmatmul.f32.gmra.mxu0 %v2613_v0  ;;  %v2730_v52 = vld [vmem:[#allocation17 + $0xa0] sm:$0xff] }
 0x3d5   : > { %v2954_v0 = vld [vmem:[#allocation17 + $0x240] sm:$0xff]  ;;  %2771 = vmatpush.msrb.mxu1 %v2730_v52 }
 0x3d6   : > { %2972 = vmatpush.msra.mxu3 %v2954_v0  ;;  %v2894_v52 = vld [vmem:[#allocation17 + $0x1e0] sm:$0xff] }
 0x3d7   : > { %2772 = vmatpush.msrb.mxu1 %v2729_v50  ;;  %v2844_v0 = vld [vmem:[#allocation17 + $0x160] sm:$0xff]  ;;  %2915 = vmatpush.msra.mxu2 %v2894_v52 }
 0x3d8   : > { %2973 = vmatpush.msra.mxu3 %v2953_v26 }
 0x3d9   : > { %2773 = vmatpush.msrb.mxu1 %v2728_v3 }
 0x3da   : > { %2974 = vmatpush.msra.mxu3 %v2952_v59 }
 0x3db   : > { %2774 = vmatpush.msrb.mxu1 %v2727_v25  ;;  %v2842_v25 = vld [vmem:[#allocation17 + $0x150] sm:$0xff] }
 0x3dc   : > { %2975 = vmatpush.msra.mxu3 %v2951_v55 }
 0x3dd   : > { %2775 = vmatpush.msrb.mxu1 %v2726_v30 }
 0x3de   : > { %2976 = vmatpush.msra.mxu3 %v2950_v24 }
 0x3df   : > { %2848 = vmatpush.msra.mxu1 %v2847_v11  ;;  %v2840_v11 = vld [vmem:[#allocation17 + $0x140] sm:$0xff] }
 0x3e0   : > { %2977 = vmatpush.msra.mxu3 %v2949_v4 }
 0x3e1   : > { %2849 = vmatpush.msra.mxu1 %v2846_v18 }
 0x3e2   : > { %2978 = vmatpush.msra.mxu3 %v2948_v22 }
 0x3e3   : > { %2850 = vmatpush.msra.mxu1 %v2845_v46  ;;  %v2837_v46 = vld [vmem:[#allocation17 + $0x128] sm:$0xff] }
 0x3e4   : > { %2979 = vmatpush.msra.mxu3 %v2947_v28 }
 0x3e5   : > { %2851 = vmatpush.msra.mxu1 %v2844_v0 }
 0x3e6   : > { %2980 = vmatpush.msra.mxu3 %v2946_v8 }
 0x3e7   : > { %2852 = vmatpush.msra.mxu1 %v2843_v34  ;;  %v2885_v34 = vld [vmem:[#allocation17 + $0x198] sm:$0xff] }
 0x3e9   : > { %2853 = vmatpush.msra.mxu1 %v2842_v25  ;;  %v2884_v25 = vld [vmem:[#allocation17 + $0x190] sm:$0xff] }
 0x409   : > { %v5298_v2 = vpop.f32.mrf.mxu0 }
 0x40a   : > { %v2496_v43 = vpop.f32.mrf.mxu1 }
 0x40f   : > { %v5300_v56 = vpop.f32.mrf.mxu3 }
 0x410   : > { %v2432_v13 = vadd.f32 %v5298_v2, %v5300_v56  ;;  %v5323_v2 = vld [vmem:[%s5690_s2] ss:$0 sm:$0xff]  ;;  %s3326_s2 = scalar_lea.sflag [#allocation4], %s4751_s19 }
 0x411   : > { %v5302_v10 = vpop.f32.mrf.mxu0 }
 0x412   : > { %v2511_v6 = vadd.f32 %v2496_v43, %v2432_v13  ;;  %v2499_v5 = vpop.f32.mrf.mxu1  ;;  %v2893_v43 = vld [vmem:[#allocation17 + $0x1d8] sm:$0xff]  ;;  %v2841_v13 = vld [vmem:[#allocation17 + $0x148] sm:$0xff] }
 0x413   : > { %2916 = vmatpush.msra.mxu2 %v2893_v43  ;;  %2854 = vmatpush.msra.mxu1 %v2841_v13 }
 0x415   : > { %2917 = vmatpush.msra.mxu2 %v2892_v38  ;;  %2855 = vmatpush.msra.mxu1 %v2840_v11  ;;  %v2835_v38 = vld [vmem:[#allocation17 + $0x118] sm:$0xff] }
 0x417   : > { %v5304_v15 = vpop.f32.mrf.mxu3  ;;  %2856 = vmatpush.msra.mxu1 %v2839_v14  ;;  %v2882_v14 = vld [vmem:[#allocation17 + $0x180] sm:$0xff] }
 0x418   : > { %v2435_v57 = vadd.f32 %v5302_v10, %v5304_v15 }
 0x419   : > { %v5306_v36 = vpop.f32.mrf.mxu0 }
 0x41a   : > { %v2512_v59 = vadd.f32 %v2499_v5, %v2435_v57  ;;  %v2502_v29 = vpop.f32.mrf.mxu1  ;;  %v2886_v57 = vld [vmem:[#allocation17 + $0x1a0] sm:$0xff] }
 0x41f   : > { %v5308_v20 = vpop.f32.mrf.mxu3 }
 0x420   : > { %v2438_v30 = vadd.f32 %v5306_v36, %v5308_v20 }
 0x421   : > { %v5310_v33 = vpop.f32.mrf.mxu0 }
 0x422   : > { %v2513_v5 = vadd.f32 %v2502_v29, %v2438_v30 }
 0x427   : > { %v5312_v58 = vpop.f32.mrf.mxu3 }
 0x428   : > { %v2441_v0 = vadd.f32 %v5310_v33, %v5312_v58  ;;  %v2883_v58 = vld [vmem:[#allocation17 + $0x188] sm:$0xff] }
 0x429   : > { %v5314_v19 = vpop.f32.mrf.mxu0 }
 0x42f   : > { %v5316_v40 = vpop.f32.mrf.mxu3 }
 0x431   : > { %v2636_v62 = vpop.f32.mrf.mxu0 }
 0x437   : > { %v2566_v17 = vpop.f32.mrf.mxu3 }
 0x438   : > { %v2581_v56 = vadd.f32 %v2566_v17, %v2511_v6  ;;  %v2888_v17 = vld [vmem:[#allocation17 + $0x1b0] sm:$0xff] }
 0x439   : > { %v2639_v50 = vpop.f32.mrf.mxu0 }
 0x43a   : > { %v2651_v48 = vadd.f32 %v2636_v62, %v2581_v56  ;;  %v2891_v62 = vld [vmem:[#allocation17 + $0x1c8] sm:$0xff]  ;;  %v2838_v56 = vld [vmem:[#allocation17 + $0x130] sm:$0xff] }
 0x43b   : > { %2918 = vmatpush.msra.mxu2 %v2891_v62  ;;  %2857 = vmatpush.msra.mxu1 %v2838_v56 }
 0x43c   : > { %v2659_v26 = vadd.f32 %v5323_v2, %v2651_v48  ;;  %v2836_v48 = vld [vmem:[#allocation17 + $0x120] sm:$0xff] }
 0x43d   : > { %2919 = vmatpush.msra.mxu2 %v2890_v47  ;;  %2858 = vmatpush.msra.mxu1 %v2837_v46 }
 0x43e   : > { %v2669_v3 = vrot.slane %v2659_v26, 4  ;;  %v2505_v26 = vpop.f32.mrf.mxu1 }
 0x43f   : > { %v2569_v10 = vpop.f32.mrf.mxu3  ;;  %2920 = vmatpush.msra.mxu2 %v2889_v37  ;;  %2859 = vmatpush.msra.mxu1 %v2836_v48  ;;  %v2514_v33 = vadd.f32 %v2505_v26, %v2441_v0 }
 0x440   : > { %v2684_v15 = vsel %vm4813_vm4, %v2669_v3, 0.0  ;;  %v2582_v55 = vadd.f32 %v2569_v10, %v2512_v59  ;;  %v2834_v10 = vld [vmem:[#allocation17 + $0x110] sm:$0xff] }
 0x441   : > { %v2690_v4 = vadd.f32 %v2684_v15, %v4825_v42  ;;  %v2642_v18 = vpop.f32.mrf.mxu0  ;;  %2921 = vmatpush.msra.mxu2 %v2888_v17  ;;  %2860 = vmatpush.msra.mxu1 %v2835_v38 }
 0x442   : > { %v2652_v24 = vadd.f32 %v2639_v50, %v2582_v55 }
 0x443   : > { %v2696_v36 = vmul.f32 0.1, %v2690_v4  ;;  %2922 = vmatpush.msra.mxu2 %v2887_v1  ;;  %2861 = vmatpush.msra.mxu1 %v2834_v10 }
 0x444   : > { %v2660_v6 = vadd.f32 %v5323_v2, %v2652_v24 }
 0x445   : > { %v2702_v43 = vmax.f32 %v2690_v4, %v2696_v36  ;;  %2923 = vmatpush.msra.mxu2 %v2886_v57 }
 0x446   : > { %v2670_v22 = vrot.slane %v2660_v6, 4  ;;  %v2444_v6 = vadd.f32 %v5314_v19, %v5316_v40  ;;  %v2508_v40 = vpop.f32.mrf.mxu1 }
 0x447   : > { %v2572_v20 = vpop.f32.mrf.mxu3  ;;  %2924 = vmatpush.msra.mxu2 %v2885_v34  ;;  %v2747_v29 = vrot.slane %v2702_v43, 6  ;;  %v2789_v30 = vrot.slane %v2702_v43, 4 }
 0x448   : > { %v2671_v42 = vsel %vm2201_vm14, %v2669_v3, %v2670_v22  ;;  %v2583_v28 = vadd.f32 %v2572_v20, %v2513_v5  ;;  %v2515_v20 = vadd.f32 %v2508_v40, %v2444_v6  ;;  %v3050_v40 = vld [vmem:[#allocation19 + $0xf8] sm:$0xff] }
 0x449   : > { %v2685_v52 = vsel %vm4819_vm5, %v2671_v42, 0.0  ;;  %v2645_v62 = vpop.f32.mrf.mxu0  ;;  %2925 = vmatpush.msra.mxu2 %v2884_v25  ;;  %3066 = vmatpush.msra.mxu0 %v3050_v40  ;;  %v3129_v40 = vld [vmem:[#allocation19 + $0x130] sm:$0xff] }
 0x44a   : > { %v2691_v8 = vadd.f32 %v2685_v52, %v4829_v44  ;;  %v2653_v50 = vadd.f32 %v2642_v18, %v2583_v28  ;;  %v2833_v44 = vld [vmem:[#allocation17 + $0x108] sm:$0xff]  ;;  %v2832_v18 = vld [vmem:[#allocation17 + $0x100] sm:$0xff] }
 0x44b   : > { %2926 = vmatpush.msra.mxu2 %v2883_v58  ;;  %2862 = vmatpush.msra.mxu1 %v2833_v44 }
 0x44c   : > { %v2697_v3 = vmul.f32 0.1, %v2691_v8  ;;  %v2661_v59 = vadd.f32 %v5323_v2, %v2653_v50 }
 0x44d   : > { %2927 = vmatpush.msra.mxu2 %v2882_v14  ;;  %2863 = vmatpush.msra.mxu1 %v2832_v18 }
 0x44e   : > { %v5341_v15 = vmax.f32 %v2691_v8, %v2697_v3  ;;  %v2672_v55 = vrot.slane %v2661_v59, 4 }
 0x44f   : > { %v2575_v13 = vpop.f32.mrf.mxu3 }
 0x450   : > { %v2673_v24 = vsel %vm2201_vm14, %v2670_v22, %v2672_v55  ;;  %v2584_v47 = vadd.f32 %v2575_v13, %v2514_v33  ;;  %v2748_v11 = vrot.slane %v5341_v15, 6  ;;  %v2790_v4 = vrot.slane %v5341_v15, 4 }
 0x451   : > { %v2686_v37 = vsel %vm4835_vm8, %v2673_v24, 0.0  ;;  %v2648_v0 = vpop.f32.mrf.mxu0 }
 0x452   : > { %v5351_v5 = vadd.f32 %v2686_v37, %v4848_v61  ;;  %v2654_v17 = vadd.f32 %v2645_v62, %v2584_v47  ;;  %v2749_v22 = vsel %vm1450_vm9, %v2747_v29, %v2748_v11  ;;  %v2791_v56 = vsel %vm2201_vm14, %v2789_v30, %v2790_v4 }
 0x453   : > { %2776 = vmatmul.f32.vlgmr.msrb.gmra.mxu1 %v2749_v22  ;;  %2818 = vmatmul.f32.vlgmr.msrb.gmra.mxu2 %v2791_v56 }
 0x454   : > { %v2698_v1 = vmul.f32 0.1, %v5351_v5  ;;  %v2662_v19 = vadd.f32 %v5323_v2, %v2654_v17 }
 0x456   : > { %v2674_v36 = vrot.slane %v2662_v19, 4  ;;  %v2704_v46 = vmax.f32 %v5351_v5, %v2698_v1 }
 0x457   : > { %v2578_v61 = vpop.f32.mrf.mxu3 }
 0x458   : > { %v2675_v42 = vsel %vm2201_vm14, %v2672_v55, %v2674_v36  ;;  %v2585_v28 = vadd.f32 %v2578_v61, %v2515_v20  ;;  %v2750_v57 = vrot.slane %v2704_v46, 6  ;;  %v2792_v48 = vrot.slane %v2704_v46, 4  ;;  %v3031_v20 = vld [vmem:[#allocation19 + $0x68] sm:$0xff]  ;;  %v3030_v61 = vld [vmem:[#allocation19 + $0x60] sm:$0xff] }
 0x459   : > { %v2687_v52 = vsel %vm4859_vm13, %v2675_v42, 0.0  ;;  %v3048_v42 = vld [vmem:[#allocation19 + $0xe8] sm:$0xff] }
 0x45a   : > { %v5362_v8 = vadd.f32 %v2687_v52, %v4875_v21  ;;  %v2655_v50 = vadd.f32 %v2648_v0, %v2585_v28  ;;  %v2751_v26 = vsel %vm1450_vm9, %v2748_v11, %v2750_v57  ;;  %v2793_v43 = vsel %vm2201_vm14, %v2790_v4, %v2792_v48  ;;  %v3029_v28 = vld [vmem:[#allocation19 + $0x58] sm:$0xff] }
 0x45b   : > { %2779 = vmatmul.f32.gmra.mxu1 %v2751_v26  ;;  %2821 = vmatmul.f32.gmra.mxu2 %v2793_v43  ;;  %v2900_v4 = vrot.slane %v2704_v46, 2  ;;  %v3138_v52 = vld [vmem:[#allocation19 + $0x178] sm:$0xff]  ;;  %v3027_v26 = vld [vmem:[#allocation19 + $0x48] sm:$0xff] }
 0x45c   : > { %v2699_v34 = vmul.f32 0.1, %v5362_v8  ;;  %v2663_v3 = vadd.f32 %v5323_v2, %v2655_v50  ;;  %2981 = vmatmul.f32.vlgmr.msra.gmra.mxu3 %v2793_v43  ;;  %v3197_v0 = vld [vmem:[#allocation19 + $0x1f8] sm:$0xff]  ;;  %3150 = vmatpush.msrb.mxu2 %v3138_v52 }
 0x45d   : > { %3209 = vmatpush.msrb.mxu3 %v3197_v0  ;;  %v3046_v50 = vld [vmem:[#allocation19 + $0xd8] sm:$0xff] }
 0x45e   : > { %v2676_v59 = vrot.slane %v2663_v3, 4  ;;  %v2705_v38 = vmax.f32 %v5362_v8, %v2699_v34  ;;  %v3137_v34 = vld [vmem:[#allocation19 + $0x170] sm:$0xff]  ;;  %v3038_v0 = vld [vmem:[#allocation19 + $0x98] sm:$0xff] }
 0x45f   : > { %v3196_v3 = vld [vmem:[#allocation19 + $0x1f0] sm:$0xff]  ;;  %3151 = vmatpush.msrb.mxu2 %v3137_v34 }
 0x460   : > { %v2677_v25 = vsel %vm2201_vm14, %v2674_v36, %v2676_v59  ;;  %v2689_v21 = vsel %vm4912_vm3, %v2676_v59, 0.0  ;;  %v2752_v10 = vrot.slane %v2705_v38, 6  ;;  %v2794_v55 = vrot.slane %v2705_v38, 4  ;;  %v3032_v36 = vld [vmem:[#allocation19 + $0x70] sm:$0xff]  ;;  %3210 = vmatpush.msrb.mxu3 %v3196_v3  ;;  %v3026_v59 = vld [vmem:[#allocation19 + $0x40] sm:$0xff] }
 0x461   : > { %v2688_v33 = vsel %vm4886_vm0, %v2677_v25, 0.0  ;;  %v2695_v62 = vadd.f32 %v2689_v21, %v4927_v53  ;;  %v2899_v53 = vrot.slane %v5341_v15, 2  ;;  %v2902_v18 = vrot.slane %v2705_v38, 2  ;;  %v3136_v25 = vld [vmem:[#allocation19 + $0x168] sm:$0xff]  ;;  %v3037_v3 = vld [vmem:[#allocation19 + $0x90] sm:$0xff] }
 0x462   : > { %v2694_v58 = vadd.f32 %v2688_v33, %v4902_v31  ;;  %v2753_v44 = vsel %vm1450_vm9, %v2750_v57, %v2752_v10  ;;  %v2795_v2 = vsel %vm2201_vm14, %v2792_v48, %v2794_v55  ;;  %v3047_v57 = vld [vmem:[#allocation19 + $0xe0] sm:$0xff]  ;;  %v3028_v48 = vld [vmem:[#allocation19 + $0x50] sm:$0xff]  ;;  %v3195_v21 = vld [vmem:[#allocation19 + $0x1e8] sm:$0xff]  ;;  %3152 = vmatpush.msrb.mxu2 %v3136_v25 }
 0x463   : > { %2782 = vmatmul.f32.gmra.mxu1 %v2753_v44  ;;  %2824 = vmatmul.f32.gmra.mxu2 %v2795_v2  ;;  %v2701_v39 = vmul.f32 0.1, %v2695_v62  ;;  %v2901_v37 = vsel %vm1105_vm11, %v2899_v53, %v2900_v4  ;;  %v2903_v17 = vsel %vm1105_vm11, %v2900_v4, %v2902_v18  ;;  %v3135_v33 = vld [vmem:[#allocation19 + $0x160] sm:$0xff]  ;;  %v3024_v44 = vld [vmem:[#allocation19 + $0x30] sm:$0xff]  ;;  %v3021_v4 = vld [vmem:[#allocation19 + $0x18] sm:$0xff] }
 0x464   : > { %v2700_v13 = vmul.f32 0.1, %v2694_v58  ;;  %2984 = vmatmul.f32.gmra.mxu3 %v2795_v2  ;;  %3153 = vmatpush.msrb.mxu2 %v3135_v33  ;;  %v3131_v53 = vld [vmem:[#allocation19 + $0x140] sm:$0xff]  ;;  %v3036_v25 = vld [vmem:[#allocation19 + $0x88] sm:$0xff] }
 0x465   : > { %v2707_v31 = vmax.f32 %v2695_v62, %v2701_v39  ;;  %3211 = vmatpush.msrb.mxu3 %v3195_v21  ;;  %v3134_v62 = vld [vmem:[#allocation19 + $0x158] sm:$0xff]  ;;  %v3124_v21 = vld [vmem:[#allocation19 + $0x108] sm:$0xff]  ;;  %v3123_v33 = vld [vmem:[#allocation19 + $0x100] sm:$0xff] }
 0x466   : > { %v2706_v29 = vmax.f32 %v2694_v58, %v2700_v13  ;;  %v3194_v58 = vld [vmem:[#allocation19 + $0x1e0] sm:$0xff]  ;;  %v3193_v13 = vld [vmem:[#allocation19 + $0x1d8] sm:$0xff]  ;;  %3154 = vmatpush.msrb.mxu2 %v3134_v62 }
 0x467   : > { %v2962_v6 = vrot.slane %v2707_v31, 4  ;;  %v2906_v1 = vrot.slane %v2707_v31, 2  ;;  %3212 = vmatpush.msrb.mxu3 %v3194_v58  ;;  %v3191_v31 = vld [vmem:[#allocation19 + $0x1c8] sm:$0xff]  ;;  %v3182_v58 = vld [vmem:[#allocation19 + $0x180] sm:$0xff]  ;;  %v3256_v62 = vld [vmem:[#allocation19 + $0x278] sm:$0xff] }
 0x468   : > { %v2754_v30 = vrot.slane %v2706_v29, 6  ;;  %v2796_v24 = vrot.slane %v2706_v29, 4  ;;  %v2904_v22 = vrot.slane %v2706_v29, 2 }
 0x469   : > { %3213 = vmatpush.msrb.mxu3 %v3193_v13 }
 0x46a   : > { %v2755_v47 = vsel %vm1450_vm9, %v2752_v10, %v2754_v30  ;;  %v2797_v11 = vsel %vm2201_vm14, %v2794_v55, %v2796_v24  ;;  %v2963_v14 = vsel %vm2201_vm14, %v2796_v24, %v2962_v6  ;;  %v2905_v56 = vsel %vm1105_vm11, %v2902_v18, %v2904_v22  ;;  %v3025_v10 = vld [vmem:[#allocation19 + $0x38] sm:$0xff]  ;;  %v3044_v55 = vld [vmem:[#allocation19 + $0xc8] sm:$0xff]  ;;  %v3133_v30 = vld [vmem:[#allocation19 + $0x150] sm:$0xff] }
 0x46b   : > { %2785 = vmatmul.f32.gmra.mxu1 %v2755_v47  ;;  %2827 = vmatmul.f32.gmra.mxu2 %v2797_v11  ;;  %v2907_v19 = vsel %vm1105_vm11, %v2904_v22, %v2906_v1  ;;  %v3192_v24 = vld [vmem:[#allocation19 + $0x1d0] sm:$0xff]  ;;  %v3022_v47 = vld [vmem:[#allocation19 + $0x20] sm:$0xff]  ;;  %v3130_v22 = vld [vmem:[#allocation19 + $0x138] sm:$0xff] }
 0x46c   : > { %2987 = vmatmul.f32.gmra.mxu3 %v2797_v11  ;;  %3155 = vmatpush.msrb.mxu2 %v3133_v30  ;;  %v3132_v11 = vld [vmem:[#allocation19 + $0x148] sm:$0xff]  ;;  %v3043_v6 = vld [vmem:[#allocation19 + $0xc0] sm:$0xff] }
 0x46d   : > { %3214 = vmatpush.msrb.mxu3 %v3192_v24  ;;  %v3019_v1 = vld [vmem:[#allocation19 + $0x8] sm:$0xff] }
 0x46e   : > { %3156 = vmatpush.msrb.mxu2 %v3132_v11  ;;  %v3254_v24 = vld [vmem:[#allocation19 + $0x268] sm:$0xff]  ;;  %v3253_v11 = vld [vmem:[#allocation19 + $0x260] sm:$0xff] }
 0x46f   : > { %3215 = vmatpush.msrb.mxu3 %v3191_v31 }
 0x470   : > { %3157 = vmatpush.msrb.mxu2 %v3131_v53 }
 0x472   : > { %3158 = vmatpush.msrb.mxu2 %v3130_v22  ;;  %v3250_v22 = vld [vmem:[#allocation19 + $0x248] sm:$0xff] }
 0x473   : > { %2864 = vmatmul.f32.vlgmr.msra.gmra.mxu1 %v5341_v15  ;;  %2928 = vmatmul.f32.vlgmr.msra.gmra.mxu2 %v2901_v37  ;;  %v3033_v15 = vld [vmem:[#allocation19 + $0x78] sm:$0xff]  ;;  %v3190_v37 = vld [vmem:[#allocation19 + $0x1c0] sm:$0xff] }
 0x474   : > { %2990 = vmatmul.f32.gmra.mxu3 %v2963_v14  ;;  %3094 = vmatpush.msrb.mxu1 %v3033_v15  ;;  %v3020_v14 = vld [vmem:[#allocation19 + $0x10] sm:$0xff] }
 0x475   : > { %3216 = vmatpush.msrb.mxu3 %v3190_v37  ;;  %v3041_v15 = vld [vmem:[#allocation19 + $0xb0] sm:$0xff]  ;;  %3159 = vmatpush.msrb.mxu2 %v3129_v40  ;;  %v5408_v37 = vld [vmem:[%s5691_s15] ss:$0 sm:$0xff] }
 0x476   : > { %3095 = vmatpush.msrb.mxu1 %v3032_v36  ;;  %v3188_v36 = vld [vmem:[#allocation19 + $0x1b0] sm:$0xff] }
 0x478   : > { %3096 = vmatpush.msrb.mxu1 %v3031_v20  ;;  %v3018_v20 = vld [vmem:[#allocation19] sm:$0xff] }
 0x47a   : > { %3097 = vmatpush.msrb.mxu1 %v3030_v61  ;;  %v3128_v61 = vld [vmem:[#allocation19 + $0x128] sm:$0xff] }
 0x47b   : > { %2867 = vmatmul.f32.gmra.mxu1 %v2704_v46  ;;  %2931 = vmatmul.f32.gmra.mxu2 %v2903_v17  ;;  %v3049_v46 = vld [vmem:[#allocation19 + $0xf0] sm:$0xff]  ;;  %v3042_v17 = vld [vmem:[#allocation19 + $0xb8] sm:$0xff] }
 0x47c   : > { %3067 = vmatpush.msra.mxu0 %v3049_v46  ;;  %3098 = vmatpush.msrb.mxu1 %v3029_v28  ;;  %v3040_v46 = vld [vmem:[#allocation19 + $0xa8] sm:$0xff]  ;;  %v3039_v28 = vld [vmem:[#allocation19 + $0xa0] sm:$0xff] }
 0x47d   : > { %3160 = vmatpush.msrb.mxu2 %v3128_v61  ;;  %v3248_v61 = vld [vmem:[#allocation19 + $0x238] sm:$0xff] }
 0x47e   : > { %3068 = vmatpush.msra.mxu0 %v3048_v42  ;;  %3099 = vmatpush.msrb.mxu1 %v3028_v48  ;;  %v3187_v42 = vld [vmem:[#allocation19 + $0x1a8] sm:$0xff]  ;;  %v3186_v48 = vld [vmem:[#allocation19 + $0x1a0] sm:$0xff] }
 0x480   : > { %3069 = vmatpush.msra.mxu0 %v3047_v57  ;;  %3100 = vmatpush.msrb.mxu1 %v3027_v26  ;;  %v3127_v57 = vld [vmem:[#allocation19 + $0x120] sm:$0xff]  ;;  %v3185_v26 = vld [vmem:[#allocation19 + $0x198] sm:$0xff] }
 0x481   : > { %3161 = vmatpush.msrb.mxu2 %v3127_v57 }
 0x482   : > { %3070 = vmatpush.msra.mxu0 %v3046_v50  ;;  %3101 = vmatpush.msrb.mxu1 %v3026_v59  ;;  %v3126_v50 = vld [vmem:[#allocation19 + $0x118] sm:$0xff]  ;;  %v3125_v59 = vld [vmem:[#allocation19 + $0x110] sm:$0xff] }
 0x483   : > { %2870 = vmatmul.f32.gmra.mxu1 %v2705_v38  ;;  %2934 = vmatmul.f32.gmra.mxu2 %v2905_v56  ;;  %v3045_v38 = vld [vmem:[#allocation19 + $0xd0] sm:$0xff]  ;;  %v3189_v56 = vld [vmem:[#allocation19 + $0x1b8] sm:$0xff] }
 0x484   : > { %3071 = vmatpush.msra.mxu0 %v3045_v38  ;;  %3102 = vmatpush.msrb.mxu1 %v3025_v10  ;;  %v3184_v38 = vld [vmem:[#allocation19 + $0x190] sm:$0xff]  ;;  %v3183_v10 = vld [vmem:[#allocation19 + $0x188] sm:$0xff] }
 0x485   : > { %3217 = vmatpush.msrb.mxu3 %v3189_v56  ;;  %3162 = vmatpush.msrb.mxu2 %v3126_v50 }
 0x486   : > { %3072 = vmatpush.msra.mxu0 %v3044_v55  ;;  %3103 = vmatpush.msrb.mxu1 %v3024_v44  ;;  %v3035_v55 = vld [vmem:[#allocation19 + $0x80] sm:$0xff] }
 0x487   : > { %3218 = vmatpush.msrb.mxu3 %v3188_v36  ;;  %3163 = vmatpush.msrb.mxu2 %v3125_v59 }
 0x488   : > { %3073 = vmatpush.msra.mxu0 %v3043_v6  ;;  %v3252_v6 = vld [vmem:[#allocation19 + $0x258] sm:$0xff] }
 0x489   : > { %3219 = vmatpush.msrb.mxu3 %v3187_v42  ;;  %3164 = vmatpush.msrb.mxu2 %v3124_v21  ;;  %v3247_v42 = vld [vmem:[#allocation19 + $0x230] sm:$0xff]  ;;  %v3244_v21 = vld [vmem:[#allocation19 + $0x218] sm:$0xff] }
 0x48a   : > { %3074 = vmatpush.msra.mxu0 %v3042_v17  ;;  %v3251_v17 = vld [vmem:[#allocation19 + $0x250] sm:$0xff] }
 0x48b   : > { %2873 = vmatmul.f32.gmra.mxu1 %v2706_v29  ;;  %2937 = vmatmul.f32.gmra.mxu2 %v2907_v19  ;;  %v3023_v29 = vld [vmem:[#allocation19 + $0x28] sm:$0xff] }
 0x48c   : > { %3104 = vmatpush.msrb.mxu1 %v3023_v29  ;;  %3075 = vmatpush.msra.mxu0 %v3041_v15  ;;  %v3255_v29 = vld [vmem:[#allocation19 + $0x270] sm:$0xff] }
 0x48d   : > { %3220 = vmatpush.msrb.mxu3 %v3186_v48  ;;  %3165 = vmatpush.msrb.mxu2 %v3123_v33 }
 0x48e   : > { %3105 = vmatpush.msrb.mxu1 %v3022_v47  ;;  %3076 = vmatpush.msra.mxu0 %v3040_v46 }
 0x48f   : > { %3221 = vmatpush.msrb.mxu3 %v3185_v26 }
 0x490   : > { %3106 = vmatpush.msrb.mxu1 %v3021_v4  ;;  %3077 = vmatpush.msra.mxu0 %v3039_v28 }
 0x491   : > { %3222 = vmatpush.msrb.mxu3 %v3184_v38 }
 0x492   : > { %3107 = vmatpush.msrb.mxu1 %v3020_v14  ;;  %3078 = vmatpush.msra.mxu0 %v3038_v0  ;;  %v3246_v0 = vld [vmem:[#allocation19 + $0x228] sm:$0xff] }
 0x493   : > { %3223 = vmatpush.msrb.mxu3 %v3183_v10  ;;  %v3243_v10 = vld [vmem:[#allocation19 + $0x210] sm:$0xff] }
 0x494   : > { %3108 = vmatpush.msrb.mxu1 %v3019_v1  ;;  %3079 = vmatpush.msra.mxu0 %v3037_v3  ;;  %v3249_v1 = vld [vmem:[#allocation19 + $0x240] sm:$0xff] }
 0x495   : > { %3224 = vmatpush.msrb.mxu3 %v3182_v58  ;;  %v3242_v58 = vld [vmem:[#allocation19 + $0x208] sm:$0xff] }
 0x496   : > { %3109 = vmatpush.msrb.mxu1 %v3018_v20  ;;  %3080 = vmatpush.msra.mxu0 %v3036_v25 }
 0x498   : > { %3081 = vmatpush.msra.mxu0 %v3035_v55 }
 0x49a   : > { %3268 = vmatpush.msrb.mxu0 %v3256_v62 }
 0x49c   : > { %3269 = vmatpush.msrb.mxu0 %v3255_v29 }
 0x49e   : > { %3270 = vmatpush.msrb.mxu0 %v3254_v24 }
 0x4a0   : > { %3271 = vmatpush.msrb.mxu0 %v3253_v11 }
 0x4a2   : > { %3272 = vmatpush.msrb.mxu0 %v3252_v6 }
 0x4a4   : > { %3273 = vmatpush.msrb.mxu0 %v3251_v17 }
 0x4a6   : > { %3274 = vmatpush.msrb.mxu0 %v3250_v22 }
 0x4a8   : > { %3275 = vmatpush.msrb.mxu0 %v3249_v1 }
 0x4aa   : > { %3276 = vmatpush.msrb.mxu0 %v3248_v61 }
 0x4ac   : > { %3277 = vmatpush.msrb.mxu0 %v3247_v42 }
 0x4ae   : > { %3278 = vmatpush.msrb.mxu0 %v3246_v0 }
 0x4d0   : > { %v5387_v43 = vpop.f32.mrf.mxu1 }
 0x4d6   : > { %v5389_v2 = vpop.f32.mrf.mxu2 }
 0x4d7   : > { %v2820_v47 = vadd.f32 %v5389_v2, %v5387_v43 }
 0x4d8   : > { %v5391_v39 = vpop.f32.mrf.mxu1 }
 0x4de   : > { %v5393_v18 = vpop.f32.mrf.mxu2 }
 0x4df   : > { %v2982_v30 = vpop.f32.mrf.mxu3  ;;  %v2823_v43 = vadd.f32 %v5393_v18, %v5391_v39  ;;  %v3245_v18 = vld [vmem:[#allocation19 + $0x220] sm:$0xff] }
 0x4e0   : > { %v5395_v19 = vpop.f32.mrf.mxu1  ;;  %3279 = vmatpush.msrb.mxu0 %v3245_v18 }
 0x4e2   : > { %3280 = vmatpush.msrb.mxu0 %v3244_v21 }
 0x4e4   : > { %3281 = vmatpush.msrb.mxu0 %v3243_v10 }
 0x4e6   : > { %v5397_v52 = vpop.f32.mrf.mxu2  ;;  %3282 = vmatpush.msrb.mxu0 %v3242_v58 }
 0x4e7   : > { %v2985_v15 = vpop.f32.mrf.mxu3  ;;  %v2826_v41 = vadd.f32 %v5397_v52, %v5395_v19 }
 0x4e8   : > { %v5399_v34 = vpop.f32.mrf.mxu1 }
 0x4ee   : > { %v5401_v44 = vpop.f32.mrf.mxu2 }
 0x4ef   : > { %v2988_v59 = vpop.f32.mrf.mxu3  ;;  %v2829_v11 = vadd.f32 %v5401_v44, %v5399_v34 }
 0x4f0   : > { %v2865_v13 = vpop.f32.mrf.mxu1 }
 0x4f1   : > { %v2877_v31 = vadd.f32 %v2865_v13, %v2820_v47 }
 0x4f6   : > { %v2929_v4 = vpop.f32.mrf.mxu2 }
 0x4f7   : > { %v2941_v53 = vadd.f32 %v2929_v4, %v2877_v31  ;;  %v3241_v4 = vld [vmem:[#allocation19 + $0x200] sm:$0xff]  ;;  %v2991_v44 = vpop.f32.mrf.mxu3 }
 0x4f8   : > { %v2868_v14 = vpop.f32.mrf.mxu1  ;;  %3283 = vmatpush.msrb.mxu0 %v3241_v4  ;;  %v1852_v4 = vadd.f32 %v5195_v54, %v5201_v63  ;;  %v1855_v54 = vadd.f32 %v5203_v23, %v5207_v45 }
 0x4f9   : > { %v2994_v56 = vadd.f32 %v2982_v30, %v2941_v53  ;;  %v2878_v36 = vadd.f32 %v2868_v14, %v2823_v43 }
 0x4fb   : > { %v3001_v2 = vadd.f32 %v5408_v37, %v2994_v56 }
 0x4fd   : > { %v3005_v40 = vsel %vm4819_vm5, %v3001_v2, 0.0 }
 0x4fe   : > { %v3009_v20 = vmul.f32 0.1, %v3005_v40  ;;  %v2932_v46 = vpop.f32.mrf.mxu2 }
 0x4ff   : > { %v2942_v28 = vadd.f32 %v2932_v46, %v2878_v36 }
 0x500   : > { %v5415_v57 = vmax.f32 %v3005_v40, %v3009_v20  ;;  %v2871_v48 = vpop.f32.mrf.mxu1 }
 0x501   : > { %v2995_v39 = vadd.f32 %v2985_v15, %v2942_v28  ;;  %v2879_v3 = vadd.f32 %v2871_v48, %v2826_v41 }
 0x502   : > { %3110 = vmatmul.f32.vlgmr.msrb.gmra.mxu1 %v5415_v57  ;;  %v3055_v19 = vrot.slane %v5415_v57, 1  ;;  %v3139_v52 = vrot.slane %v5415_v57, 2  ;;  %v3198_v24 = vrot.slane %v5415_v57, 3 }
 0x503   : > { %v3002_v50 = vadd.f32 %v5408_v37, %v2995_v39 }
 0x505   : > { %v3006_v26 = vsel %vm4835_vm8, %v3002_v50, 0.0 }
 0x506   : > { %v3010_v38 = vmul.f32 0.1, %v3006_v26  ;;  %v2935_v25 = vpop.f32.mrf.mxu2 }
 0x507   : > { %v2943_v55 = vadd.f32 %v2935_v25, %v2879_v3  ;;  %v3257_v3 = vrot.slane %v5415_v57, 4 }
 0x508   : > { %v5423_v33 = vmax.f32 %v3006_v26, %v3010_v38  ;;  %v2874_v13 = vpop.f32.mrf.mxu1 }
 0x509   : > { %v2996_v62 = vadd.f32 %v2988_v59, %v2943_v55  ;;  %v2880_v22 = vadd.f32 %v2874_v13, %v2829_v11 }
 0x50a   : > { %3113 = vmatmul.f32.gmra.mxu1 %v5423_v33  ;;  %v3056_v29 = vrot.slane %v5423_v33, 1  ;;  %v3140_v30 = vrot.slane %v5423_v33, 2  ;;  %v3199_v47 = vrot.slane %v5423_v33, 3  ;;  %v3258_v27 = vrot.slane %v5423_v33, 4 }
 0x50b   : > { %v3003_v31 = vadd.f32 %v5408_v37, %v2996_v62 }
 0x50c   : > { %v3057_v6 = vsel %vm1000_vm12, %v3055_v19, %v3056_v29  ;;  %v3141_v53 = vsel %vm1105_vm11, %v3139_v52, %v3140_v30  ;;  %v3200_v14 = vsel %vm1376_vm7, %v3198_v24, %v3199_v47  ;;  %v3259_v59 = vsel %vm2201_vm14, %v3257_v3, %v3258_v27 }
 0x50d   : > { %v3007_v17 = vsel %vm4859_vm13, %v3003_v31, 0.0  ;;  %3082 = vmatmul.f32.vlgmr.msra.gmra.mxu0 %v3057_v6  ;;  %3166 = vmatmul.f32.vlgmr.msrb.gmra.mxu2 %v3141_v53  ;;  %v1849_v6 = vadd.f32 %v5187_v49, %v5193_v32 }
 0x50e   : > { %v3011_v56 = vmul.f32 0.1, %v3007_v17  ;;  %3225 = vmatmul.f32.vlgmr.msrb.gmra.mxu3 %v3200_v14  ;;  %v2938_v1 = vpop.f32.mrf.mxu2 }
 0x50f   : > { %v2944_v34 = vadd.f32 %v2938_v1, %v2880_v22 }
 0x510   : > { %v3015_v43 = vmax.f32 %v3007_v17, %v3011_v56  ;;  %v1923_v17 = vadd.f32 %v5197_v60, %v1852_v4  ;;  %v3834_v60 = vld [vmem:[%s5694_s11] ss:$0 sm:$0xff] }
 0x511   : > { %v2997_v2 = vadd.f32 %v2991_v44, %v2944_v34  ;;  %v1922_v34 = vadd.f32 %v5189_v7, %v1849_v6  ;;  %v3830_v44 = vld [vmem:[%s5692_s16] ss:$0 sm:$0xff] }
 0x512   : > { %3116 = vmatmul.f32.gmra.mxu1 %v3015_v43  ;;  %v3058_v15 = vrot.slane %v3015_v43, 1  ;;  %v3142_v40 = vrot.slane %v3015_v43, 2  ;;  %v3201_v36 = vrot.slane %v3015_v43, 3  ;;  %v3260_v38 = vrot.slane %v3015_v43, 4 }
 0x513   : > { %v3004_v20 = vadd.f32 %v5408_v37, %v2997_v2  ;;  %v1929_v2 = vadd.f32 %v3830_v44, %v1923_v17  ;;  %v1928_v32 = vadd.f32 %v3830_v44, %v1922_v34 }
 0x514   : > { %v3059_v46 = vsel %vm1000_vm12, %v3056_v29, %v3058_v15  ;;  %v3143_v61 = vsel %vm1105_vm11, %v3140_v30, %v3142_v40  ;;  %v3202_v42 = vsel %vm1376_vm7, %v3199_v47, %v3201_v36  ;;  %v3261_v25 = vsel %vm2201_vm14, %v3258_v27, %v3260_v38 }
 0x515   : > { %v3008_v28 = vsel %vm4886_vm0, %v3004_v20, 0.0  ;;  %3085 = vmatmul.f32.gmra.mxu0 %v3059_v46  ;;  %3169 = vmatmul.f32.gmra.mxu2 %v3143_v61  ;;  %v1935_v7 = vrot.slane %v1929_v2, 2  ;;  %v1934_v46 = vrot.slane %v1928_v32, 2 }
 0x516   : > { %v3012_v48 = vmul.f32 0.1, %v3008_v28  ;;  %3228 = vmatmul.f32.gmra.mxu3 %v3202_v42 }
 0x517   : > { %v1936_v23 = vsel %vm1105_vm11, %v1934_v46, %v1935_v7 }
 0x518   : > { %v3016_v0 = vmax.f32 %v3008_v28, %v3012_v48 }
 0x51a   : > { %3119 = vmatmul.f32.gmra.mxu1 %v3016_v0  ;;  %v3060_v39 = vrot.slane %v3016_v0, 1  ;;  %v3144_v18 = vrot.slane %v3016_v0, 2  ;;  %v3203_v41 = vrot.slane %v3016_v0, 3  ;;  %v3262_v21 = vrot.slane %v3016_v0, 4 }
 0x51c   : > { %v3061_v37 = vsel %vm1000_vm12, %v3058_v15, %v3060_v39  ;;  %v3145_v50 = vsel %vm1105_vm11, %v3142_v40, %v3144_v18  ;;  %v3204_v26 = vsel %vm1376_vm7, %v3201_v36, %v3203_v41  ;;  %v3263_v10 = vsel %vm2201_vm14, %v3260_v38, %v3262_v21 }
 0x51d   : > { %3088 = vmatmul.f32.gmra.mxu0 %v3061_v37  ;;  %3172 = vmatmul.f32.gmra.mxu2 %v3145_v50  ;;  %v1924_v40 = vadd.f32 %v5205_v9, %v1855_v54 }
 0x51e   : > { %3231 = vmatmul.f32.gmra.mxu3 %v3204_v26 }
 0x51f   : > { %v1930_v45 = vadd.f32 %v3830_v44, %v1924_v40 }
 0x521   : > { %v1937_v37 = vrot.slane %v1930_v45, 2 }
 0x525   : > { %3091 = vmatmul.f32.gmra.mxu0 %v3060_v39  ;;  %3175 = vmatmul.f32.gmra.mxu2 %v3144_v18 }
 0x526   : > { %3234 = vmatmul.f32.gmra.mxu3 %v3203_v41  ;;  %v1941_v41 = vsel %vm4835_vm8, %v1936_v23, 0.0 }
 0x527   : > { %v1943_v3 = vadd.f32 %v1941_v41, %v5033_v35 }
 0x52d   : > { %3284 = vmatmul.f32.vlgmr.msrb.gmra.mxu0 %v3259_v59 }
 0x535   : > { %3287 = vmatmul.f32.gmra.mxu0 %v3261_v25  ;;  %v1938_v25 = vsel %vm1105_vm11, %v1935_v7, %v1937_v37 }
 0x53d   : > { %3290 = vmatmul.f32.gmra.mxu0 %v3263_v10 }
 0x545   : > { %3293 = vmatmul.f32.gmra.mxu0 %v3262_v21 }
 0x57f   : > { %v3111_v55 = vpop.f32.mrf.mxu1 }
 0x587   : > { %v3114_v58 = vpop.f32.mrf.mxu1 }
 0x58a   : > { %v3083_v62 = vpop.f32.mrf.mxu0 }
 0x58b   : > { %v3112_v53 = vadd.f32 %v3111_v55, %v3083_v62  ;;  %v1942_v62 = vsel %vm4859_vm13, %v1938_v25, 0.0 }
 0x58f   : > { %v3117_v19 = vpop.f32.mrf.mxu1 }
 0x590   : > { %v3167_v52 = vpop.f32.mrf.mxu2 }
 0x591   : > { %v3226_v33 = vpop.f32.mrf.mxu3  ;;  %v3178_v22 = vadd.f32 %v3167_v52, %v3112_v53 }
 0x592   : > { %v3086_v13 = vpop.f32.mrf.mxu0 }
 0x593   : > { %v3115_v43 = vadd.f32 %v3114_v58, %v3086_v13  ;;  %v3237_v63 = vadd.f32 %v3226_v33, %v3178_v22 }
 0x597   : > { %v3120_v57 = vpop.f32.mrf.mxu1 }
 0x598   : > { %v3170_v29 = vpop.f32.mrf.mxu2 }
 0x599   : > { %v3229_v30 = vpop.f32.mrf.mxu3  ;;  %v3179_v49 = vadd.f32 %v3170_v29, %v3115_v43 }
 0x59a   : > { %v3089_v24 = vpop.f32.mrf.mxu0 }
 0x59b   : > { %v3238_v36 = vadd.f32 %v3229_v30, %v3179_v49  ;;  %v3118_v61 = vadd.f32 %v3117_v19, %v3089_v24  ;;  %v1944_v19 = vadd.f32 %v1942_v62, %v5044_v16 }
 0x5a0   : > { %v3173_v47 = vpop.f32.mrf.mxu2 }
 0x5a1   : > { %v3232_v11 = vpop.f32.mrf.mxu3  ;;  %v3180_v48 = vadd.f32 %v3173_v47, %v3118_v61 }
 0x5a2   : > { %v3092_v31 = vpop.f32.mrf.mxu0 }
 0x5a3   : > { %v3239_v9 = vadd.f32 %v3232_v11, %v3180_v48 }
 0x5a8   : > { %v3176_v14 = vpop.f32.mrf.mxu2 }
 0x5a9   : > { %v3235_v56 = vpop.f32.mrf.mxu3 }
 0x5aa   : > { %v3285_v1 = vpop.f32.mrf.mxu0 }
 0x5ab   : > { %v3296_v15 = vadd.f32 %v3285_v1, %v3237_v63 }
 0x5ad   : > { %v3302_v42 = vadd.f32 %v3834_v60, %v3296_v15 }
 0x5af   : > { %v3308_v39 = vrot.slane %v3302_v42, 6 }
 0x5b2   : > { %v3288_v20 = vpop.f32.mrf.mxu0 }
 0x5b3   : > { %v3297_v28 = vadd.f32 %v3288_v20, %v3238_v36 }
 0x5b5   : > { %v3303_v0 = vadd.f32 %v3834_v60, %v3297_v28 }
 0x5b7   : > { %v3309_v18 = vrot.slane %v3303_v0, 6 }
 0x5b9   : > { %v3310_v50 = vsel %vm1450_vm9, %v3308_v39, %v3309_v18 }
 0x5ba   : > { %v3315_v26 = vsel %vm4835_vm8, %v3310_v50, 0.0  ;;  %v3291_v27 = vpop.f32.mrf.mxu0 }
 0x5bb   : > { %v3317_v59 = vadd.f32 %v3315_v26, %v5351_v5  ;;  %v3298_v38 = vadd.f32 %v3291_v27, %v3239_v9 }
 0x5bd   : > { %v3319_v21 = vadd.f32 %v3317_v59, %v1943_v3  ;;  %v3304_v10 = vadd.f32 %v3834_v60, %v3298_v38 }
 0x5bf   : > { %v3321_v55 = vmul.f32 0.5, %v3319_v21  ;;  %v3311_v58 = vrot.slane %v3304_v10, 6 }
 0x5c1   : > { %v3312_v51 = vsel %vm1450_vm9, %v3309_v18, %v3311_v58  ;;  %3323 = vst [vmem:[%s879_s25] sm:$0xff] %v3321_v55 }
 0x5c2   : > { %v3316_v35 = vsel %vm4859_vm13, %v3312_v51, 0.0  ;;  %v3294_v5 = vpop.f32.mrf.mxu0 }
 0x5c3   : > { %v3318_v52 = vadd.f32 %v3316_v35, %v5362_v8 }
 0x5c5   : > { %v3320_v33 = vadd.f32 %v3318_v52, %v1944_v19 }
 0x5c7   : > { %v3322_v13 = vmul.f32 0.5, %v3320_v33 }
 0x5c9   : > { %3324 = vst [vmem:[%s879_s25 + $0x8] sm:$0xff] %v3322_v13 }
 0x5ca   : > { %4192 = shalt.err (!%p4189_p11)
}
 0x5cb   : > { %s4347_s19 = smov 128   ;;  %s4348_s27 = smov 8  }
 0x5cc   : > { %3644 = dma.vmem_to_hbm [thread:$0]  (%p4690_p5), %s3341_s30, 256, %s3343_s3, %s3326_s2, %s4347_s19, %s4347_s19, %s4348_s27  }
 0x5cd PF: > { %s5697_s29 = sld [smem:[#allocation33_spill]]  ;;  %p3702_p12 = scmp.ge.s32.totalorder %s4335_s28, 2 }
 0x5cf   : > { %p3682_p13 = pnand %p3702_p12, %p4694_p0 }
 0x5d1   : > { %p3683_p8 = pneg %p3682_p13 }
 0x5d3   : > { %s3357_s10 = sand.u32 1, %s5697_s29  }
 0x5d4   : > { %s3358_s11 = scalar_lea.sflag [#allocation4], %s3357_s10 }
 0x5d5   : > { %4278 = dma.done.wait (%p3683_p8), %s3358_s11, 256  }
 0x5d6   : > { %4280 = vsyncadd (%p3683_p8), %s3358_s11, 4294967040  ;;  %s42_s28 = sadd.s32 1, %s4335_s28   ;;  %s5699_s0 = sld [smem:[#allocation30_spill]] }
 0x5d7   : > { %p5508_p7 = scmp.ge.s32.totalorder %s42_s28, 8   ;;  %s5700_s30 = sld [smem:[#allocation31_spill]] }
 0x5d8   : > { %s5701_s21 = sld [smem:[#allocation32_spill]]  ;;  %s5709_s20 = smov %s5727_s5 }
 0x5d9   : > { %s5702_s17 = sld [smem:[#allocation45_spill]]  ;;  %s5710_s1 = smov %s4303_s22 }
 0x5da   : > { %s5703_s14 = sld [smem:[#allocation34_spill]]  ;;  %s5712_s2 = smov %s4311_s23 }
 0x5db   : > { %s5704_s24 = sld [smem:[#allocation46_spill]] }
 0x5dc   : > { %s5705_s25 = sld [smem:[#allocation37_spill]]  ;;  %41 = sbr.rel (!%p5508_p7) target bundleno = 37 (0x25), region = 221 }
 0x5dd   : > { %s5706_s3 = sld [smem:[#allocation38_spill]] }
 0x5de   : > { %s5707_s26 = sld [smem:[#allocation42_spill]] }
 0x5df   : > { %s5708_s27 = sld [smem:[#allocation43_spill]]  ;;  %s5711_s22 = smov %s5702_s17 }
 0x5e0   : > { %s5713_s23 = smov %s5703_s14 }
 0x5e1   :  { %3364 = vsyncpa [#allocation3], 1 }
 0x5e2   :  { %3366 = vsyncpa [#allocation3 + $0x1], 1 }
 0x5e3   :  { %3367 = vsyncpa [#allocation6], 1 }
 0x5e4   :  { %3369 = vsyncpa [#allocation6 + $0x1], 1 }
 0x5e5   :  { %3370 = vsyncpa [#allocation9], 1 }
 0x5e6   :  { %3371 = vsyncpa [#allocation12], 1 }
 0x5e7   :  { %3372 = vsyncpa [#allocation15], 1 }
 0x5e8   :  { %3373 = vsyncpa [#allocation18], 1 }
 0x5e9   :  { %3374 = vsyncpa [#allocation4], 1 }
 0x5ea   :  { %3376 = vsyncpa [#allocation4 + $0x1], 1 }

</bundles_post_ra>
